<compile_context>
chip_gen: v5e
topology: v5e:2x2
jax: 0.10.0
libtpu: 0.0.40
codegen_flags: <defaults>
</compile_context>

<pallas_src>
import functools

import jax
import jax.numpy as jnp
from jax.experimental import pallas as pl
from jax.experimental.pallas import tpu as pltpu

_NEG_INF = -1e30              # reference only
_LEAKY_SLOPE = 0.2            # PyG GATConv default negative_slope
_FUSE_MAX_NODES = 1024        # whole-network-in-VMEM threshold
_VMEM_LIMIT = 64 * 1024 * 1024


# ---------------------------------------------------------------------------
# Shared GAT masked-softmax aggregation (f32 softmax math, bf16 MXU operands)
# ---------------------------------------------------------------------------
def _gat_softmax_agg(adj, ht, as_row, ad, b):
    # e[i, j] = a_dst[i] + a_src[j]
    e = ad + as_row                                   # [tm, N] f32
    e = jnp.maximum(e, _LEAKY_SLOPE * e)              # LeakyReLU(0.2)
    e = e - jnp.max(e, axis=1, keepdims=True)         # shift-invariant
    p = jnp.exp(e) * adj                              # multiplicative edge mask
    inv = pl.reciprocal(jnp.sum(p, axis=1, keepdims=True), approx=True)
    p = (p * inv).astype(jnp.bfloat16)                # bf16 at the MXU
    out = jnp.dot(p, ht, preferred_element_type=jnp.float32) + b
    return jnp.maximum(out, 0.0)                      # relu(gat)


# ---------------------------------------------------------------------------
# Fused whole-network kernel (small graphs: everything resident in VMEM)
# ---------------------------------------------------------------------------
def fused_gnn_kernel(adj_ref, g1_ref, dinv_ref,
                     w_gcn1_ref, b_gcn1_ref, w_gat1_ref, att1_ref, b_gat1_ref,
                     w_gcn2_ref, b_gcn2_ref, w_gat2_ref, att2_ref, b_gat2_ref,
                     w_out_ref, b_out_ref, h_ref, z_ref):
    adj = adj_ref[...]                      # [N, N] bf16 (0/1 mask, exact)
    dinv = dinv_ref[...]                    # [N, 1] f32

    def gcn(g_bf16, w_ref, b_ref):
        # aggregate-first: N^2 contraction over the (smaller) feature dim
        agg = jnp.dot(adj, g_bf16, preferred_element_type=jnp.float32)
        h = jnp.dot(agg, w_ref[...], preferred_element_type=jnp.float32)
        return jnp.maximum(dinv * h + b_ref[...], 0.0)            # relu(gcn)

    def gat(h, w_ref, att_ref, b_ref):
        ht = jnp.dot(h, w_ref[...], preferred_element_type=jnp.float32)
        sc = jnp.dot(ht, att_ref[...], preferred_element_type=jnp.float32)  # [N,2]
        ad = sc[:, 0:1]                                            # [N, 1]
        as_row = jnp.transpose(sc[:, 1:2])                         # [1, N]
        return _gat_softmax_agg(adj, ht.astype(jnp.bfloat16), as_row, ad,
                                b_ref[...])

    h1 = gcn(g1_ref[...], w_gcn1_ref, b_gcn1_ref)
    h2 = gat(h1, w_gat1_ref, att1_ref, b_gat1_ref)
    h3 = gcn((dinv * h2).astype(jnp.bfloat16), w_gcn2_ref, b_gcn2_ref)
    h4 = gat(h3, w_gat2_ref, att2_ref, b_gat2_ref)
    h_ref[...] = h4
    z_ref[...] = (jnp.dot(h4, w_out_ref[...], preferred_element_type=jnp.float32)
                  + b_out_ref[...])


# ---------------------------------------------------------------------------
# Row-tiled streaming kernels (large graphs)
# ---------------------------------------------------------------------------
def gcn_gatprep_kernel(adj_ref, g_ref, dinv_row_ref, w_gcn_ref, b_gcn_ref,
                       w_gat_ref, att_ref, ht_ref, ad_ref, as_row_ref):
    # GCN with normalization folded into features: g = dinv * x (prescaled).
    agg = jnp.dot(adj_ref[...], g_ref[...], preferred_element_type=jnp.float32)
    h = jnp.dot(agg, w_gcn_ref[...], preferred_element_type=jnp.float32)
    h = jnp.maximum(dinv_row_ref[...] * h + b_gcn_ref[...], 0.0)   # relu(gcn)

    # Next GAT layer prep: transformed features + fused attention scores.
    ht = jnp.dot(h, w_gat_ref[...], preferred_element_type=jnp.float32)
    sc = jnp.dot(ht, att_ref[...], preferred_element_type=jnp.float32)  # [tm, 2]
    ad_ref[...] = sc[:, 0:1]                      # target scores  [tm, 1]
    as_row_ref[...] = jnp.transpose(sc[:, 1:2])   # source scores  [1, tm] lane-major
    ht_ref[...] = ht.astype(jnp.bfloat16)         # value matrix (bf16)


def gat_agg_kernel(adj_ref, ht_ref, as_row_ref, ad_ref, b_gat_ref,
                   dinv_row_ref, g_out_ref):
    out = _gat_softmax_agg(adj_ref[...], ht_ref[...], as_row_ref[...],
                           ad_ref[...], b_gat_ref[...])
    # Emit the next GCN layer's pre-scaled bf16 features directly.
    g_out_ref[...] = (dinv_row_ref[...] * out).astype(jnp.bfloat16)


def gat_agg_out_kernel(adj_ref, ht_ref, as_row_ref, ad_ref, b_gat_ref,
                       w_out_ref, b_out_ref, h_ref, z_ref):
    h = _gat_softmax_agg(adj_ref[...], ht_ref[...], as_row_ref[...],
                         ad_ref[...], b_gat_ref[...])
    h_ref[...] = h
    z_ref[...] = (jnp.dot(h, w_out_ref[...], preferred_element_type=jnp.float32)
                  + b_out_ref[...])


# ---------------------------------------------------------------------------
# pallas_call wrappers
# ---------------------------------------------------------------------------
def _full_spec(a):
    nd = a.ndim
    return pl.BlockSpec(a.shape, lambda i, _nd=nd: (0,) * _nd)


_PARAMS_PARALLEL = pltpu.CompilerParams(
    dimension_semantics=("parallel",), vmem_limit_bytes=_VMEM_LIMIT)
_PARAMS_SINGLE = pltpu.CompilerParams(
    dimension_semantics=("arbitrary",), vmem_limit_bytes=_VMEM_LIMIT)


def _fused_forward(adj, g1, dinv, params, att1, att2):
    n = adj.shape[0]
    hid = params["w_gcn1"].shape[1]
    ncls = params["w_out"].shape[1]
    args = (adj, g1, dinv,
            params["w_gcn1"], params["b_gcn1"], params["w_gat1"], att1,
            params["b_gat1"],
            params["w_gcn2"], params["b_gcn2"], params["w_gat2"], att2,
            params["b_gat2"],
            params["w_out"], params["b_out"])
    return pl.pallas_call(
        fused_gnn_kernel,
        grid=(1,),
        in_specs=[_full_spec(a) for a in args],
        out_specs=(pl.BlockSpec((n, hid), lambda i: (0, 0)),
                   pl.BlockSpec((n, ncls), lambda i: (0, 0))),
        out_shape=(jax.ShapeDtypeStruct((n, hid), jnp.float32),
                   jax.ShapeDtypeStruct((n, ncls), jnp.float32)),
        compiler_params=_PARAMS_SINGLE,
    )(*args)


def _gcn_gatprep(adj, g, dinv, w_gcn, b_gcn, w_gat, att, *, tm):
    n = adj.shape[0]
    hid = w_gcn.shape[1]
    return pl.pallas_call(
        gcn_gatprep_kernel,
        grid=(n // tm,),
        in_specs=[
            pl.BlockSpec((tm, n), lambda i: (i, 0)),   # adjacency row tile (streamed)
            _full_spec(g),                             # prescaled bf16 features (resident)
            pl.BlockSpec((tm, 1), lambda i: (i, 0)),   # dinv for target rows
            _full_spec(w_gcn), _full_spec(b_gcn),
            _full_spec(w_gat), _full_spec(att),
        ],
        out_specs=(
            pl.BlockSpec((tm, hid), lambda i: (i, 0)),
            pl.BlockSpec((tm, 1), lambda i: (i, 0)),
            pl.BlockSpec((1, tm), lambda i: (0, i)),   # lane-major source scores
        ),
        out_shape=(jax.ShapeDtypeStruct((n, hid), jnp.bfloat16),
                   jax.ShapeDtypeStruct((n, 1), jnp.float32),
                   jax.ShapeDtypeStruct((1, n), jnp.float32)),
        compiler_params=_PARAMS_PARALLEL,
    )(adj, g, dinv, w_gcn, b_gcn, w_gat, att)


def _gat_agg(adj, ht, as_row, ad, b_gat, dinv, *, tm):
    n = adj.shape[0]
    hid = ht.shape[1]
    return pl.pallas_call(
        gat_agg_kernel,
        grid=(n // tm,),
        in_specs=[
            pl.BlockSpec((tm, n), lambda i: (i, 0)),   # adjacency row tile
            _full_spec(ht),                            # value matrix (resident)
            _full_spec(as_row),                        # [1, N] source scores (resident)
            pl.BlockSpec((tm, 1), lambda i: (i, 0)),   # target scores
            _full_spec(b_gat),
            pl.BlockSpec((tm, 1), lambda i: (i, 0)),   # dinv for next GCN layer
        ],
        out_specs=pl.BlockSpec((tm, hid), lambda i: (i, 0)),
        out_shape=jax.ShapeDtypeStruct((n, hid), jnp.bfloat16),
        compiler_params=_PARAMS_PARALLEL,
    )(adj, ht, as_row, ad, b_gat, dinv)


def _gat_agg_out(adj, ht, as_row, ad, b_gat, w_out, b_out, *, tm):
    n = adj.shape[0]
    hid = ht.shape[1]
    ncls = w_out.shape[1]
    return pl.pallas_call(
        gat_agg_out_kernel,
        grid=(n // tm,),
        in_specs=[
            pl.BlockSpec((tm, n), lambda i: (i, 0)),
            _full_spec(ht), _full_spec(as_row),
            pl.BlockSpec((tm, 1), lambda i: (i, 0)),
            _full_spec(b_gat), _full_spec(w_out), _full_spec(b_out),
        ],
        out_specs=(pl.BlockSpec((tm, hid), lambda i: (i, 0)),
                   pl.BlockSpec((tm, ncls), lambda i: (i, 0))),
        out_shape=(jax.ShapeDtypeStruct((n, hid), jnp.float32),
                   jax.ShapeDtypeStruct((n, ncls), jnp.float32)),
        compiler_params=_PARAMS_PARALLEL,
    )(adj, ht, as_row, ad, b_gat, w_out, b_out)


# ---------------------------------------------------------------------------
# Generation-aware tile selection (VMEM-budget heuristic)
# ---------------------------------------------------------------------------
def _vmem_budget_bytes():
    try:
        cap = int(pltpu.get_tpu_info().vmem_capacity_bytes)
    except Exception:
        cap = 64 * 1024 * 1024
    return min(cap // 2, 48 * 1024 * 1024)


def _auto_row_tile(n):
    budget = _vmem_budget_bytes()
    for tm in (512, 256, 128):
        # double-buffered bf16 adjacency tile + f32 e/p softmax temporaries
        if n % tm == 0 and (2 * 2 * tm * n + 12 * tm * n) <= budget:
            return tm
    return n
    # TODO(synk): for N large enough that even tm=128 blows the budget (v7x,
    # N >= ~16-32K), add a column-tiled online-softmax variant.


# ---------------------------------------------------------------------------
# Forward wrapper
# ---------------------------------------------------------------------------
@functools.partial(jax.jit, static_argnames=("num_nodes", "row_tile", "fuse"))
def gnn_comp_forward(x, edge_index, params, *, num_nodes, row_tile=None,
                     fuse=None):
    """x: [N, num_features] f32, edge_index: [2, E] int32 (row0=src, row1=dst)."""
    n = num_nodes

    # Dense adjacency with self-loops, single scatter.  adj[i, j] = 1 iff
    # edge j -> i (or i == j).  bf16 is exact for 0/1; degrees in f32.
    loop = jnp.arange(n, dtype=edge_index.dtype)
    src = jnp.concatenate([edge_index[0], loop])
    dst = jnp.concatenate([edge_index[1], loop])
    adj = jnp.zeros((n, n), jnp.bfloat16).at[dst, src].set(1.0)
    deg = jnp.sum(adj, axis=1, keepdims=True, dtype=jnp.float32)
    dinv = jax.lax.rsqrt(jnp.maximum(deg, 1e-12))

    # Grid-invariant prep hoisted out of the kernels (done ONCE, not per tile).
    g1 = (dinv * x).astype(jnp.bfloat16)
    att1 = jnp.concatenate([params["att_dst1"], params["att_src1"]], axis=1)
    att2 = jnp.concatenate([params["att_dst2"], params["att_src2"]], axis=1)

    use_fused = fuse if fuse is not None else (n <= _FUSE_MAX_NODES)
    if use_fused:
        return _fused_forward(adj, g1, dinv, params, att1, att2)

    tm = row_tile if (row_tile is not None and row_tile > 0
                      and n % row_tile == 0) else _auto_row_tile(n)

    # GCN1 (+GAT1 prep) -> GAT1 -> GCN2 (+GAT2 prep) -> GAT2 + Linear
    ht1, ad1, as1 = _gcn_gatprep(adj, g1, dinv, params["w_gcn1"],
                                 params["b_gcn1"], params["w_gat1"], att1,
                                 tm=tm)
    g2 = _gat_agg(adj, ht1, as1, ad1, params["b_gat1"], dinv, tm=tm)
    ht2, ad2, as2 = _gcn_gatprep(adj, g2, dinv, params["w_gcn2"],
                                 params["b_gcn2"], params["w_gat2"], att2,
                                 tm=tm)
    h, z = _gat_agg_out(adj, ht2, as2, ad2, params["b_gat2"],
                        params["w_out"], params["b_out"], tm=tm)
    return h, z


# ---------------------------------------------------------------------------
# Deterministic parameter init (synthetic, glorot-ish scaling)
# ---------------------------------------------------------------------------
def init_params(key, num_features, num_classes, hidden):
    def glorot(k, shape):
        fan_in, fan_out = shape[0], shape[-1]
        scale = jnp.sqrt(6.0 / (fan_in + fan_out))
        return jax.random.uniform(k, shape, jnp.float32, -scale, scale)

    ks = jax.random.split(key, 12)
    return {
        "w_gcn1": glorot(ks[0], (num_features, hidden)),
        "b_gcn1": jnp.zeros((1, hidden), jnp.float32),
        "w_gat1": glorot(ks[1], (hidden, hidden)),
        "att_src1": glorot(ks[2], (hidden, 1)),
        "att_dst1": glorot(ks[3], (hidden, 1)),
        "b_gat1": jnp.zeros((1, hidden), jnp.float32),
        "w_gcn2": glorot(ks[4], (hidden, hidden)),
        "b_gcn2": jnp.zeros((1, hidden), jnp.float32),
        "w_gat2": glorot(ks[5], (hidden, hidden)),
        "att_src2": glorot(ks[6], (hidden, 1)),
        "att_dst2": glorot(ks[7], (hidden, 1)),
        "b_gat2": jnp.zeros((1, hidden), jnp.float32),
        "w_out": glorot(ks[8], (hidden, num_classes)),
        "b_out": glorot(ks[9], (1, num_classes)),
    }


# ---------------------------------------------------------------------------
# Pure-JAX f32 reference (same math, no Pallas) for a sanity check
# ---------------------------------------------------------------------------
def reference_forward(x, edge_index, params, num_nodes):
    n = num_nodes
    loop = jnp.arange(n, dtype=edge_index.dtype)
    src = jnp.concatenate([edge_index[0], loop])
    dst = jnp.concatenate([edge_index[1], loop])
    adj = jnp.zeros((n, n), jnp.float32).at[dst, src].set(1.0)

    def gcn(x, w, b):
        deg = adj.sum(1, keepdims=True)
        dinv = 1.0 / jnp.sqrt(jnp.maximum(deg, 1e-12))
        a_norm = adj * dinv * dinv.T
        return a_norm @ (x @ w) + b

    def gat(x, w, a_s, a_d, b):
        h = x @ w
        e = (h @ a_d) + (h @ a_s).T
        e = jnp.where(e > 0, e, _LEAKY_SLOPE * e)
        e = jnp.where(adj > 0, e, _NEG_INF)
        e = e - e.max(1, keepdims=True)
        p = jnp.exp(e)
        p = p / p.sum(1, keepdims=True)
        return p @ h + b

    h = jax.nn.relu(gcn(x, params["w_gcn1"], params["b_gcn1"]))
    h = jax.nn.relu(gat(h, params["w_gat1"], params["att_src1"],
                        params["att_dst1"], params["b_gat1"]))
    h = jax.nn.relu(gcn(h, params["w_gcn2"], params["b_gcn2"]))
    h = jax.nn.relu(gat(h, params["w_gat2"], params["att_src2"],
                        params["att_dst2"], params["b_gat2"]))
    z = h @ params["w_out"] + params["b_out"]
    return h, z


if __name__ == "__main__":
    NUM_NODES = 256
    NUM_FEATURES = 16
    HIDDEN = 32
    NUM_CLASSES = 4

    key = jax.random.PRNGKey(0)
    k_x, k_p = jax.random.split(key)

    x = jax.random.normal(k_x, (NUM_NODES, NUM_FEATURES), jnp.float32)

    # Deterministic graph: bidirectional ring + stride-5 chords.
    idx = jnp.arange(NUM_NODES, dtype=jnp.int32)
    n1 = (idx + 1) % NUM_NODES
    n5 = (idx + 5) % NUM_NODES
    src = jnp.concatenate([idx, n1, idx, n5])
    dst = jnp.concatenate([n1, idx, n5, idx])
    edge_index = jnp.stack([src, dst], axis=0)  # [2, 4N]

    params = init_params(k_p, NUM_FEATURES, NUM_CLASSES, HIDDEN)
    h_ref, z_ref = reference_forward(x, edge_index, params, NUM_NODES)

    # bf16 MXU operands + approx reciprocal => compare against the f32
    # reference with a correspondingly loosened tolerance.

    # 1) Fused single-kernel path (default for small graphs).
    h_f, z_f = gnn_comp_forward(x, edge_index, params, num_nodes=NUM_NODES)
    jax.block_until_ready((h_f, z_f))
    assert jnp.allclose(h_f, h_ref, atol=5e-2, rtol=5e-2), "fused h mismatch"
    assert jnp.allclose(z_f, z_ref, atol=5e-2, rtol=5e-2), "fused z mismatch"

    # 2) Row-tiled streaming path (used for graphs too large to fuse).
    h_t, z_t = gnn_comp_forward(x, edge_index, params, num_nodes=NUM_NODES,
                                fuse=False, row_tile=128)
    jax.block_until_ready((h_t, z_t))
    assert jnp.allclose(h_t, h_ref, atol=5e-2, rtol=5e-2), "tiled h mismatch"
    assert jnp.allclose(z_t, z_ref, atol=5e-2, rtol=5e-2), "tiled z mismatch"

    print("KERNEL_OK")
</pallas_src>

<mosaic_0001>
module attributes {stable_mosaic.version = 11 : i64} {
  func.func @fused_gnn_kernel(%arg0: i32, %arg1: memref<256x256xbf16, #tpu.memory_space<vmem>>, %arg2: memref<256x16xbf16, #tpu.memory_space<vmem>>, %arg3: memref<256x1xf32, #tpu.memory_space<vmem>>, %arg4: memref<16x32xf32, #tpu.memory_space<vmem>>, %arg5: memref<1x32xf32, #tpu.memory_space<vmem>>, %arg6: memref<32x32xf32, #tpu.memory_space<vmem>>, %arg7: memref<32x2xf32, #tpu.memory_space<vmem>>, %arg8: memref<1x32xf32, #tpu.memory_space<vmem>>, %arg9: memref<32x32xf32, #tpu.memory_space<vmem>>, %arg10: memref<1x32xf32, #tpu.memory_space<vmem>>, %arg11: memref<32x32xf32, #tpu.memory_space<vmem>>, %arg12: memref<32x2xf32, #tpu.memory_space<vmem>>, %arg13: memref<1x32xf32, #tpu.memory_space<vmem>>, %arg14: memref<32x4xf32, #tpu.memory_space<vmem>>, %arg15: memref<1x4xf32, #tpu.memory_space<vmem>>, %arg16: memref<256x32xf32, #tpu.memory_space<vmem>>, %arg17: memref<256x4xf32, #tpu.memory_space<vmem>>) attributes {dimension_semantics = [#tpu.dimension_semantics<arbitrary>], iteration_bounds = array<i64: 1>, scalar_prefetch = 0 : i64, scratch_operands = 0 : i64, tpu.core_type = #tpu.core_type<tc>, window_params = [{pipeline_mode = #tpu.pipeline_mode<synchronous>, transform_indices = @transform_0, window_bounds = array<i64: 256, 256>}, {pipeline_mode = #tpu.pipeline_mode<synchronous>, transform_indices = @transform_1, window_bounds = array<i64: 256, 16>}, {pipeline_mode = #tpu.pipeline_mode<synchronous>, transform_indices = @transform_2, window_bounds = array<i64: 256, 1>}, {pipeline_mode = #tpu.pipeline_mode<synchronous>, transform_indices = @transform_3, window_bounds = array<i64: 16, 32>}, {pipeline_mode = #tpu.pipeline_mode<synchronous>, transform_indices = @transform_4, window_bounds = array<i64: 1, 32>}, {pipeline_mode = #tpu.pipeline_mode<synchronous>, transform_indices = @transform_5, window_bounds = array<i64: 32, 32>}, {pipeline_mode = #tpu.pipeline_mode<synchronous>, transform_indices = @transform_6, window_bounds = array<i64: 32, 2>}, {pipeline_mode = #tpu.pipeline_mode<synchronous>, transform_indices = @transform_7, window_bounds = array<i64: 1, 32>}, {pipeline_mode = #tpu.pipeline_mode<synchronous>, transform_indices = @transform_8, window_bounds = array<i64: 32, 32>}, {pipeline_mode = #tpu.pipeline_mode<synchronous>, transform_indices = @transform_9, window_bounds = array<i64: 1, 32>}, {pipeline_mode = #tpu.pipeline_mode<synchronous>, transform_indices = @transform_10, window_bounds = array<i64: 32, 32>}, {pipeline_mode = #tpu.pipeline_mode<synchronous>, transform_indices = @transform_11, window_bounds = array<i64: 32, 2>}, {pipeline_mode = #tpu.pipeline_mode<synchronous>, transform_indices = @transform_12, window_bounds = array<i64: 1, 32>}, {pipeline_mode = #tpu.pipeline_mode<synchronous>, transform_indices = @transform_13, window_bounds = array<i64: 32, 4>}, {pipeline_mode = #tpu.pipeline_mode<synchronous>, transform_indices = @transform_14, window_bounds = array<i64: 1, 4>}, {pipeline_mode = #tpu.pipeline_mode<synchronous>, transform_indices = @transform_15, window_bounds = array<i64: 256, 32>}, {pipeline_mode = #tpu.pipeline_mode<synchronous>, transform_indices = @transform_16, window_bounds = array<i64: 256, 4>}]} {
    %c0 = arith.constant 0 : index
    %c0_0 = arith.constant 0 : index
    %0 = vector.load %arg1[%c0, %c0_0] : memref<256x256xbf16, #tpu.memory_space<vmem>>, vector<256x256xbf16>
    %c0_1 = arith.constant 0 : index
    %c0_2 = arith.constant 0 : index
    %1 = vector.load %arg3[%c0_1, %c0_2] : memref<256x1xf32, #tpu.memory_space<vmem>>, vector<256x1xf32>
    %c0_3 = arith.constant 0 : index
    %c0_4 = arith.constant 0 : index
    %2 = vector.load %arg2[%c0_3, %c0_4] : memref<256x16xbf16, #tpu.memory_space<vmem>>, vector<256x16xbf16>
    %cst = arith.constant dense<0.000000e+00> : vector<256x16xf32>
    %3 = tpu.matmul %0, %2, %cst {dimension_numbers = #tpu.dot_dimension_numbers<[1], [0], [0], [1], [0, 0, 1, 1], [], []>} : vector<256x256xbf16>, vector<256x16xbf16>, vector<256x16xf32> -> vector<256x16xf32>
    %c0_5 = arith.constant 0 : index
    %c0_6 = arith.constant 0 : index
    %4 = vector.load %arg4[%c0_5, %c0_6] : memref<16x32xf32, #tpu.memory_space<vmem>>, vector<16x32xf32>
    %cst_7 = arith.constant dense<0.000000e+00> : vector<256x32xf32>
    %5 = tpu.matmul %3, %4, %cst_7 {dimension_numbers = #tpu.dot_dimension_numbers<[1], [0], [0], [1], [0, 0, 1, 1], [], []>} : vector<256x16xf32>, vector<16x32xf32>, vector<256x32xf32> -> vector<256x32xf32>
    %6 = vector.broadcast %1 : vector<256x1xf32> to vector<256x32xf32>
    %7 = arith.mulf %6, %5 : vector<256x32xf32>
    %c0_8 = arith.constant 0 : index
    %c0_9 = arith.constant 0 : index
    %8 = vector.load %arg5[%c0_8, %c0_9] : memref<1x32xf32, #tpu.memory_space<vmem>>, vector<1x32xf32>
    %9 = vector.broadcast %8 : vector<1x32xf32> to vector<256x32xf32>
    %10 = arith.addf %7, %9 : vector<256x32xf32>
    %cst_10 = arith.constant 0.000000e+00 : f32
    %11 = vector.broadcast %cst_10 : f32 to vector<256x32xf32>
    %12 = arith.maximumf %10, %11 : vector<256x32xf32>
    %c0_11 = arith.constant 0 : index
    %c0_12 = arith.constant 0 : index
    %13 = vector.load %arg6[%c0_11, %c0_12] : memref<32x32xf32, #tpu.memory_space<vmem>>, vector<32x32xf32>
    %cst_13 = arith.constant dense<0.000000e+00> : vector<256x32xf32>
    %14 = tpu.matmul %12, %13, %cst_13 {dimension_numbers = #tpu.dot_dimension_numbers<[1], [0], [0], [1], [0, 0, 1, 1], [], []>} : vector<256x32xf32>, vector<32x32xf32>, vector<256x32xf32> -> vector<256x32xf32>
    %c0_14 = arith.constant 0 : index
    %c0_15 = arith.constant 0 : index
    %15 = vector.load %arg7[%c0_14, %c0_15] : memref<32x2xf32, #tpu.memory_space<vmem>>, vector<32x2xf32>
    %cst_16 = arith.constant dense<0.000000e+00> : vector<256x2xf32>
    %16 = tpu.matmul %14, %15, %cst_16 {dimension_numbers = #tpu.dot_dimension_numbers<[1], [0], [0], [1], [0, 0, 1, 1], [], []>} : vector<256x32xf32>, vector<32x2xf32>, vector<256x2xf32> -> vector<256x2xf32>
    %17 = vector.extract_strided_slice %16 {offsets = [0, 0], sizes = [256, 1], strides = [1, 1]} : vector<256x2xf32> to vector<256x1xf32>
    %18 = vector.extract_strided_slice %16 {offsets = [0, 1], sizes = [256, 1], strides = [1, 1]} : vector<256x2xf32> to vector<256x1xf32>
    %19 = tpu.transpose %18, [1, 0] : vector<256x1xf32> -> vector<1x256xf32>
    %20 = arith.truncf %14 : vector<256x32xf32> to vector<256x32xbf16>
    %c0_17 = arith.constant 0 : index
    %c0_18 = arith.constant 0 : index
    %21 = vector.load %arg8[%c0_17, %c0_18] : memref<1x32xf32, #tpu.memory_space<vmem>>, vector<1x32xf32>
    %22 = vector.broadcast %17 : vector<256x1xf32> to vector<256x256xf32>
    %23 = vector.broadcast %19 : vector<1x256xf32> to vector<256x256xf32>
    %24 = arith.addf %22, %23 : vector<256x256xf32>
    %cst_19 = arith.constant 2.000000e-01 : f32
    %25 = vector.broadcast %cst_19 : f32 to vector<256x256xf32>
    %26 = arith.mulf %25, %24 : vector<256x256xf32>
    %27 = arith.maximumf %24, %26 : vector<256x256xf32>
    %cst_20 = arith.constant dense<0xFF800000> : vector<256xf32>
    %28 = vector.multi_reduction <maximumf>, %27, %cst_20 [1] : vector<256x256xf32> to vector<256xf32>
    %29 = vector.shape_cast %28 : vector<256xf32> to vector<256x1xf32>
    %30 = vector.broadcast %29 : vector<256x1xf32> to vector<256x256xf32>
    %31 = arith.subf %27, %30 : vector<256x256xf32>
    %32 = math.exp %31 : vector<256x256xf32>
    %33 = arith.extf %0 : vector<256x256xbf16> to vector<256x256xf32>
    %34 = arith.mulf %32, %33 : vector<256x256xf32>
    %cst_21 = arith.constant dense<0.000000e+00> : vector<256xf32>
    %35 = vector.multi_reduction <add>, %34, %cst_21 [1] : vector<256x256xf32> to vector<256xf32>
    %36 = vector.shape_cast %35 : vector<256xf32> to vector<256x1xf32>
    %37 = tpu.reciprocal %36 {approx = true} : vector<256x1xf32> -> vector<256x1xf32>
    %38 = vector.broadcast %37 : vector<256x1xf32> to vector<256x256xf32>
    %39 = arith.mulf %34, %38 : vector<256x256xf32>
    %40 = arith.truncf %39 : vector<256x256xf32> to vector<256x256xbf16>
    %cst_22 = arith.constant dense<0.000000e+00> : vector<256x32xf32>
    %41 = tpu.matmul %40, %20, %cst_22 {dimension_numbers = #tpu.dot_dimension_numbers<[1], [0], [0], [1], [0, 0, 1, 1], [], []>} : vector<256x256xbf16>, vector<256x32xbf16>, vector<256x32xf32> -> vector<256x32xf32>
    %42 = vector.broadcast %21 : vector<1x32xf32> to vector<256x32xf32>
    %43 = arith.addf %41, %42 : vector<256x32xf32>
    %cst_23 = arith.constant 0.000000e+00 : f32
    %44 = vector.broadcast %cst_23 : f32 to vector<256x32xf32>
    %45 = arith.maximumf %43, %44 : vector<256x32xf32>
    %46 = vector.broadcast %1 : vector<256x1xf32> to vector<256x32xf32>
    %47 = arith.mulf %46, %45 : vector<256x32xf32>
    %48 = arith.truncf %47 : vector<256x32xf32> to vector<256x32xbf16>
    %cst_24 = arith.constant dense<0.000000e+00> : vector<256x32xf32>
    %49 = tpu.matmul %0, %48, %cst_24 {dimension_numbers = #tpu.dot_dimension_numbers<[1], [0], [0], [1], [0, 0, 1, 1], [], []>} : vector<256x256xbf16>, vector<256x32xbf16>, vector<256x32xf32> -> vector<256x32xf32>
    %c0_25 = arith.constant 0 : index
    %c0_26 = arith.constant 0 : index
    %50 = vector.load %arg9[%c0_25, %c0_26] : memref<32x32xf32, #tpu.memory_space<vmem>>, vector<32x32xf32>
    %cst_27 = arith.constant dense<0.000000e+00> : vector<256x32xf32>
    %51 = tpu.matmul %49, %50, %cst_27 {dimension_numbers = #tpu.dot_dimension_numbers<[1], [0], [0], [1], [0, 0, 1, 1], [], []>} : vector<256x32xf32>, vector<32x32xf32>, vector<256x32xf32> -> vector<256x32xf32>
    %52 = vector.broadcast %1 : vector<256x1xf32> to vector<256x32xf32>
    %53 = arith.mulf %52, %51 : vector<256x32xf32>
    %c0_28 = arith.constant 0 : index
    %c0_29 = arith.constant 0 : index
    %54 = vector.load %arg10[%c0_28, %c0_29] : memref<1x32xf32, #tpu.memory_space<vmem>>, vector<1x32xf32>
    %55 = vector.broadcast %54 : vector<1x32xf32> to vector<256x32xf32>
    %56 = arith.addf %53, %55 : vector<256x32xf32>
    %cst_30 = arith.constant 0.000000e+00 : f32
    %57 = vector.broadcast %cst_30 : f32 to vector<256x32xf32>
    %58 = arith.maximumf %56, %57 : vector<256x32xf32>
    %c0_31 = arith.constant 0 : index
    %c0_32 = arith.constant 0 : index
    %59 = vector.load %arg11[%c0_31, %c0_32] : memref<32x32xf32, #tpu.memory_space<vmem>>, vector<32x32xf32>
    %cst_33 = arith.constant dense<0.000000e+00> : vector<256x32xf32>
    %60 = tpu.matmul %58, %59, %cst_33 {dimension_numbers = #tpu.dot_dimension_numbers<[1], [0], [0], [1], [0, 0, 1, 1], [], []>} : vector<256x32xf32>, vector<32x32xf32>, vector<256x32xf32> -> vector<256x32xf32>
    %c0_34 = arith.constant 0 : index
    %c0_35 = arith.constant 0 : index
    %61 = vector.load %arg12[%c0_34, %c0_35] : memref<32x2xf32, #tpu.memory_space<vmem>>, vector<32x2xf32>
    %cst_36 = arith.constant dense<0.000000e+00> : vector<256x2xf32>
    %62 = tpu.matmul %60, %61, %cst_36 {dimension_numbers = #tpu.dot_dimension_numbers<[1], [0], [0], [1], [0, 0, 1, 1], [], []>} : vector<256x32xf32>, vector<32x2xf32>, vector<256x2xf32> -> vector<256x2xf32>
    %63 = vector.extract_strided_slice %62 {offsets = [0, 0], sizes = [256, 1], strides = [1, 1]} : vector<256x2xf32> to vector<256x1xf32>
    %64 = vector.extract_strided_slice %62 {offsets = [0, 1], sizes = [256, 1], strides = [1, 1]} : vector<256x2xf32> to vector<256x1xf32>
    %65 = tpu.transpose %64, [1, 0] : vector<256x1xf32> -> vector<1x256xf32>
    %66 = arith.truncf %60 : vector<256x32xf32> to vector<256x32xbf16>
    %c0_37 = arith.constant 0 : index
    %c0_38 = arith.constant 0 : index
    %67 = vector.load %arg13[%c0_37, %c0_38] : memref<1x32xf32, #tpu.memory_space<vmem>>, vector<1x32xf32>
    %68 = vector.broadcast %63 : vector<256x1xf32> to vector<256x256xf32>
    %69 = vector.broadcast %65 : vector<1x256xf32> to vector<256x256xf32>
    %70 = arith.addf %68, %69 : vector<256x256xf32>
    %cst_39 = arith.constant 2.000000e-01 : f32
    %71 = vector.broadcast %cst_39 : f32 to vector<256x256xf32>
    %72 = arith.mulf %71, %70 : vector<256x256xf32>
    %73 = arith.maximumf %70, %72 : vector<256x256xf32>
    %cst_40 = arith.constant dense<0xFF800000> : vector<256xf32>
    %74 = vector.multi_reduction <maximumf>, %73, %cst_40 [1] : vector<256x256xf32> to vector<256xf32>
    %75 = vector.shape_cast %74 : vector<256xf32> to vector<256x1xf32>
    %76 = vector.broadcast %75 : vector<256x1xf32> to vector<256x256xf32>
    %77 = arith.subf %73, %76 : vector<256x256xf32>
    %78 = math.exp %77 : vector<256x256xf32>
    %79 = arith.extf %0 : vector<256x256xbf16> to vector<256x256xf32>
    %80 = arith.mulf %78, %79 : vector<256x256xf32>
    %cst_41 = arith.constant dense<0.000000e+00> : vector<256xf32>
    %81 = vector.multi_reduction <add>, %80, %cst_41 [1] : vector<256x256xf32> to vector<256xf32>
    %82 = vector.shape_cast %81 : vector<256xf32> to vector<256x1xf32>
    %83 = tpu.reciprocal %82 {approx = true} : vector<256x1xf32> -> vector<256x1xf32>
    %84 = vector.broadcast %83 : vector<256x1xf32> to vector<256x256xf32>
    %85 = arith.mulf %80, %84 : vector<256x256xf32>
    %86 = arith.truncf %85 : vector<256x256xf32> to vector<256x256xbf16>
    %cst_42 = arith.constant dense<0.000000e+00> : vector<256x32xf32>
    %87 = tpu.matmul %86, %66, %cst_42 {dimension_numbers = #tpu.dot_dimension_numbers<[1], [0], [0], [1], [0, 0, 1, 1], [], []>} : vector<256x256xbf16>, vector<256x32xbf16>, vector<256x32xf32> -> vector<256x32xf32>
    %88 = vector.broadcast %67 : vector<1x32xf32> to vector<256x32xf32>
    %89 = arith.addf %87, %88 : vector<256x32xf32>
    %cst_43 = arith.constant 0.000000e+00 : f32
    %90 = vector.broadcast %cst_43 : f32 to vector<256x32xf32>
    %91 = arith.maximumf %89, %90 : vector<256x32xf32>
    %c0_44 = arith.constant 0 : index
    %c0_45 = arith.constant 0 : index
    %92 = vector.load %arg16[%c0_44, %c0_45] : memref<256x32xf32, #tpu.memory_space<vmem>>, vector<256x32xf32>
    tpu.vector_store %arg16[%c0_44, %c0_45], %91 {strides = array<i32>} : memref<256x32xf32, #tpu.memory_space<vmem>>, vector<256x32xf32>,
    %c0_46 = arith.constant 0 : index
    %c0_47 = arith.constant 0 : index
    %93 = vector.load %arg14[%c0_46, %c0_47] : memref<32x4xf32, #tpu.memory_space<vmem>>, vector<32x4xf32>
    %cst_48 = arith.constant dense<0.000000e+00> : vector<256x4xf32>
    %94 = tpu.matmul %91, %93, %cst_48 {dimension_numbers = #tpu.dot_dimension_numbers<[1], [0], [0], [1], [0, 0, 1, 1], [], []>} : vector<256x32xf32>, vector<32x4xf32>, vector<256x4xf32> -> vector<256x4xf32>
    %c0_49 = arith.constant 0 : index
    %c0_50 = arith.constant 0 : index
    %95 = vector.load %arg15[%c0_49, %c0_50] : memref<1x4xf32, #tpu.memory_space<vmem>>, vector<1x4xf32>
    %96 = vector.broadcast %95 : vector<1x4xf32> to vector<256x4xf32>
    %97 = arith.addf %94, %96 : vector<256x4xf32>
    %c0_51 = arith.constant 0 : index
    %c0_52 = arith.constant 0 : index
    %98 = vector.load %arg17[%c0_51, %c0_52] : memref<256x4xf32, #tpu.memory_space<vmem>>, vector<256x4xf32>
    tpu.vector_store %arg17[%c0_51, %c0_52], %97 {strides = array<i32>} : memref<256x4xf32, #tpu.memory_space<vmem>>, vector<256x4xf32>,
    return
  }
  func.func @transform_0(%arg0: i32) -> (i32, i32) {
    %c0_i32 = arith.constant 0 : i32
    %c0_i32_0 = arith.constant 0 : i32
    %c0_i32_1 = arith.constant 0 : i32
    return %c0_i32, %c0_i32_0 : i32, i32
  }
  func.func @transform_1(%arg0: i32) -> (i32, i32) {
    %c0_i32 = arith.constant 0 : i32
    %c0_i32_0 = arith.constant 0 : i32
    %c0_i32_1 = arith.constant 0 : i32
    return %c0_i32, %c0_i32_0 : i32, i32
  }
  func.func @transform_2(%arg0: i32) -> (i32, i32) {
    %c0_i32 = arith.constant 0 : i32
    %c0_i32_0 = arith.constant 0 : i32
    %c0_i32_1 = arith.constant 0 : i32
    return %c0_i32, %c0_i32_0 : i32, i32
  }
  func.func @transform_3(%arg0: i32) -> (i32, i32) {
    %c0_i32 = arith.constant 0 : i32
    %c0_i32_0 = arith.constant 0 : i32
    %c0_i32_1 = arith.constant 0 : i32
    return %c0_i32, %c0_i32_0 : i32, i32
  }
  func.func @transform_4(%arg0: i32) -> (i32, i32) {
    %c0_i32 = arith.constant 0 : i32
    %c0_i32_0 = arith.constant 0 : i32
    %c0_i32_1 = arith.constant 0 : i32
    return %c0_i32, %c0_i32_0 : i32, i32
  }
  func.func @transform_5(%arg0: i32) -> (i32, i32) {
    %c0_i32 = arith.constant 0 : i32
    %c0_i32_0 = arith.constant 0 : i32
    %c0_i32_1 = arith.constant 0 : i32
    return %c0_i32, %c0_i32_0 : i32, i32
  }
  func.func @transform_6(%arg0: i32) -> (i32, i32) {
    %c0_i32 = arith.constant 0 : i32
    %c0_i32_0 = arith.constant 0 : i32
    %c0_i32_1 = arith.constant 0 : i32
    return %c0_i32, %c0_i32_0 : i32, i32
  }
  func.func @transform_7(%arg0: i32) -> (i32, i32) {
    %c0_i32 = arith.constant 0 : i32
    %c0_i32_0 = arith.constant 0 : i32
    %c0_i32_1 = arith.constant 0 : i32
    return %c0_i32, %c0_i32_0 : i32, i32
  }
  func.func @transform_8(%arg0: i32) -> (i32, i32) {
    %c0_i32 = arith.constant 0 : i32
    %c0_i32_0 = arith.constant 0 : i32
    %c0_i32_1 = arith.constant 0 : i32
    return %c0_i32, %c0_i32_0 : i32, i32
  }
  func.func @transform_9(%arg0: i32) -> (i32, i32) {
    %c0_i32 = arith.constant 0 : i32
    %c0_i32_0 = arith.constant 0 : i32
    %c0_i32_1 = arith.constant 0 : i32
    return %c0_i32, %c0_i32_0 : i32, i32
  }
  func.func @transform_10(%arg0: i32) -> (i32, i32) {
    %c0_i32 = arith.constant 0 : i32
    %c0_i32_0 = arith.constant 0 : i32
    %c0_i32_1 = arith.constant 0 : i32
    return %c0_i32, %c0_i32_0 : i32, i32
  }
  func.func @transform_11(%arg0: i32) -> (i32, i32) {
    %c0_i32 = arith.constant 0 : i32
    %c0_i32_0 = arith.constant 0 : i32
    %c0_i32_1 = arith.constant 0 : i32
    return %c0_i32, %c0_i32_0 : i32, i32
  }
  func.func @transform_12(%arg0: i32) -> (i32, i32) {
    %c0_i32 = arith.constant 0 : i32
    %c0_i32_0 = arith.constant 0 : i32
    %c0_i32_1 = arith.constant 0 : i32
    return %c0_i32, %c0_i32_0 : i32, i32
  }
  func.func @transform_13(%arg0: i32) -> (i32, i32) {
    %c0_i32 = arith.constant 0 : i32
    %c0_i32_0 = arith.constant 0 : i32
    %c0_i32_1 = arith.constant 0 : i32
    return %c0_i32, %c0_i32_0 : i32, i32
  }
  func.func @transform_14(%arg0: i32) -> (i32, i32) {
    %c0_i32 = arith.constant 0 : i32
    %c0_i32_0 = arith.constant 0 : i32
    %c0_i32_1 = arith.constant 0 : i32
    return %c0_i32, %c0_i32_0 : i32, i32
  }
  func.func @transform_15(%arg0: i32) -> (i32, i32) {
    %c0_i32 = arith.constant 0 : i32
    %c0_i32_0 = arith.constant 0 : i32
    %c0_i32_1 = arith.constant 0 : i32
    return %c0_i32, %c0_i32_0 : i32, i32
  }
  func.func @transform_16(%arg0: i32) -> (i32, i32) {
    %c0_i32 = arith.constant 0 : i32
    %c0_i32_0 = arith.constant 0 : i32
    %c0_i32_1 = arith.constant 0 : i32
    return %c0_i32, %c0_i32_0 : i32, i32
  }
}

</mosaic_0001>

<bundles_post_ra>
// kernel: gnn_comp_forward.1
= control target key start
LH: loop header
LB: loop body
LE: loop exit
PB: predicated region body
PF: predicated region fallthrough
CT: control target
= control target key end

     0   :  { %vm584_vm0 = vcmask 130048   ;;  %vm1058_vm1 = vcmask 261120   ;;  %vm5399_vm2 = vcmask 31744   ;;  %s10077_s1 = inlined_call_operand.vmem [shape: bf16[256,16], index: 1, kind: input, shape index: {}]   ;;  %s10078_s0 = inlined_call_operand.vmem [shape: bf16[256,256], index: 0, kind: input, shape index: {}]   ;;  %s10079_s3 = inlined_call_operand.vmem [shape: f32[16,32], index: 3, kind: input, shape index: {}]   ;;  %s10080_s2 = inlined_call_operand.vmem [shape: f32[256,1], index: 2, kind: input, shape index: {}]   ;;  %s10081_s4 = inlined_call_operand.vmem [shape: f32[1,32], index: 4, kind: input, shape index: {}]   ;;  %s10082_s5 = inlined_call_operand.vmem [shape: f32[32,32], index: 5, kind: input, shape index: {}]   ;;  %s10083_s6 = inlined_call_operand.vmem [shape: f32[32,2], index: 6, kind: input, shape index: {}]   ;;  %s10084_s7 = inlined_call_operand.vmem [shape: f32[1,32], index: 7, kind: input, shape index: {}]   ;;  %s10085_s8 = inlined_call_operand.vmem [shape: f32[32,32], index: 8, kind: input, shape index: {}]   ;;  %s10086_s9 = inlined_call_operand.vmem [shape: f32[1,32], index: 9, kind: input, shape index: {}]   ;;  %s10087_s10 = inlined_call_operand.vmem [shape: f32[32,32], index: 10, kind: input, shape index: {}]   ;;  %s10088_s11 = inlined_call_operand.vmem [shape: f32[32,2], index: 11, kind: input, shape index: {}]   ;;  %s10089_s12 = inlined_call_operand.vmem [shape: f32[1,32], index: 12, kind: input, shape index: {}]   ;;  %s10090_s13 = inlined_call_operand.vmem [shape: f32[32,4], index: 13, kind: input, shape index: {}]   ;;  %s10091_s15 = inlined_call_operand.vmem [shape: f32[256,32], index: 15, kind: output, shape index: {0}]   ;;  %s10092_s14 = inlined_call_operand.vmem [shape: f32[1,4], index: 14, kind: input, shape index: {}]   ;;  %s10093_s16 = inlined_call_operand.vmem [shape: f32[256,4], index: 16, kind: output, shape index: {1}]  }
   0x1   :  { %10336 = sst [smem:[#allocation98_spill]] %s10077_s1  ;;  %v5442_v16 = vld [vmem:[%s10078_s0] sm:$0xf]  ;;  %v5857_v17 = vld [vmem:[%s10078_s0 + $0x4] sm:$0xf0] }
   0x2   :  { %s10337_s23 = sld [smem:[#allocation98_spill]]  ;;  %v5856_v18 = vld [vmem:[%s10078_s0 + $0x4] sm:$0xf]  ;;  %v5444_v19 = vld [vmem:[%s10078_s0 + $0x8] sm:$0xf0]  ;;  %v6456_v20 = vor.u32 %v5857_v17, %v5442_v16 }
   0x3   :  { %v6458_v21 = vor.u32 %v5856_v18, %v5444_v19  ;;  %v5450_v22 = vld [vmem:[%s10078_s0 + $0x10] sm:$0xf]  ;;  %v5859_v23 = vld [vmem:[%s10078_s0 + $0x14] sm:$0xf0]  ;;  %v5858_v24 = vld [vmem:[%s10078_s0 + $0x14] sm:$0xf] }
   0x4   :  { %10338 = vst [vmem:[#allocation2_spill] sm:$0xff] %v6456_v20  ;;  %v5452_v25 = vld [vmem:[%s10078_s0 + $0x18] sm:$0xf0]  ;;  %v6474_v26 = vor.u32 %v5859_v23, %v5450_v22  ;;  %v5458_v28 = vld [vmem:[%s10078_s0 + $0x20] sm:$0xf]  ;;  %v583_v18 = vld [vmem:[%s10079_s3 + $0x8] sm:$0xff] }
   0x5   :  { %10339 = vst [vmem:[#allocation3_spill] sm:$0xff] %v6458_v21  ;;  %v6476_v27 = vor.u32 %v5858_v24, %v5452_v25  ;;  %v5861_v29 = vld [vmem:[%s10078_s0 + $0x24] sm:$0xf0]  ;;  %v5860_v30 = vld [vmem:[%s10078_s0 + $0x24] sm:$0xf]  ;;  %5904 = vmatpush.msra.mxu2 %v583_v18  ;;  %v6309_v25 = vmov 0  }
   0x6   :  { %10340 = vst [vmem:[#allocation4_spill] sm:$0xff] %v6474_v26  ;;  %v5460_v31 = vld [vmem:[%s10078_s0 + $0x28] sm:$0xf0]  ;;  %v6492_v32 = vor.u32 %v5861_v29, %v5458_v28  ;;  %v5466_v34 = vld [vmem:[%s10078_s0 + $0x30] sm:$0xf]  ;;  %v582_v24 = vld [vmem:[%s10079_s3] sm:$0xff]  ;;  %5916 = vset.pattern.permute.xlu0 %v6309_v25  ;;  %5917 = vset.pattern.permute.xlu1 %v6309_v25 }
   0x7   :  { %10341 = vst [vmem:[#allocation5_spill] sm:$0xff] %v6476_v27  ;;  %v6494_v33 = vor.u32 %v5860_v30, %v5460_v31  ;;  %v5863_v35 = vld [vmem:[%s10078_s0 + $0x34] sm:$0xf0]  ;;  %v5862_v36 = vld [vmem:[%s10078_s0 + $0x34] sm:$0xf]  ;;  %5905 = vmatpush.msra.mxu2 %v582_v24  ;;  %v84_v28 = vld [vmem:[%s10080_s2] sm:$0xff]  ;;  %5918 = vset.pattern.permute.xlu2 %v6309_v25 }
   0x8   :  { %v5895_v0 = vld [vmem:[%s10337_s23 + $0x38] sm:$0xff]  ;;  %v5894_v2 = vld [vmem:[%s10337_s23 + $0x30] sm:$0xff]  ;;  %v5893_v4 = vld [vmem:[%s10337_s23 + $0x28] sm:$0xff]  ;;  %10342 = vst [vmem:[#allocation6_spill] sm:$0xff] %v6492_v32  ;;  %v6510_v38 = vor.u32 %v5863_v35, %v5466_v34  ;;  %796 = vperm.xlu0 %5916, %v84_v28  }
   0x9   :  { %v5903_v1 = vld [vmem:[%s10337_s23 + $0x78] sm:$0xff]  ;;  %404 = vmatpush.bf16.msra.mxu0 %v5895_v0  ;;  %v5902_v3 = vld [vmem:[%s10337_s23 + $0x70] sm:$0xff]  ;;  %v5901_v5 = vld [vmem:[%s10337_s23 + $0x68] sm:$0xff]  ;;  %10343 = vst [vmem:[#allocation7_spill] sm:$0xff] %v6494_v33 }
   0xa   :  { %493 = vmatpush.bf16.msra.mxu1 %v5903_v1  ;;  %v5892_v6 = vld [vmem:[%s10337_s23 + $0x20] sm:$0xff]  ;;  %v5891_v8 = vld [vmem:[%s10337_s23 + $0x18] sm:$0xff]  ;;  %v5890_v10 = vld [vmem:[%s10337_s23 + $0x10] sm:$0xff]  ;;  %10344 = vst [vmem:[#allocation8_spill] sm:$0xff] %v6510_v38 }
   0xb   :  { %v5900_v7 = vld [vmem:[%s10337_s23 + $0x60] sm:$0xff]  ;;  %v5899_v9 = vld [vmem:[%s10337_s23 + $0x58] sm:$0xff]  ;;  %v5898_v11 = vld [vmem:[%s10337_s23 + $0x50] sm:$0xff] }
   0xc   :  { %v5889_v12 = vld [vmem:[%s10337_s23 + $0x8] sm:$0xff]  ;;  %v5888_v14 = vld [vmem:[%s10337_s23] sm:$0xff]  ;;  %v5468_v37 = vld [vmem:[%s10078_s0 + $0x38] sm:$0xf0] }
   0xd   :  { %405 = vmatpush.bf16.msra.mxu0 %v5894_v2  ;;  %v5897_v13 = vld [vmem:[%s10337_s23 + $0x48] sm:$0xff]  ;;  %v5896_v15 = vld [vmem:[%s10337_s23 + $0x40] sm:$0xff]  ;;  %v6512_v39 = vor.u32 %v5862_v36, %v5468_v37  ;;  %v5482_v46 = vld [vmem:[%s10078_s0 + $0x50] sm:$0xf] }
   0xe   :  { %494 = vmatpush.bf16.msra.mxu1 %v5902_v3  ;;  %v5474_v40 = vld [vmem:[%s10078_s0 + $0x40] sm:$0xf]  ;;  %v5865_v41 = vld [vmem:[%s10078_s0 + $0x44] sm:$0xf0]  ;;  %v5864_v42 = vld [vmem:[%s10078_s0 + $0x44] sm:$0xf] }
   0xf   :  { %10345 = vst [vmem:[#allocation9_spill] sm:$0xff] %v6512_v39  ;;  %v5476_v43 = vld [vmem:[%s10078_s0 + $0x48] sm:$0xf0]  ;;  %v6528_v44 = vor.u32 %v5865_v41, %v5474_v40  ;;  %v5867_v47 = vld [vmem:[%s10078_s0 + $0x54] sm:$0xf0]  ;;  %v86_v40 = vld [vmem:[%s10080_s2 + $0x10] sm:$0xff] }
  0x10   :  { %v6530_v45 = vor.u32 %v5864_v42, %v5476_v43  ;;  %v5866_v48 = vld [vmem:[%s10078_s0 + $0x54] sm:$0xf]  ;;  %v5484_v49 = vld [vmem:[%s10078_s0 + $0x58] sm:$0xf0]  ;;  %v6546_v50 = vor.u32 %v5867_v47, %v5482_v46  ;;  %v5490_v52 = vld [vmem:[%s10078_s0 + $0x60] sm:$0xf]  ;;  %806 = vperm.xlu1 %5917, %v86_v40  }
  0x11   :  { %406 = vmatpush.bf16.msra.mxu0 %v5893_v4  ;;  %10346 = vst [vmem:[#allocation10_spill] sm:$0xff] %v6528_v44  ;;  %v6548_v51 = vor.u32 %v5866_v48, %v5484_v49  ;;  %v5869_v53 = vld [vmem:[%s10078_s0 + $0x64] sm:$0xf0]  ;;  %v5868_v54 = vld [vmem:[%s10078_s0 + $0x64] sm:$0xf]  ;;  %v87_v49 = vld [vmem:[%s10080_s2 + $0x18] sm:$0xff] }
  0x12   :  { %495 = vmatpush.bf16.msra.mxu1 %v5901_v5  ;;  %10347 = vst [vmem:[#allocation11_spill] sm:$0xff] %v6530_v45  ;;  %v5492_v55 = vld [vmem:[%s10078_s0 + $0x68] sm:$0xf0]  ;;  %v6564_v56 = vor.u32 %v5869_v53, %v5490_v52  ;;  %v5498_v58 = vld [vmem:[%s10078_s0 + $0x70] sm:$0xf] }
  0x13   :  { %10348 = vst [vmem:[#allocation12_spill] sm:$0xff] %v6546_v50  ;;  %v6566_v57 = vor.u32 %v5868_v54, %v5492_v55  ;;  %v5871_v59 = vld [vmem:[%s10078_s0 + $0x74] sm:$0xf0]  ;;  %v5870_v60 = vld [vmem:[%s10078_s0 + $0x74] sm:$0xf]  ;;  %v85_v41 = vld [vmem:[%s10080_s2 + $0x8] sm:$0xff] }
  0x14   :  { %10349 = vst [vmem:[#allocation13_spill] sm:$0xff] %v6548_v51  ;;  %v5500_v61 = vld [vmem:[%s10078_s0 + $0x78] sm:$0xf0]  ;;  %v6582_v62 = vor.u32 %v5871_v59, %v5498_v58  ;;  %v5506_v0 = vld [vmem:[%s10078_s0 + $0x80] sm:$0xf]  ;;  %801 = vperm.xlu0 %5916, %v85_v41   ;;  %v90_v52 = vld [vmem:[%s10080_s2 + $0x30] sm:$0xff] }
  0x15   :  { %407 = vmatpush.bf16.msra.mxu0 %v5892_v6  ;;  %10350 = vst [vmem:[#allocation14_spill] sm:$0xff] %v6564_v56  ;;  %v6584_v63 = vor.u32 %v5870_v60, %v5500_v61  ;;  %v5873_v1 = vld [vmem:[%s10078_s0 + $0x84] sm:$0xf0]  ;;  %v5872_v2 = vld [vmem:[%s10078_s0 + $0x84] sm:$0xf] }
  0x16   :  { %496 = vmatpush.bf16.msra.mxu1 %v5900_v7  ;;  %10351 = vst [vmem:[#allocation15_spill] sm:$0xff] %v6566_v57  ;;  %v5508_v3 = vld [vmem:[%s10078_s0 + $0x88] sm:$0xf0]  ;;  %v6600_v4 = vor.u32 %v5873_v1, %v5506_v0  ;;  %v5522_v34 = vld [vmem:[%s10078_s0 + $0xa0] sm:$0xf]  ;;  %v91_v0 = vld [vmem:[%s10080_s2 + $0x38] sm:$0xff] }
  0x17   :  { %10352 = vst [vmem:[#allocation16_spill] sm:$0xff] %v6582_v62  ;;  %v6602_v5 = vor.u32 %v5872_v2, %v5508_v3  ;;  %v5877_v35 = vld [vmem:[%s10078_s0 + $0xa4] sm:$0xf0]  ;;  %v5876_v36 = vld [vmem:[%s10078_s0 + $0xa4] sm:$0xf] }
  0x18   :  { %10353 = vst [vmem:[#allocation17_spill] sm:$0xff] %v6584_v63  ;;  %v5524_v37 = vld [vmem:[%s10078_s0 + $0xa8] sm:$0xf0]  ;;  %v6659_v42 = vor.u32 %v5877_v35, %v5522_v34  ;;  %811 = vperm.xlu1 %5917, %v87_v49   ;;  %v5530_v58 = vld [vmem:[%s10078_s0 + $0xb0] sm:$0xf] }
  0x19   :  { %408 = vmatpush.bf16.msra.mxu0 %v5891_v8  ;;  %10354 = vst [vmem:[#allocation18_spill] sm:$0xff] %v6600_v4  ;;  %v6661_v43 = vor.u32 %v5876_v36, %v5524_v37  ;;  %v5879_v59 = vld [vmem:[%s10078_s0 + $0xb4] sm:$0xf0]  ;;  %v5878_v60 = vld [vmem:[%s10078_s0 + $0xb4] sm:$0xf]  ;;  %v89_v35 = vld [vmem:[%s10080_s2 + $0x28] sm:$0xff] }
  0x1a   :  { %497 = vmatpush.bf16.msra.mxu1 %v5899_v9  ;;  %10355 = vst [vmem:[#allocation19_spill] sm:$0xff] %v6602_v5  ;;  %v5532_v61 = vld [vmem:[%s10078_s0 + $0xb8] sm:$0xf0]  ;;  %v6690_v1 = vor.u32 %v5879_v59, %v5530_v58  ;;  %v94_v36 = vld [vmem:[%s10080_s2 + $0x50] sm:$0xff]  ;;  %v5883_v49 = vld [vmem:[%s10078_s0 + $0xd4] sm:$0xf0] }
  0x1b   :  { %10358 = vst [vmem:[#allocation22_spill] sm:$0xff] %v6659_v42  ;;  %v6692_v2 = vor.u32 %v5878_v60, %v5532_v61  ;;  %v99_v37 = vld [vmem:[%s10080_s2 + $0x78] sm:$0xff]  ;;  %v97_v58 = vld [vmem:[%s10080_s2 + $0x68] sm:$0xff]  ;;  %v102_v59 = vld [vmem:[%s10080_s2 + $0x90] sm:$0xff] }
  0x1c   :  { %10359 = vst [vmem:[#allocation23_spill] sm:$0xff] %v6661_v43  ;;  %826 = vperm.xlu0 %5916, %v90_v52   ;;  %v5882_v52 = vld [vmem:[%s10078_s0 + $0xd4] sm:$0xf] }
  0x1d   :  { %409 = vmatpush.bf16.msra.mxu0 %v5890_v10  ;;  %10360 = vst [vmem:[#allocation24_spill] sm:$0xff] %v6690_v1 }
  0x1e   :  { %498 = vmatpush.bf16.msra.mxu1 %v5898_v11  ;;  %10361 = vst [vmem:[#allocation25_spill] sm:$0xff] %v6692_v2 }
  0x20   :  { %831 = vperm.xlu1 %5917, %v91_v0  }
  0x21   :  { %410 = vmatpush.bf16.msra.mxu0 %v5889_v12  ;;  %v5514_v12 = vld [vmem:[%s10078_s0 + $0x90] sm:$0xf] }
  0x22   :  { %499 = vmatpush.bf16.msra.mxu1 %v5897_v13  ;;  %v5875_v13 = vld [vmem:[%s10078_s0 + $0x94] sm:$0xf0] }
  0x23   :  { %v6622_v16 = vor.u32 %v5875_v13, %v5514_v12 }
  0x25   :  { %411 = vmatpush.bf16.msra.mxu0 %v5888_v14  ;;  %v5874_v14 = vld [vmem:[%s10078_s0 + $0x94] sm:$0xf]  ;;  %10356 = vst [vmem:[#allocation20_spill] sm:$0xff] %v6622_v16 }
  0x26   :  { %500 = vmatpush.bf16.msra.mxu1 %v5896_v15  ;;  %v5516_v15 = vld [vmem:[%s10078_s0 + $0x98] sm:$0xf0] }
  0x27   :  { %v6624_v17 = vor.u32 %v5874_v14, %v5516_v15  ;;  %v5538_v14 = vld [vmem:[%s10078_s0 + $0xc0] sm:$0xf]  ;;  %v5881_v15 = vld [vmem:[%s10078_s0 + $0xc4] sm:$0xf0] }
  0x28   :  { %412 = vmatmul.bf16.vlgmr.msra.gmra.mxu0 %v6456_v20  ;;  %v6719_v25 = vor.u32 %v5881_v15, %v5538_v14  ;;  %846 = vperm.xlu1 %5917, %v94_v36   ;;  %v5554_v14 = vld [vmem:[%s10078_s0 + $0xe0] sm:$0xf]  ;;  %v5885_v15 = vld [vmem:[%s10078_s0 + $0xe4] sm:$0xf0] }
  0x29   :  { %501 = vmatmul.bf16.vlgmr.msra.gmra.mxu1 %v6458_v21  ;;  %10357 = vst [vmem:[#allocation21_spill] sm:$0xff] %v6624_v17 }
  0x2a   :  { %695 = vmatpush.msrb.mxu1 %v583_v18  ;;  %v5880_v18 = vld [vmem:[%s10078_s0 + $0xc4] sm:$0xf]  ;;  %10362 = vst [vmem:[#allocation26_spill] sm:$0xff] %v6719_v25 }
  0x2c   :  { %696 = vmatpush.msrb.mxu1 %v582_v24  ;;  %v96_v24 = vld [vmem:[%s10080_s2 + $0x60] sm:$0xff] }
  0x30   :  { %861 = vperm.xlu1 %5917, %v97_v58   ;;  %v5564_v58 = vld [vmem:[%s10078_s0 + $0xf8] sm:$0xf0] }
  0x38   :  { %417 = vmatmul.bf16.gmra.mxu0 %v6474_v26 }
  0x39   :  { %506 = vmatmul.bf16.gmra.mxu1 %v6476_v27 }
  0x48   :  { %422 = vmatmul.bf16.gmra.mxu0 %v6492_v32 }
  0x49   :  { %511 = vmatmul.bf16.gmra.mxu1 %v6494_v33 }
  0x58   :  { %427 = vmatmul.bf16.gmra.mxu0 %v6510_v38 }
  0x59   :  { %516 = vmatmul.bf16.gmra.mxu1 %v6512_v39 }
  0x68   :  { %432 = vmatmul.bf16.gmra.mxu0 %v6528_v44 }
  0x69   :  { %521 = vmatmul.bf16.gmra.mxu1 %v6530_v45 }
  0x78   :  { %437 = vmatmul.bf16.gmra.mxu0 %v6546_v50 }
  0x79   :  { %526 = vmatmul.bf16.gmra.mxu1 %v6548_v51 }
  0x88   :  { %442 = vmatmul.bf16.gmra.mxu0 %v6564_v56 }
  0x89   :  { %531 = vmatmul.bf16.gmra.mxu1 %v6566_v57 }
  0x98   :  { %447 = vmatmul.bf16.gmra.mxu0 %v6582_v62 }
  0x99   :  { %536 = vmatmul.bf16.gmra.mxu1 %v6584_v63 }
  0xa5   :  { %v413_v6 = vpop.f32.mrf.mxu0 }
  0xa6   :  { %v502_v7 = vpop.f32.mrf.mxu1 }
  0xa7   :  { %v6604_v8 = vadd.f32 %v502_v7, %v413_v6 }
  0xa8   :  { %452 = vmatmul.bf16.gmra.mxu0 %v6600_v4 }
  0xa9   :  { %541 = vmatmul.bf16.gmra.mxu1 %v6602_v5 }
  0xad   :  { %v415_v9 = vpop.f32.mrf.mxu0 }
  0xae   :  { %v504_v10 = vpop.f32.mrf.mxu1 }
  0xaf   :  { %v6608_v11 = vadd.f32 %v504_v10, %v415_v9  ;;  %v93_v9 = vld [vmem:[%s10080_s2 + $0x48] sm:$0xff] }
  0xb0   :  { %841 = vperm.xlu0 %5916, %v93_v9   ;;  %v105_v9 = vld [vmem:[%s10080_s2 + $0xa8] sm:$0xff] }
  0xb5   :  { %v418_v19 = vpop.f32.mrf.mxu0 }
  0xb6   :  { %v507_v22 = vpop.f32.mrf.mxu1 }
  0xb7   :  { %v6629_v23 = vadd.f32 %v507_v22, %v418_v19  ;;  %v5540_v19 = vld [vmem:[%s10078_s0 + $0xc8] sm:$0xf0]  ;;  %v88_v22 = vld [vmem:[%s10080_s2 + $0x20] sm:$0xff] }
  0xb8   :  { %457 = vmatmul.bf16.gmra.mxu0 %v6622_v16  ;;  %816 = vperm.xlu2 %5918, %v88_v22   ;;  %v6721_v28 = vor.u32 %v5880_v18, %v5540_v19  ;;  %v5884_v18 = vld [vmem:[%s10078_s0 + $0xe4] sm:$0xf]  ;;  %v5556_v19 = vld [vmem:[%s10078_s0 + $0xe8] sm:$0xf0]  ;;  %v103_v22 = vld [vmem:[%s10080_s2 + $0x98] sm:$0xff] }
  0xb9   :  { %546 = vmatmul.bf16.gmra.mxu1 %v6624_v17  ;;  %856 = vperm.xlu0 %5916, %v96_v24   ;;  %v108_v24 = vld [vmem:[%s10080_s2 + $0xc0] sm:$0xff] }
  0xba   :  { %10363 = vst [vmem:[#allocation27_spill] sm:$0xff] %v6721_v28 }
  0xbd   :  { %v420_v29 = vpop.f32.mrf.mxu0 }
  0xbe   :  { %v509_v30 = vpop.f32.mrf.mxu1 }
  0xbf   :  { %v6639_v31 = vadd.f32 %v509_v30, %v420_v29 }
  0xc0   :  { %821 = vperm.xlu2 %5918, %v89_v35  }
  0xc1   :  { %871 = vperm.xlu0 %5916, %v99_v37   ;;  %v95_v37 = vld [vmem:[%s10080_s2 + $0x58] sm:$0xff] }
  0xc5   :  { %v423_v46 = vpop.f32.mrf.mxu0 }
  0xc6   :  { %v512_v47 = vpop.f32.mrf.mxu1 }
  0xc7   :  { %v6663_v48 = vadd.f32 %v512_v47, %v423_v46  ;;  %v5546_v47 = vld [vmem:[%s10078_s0 + $0xd0] sm:$0xf] }
  0xc8   :  { %462 = vmatmul.bf16.gmra.mxu0 %v6659_v42  ;;  %v6757_v60 = vor.u32 %v5883_v49, %v5546_v47 }
  0xc9   :  { %551 = vmatmul.bf16.gmra.mxu1 %v6661_v43  ;;  %886 = vperm.xlu0 %5916, %v102_v59   ;;  %v109_v59 = vld [vmem:[%s10080_s2 + $0xc8] sm:$0xff] }
  0xca   :  { %10364 = vst [vmem:[#allocation28_spill] sm:$0xff] %v6757_v60 }
  0xcd   :  { %v425_v53 = vpop.f32.mrf.mxu0 }
  0xce   :  { %v514_v54 = vpop.f32.mrf.mxu1 }
  0xcf   :  { %v6673_v55 = vadd.f32 %v514_v54, %v425_v53  ;;  %v5548_v53 = vld [vmem:[%s10078_s0 + $0xd8] sm:$0xf0]  ;;  %v92_v54 = vld [vmem:[%s10080_s2 + $0x40] sm:$0xff] }
  0xd0   :  { %836 = vperm.xlu2 %5918, %v92_v54   ;;  %v6759_v61 = vor.u32 %v5882_v52, %v5548_v53  ;;  %v5562_v52 = vld [vmem:[%s10078_s0 + $0xf0] sm:$0xf]  ;;  %v5887_v53 = vld [vmem:[%s10078_s0 + $0xf4] sm:$0xf0]  ;;  %v5886_v54 = vld [vmem:[%s10078_s0 + $0xf4] sm:$0xf] }
  0xd1   :  { %901 = vperm.xlu0 %5916, %v105_v9  }
  0xd2   :  { %10365 = vst [vmem:[#allocation29_spill] sm:$0xff] %v6759_v61 }
  0xd5   :  { %v428_v3 = vpop.f32.mrf.mxu0 }
  0xd6   :  { %v517_v6 = vpop.f32.mrf.mxu1 }
  0xd7   :  { %v518_v7 = vadd.f32 %v517_v6, %v428_v3 }
  0xd8   :  { %467 = vmatmul.bf16.gmra.mxu0 %v6690_v1  ;;  %851 = vperm.xlu2 %5918, %v95_v37  }
  0xd9   :  { %556 = vmatmul.bf16.gmra.mxu1 %v6692_v2  ;;  %5638 = vmatmul.msk.f32.vlgmr.msra.gmra.mxu2 %vm584_vm0, %v518_v7  ;;  %v100_v7 = vld [vmem:[%s10080_s2 + $0x80] sm:$0xff] }
  0xda   :  { %876 = vperm.xlu1 %5917, %v100_v7   ;;  %916 = vperm.xlu0 %5916, %v108_v24  }
  0xdd   :  { %v430_v10 = vpop.f32.mrf.mxu0 }
  0xde   :  { %v519_v12 = vpop.f32.mrf.mxu1 }
  0xdf   :  { %v520_v13 = vadd.f32 %v519_v12, %v430_v10 }
  0xe1   :  { %5639 = vmatmul.msk.f32.gmra.mxu2 %vm584_vm0, %v520_v13 }
  0xe2   :  { %891 = vperm.xlu1 %5917, %v103_v22  }
  0xe5   :  { %v433_v29 = vpop.f32.mrf.mxu0 }
  0xe6   :  { %v522_v30 = vpop.f32.mrf.mxu1 }
  0xe7   :  { %v523_v34 = vadd.f32 %v522_v30, %v433_v29  ;;  %v6789_v29 = vor.u32 %v5885_v15, %v5554_v14  ;;  %v6791_v30 = vor.u32 %v5884_v18, %v5556_v19  ;;  %v98_v18 = vld [vmem:[%s10080_s2 + $0x70] sm:$0xff]  ;;  %v115_v19 = vld [vmem:[%s10080_s2 + $0xf8] sm:$0xff] }
  0xe8   :  { %472 = vmatmul.bf16.gmra.mxu0 %v6719_v25  ;;  %866 = vperm.xlu2 %5918, %v98_v18   ;;  %v6885_v18 = vpop.permute.xlu1 %806 }
  0xe9   :  { %561 = vmatmul.bf16.gmra.mxu1 %v6721_v28  ;;  %5640 = vmatmul.msk.f32.gmra.mxu2 %vm584_vm0, %v523_v34  ;;  %10366 = vst [vmem:[#allocation30_spill] sm:$0xff] %v6789_v29 }
  0xea   :  { %10367 = vst [vmem:[#allocation31_spill] sm:$0xff] %v6791_v30 }
  0xeb   :  { %10371 = vst [vmem:[#allocation35_spill] sm:$0xff] %v6885_v18 }
  0xed   :  { %v435_v40 = vpop.f32.mrf.mxu0 }
  0xee   :  { %v524_v41 = vpop.f32.mrf.mxu1 }
  0xef   :  { %v525_v46 = vadd.f32 %v524_v41, %v435_v40  ;;  %v106_v40 = vld [vmem:[%s10080_s2 + $0xb0] sm:$0xff]  ;;  %v111_v41 = vld [vmem:[%s10080_s2 + $0xd8] sm:$0xff] }
  0xf0   :  { %906 = vperm.xlu1 %5917, %v106_v40   ;;  %931 = vperm.xlu0 %5916, %v111_v41   ;;  %v104_v41 = vld [vmem:[%s10080_s2 + $0xa0] sm:$0xff] }
  0xf1   :  { %5641 = vmatmul.msk.f32.gmra.mxu2 %vm584_vm0, %v525_v46 }
  0xf5   :  { %v438_v0 = vpop.f32.mrf.mxu0 }
  0xf6   :  { %v527_v3 = vpop.f32.mrf.mxu1 }
  0xf7   :  { %v528_v6 = vadd.f32 %v527_v3, %v438_v0  ;;  %v114_v0 = vld [vmem:[%s10080_s2 + $0xf0] sm:$0xff]  ;;  %v6824_v3 = vor.u32 %v5887_v53, %v5562_v52 }
  0xf8   :  { %477 = vmatmul.bf16.gmra.mxu0 %v6757_v60  ;;  %921 = vperm.xlu1 %5917, %v109_v59   ;;  %v1054_v59 = vld [vmem:[%s10082_s5] sm:$0xff] }
  0xf9   :  { %566 = vmatmul.bf16.gmra.mxu1 %v6759_v61  ;;  %5642 = vmatmul.msk.f32.gmra.mxu2 %vm584_vm0, %v528_v6  ;;  %10368 = vst [vmem:[#allocation32_spill] sm:$0xff] %v6824_v3  ;;  %v6826_v6 = vor.u32 %v5886_v54, %v5564_v58  ;;  %v1056_v54 = vld [vmem:[%s10082_s5 + $0x10] sm:$0xff]  ;;  %v1055_v58 = vld [vmem:[%s10082_s5 + $0x8] sm:$0xff] }
  0xfa   :  { %946 = vperm.xlu0 %5916, %v114_v0   ;;  %v110_v0 = vld [vmem:[%s10080_s2 + $0xd0] sm:$0xff] }
  0xfb   :  { %10369 = vst [vmem:[#allocation33_spill] sm:$0xff] %v6826_v6 }
  0xfd   :  { %v440_v10 = vpop.f32.mrf.mxu0 }
  0xfe   :  { %v529_v12 = vpop.f32.mrf.mxu1 }
  0xff   :  { %v530_v13 = vadd.f32 %v529_v12, %v440_v10  ;;  %v112_v12 = vld [vmem:[%s10080_s2 + $0xe0] sm:$0xff] }
 0x100   :  { %936 = vperm.xlu1 %5917, %v112_v12   ;;  %v6877_v12 = vpop.permute.xlu0 %796 }
 0x101   :  { %5643 = vmatmul.msk.f32.gmra.mxu2 %vm584_vm0, %v530_v13  ;;  %10370 = vst [vmem:[#allocation34_spill] sm:$0xff] %v6877_v12 }
 0x105   :  { %v443_v34 = vpop.f32.mrf.mxu0 }
 0x106   :  { %v532_v35 = vpop.f32.mrf.mxu1 }
 0x107   :  { %v533_v36 = vadd.f32 %v532_v35, %v443_v34  ;;  %v101_v35 = vld [vmem:[%s10080_s2 + $0x88] sm:$0xff] }
 0x108   :  { %482 = vmatmul.bf16.gmra.mxu0 %v6789_v29  ;;  %951 = vperm.xlu1 %5917, %v115_v19   ;;  %v6889_v19 = vpop.permute.xlu0 %801 }
 0x109   :  { %571 = vmatmul.bf16.gmra.mxu1 %v6791_v30  ;;  %5644 = vmatmul.msk.f32.gmra.mxu2 %vm584_vm0, %v533_v36  ;;  %10372 = vst [vmem:[#allocation36_spill] sm:$0xff] %v6889_v19 }
 0x10a   :  { %881 = vperm.xlu2 %5918, %v101_v35   ;;  %v6894_v35 = vpop.permute.xlu1 %811 }
 0x10b   :  { %10374 = vst [vmem:[#allocation38_spill] sm:$0xff] %v6894_v35 }
 0x10d   :  { %v445_v46 = vpop.f32.mrf.mxu0 }
 0x10e   :  { %v534_v47 = vpop.f32.mrf.mxu1 }
 0x10f   :  { %v535_v49 = vadd.f32 %v534_v47, %v445_v46 }
 0x111   :  { %5645 = vmatmul.msk.f32.gmra.mxu2 %vm584_vm0, %v535_v49  ;;  %v1057_v49 = vld [vmem:[%s10082_s5 + $0x18] sm:$0xff] }
 0x112   :  { %896 = vperm.xlu2 %5918, %v104_v41   ;;  %5906 = vmatpush.msra.mxu3 %v1057_v49 }
 0x113   :  { %1167 = vmatpush.msra.mxu1 %v1057_v49 }
 0x114   :  { %5907 = vmatpush.msra.mxu3 %v1056_v54 }
 0x115   :  { %v448_v7 = vpop.f32.mrf.mxu0  ;;  %1168 = vmatpush.msra.mxu1 %v1056_v54 }
 0x116   :  { %v537_v9 = vpop.f32.mrf.mxu1  ;;  %5908 = vmatpush.msra.mxu3 %v1055_v58 }
 0x117   :  { %v538_v10 = vadd.f32 %v537_v9, %v448_v7  ;;  %1169 = vmatpush.msra.mxu1 %v1055_v58 }
 0x118   :  { %487 = vmatmul.bf16.gmra.mxu0 %v6824_v3  ;;  %5909 = vmatpush.msra.mxu3 %v1054_v59 }
 0x119   :  { %576 = vmatmul.bf16.gmra.mxu1 %v6826_v6  ;;  %5646 = vmatmul.msk.f32.gmra.mxu2 %vm584_vm0, %v538_v10 }
 0x11a   :  { %1170 = vmatpush.msra.mxu1 %v1054_v59 }
 0x11d   :  { %v450_v13 = vpop.f32.mrf.mxu0 }
 0x11e   :  { %v539_v14 = vpop.f32.mrf.mxu1 }
 0x11f   :  { %v540_v15 = vadd.f32 %v539_v14, %v450_v13 }
 0x121   :  { %5647 = vmatmul.msk.f32.gmra.mxu2 %vm584_vm0, %v540_v15 }
 0x125   :  { %v453_v22 = vpop.f32.mrf.mxu0 }
 0x126   :  { %v542_v24 = vpop.f32.mrf.mxu1 }
 0x127   :  { %v543_v34 = vadd.f32 %v542_v24, %v453_v22 }
 0x129   :  { %5632 = vmatmul.msk.f32.vlgmr.msrb.gmra.mxu1 %vm584_vm0, %v6604_v8  ;;  %5648 = vmatmul.msk.f32.gmra.mxu2 %vm584_vm0, %v543_v34  ;;  %v6892_v34 = vpop.permute.xlu2 %816 }
 0x12a   :  { %10373 = vst [vmem:[#allocation37_spill] sm:$0xff] %v6892_v34 }
 0x12d   :  { %v455_v36 = vpop.f32.mrf.mxu0 }
 0x12e   :  { %v544_v37 = vpop.f32.mrf.mxu1 }
 0x12f   :  { %v545_v40 = vadd.f32 %v544_v37, %v455_v36  ;;  %v6897_v36 = vpop.permute.xlu0 %826  ;;  %v6902_v37 = vld [vmem:[%s10081_s4] ss:$0 sm:$0xff] }
 0x130   :  { %10375 = vst [vmem:[#allocation39_spill] sm:$0xff] %v6897_v36 }
 0x131   :  { %5633 = vmatmul.msk.f32.gmra.mxu1 %vm584_vm0, %v6608_v11  ;;  %5649 = vmatmul.msk.f32.gmra.mxu2 %vm584_vm0, %v545_v40  ;;  %v107_v11 = vld [vmem:[%s10080_s2 + $0xb8] sm:$0xff]  ;;  %v6906_v49 = vpop.permute.xlu2 %821 }
 0x132   :  { %911 = vperm.xlu2 %5918, %v107_v11   ;;  %10376 = vst [vmem:[#allocation40_spill] sm:$0xff] %v6906_v49 }
 0x135   :  { %v458_v8 = vpop.f32.mrf.mxu0 }
 0x136   :  { %v547_v46 = vpop.f32.mrf.mxu1 }
 0x137   :  { %v548_v47 = vadd.f32 %v547_v46, %v458_v8 }
 0x139   :  { %5634 = vmatmul.msk.f32.gmra.mxu1 %vm584_vm0, %v6629_v23  ;;  %5650 = vmatmul.msk.f32.gmra.mxu2 %vm584_vm0, %v548_v47 }
 0x13a   :  { %926 = vperm.xlu2 %5918, %v110_v0  }
 0x13d   :  { %v460_v52 = vpop.f32.mrf.mxu0 }
 0x13e   :  { %v549_v53 = vpop.f32.mrf.mxu1 }
 0x13f   :  { %v550_v23 = vadd.f32 %v549_v53, %v460_v52  ;;  %v6909_v52 = vpop.permute.xlu1 %831 }
 0x140   :  { %10377 = vst [vmem:[#allocation41_spill] sm:$0xff] %v6909_v52 }
 0x141   :  { %5635 = vmatmul.msk.f32.gmra.mxu1 %vm584_vm0, %v6639_v31  ;;  %5651 = vmatmul.msk.f32.gmra.mxu2 %vm584_vm0, %v550_v23  ;;  %v113_v31 = vld [vmem:[%s10080_s2 + $0xe8] sm:$0xff] }
 0x142   :  { %941 = vperm.xlu2 %5918, %v113_v31  }
 0x145   :  { %v463_v7 = vpop.f32.mrf.mxu0 }
 0x146   :  { %v552_v9 = vpop.f32.mrf.mxu1 }
 0x147   :  { %v553_v10 = vadd.f32 %v552_v9, %v463_v7  ;;  %v6915_v9 = vpop.permute.xlu2 %836 }
 0x148   :  { %10378 = vst [vmem:[#allocation42_spill] sm:$0xff] %v6915_v9 }
 0x149   :  { %5636 = vmatmul.msk.f32.gmra.mxu1 %vm584_vm0, %v6663_v48  ;;  %5652 = vmatmul.msk.f32.gmra.mxu2 %vm584_vm0, %v553_v10 }
 0x14d   :  { %v465_v13 = vpop.f32.mrf.mxu0 }
 0x14e   :  { %v554_v14 = vpop.f32.mrf.mxu1 }
 0x14f   :  { %v555_v15 = vadd.f32 %v554_v14, %v465_v13 }
 0x151   :  { %5637 = vmatmul.msk.f32.gmra.mxu1 %vm584_vm0, %v6673_v55  ;;  %5653 = vmatmul.msk.f32.gmra.mxu2 %vm584_vm0, %v555_v15 }
 0x155   :  { %v468_v48 = vpop.f32.mrf.mxu0 }
 0x156   :  { %v557_v22 = vpop.f32.mrf.mxu1 }
 0x157   :  { %v558_v24 = vadd.f32 %v557_v22, %v468_v48 }
 0x159   :  { %5654 = vmatmul.msk.f32.gmra.mxu2 %vm584_vm0, %v558_v24  ;;  %v6922_v24 = vpop.permute.xlu0 %841 }
 0x15a   :  { %10379 = vst [vmem:[#allocation43_spill] sm:$0xff] %v6922_v24 }
 0x15c   :  { %v716_v55 = vpop.f32.mrf.mxu2 }
 0x15d   :  { %v960_v40 = vmul.f32 %v6897_v36, %v716_v55  ;;  %v470_v41 = vpop.f32.mrf.mxu0 }
 0x15e   :  { %v559_v8 = vpop.f32.mrf.mxu1 }
 0x15f   :  { %v560_v46 = vadd.f32 %v559_v8, %v470_v41  ;;  %v996_v47 = vadd.f32 %v6902_v37, %v960_v40 }
 0x161   :  { %5655 = vmatmul.msk.f32.gmra.mxu2 %vm584_vm0, %v560_v46  ;;  %v1028_v11 = vmax.f32 %v996_v47, 0.0 }
 0x163   :  { %5670 = vmatmul.msk.f32.vlgmr.msra.gmra.mxu3 %vm1058_vm1, %v1028_v11 }
 0x164   :  { %v719_v53 = vpop.f32.mrf.mxu2 }
 0x165   :  { %v961_v54 = vmul.f32 %v6909_v52, %v719_v53  ;;  %v473_v23 = vpop.f32.mrf.mxu0  ;;  %v6927_v53 = vpop.permute.xlu1 %846 }
 0x166   :  { %v562_v58 = vpop.f32.mrf.mxu1  ;;  %10380 = vst [vmem:[#allocation44_spill] sm:$0xff] %v6927_v53 }
 0x167   :  { %v563_v59 = vadd.f32 %v562_v58, %v473_v23  ;;  %v997_v0 = vadd.f32 %v6902_v37, %v961_v54 }
 0x169   :  { %5656 = vmatmul.msk.f32.gmra.mxu2 %vm584_vm0, %v563_v59  ;;  %v1029_v7 = vmax.f32 %v997_v0, 0.0 }
 0x16b   :  { %5671 = vmatmul.msk.f32.gmra.mxu3 %vm1058_vm1, %v1029_v7 }
 0x16c   :  { %v722_v10 = vpop.f32.mrf.mxu2 }
 0x16d   :  { %v962_v31 = vmul.f32 %v6915_v9, %v722_v10  ;;  %v475_v13 = vpop.f32.mrf.mxu0 }
 0x16e   :  { %v564_v14 = vpop.f32.mrf.mxu1 }
 0x16f   :  { %v565_v15 = vadd.f32 %v564_v14, %v475_v13  ;;  %v998_v48 = vadd.f32 %v6902_v37, %v962_v31  ;;  %v6933_v31 = vpop.permute.xlu2 %851 }
 0x170   :  { %10381 = vst [vmem:[#allocation45_spill] sm:$0xff] %v6933_v31 }
 0x171   :  { %5657 = vmatmul.msk.f32.gmra.mxu2 %vm584_vm0, %v565_v15  ;;  %v1030_v22 = vmax.f32 %v998_v48, 0.0 }
 0x173   :  { %5672 = vmatmul.msk.f32.gmra.mxu3 %vm1058_vm1, %v1030_v22 }
 0x174   :  { %v725_v55 = vpop.f32.mrf.mxu2 }
 0x175   :  { %v963_v40 = vmul.f32 %v6922_v24, %v725_v55  ;;  %v478_v41 = vpop.f32.mrf.mxu0 }
 0x176   :  { %v567_v8 = vpop.f32.mrf.mxu1 }
 0x177   :  { %v568_v46 = vadd.f32 %v567_v8, %v478_v41  ;;  %v999_v47 = vadd.f32 %v6902_v37, %v963_v40  ;;  %v6940_v41 = vpop.permute.xlu0 %856 }
 0x178   :  { %10382 = vst [vmem:[#allocation46_spill] sm:$0xff] %v6940_v41 }
 0x179   :  { %5658 = vmatmul.msk.f32.gmra.mxu2 %vm584_vm0, %v568_v46  ;;  %v1031_v11 = vmax.f32 %v999_v47, 0.0 }
 0x17b   :  { %5673 = vmatmul.msk.f32.gmra.mxu3 %vm1058_vm1, %v1031_v11 }
 0x17c   :  { %v728_v54 = vpop.f32.mrf.mxu2 }
 0x17d   :  { %v964_v23 = vmul.f32 %v6927_v53, %v728_v54  ;;  %v480_v58 = vpop.f32.mrf.mxu0 }
 0x17e   :  { %v569_v59 = vpop.f32.mrf.mxu1 }
 0x17f   :  { %v570_v0 = vadd.f32 %v569_v59, %v480_v58  ;;  %v1000_v7 = vadd.f32 %v6902_v37, %v964_v23  ;;  %v6946_v59 = vpop.permute.xlu1 %861 }
 0x180   :  { %10383 = vst [vmem:[#allocation47_spill] sm:$0xff] %v6946_v59 }
 0x181   :  { %5659 = vmatmul.msk.f32.gmra.mxu2 %vm584_vm0, %v570_v0  ;;  %v1032_v10 = vmax.f32 %v1000_v7, 0.0 }
 0x183   :  { %5674 = vmatmul.msk.f32.gmra.mxu3 %vm1058_vm1, %v1032_v10 }
 0x184   :  { %v731_v13 = vpop.f32.mrf.mxu2 }
 0x185   :  { %v965_v14 = vmul.f32 %v6933_v31, %v731_v13  ;;  %v483_v15 = vpop.f32.mrf.mxu0 }
 0x186   :  { %v572_v48 = vpop.f32.mrf.mxu1 }
 0x187   :  { %v573_v22 = vadd.f32 %v572_v48, %v483_v15  ;;  %v1001_v55 = vadd.f32 %v6902_v37, %v965_v14 }
 0x189   :  { %5660 = vmatmul.msk.f32.gmra.mxu2 %vm584_vm0, %v573_v22  ;;  %v1033_v40 = vmax.f32 %v1001_v55, 0.0  ;;  %v6951_v22 = vpop.permute.xlu2 %866 }
 0x18a   :  { %10384 = vst [vmem:[#allocation48_spill] sm:$0xff] %v6951_v22 }
 0x18b   :  { %5675 = vmatmul.msk.f32.gmra.mxu3 %vm1058_vm1, %v1033_v40 }
 0x18c   :  { %v734_v8 = vpop.f32.mrf.mxu2 }
 0x18d   :  { %v966_v46 = vmul.f32 %v6940_v41, %v734_v8  ;;  %v485_v47 = vpop.f32.mrf.mxu0 }
 0x18e   :  { %v574_v11 = vpop.f32.mrf.mxu1 }
 0x18f   :  { %v575_v54 = vadd.f32 %v574_v11, %v485_v47  ;;  %v1002_v23 = vadd.f32 %v6902_v37, %v966_v46 }
 0x191   :  { %5661 = vmatmul.msk.f32.gmra.mxu2 %vm584_vm0, %v575_v54  ;;  %v1034_v58 = vmax.f32 %v1002_v23, 0.0  ;;  %v6958_v23 = vpop.permute.xlu0 %871 }
 0x192   :  { %10385 = vst [vmem:[#allocation49_spill] sm:$0xff] %v6958_v23 }
 0x193   :  { %5676 = vmatmul.msk.f32.gmra.mxu3 %vm1058_vm1, %v1034_v58 }
 0x194   :  { %v737_v0 = vpop.f32.mrf.mxu2 }
 0x195   :  { %v967_v7 = vmul.f32 %v6946_v59, %v737_v0  ;;  %v488_v10 = vpop.f32.mrf.mxu0 }
 0x196   :  { %v577_v13 = vpop.f32.mrf.mxu1 }
 0x197   :  { %v578_v14 = vadd.f32 %v577_v13, %v488_v10  ;;  %v1003_v15 = vadd.f32 %v6902_v37, %v967_v7 }
 0x199   :  { %5662 = vmatmul.msk.f32.gmra.mxu2 %vm584_vm0, %v578_v14  ;;  %v1035_v48 = vmax.f32 %v1003_v15, 0.0 }
 0x19b   :  { %5677 = vmatmul.msk.f32.gmra.mxu3 %vm1058_vm1, %v1035_v48 }
 0x19c   :  { %v740_v55 = vpop.f32.mrf.mxu2 }
 0x19d   :  { %v968_v40 = vmul.f32 %v6951_v22, %v740_v55  ;;  %v490_v8 = vpop.f32.mrf.mxu0  ;;  %v6965_v55 = vpop.permute.xlu1 %876 }
 0x19e   :  { %v579_v46 = vpop.f32.mrf.mxu1  ;;  %10386 = vst [vmem:[#allocation50_spill] sm:$0xff] %v6965_v55 }
 0x19f   :  { %v580_v47 = vadd.f32 %v579_v46, %v490_v8  ;;  %v1004_v11 = vadd.f32 %v6902_v37, %v968_v40 }
 0x1a1   :  { %5663 = vmatmul.msk.f32.gmra.mxu2 %vm584_vm0, %v580_v47  ;;  %v1036_v54 = vmax.f32 %v1004_v11, 0.0 }
 0x1a3   :  { %5678 = vmatmul.msk.f32.gmra.mxu3 %vm1058_vm1, %v1036_v54 }
 0x1a4   :  { %v743_v58 = vpop.f32.mrf.mxu2 }
 0x1a5   :  { %v969_v0 = vmul.f32 %v6958_v23, %v743_v58 }
 0x1a6   :  { %v698_v7 = vpop.f32.mrf.mxu1 }
 0x1a7   :  { %v954_v10 = vmul.f32 %v6877_v12, %v698_v7  ;;  %v1005_v13 = vadd.f32 %v6902_v37, %v969_v0  ;;  %v6973_v7 = vpop.permute.xlu2 %881 }
 0x1a8   :  { %10387 = vst [vmem:[#allocation51_spill] sm:$0xff] %v6973_v7 }
 0x1a9   :  { %v990_v14 = vadd.f32 %v6902_v37, %v954_v10  ;;  %v1037_v15 = vmax.f32 %v1005_v13, 0.0 }
 0x1ab   :  { %v1022_v48 = vmax.f32 %v990_v14, 0.0  ;;  %5679 = vmatmul.msk.f32.gmra.mxu3 %vm1058_vm1, %v1037_v15 }
 0x1ac   :  { %v746_v40 = vpop.f32.mrf.mxu2 }
 0x1ad   :  { %5664 = vmatmul.msk.f32.vlgmr.msra.gmra.mxu1 %vm1058_vm1, %v1022_v48  ;;  %v970_v8 = vmul.f32 %v6965_v55, %v746_v40 }
 0x1ae   :  { %v701_v46 = vpop.f32.mrf.mxu1 }
 0x1af   :  { %v955_v47 = vmul.f32 %v6889_v19, %v701_v46  ;;  %v1006_v11 = vadd.f32 %v6902_v37, %v970_v8 }
 0x1b1   :  { %v991_v54 = vadd.f32 %v6902_v37, %v955_v47  ;;  %v1038_v58 = vmax.f32 %v1006_v11, 0.0  ;;  %v6981_v47 = vpop.permute.xlu0 %886 }
 0x1b2   :  { %10388 = vst [vmem:[#allocation52_spill] sm:$0xff] %v6981_v47 }
 0x1b3   :  { %v1023_v0 = vmax.f32 %v991_v54, 0.0  ;;  %5680 = vmatmul.msk.f32.gmra.mxu3 %vm1058_vm1, %v1038_v58 }
 0x1b4   :  { %v749_v10 = vpop.f32.mrf.mxu2 }
 0x1b5   :  { %5665 = vmatmul.msk.f32.gmra.mxu1 %vm1058_vm1, %v1023_v0  ;;  %v971_v13 = vmul.f32 %v6973_v7, %v749_v10 }
 0x1b6   :  { %v704_v14 = vpop.f32.mrf.mxu1 }
 0x1b7   :  { %v956_v15 = vmul.f32 %v6885_v18, %v704_v14  ;;  %v1007_v48 = vadd.f32 %v6902_v37, %v971_v13 }
 0x1b9   :  { %v992_v40 = vadd.f32 %v6902_v37, %v956_v15  ;;  %v1039_v8 = vmax.f32 %v1007_v48, 0.0  ;;  %v6989_v48 = vpop.permute.xlu1 %891 }
 0x1ba   :  { %10389 = vst [vmem:[#allocation53_spill] sm:$0xff] %v6989_v48 }
 0x1bb   :  { %v1024_v46 = vmax.f32 %v992_v40, 0.0  ;;  %5681 = vmatmul.msk.f32.gmra.mxu3 %vm1058_vm1, %v1039_v8 }
 0x1bc   :  { %v752_v11 = vpop.f32.mrf.mxu2 }
 0x1bd   :  { %5666 = vmatmul.msk.f32.gmra.mxu1 %vm1058_vm1, %v1024_v46  ;;  %v972_v54 = vmul.f32 %v6981_v47, %v752_v11 }
 0x1be   :  { %v707_v58 = vpop.f32.mrf.mxu1 }
 0x1bf   :  { %v957_v0 = vmul.f32 %v6894_v35, %v707_v58  ;;  %v1008_v10 = vadd.f32 %v6902_v37, %v972_v54 }
 0x1c1   :  { %v993_v13 = vadd.f32 %v6902_v37, %v957_v0  ;;  %v1040_v14 = vmax.f32 %v1008_v10, 0.0  ;;  %v6997_v10 = vpop.permute.xlu2 %896 }
 0x1c2   :  { %10390 = vst [vmem:[#allocation54_spill] sm:$0xff] %v6997_v10 }
 0x1c3   :  { %v1025_v15 = vmax.f32 %v993_v13, 0.0  ;;  %5682 = vmatmul.msk.f32.gmra.mxu3 %vm1058_vm1, %v1040_v14 }
 0x1c4   :  { %v755_v40 = vpop.f32.mrf.mxu2 }
 0x1c5   :  { %5667 = vmatmul.msk.f32.gmra.mxu1 %vm1058_vm1, %v1025_v15  ;;  %v973_v8 = vmul.f32 %v6989_v48, %v755_v40 }
 0x1c6   :  { %v710_v46 = vpop.f32.mrf.mxu1 }
 0x1c7   :  { %v958_v11 = vmul.f32 %v6892_v34, %v710_v46  ;;  %v1009_v58 = vadd.f32 %v6902_v37, %v973_v8 }
 0x1c9   :  { %v994_v54 = vadd.f32 %v6902_v37, %v958_v11  ;;  %v1041_v6 = vmax.f32 %v1009_v58, 0.0  ;;  %v7005_v58 = vpop.permute.xlu0 %901 }
 0x1ca   :  { %10391 = vst [vmem:[#allocation55_spill] sm:$0xff] %v7005_v58 }
 0x1cb   :  { %v1026_v0 = vmax.f32 %v994_v54, 0.0  ;;  %5683 = vmatmul.msk.f32.gmra.mxu3 %vm1058_vm1, %v1041_v6 }
 0x1cc   :  { %v758_v13 = vpop.f32.mrf.mxu2 }
 0x1cd   :  { %5668 = vmatmul.msk.f32.gmra.mxu1 %vm1058_vm1, %v1026_v0  ;;  %v974_v14 = vmul.f32 %v6997_v10, %v758_v13 }
 0x1ce   :  { %v713_v15 = vpop.f32.mrf.mxu1 }
 0x1cf   :  { %v959_v40 = vmul.f32 %v6906_v49, %v713_v15  ;;  %v1010_v46 = vadd.f32 %v6902_v37, %v974_v14  ;;  %v7011_v15 = vpop.permute.xlu1 %906 }
 0x1d0   :  { %10392 = vst [vmem:[#allocation56_spill] sm:$0xff] %v7011_v15 }
 0x1d1   :  { %v995_v8 = vadd.f32 %v6902_v37, %v959_v40  ;;  %v1042_v30 = vmax.f32 %v1010_v46, 0.0 }
 0x1d3   :  { %v1027_v11 = vmax.f32 %v995_v8, 0.0  ;;  %5684 = vmatmul.msk.f32.gmra.mxu3 %vm1058_vm1, %v1042_v30  ;;  %v7016_v8 = vpop.permute.xlu2 %911 }
 0x1d4   :  { %v761_v6 = vpop.f32.mrf.mxu2  ;;  %10393 = vst [vmem:[#allocation57_spill] sm:$0xff] %v7016_v8 }
 0x1d5   :  { %5669 = vmatmul.msk.f32.gmra.mxu1 %vm1058_vm1, %v1027_v11  ;;  %v975_v54 = vmul.f32 %v7005_v58, %v761_v6 }
 0x1d7   :  { %v1011_v0 = vadd.f32 %v6902_v37, %v975_v54 }
 0x1d9   :  { %v1043_v13 = vmax.f32 %v1011_v0, 0.0 }
 0x1db   :  { %5685 = vmatmul.msk.f32.gmra.mxu3 %vm1058_vm1, %v1043_v13  ;;  %v7023_v13 = vpop.permute.xlu0 %916 }
 0x1dc   :  { %v764_v14 = vpop.f32.mrf.mxu2  ;;  %10394 = vst [vmem:[#allocation58_spill] sm:$0xff] %v7023_v13 }
 0x1dd   :  { %v976_v40 = vmul.f32 %v7011_v15, %v764_v14 }
 0x1df   :  { %v1012_v46 = vadd.f32 %v6902_v37, %v976_v40 }
 0x1e1   :  { %v1044_v30 = vmax.f32 %v1012_v46, 0.0 }
 0x1e3   :  { %5686 = vmatmul.msk.f32.gmra.mxu3 %vm1058_vm1, %v1044_v30 }
 0x1e4   :  { %v767_v11 = vpop.f32.mrf.mxu2 }
 0x1e5   :  { %v977_v6 = vmul.f32 %v7016_v8, %v767_v11  ;;  %v7030_v11 = vpop.permute.xlu1 %921 }
 0x1e6   :  { %v7019_v61 = vpop.f32.mrf.mxu3  ;;  %10395 = vst [vmem:[#allocation59_spill] sm:$0xff] %v7030_v11 }
 0x1e7   :  { %v1013_v54 = vadd.f32 %v6902_v37, %v977_v6 }
 0x1e9   :  { %v1045_v0 = vmax.f32 %v1013_v54, 0.0 }
 0x1eb   :  { %5687 = vmatmul.msk.f32.gmra.mxu3 %vm1058_vm1, %v1045_v0 }
 0x1ec   :  { %v770_v14 = vpop.f32.mrf.mxu2 }
 0x1ed   :  { %v978_v40 = vmul.f32 %v7023_v13, %v770_v14  ;;  %v7037_v14 = vpop.permute.xlu2 %926 }
 0x1ee   :  { %v7026_v46 = vpop.f32.mrf.mxu3  ;;  %10396 = vst [vmem:[#allocation60_spill] sm:$0xff] %v7037_v14 }
 0x1ef   :  { %v1014_v30 = vadd.f32 %v6902_v37, %v978_v40 }
 0x1f1   :  { %v1046_v28 = vmax.f32 %v1014_v30, 0.0 }
 0x1f3   :  { %5688 = vmatmul.msk.f32.gmra.mxu3 %vm1058_vm1, %v1046_v28 }
 0x1f4   :  { %v773_v2 = vpop.f32.mrf.mxu2 }
 0x1f5   :  { %v979_v6 = vmul.f32 %v7030_v11, %v773_v2  ;;  %v1271_v2 = vld [vmem:[%s10083_s6 + $0x18] sm:$0xff] }
 0x1f6   :  { %v7033_v54 = vpop.f32.mrf.mxu3  ;;  %1380 = vmatpush.msrb.mxu2 %v1271_v2  ;;  %v1268_v2 = vld [vmem:[%s10083_s6] sm:$0xff] }
 0x1f7   :  { %v1015_v0 = vadd.f32 %v6902_v37, %v979_v6  ;;  %v7047_v6 = vpop.permute.xlu0 %931 }
 0x1f8   :  { %10397 = vst [vmem:[#allocation61_spill] sm:$0xff] %v7047_v6 }
 0x1f9   :  { %v1047_v43 = vmax.f32 %v1015_v0, 0.0 }
 0x1fb   :  { %5689 = vmatmul.msk.f32.gmra.mxu3 %vm1058_vm1, %v1047_v43 }
 0x1fc   :  { %v776_v3 = vpop.f32.mrf.mxu2 }
 0x1fd   :  { %v980_v40 = vmul.f32 %v7037_v14, %v776_v3  ;;  %v1270_v3 = vld [vmem:[%s10083_s6 + $0x10] sm:$0xff] }
 0x1fe   :  { %v7040_v30 = vpop.f32.mrf.mxu3  ;;  %1381 = vmatpush.msrb.mxu2 %v1270_v3 }
 0x1ff   :  { %v1016_v28 = vadd.f32 %v6902_v37, %v980_v40 }
 0x201   :  { %v1048_v17 = vmax.f32 %v1016_v28, 0.0 }
 0x203   :  { %5690 = vmatmul.msk.f32.gmra.mxu3 %vm1058_vm1, %v1048_v17  ;;  %v1269_v17 = vld [vmem:[%s10083_s6 + $0x8] sm:$0xff]  ;;  %s6310_s6 = smov 127  }
 0x204   :  { %v779_v0 = vpop.f32.mrf.mxu2  ;;  %1382 = vmatpush.msrb.mxu2 %v1269_v17 }
 0x205   :  { %v981_v43 = vmul.f32 %v7047_v6, %v779_v0  ;;  %v7063_v0 = vpop.permute.xlu1 %936 }
 0x206   :  { %v7053_v29 = vpop.f32.mrf.mxu3  ;;  %1383 = vmatpush.msrb.mxu2 %v1268_v2  ;;  %10398 = vst [vmem:[#allocation62_spill] sm:$0xff] %v7063_v0 }
 0x207   :  { %v1017_v40 = vadd.f32 %v6902_v37, %v981_v43 }
 0x209   :  { %v1049_v28 = vmax.f32 %v1017_v40, 0.0  ;;  %v7070_v40 = vpop.permute.xlu2 %941 }
 0x20a   :  { %10399 = vst [vmem:[#allocation63_spill] sm:$0xff] %v7070_v40 }
 0x20b   :  { %5691 = vmatmul.msk.f32.gmra.mxu3 %vm1058_vm1, %v1049_v28 }
 0x20c   :  { %v782_v5 = vpop.f32.mrf.mxu2 }
 0x20d   :  { %v982_v3 = vmul.f32 %v7063_v0, %v782_v5  ;;  %v7077_v5 = vpop.permute.xlu0 %946  ;;  %v7082_v39 = vpop.permute.xlu1 %951 }
 0x20e   :  { %v7066_v60 = vpop.f32.mrf.mxu3  ;;  %10400 = vst [vmem:[#allocation64_spill] sm:$0xff] %v7077_v5 }
 0x20f   :  { %v1018_v43 = vadd.f32 %v6902_v37, %v982_v3  ;;  %10401 = vst [vmem:[#allocation65_spill] sm:$0xff] %v7082_v39 }
 0x211   :  { %v1050_v63 = vmax.f32 %v1018_v43, 0.0 }
 0x213   :  { %5692 = vmatmul.msk.f32.gmra.mxu3 %vm1058_vm1, %v1050_v63 }
 0x214   :  { %v785_v17 = vpop.f32.mrf.mxu2 }
 0x215   :  { %v983_v25 = vmul.f32 %v7070_v40, %v785_v17 }
 0x216   :  { %v7073_v2 = vpop.f32.mrf.mxu3 }
 0x217   :  { %v1019_v28 = vadd.f32 %v6902_v37, %v983_v25 }
 0x219   :  { %v1051_v57 = vmax.f32 %v1019_v28, 0.0 }
 0x21b   :  { %5693 = vmatmul.msk.f32.gmra.mxu3 %vm1058_vm1, %v1051_v57 }
 0x21c   :  { %v788_v51 = vpop.f32.mrf.mxu2 }
 0x21d   :  { %v984_v3 = vmul.f32 %v7077_v5, %v788_v51 }
 0x21e   :  { %v1211_v43 = vpop.f32.mrf.mxu3 }
 0x21f   :  { %v1020_v63 = vadd.f32 %v6902_v37, %v984_v3 }
 0x221   :  { %v1052_v45 = vmax.f32 %v1020_v63, 0.0 }
 0x223   :  { %5694 = vmatmul.msk.f32.gmra.mxu3 %vm1058_vm1, %v1052_v45  ;;  %v1679_v45 = vpack.c.bf16 %v1211_v43, %v7073_v2 }
 0x224   :  { %v791_v17 = vpop.f32.mrf.mxu2 }
 0x225   :  { %v985_v33 = vmul.f32 %v7082_v39, %v791_v17  ;;  %v1677_v17 = vpack.c.bf16 %v7040_v30, %v7033_v54 }
 0x226   :  { %v1214_v25 = vpop.f32.mrf.mxu3 }
 0x227   :  { %v1021_v28 = vadd.f32 %v6902_v37, %v985_v33  ;;  %v1678_v33 = vpack.c.bf16 %v7066_v60, %v7053_v29 }
 0x229   :  { %v1053_v57 = vmax.f32 %v1021_v28, 0.0  ;;  %v1676_v28 = vpack.c.bf16 %v7026_v46, %v7019_v61 }
 0x22a   :  { %v1172_v27 = vpop.f32.mrf.mxu1 }
 0x22b   :  { %5696 = vmatmul.msk.f32.vlgmr.msrb.gmra.mxu2 %vm1058_vm1, %v1172_v27  ;;  %5695 = vmatmul.msk.f32.gmra.mxu3 %vm1058_vm1, %v1053_v57 }
 0x22e   :  { %v1217_v51 = vpop.f32.mrf.mxu3 }
 0x22f   :  { %v1680_v21 = vpack.c.bf16 %v1217_v51, %v1214_v25 }
 0x231   :  { %2655 = vmatpush.bf16.msrb.mxu3 %v1680_v21 }
 0x232   :  { %v1175_v3 = vpop.f32.mrf.mxu1 }
 0x233   :  { %5697 = vmatmul.msk.f32.gmra.mxu2 %vm1058_vm1, %v1175_v3 }
 0x235   :  { %2656 = vmatpush.bf16.msrb.mxu3 %v1679_v45 }
 0x236   :  { %v7090_v63 = vpop.f32.mrf.mxu3 }
 0x239   :  { %2657 = vmatpush.bf16.msrb.mxu3 %v1678_v33 }
 0x23a   :  { %v1178_v37 = vpop.f32.mrf.mxu1 }
 0x23b   :  { %5698 = vmatmul.msk.f32.gmra.mxu2 %vm1058_vm1, %v1178_v37 }
 0x23d   :  { %2658 = vmatpush.bf16.msrb.mxu3 %v1677_v17 }
 0x23e   :  { %v7097_v21 = vpop.f32.mrf.mxu3 }
 0x241   :  { %2659 = vmatpush.bf16.msrb.mxu3 %v1676_v28  ;;  %v1673_v28 = vpack.c.bf16 %v1175_v3, %v1172_v27 }
 0x242   :  { %v1181_v57 = vpop.f32.mrf.mxu1 }
 0x243   :  { %5699 = vmatmul.msk.f32.gmra.mxu2 %vm1058_vm1, %v1181_v57  ;;  %v1674_v48 = vpack.c.bf16 %v1181_v57, %v1178_v37 }
 0x246   :  { %v7102_v45 = vpop.f32.mrf.mxu3 }
 0x24a   :  { %v1184_v55 = vpop.f32.mrf.mxu1 }
 0x24b   :  { %5700 = vmatmul.msk.f32.gmra.mxu2 %vm1058_vm1, %v1184_v55 }
 0x24e   :  { %v1229_v33 = vpop.f32.mrf.mxu3 }
 0x252   :  { %v1187_v7 = vpop.f32.mrf.mxu1 }
 0x253   :  { %5701 = vmatmul.msk.f32.gmra.mxu2 %vm1058_vm1, %v1187_v7  ;;  %v1675_v47 = vpack.c.bf16 %v1187_v7, %v1184_v55 }
 0x255   :  { %2660 = vmatpush.bf16.msrb.mxu3 %v1675_v47 }
 0x256   :  { %v1232_v17 = vpop.f32.mrf.mxu3 }
 0x259   :  { %2661 = vmatpush.bf16.msrb.mxu3 %v1674_v48 }
 0x25b   :  { %5702 = vmatmul.msk.f32.gmra.mxu2 %vm1058_vm1, %v7019_v61 }
 0x25d   :  { %2662 = vmatpush.bf16.msrb.mxu3 %v1673_v28  ;;  %v1682_v28 = vpack.c.bf16 %v1229_v33, %v7102_v45 }
 0x25e   :  { %v1235_v10 = vpop.f32.mrf.mxu3 }
 0x25f   :  { %v1683_v37 = vpack.c.bf16 %v1235_v10, %v1232_v17 }
 0x263   :  { %5703 = vmatmul.msk.f32.gmra.mxu2 %vm1058_vm1, %v7026_v46 }
 0x266   :  { %v1238_v58 = vpop.f32.mrf.mxu3 }
 0x26b   :  { %5704 = vmatmul.msk.f32.gmra.mxu2 %vm1058_vm1, %v7033_v54 }
 0x26e   :  { %v1241_v15 = vpop.f32.mrf.mxu3 }
 0x26f   :  { %v1684_v3 = vpack.c.bf16 %v1241_v15, %v1238_v58 }
 0x273   :  { %5705 = vmatmul.msk.f32.gmra.mxu2 %vm1058_vm1, %v7040_v30 }
 0x276   :  { %v1244_v55 = vpop.f32.mrf.mxu3 }
 0x27b   :  { %5706 = vmatmul.msk.f32.gmra.mxu2 %vm1058_vm1, %v7053_v29 }
 0x27e   :  { %v7116_v7 = vpop.f32.mrf.mxu3 }
 0x283   :  { %5707 = vmatmul.msk.f32.gmra.mxu2 %vm1058_vm1, %v7066_v60 }
 0x286   :  { %v7120_v27 = vpop.f32.mrf.mxu3 }
 0x28b   :  { %5708 = vmatmul.msk.f32.gmra.mxu2 %vm1058_vm1, %v7073_v2 }
 0x28e   :  { %v7124_v61 = vpop.f32.mrf.mxu3 }
 0x293   :  { %5709 = vmatmul.msk.f32.gmra.mxu2 %vm1058_vm1, %v1211_v43  ;;  %v1686_v43 = vpack.c.bf16 %v7124_v61, %v7120_v27 }
 0x296   :  { %v7127_v47 = vpop.f32.mrf.mxu3 }
 0x29b   :  { %5710 = vmatmul.msk.f32.gmra.mxu2 %vm1058_vm1, %v1214_v25  ;;  %v1685_v25 = vpack.c.bf16 %v7116_v7, %v1244_v55 }
 0x29e   :  { %v7130_v48 = vpop.f32.mrf.mxu3 }
 0x29f   :  { %v1687_v30 = vpack.c.bf16 %v7130_v48, %v7127_v47 }
 0x2a3   :  { %5711 = vmatmul.msk.f32.gmra.mxu2 %vm1058_vm1, %v1217_v51 }
 0x2a6   :  { %v7133_v29 = vpop.f32.mrf.mxu3 }
 0x2ab   :  { %5712 = vmatmul.msk.f32.gmra.mxu2 %vm1058_vm1, %v7090_v63 }
 0x2ae   :  { %v1385_v60 = vpop.f32.mrf.mxu2  ;;  %v7137_v46 = vpop.f32.mrf.mxu3 }
 0x2af   :  { %1691 = vperm.xlu1 %5917, %v1385_v60   ;;  %1513 = vrot.lane.b32.xlu2 %v1385_v60, %s6310_s6  ;;  %v1688_v54 = vpack.c.bf16 %v7137_v46, %v7133_v29  ;;  %v1681_v60 = vpack.c.bf16 %v7097_v21, %v7090_v63 }
 0x2b1   :  { %2744 = vmatpush.bf16.msrb.mxu0 %v1688_v54 }
 0x2b3   :  { %5713 = vmatmul.msk.f32.gmra.mxu2 %vm1058_vm1, %v7097_v21 }
 0x2b5   :  { %2745 = vmatpush.bf16.msrb.mxu0 %v1687_v30 }
 0x2b6   :  { %v1388_v2 = vpop.f32.mrf.mxu2 }
 0x2b7   :  { %1695 = vperm.xlu2 %5918, %v1388_v2   ;;  %1515 = vrot.lane.b32.xlu1 %v1388_v2, %s6310_s6 }
 0x2b9   :  { %2746 = vmatpush.bf16.msrb.mxu0 %v1686_v43 }
 0x2bb   :  { %5714 = vmatmul.msk.f32.gmra.mxu2 %vm1058_vm1, %v7102_v45 }
 0x2bd   :  { %2747 = vmatpush.bf16.msrb.mxu0 %v1685_v25 }
 0x2be   :  { %v1391_v51 = vpop.f32.mrf.mxu2 }
 0x2bf   :  { %1517 = vrot.lane.b32.xlu0 %v1391_v51, %s6310_s6 }
 0x2c1   :  { %2748 = vmatpush.bf16.msrb.mxu0 %v1684_v3 }
 0x2c3   :  { %5715 = vmatmul.msk.f32.gmra.mxu2 %vm1058_vm1, %v1229_v33 }
 0x2c5   :  { %2749 = vmatpush.bf16.msrb.mxu0 %v1683_v37 }
 0x2c6   :  { %v1394_v57 = vpop.f32.mrf.mxu2 }
 0x2c7   :  { %1699 = vperm.xlu0 %5916, %v1391_v51   ;;  %1703 = vperm.xlu1 %5917, %v1394_v57  }
 0x2c8   :  { %1519 = vrot.lane.b32.xlu2 %v1394_v57, %s6310_s6 }
 0x2c9   :  { %2750 = vmatpush.bf16.msrb.mxu0 %v1682_v28 }
 0x2cb   :  { %5716 = vmatmul.msk.f32.gmra.mxu2 %vm1058_vm1, %v1232_v17 }
 0x2cd   :  { %2751 = vmatpush.bf16.msrb.mxu0 %v1681_v60 }
 0x2ce   :  { %v1397_v54 = vpop.f32.mrf.mxu2 }
 0x2cf   :  { %1521 = vrot.lane.b32.xlu1 %v1397_v54, %s6310_s6 }
 0x2d3   :  { %5717 = vmatmul.msk.f32.gmra.mxu2 %vm1058_vm1, %v1235_v10 }
 0x2d6   :  { %v1400_v30 = vpop.f32.mrf.mxu2 }
 0x2d7   :  { %1707 = vperm.xlu1 %5917, %v1397_v54   ;;  %1523 = vrot.lane.b32.xlu0 %v1400_v30, %s6310_s6 }
 0x2db   :  { %5718 = vmatmul.msk.f32.gmra.mxu2 %vm1058_vm1, %v1238_v58 }
 0x2de   :  { %v1403_v2 = vpop.f32.mrf.mxu2 }
 0x2df   :  { %1711 = vperm.xlu1 %5917, %v1400_v30   ;;  %1525 = vrot.lane.b32.xlu2 %v1403_v2, %s6310_s6 }
 0x2e3   :  { %5719 = vmatmul.msk.f32.gmra.mxu2 %vm1058_vm1, %v1241_v15 }
 0x2e6   :  { %v1406_v45 = vpop.f32.mrf.mxu2 }
 0x2e7   :  { %1715 = vperm.xlu1 %5917, %v1403_v2  }
 0x2eb   :  { %5720 = vmatmul.msk.f32.gmra.mxu2 %vm1058_vm1, %v1244_v55 }
 0x2ee   :  { %v1409_v63 = vpop.f32.mrf.mxu2 }
 0x2ef   :  { %1527 = vrot.lane.b32.xlu1 %v1406_v45, %s6310_s6  ;;  %1529 = vrot.lane.b32.xlu0 %v1409_v63, %s6310_s6 }
 0x2f3   :  { %5721 = vmatmul.msk.f32.gmra.mxu2 %vm1058_vm1, %v7116_v7 }
 0x2f6   :  { %v1412_v10 = vpop.f32.mrf.mxu2 }
 0x2f7   :  { %1719 = vperm.xlu1 %5917, %v1406_v45   ;;  %1531 = vrot.lane.b32.xlu2 %v1412_v10, %s6310_s6 }
 0x2fb   :  { %5722 = vmatmul.msk.f32.gmra.mxu2 %vm1058_vm1, %v7120_v27 }
 0x2fe   :  { %v1415_v58 = vpop.f32.mrf.mxu2 }
 0x2ff   :  { %1723 = vperm.xlu1 %5917, %v1409_v63   ;;  %1727 = vperm.xlu2 %5918, %v1412_v10  }
 0x303   :  { %5723 = vmatmul.msk.f32.gmra.mxu2 %vm1058_vm1, %v7124_v61 }
 0x306   :  { %v1418_v15 = vpop.f32.mrf.mxu2 }
 0x307   :  { %1533 = vrot.lane.b32.xlu1 %v1415_v58, %s6310_s6  ;;  %1535 = vrot.lane.b32.xlu0 %v1418_v15, %s6310_s6 }
 0x309   :  { %v1514_v30 = vpop.permute.xlu2 %1513 }
 0x30b   :  { %5724 = vmatmul.msk.f32.gmra.mxu2 %vm1058_vm1, %v7127_v47 }
 0x30e   :  { %v1421_v21 = vpop.f32.mrf.mxu2 }
 0x30f   :  { %1731 = vperm.xlu1 %5917, %v1415_v58   ;;  %1739 = vperm.xlu0 %5916, %v1421_v21  }
 0x310   :  { %1537 = vrot.lane.b32.xlu2 %v1421_v21, %s6310_s6 }
 0x311   :  { %v7216_v10 = vpop.permute.xlu2 %1695 }
 0x313   :  { %5725 = vmatmul.msk.f32.gmra.mxu2 %vm1058_vm1, %v7130_v48 }
 0x316   :  { %v1424_v33 = vpop.f32.mrf.mxu2 }
 0x317   :  { %1735 = vperm.xlu1 %5917, %v1418_v15   ;;  %1743 = vperm.xlu0 %5916, %v1424_v33  }
 0x31b   :  { %5726 = vmatmul.msk.f32.gmra.mxu2 %vm1058_vm1, %v7133_v29 }
 0x31e   :  { %v1427_v17 = vpop.f32.mrf.mxu2 }
 0x31f   :  { %1539 = vrot.lane.b32.xlu1 %v1424_v33, %s6310_s6  ;;  %1747 = vperm.xlu2 %5918, %v1427_v17  }
 0x320   :  { %1541 = vrot.lane.b32.xlu0 %v1427_v17, %s6310_s6 }
 0x321   :  { %v7192_v47 = vpop.permute.xlu1 %1691 }
 0x322   :  { %v1520_v33 = vpop.permute.xlu2 %1519 }
 0x323   :  { %5727 = vmatmul.msk.f32.gmra.mxu2 %vm1058_vm1, %v7137_v46 }
 0x326   :  { %v1430_v55 = vpop.f32.mrf.mxu2 }
 0x327   :  { %1751 = vperm.xlu1 %5917, %v1430_v55   ;;  %1543 = vrot.lane.b32.xlu2 %v1430_v55, %s6310_s6 }
 0x329   :  { %v1516_v46 = vpop.permute.xlu1 %1515 }
 0x32e   :  { %v1433_v7 = vpop.f32.mrf.mxu2 }
 0x32f   :  { %1545 = vrot.lane.b32.xlu0 %v1433_v7, %s6310_s6 }
 0x331   :  { %v1518_v45 = vpop.permute.xlu0 %1517 }
 0x336   :  { %v1436_v27 = vpop.f32.mrf.mxu2 }
 0x337   :  { %1755 = vperm.xlu0 %5916, %v1433_v7   ;;  %1547 = vrot.lane.b32.xlu2 %v1436_v27, %s6310_s6 }
 0x339   :  { %v7197_v25 = vpop.permute.xlu1 %1703  ;;  %v7222_v15 = vpop.permute.xlu0 %1699 }
 0x33e   :  { %v1439_v61 = vpop.f32.mrf.mxu2 }
 0x33f   :  { %1759 = vperm.xlu2 %5918, %v1436_v27   ;;  %1549 = vrot.lane.b32.xlu1 %v1439_v61, %s6310_s6  ;;  %v1526_v27 = vpop.permute.xlu2 %1525 }
 0x341   :  { %v1522_v3 = vpop.permute.xlu1 %1521 }
 0x346   :  { %v1442_v48 = vpop.f32.mrf.mxu2 }
 0x347   :  { %1763 = vperm.xlu2 %5918, %v1439_v61   ;;  %1767 = vperm.xlu1 %5917, %v1442_v48  }
 0x348   :  { %1551 = vrot.lane.b32.xlu0 %v1442_v48, %s6310_s6 }
 0x349   :  { %v7201_v57 = vpop.permute.xlu1 %1707  ;;  %v1524_v55 = vpop.permute.xlu0 %1523 }
 0x34e   :  { %v1445_v29 = vpop.f32.mrf.mxu2 }
 0x34f   :  { %1553 = vrot.lane.b32.xlu2 %v1445_v29, %s6310_s6 }
 0x350   :  { %1771 = vperm.xlu0 %5916, %v1445_v29  }
 0x351   :  { %v7204_v60 = vpop.permute.xlu1 %1711  ;;  %v1532_v29 = vpop.permute.xlu2 %1531 }
 0x356   :  { %v1448_v43 = vpop.f32.mrf.mxu2 }
 0x357   :  { %1775 = vperm.xlu2 %5918, %v1448_v43   ;;  %1555 = vrot.lane.b32.xlu1 %v1448_v43, %s6310_s6 }
 0x359   :  { %v7214_v63 = vpop.permute.xlu1 %1715  ;;  %v7244_v8 = vpop.permute.xlu2 %1727 }
 0x35e   :  { %v1451_v51 = vpop.f32.mrf.mxu2 }
 0x35f   :  { %1557 = vrot.lane.b32.xlu0 %v1451_v51, %s6310_s6 }
 0x361   :  { %v1528_v21 = vpop.permute.xlu1 %1527  ;;  %v1530_v48 = vpop.permute.xlu0 %1529 }
 0x366   :  { %v1454_v37 = vpop.f32.mrf.mxu2 }
 0x367   :  { %1783 = vperm.xlu0 %5916, %v1454_v37   ;;  %1559 = vrot.lane.b32.xlu2 %v1454_v37, %s6310_s6 }
 0x369   :  { %v7228_v7 = vpop.permute.xlu1 %1719 }
 0x36a   :  { %v1538_v14 = vpop.permute.xlu2 %1537 }
 0x36e   :  { %v1457_v28 = vpop.f32.mrf.mxu2 }
 0x36f   :  { %1787 = vperm.xlu2 %5918, %v1457_v28   ;;  %1561 = vrot.lane.b32.xlu1 %v1457_v28, %s6310_s6 }
 0x371   :  { %v7234_v43 = vpop.permute.xlu1 %1723 }
 0x376   :  { %v7206_v54 = vpop.f32.mrf.mxu2 }
 0x377   :  { %1779 = vperm.xlu1 %5917, %v1451_v51   ;;  %1563 = vrot.lane.b32.xlu0 %v7206_v54, %s6310_s6 }
 0x379   :  { %v1536_v37 = vpop.permute.xlu0 %1535  ;;  %v1534_v13 = vpop.permute.xlu1 %1533 }
 0x37a   :  { %v7252_v40 = vpop.permute.xlu2 %1747 }
 0x37e   :  { %v7210_v2 = vpop.f32.mrf.mxu2 }
 0x37f   :  { %1565 = vrot.lane.b32.xlu2 %v7210_v2, %s6310_s6 }
 0x381   :  { %v7246_v11 = vpop.permute.xlu0 %1739  ;;  %v7248_v6 = vpop.permute.xlu1 %1731 }
 0x382   :  { %v1544_v1 = vpop.permute.xlu2 %1543 }
 0x386   :  { %v7218_v58 = vpop.f32.mrf.mxu2 }
 0x387   :  { %1567 = vrot.lane.b32.xlu1 %v7218_v58, %s6310_s6 }
 0x389   :  { %v7250_v0 = vpop.permute.xlu0 %1743  ;;  %v7254_v39 = vpop.permute.xlu1 %1735 }
 0x38e   :  { %v7224_v17 = vpop.f32.mrf.mxu2 }
 0x38f   :  { %1569 = vrot.lane.b32.xlu0 %v7224_v17, %s6310_s6 }
 0x391   :  { %v1540_v42 = vpop.permute.xlu1 %1539  ;;  %v1548_v4 = vpop.permute.xlu2 %1547 }
 0x392   :  { %v1542_v5 = vpop.permute.xlu0 %1541 }
 0x396   :  { %v7230_v61 = vpop.f32.mrf.mxu2 }
 0x397   :  { %10402 = vst [vmem:[#allocation66_spill] sm:$0xff] %v7230_v61  ;;  %1571 = vrot.lane.b32.xlu2 %v7230_v61, %s6310_s6 }
 0x399   :  { %v7256_v62 = vpop.permute.xlu1 %1751  ;;  %v7258_v56 = vpop.permute.xlu2 %1759 }
 0x39e   :  { %v7236_v51 = vpop.f32.mrf.mxu2 }
 0x39f   :  { %1573 = vrot.lane.b32.xlu1 %v7236_v51, %s6310_s6 }
 0x3a1   :  { %v1546_v16 = vpop.permute.xlu0 %1545 }
 0x3a6   :  { %v7240_v28 = vpop.f32.mrf.mxu2 }
 0x3a7   :  { %1575 = vrot.lane.b32.xlu0 %v7240_v28, %s6310_s6 }
 0x3a9   :  { %v7260_v50 = vpop.permute.xlu0 %1755 }
 0x3b1   :  { %v1550_v44 = vpop.permute.xlu1 %1549 }
 0x3ba   :  { %v1552_v38 = vpop.permute.xlu0 %1551 }
 0x3bd   :  { %1609 = vxpose.xlu2.b32.start [1/16] (narrow) %v1514_v30, 8  ;;  %v7262_v30 = vpop.permute.xlu2 %1763 }
 0x3c5   :  { %1610 = vxpose.xlu2.b32.cont [2/16] (narrow) %v1516_v46, 8  ;;  %v1554_v46 = vpop.permute.xlu2 %1553 }
 0x3c9   :  { %1641 = vxpose.xlu0.b32.start [1/16] (narrow) %v1546_v16, 8  ;;  %v7264_v16 = vpop.permute.xlu1 %1767 }
 0x3cd   :  { %1611 = vxpose.xlu2.b32.cont [3/16] (narrow) %v1518_v45, 8  ;;  %v7266_v45 = vpop.permute.xlu0 %1771 }
 0x3d1   :  { %1642 = vxpose.xlu0.b32.cont [2/16] (narrow) %v1548_v4, 8  ;;  %v1556_v4 = vpop.permute.xlu1 %1555 }
 0x3d5   :  { %1612 = vxpose.xlu2.b32.cont [4/16] (narrow) %v1520_v33, 8  ;;  %v7268_v33 = vpop.permute.xlu2 %1775  ;;  %v1558_v32 = vpop.permute.xlu0 %1557 }
 0x3d9   :  { %1643 = vxpose.xlu0.b32.cont [3/16] (narrow) %v1550_v44, 8 }
 0x3dd   :  { %1613 = vxpose.xlu2.b32.cont [5/16] (narrow) %v1522_v3, 8  ;;  %v1560_v44 = vpop.permute.xlu2 %1559 }
 0x3e1   :  { %1644 = vxpose.xlu0.b32.cont [4/16] (narrow) %v1552_v38, 8  ;;  %v7270_v38 = vpop.permute.xlu0 %1783  ;;  %v1562_v3 = vpop.permute.xlu1 %1561 }
 0x3e5   :  { %1614 = vxpose.xlu2.b32.cont [6/16] (narrow) %v1524_v55, 8  ;;  %v7272_v55 = vpop.permute.xlu2 %1787 }
 0x3e9   :  { %1645 = vxpose.xlu0.b32.cont [5/16] (narrow) %v1554_v46, 8 }
 0x3ed   :  { %1615 = vxpose.xlu2.b32.cont [7/16] (narrow) %v1526_v27, 8  ;;  %v1564_v27 = vpop.permute.xlu0 %1563  ;;  %v1566_v46 = vpop.permute.xlu2 %1565 }
 0x3f1   :  { %1646 = vxpose.xlu0.b32.cont [6/16] (narrow) %v1556_v4, 8 }
 0x3f5   :  { %1616 = vxpose.xlu2.b32.cont [8/16] (narrow) %v1528_v21, 8  ;;  %v7274_v21 = vpop.permute.xlu1 %1779 }
 0x3f9   :  { %1647 = vxpose.xlu0.b32.cont [7/16] (narrow) %v1558_v32, 8 }
 0x3fd   :  { %1617 = vxpose.xlu2.b32.cont [9/16] (narrow) %v1530_v48, 8  ;;  %v1568_v32 = vpop.permute.xlu1 %1567 }
 0x401   :  { %1648 = vxpose.xlu0.b32.cont [8/16] (narrow) %v1560_v44, 8  ;;  %v1570_v48 = vpop.permute.xlu0 %1569 }
 0x405   :  { %1618 = vxpose.xlu2.b32.cont [10/16] (narrow) %v1532_v29, 8  ;;  %v1572_v29 = vpop.permute.xlu2 %1571 }
 0x409   :  { %1649 = vxpose.xlu0.b32.cont [9/16] (narrow) %v1562_v3, 8 }
 0x40d   :  { %1619 = vxpose.xlu2.b32.cont [11/16] (narrow) %v1534_v13, 8 }
 0x411   :  { %1650 = vxpose.xlu0.b32.cont [10/16] (narrow) %v1564_v27, 8  ;;  %v1574_v13 = vpop.permute.xlu1 %1573 }
 0x415   :  { %1620 = vxpose.xlu2.b32.cont [12/16] (narrow) %v1536_v37, 8 }
 0x419   :  { %1651 = vxpose.xlu0.b32.cont [11/16] (narrow) %v1566_v46, 8  ;;  %v1576_v4 = vpop.permute.xlu0 %1575 }
 0x41d   :  { %1621 = vxpose.xlu2.b32.cont [13/16] (narrow) %v1538_v14, 8 }
 0x421   :  { %1652 = vxpose.xlu0.b32.cont [12/16] (narrow) %v1568_v32, 8 }
 0x425   :  { %1622 = vxpose.xlu2.b32.cont [14/16] (narrow) %v1540_v42, 8 }
 0x429   :  { %1653 = vxpose.xlu0.b32.cont [13/16] (narrow) %v1570_v48, 8 }
 0x42d   :  { %1623 = vxpose.xlu2.b32.cont [15/16] (narrow) %v1542_v5, 8 }
 0x431   :  { %1654 = vxpose.xlu0.b32.cont [14/16] (narrow) %v1572_v29, 8 }
 0x435   :  { %1624 = vxpose.xlu2.b32.end [16/16] (narrow) %v1544_v1, 8 }
 0x439   :  { %1655 = vxpose.xlu0.b32.cont [15/16] (narrow) %v1574_v13, 8 }
 0x441   :  { %1656 = vxpose.xlu0.b32.end [16/16] (narrow) %v1576_v4, 8 }
 0x456   :  { %v1625_v44 = vpop.trf.xlu2 }
 0x457   :  { %v7276_v37 = vperm.slane %v1625_v44, 0 }
 0x459   :  { %v1820_v14 = vadd.f32 %v7276_v37, %v7192_v47  ;;  %v1822_v32 = vadd.f32 %v7276_v37, %v7216_v10  ;;  %v1824_v26 = vadd.f32 %v7276_v37, %v7222_v15 }
 0x45b   :  { %v1884_v5 = vmul.f32 0.2, %v1820_v14  ;;  %v1886_v44 = vmul.f32 0.2, %v1822_v32 }
 0x45d   :  { %v7288_v48 = vmax.f32 %v1820_v14, %v1884_v5  ;;  %v7300_v20 = vmax.f32 %v1822_v32, %v1886_v44 }
 0x46d   :  { %v1657_v3 = vpop.trf.xlu0 }
 0x46e   :  { %v7278_v27 = vperm.slane %v1657_v3, 0 }
 0x470   :  { %v1821_v42 = vadd.f32 %v7278_v27, %v7192_v47  ;;  %v1823_v1 = vadd.f32 %v7278_v27, %v7216_v10  ;;  %v1825_v47 = vadd.f32 %v7278_v27, %v7222_v15  ;;  %v1827_v5 = vadd.f32 %v7278_v27, %v7197_v25 }
 0x471   :  { %v1831_v44 = vadd.f32 %v7278_v27, %v7204_v60 }
 0x472   :  { %v1885_v46 = vmul.f32 0.2, %v1821_v42  ;;  %v1887_v4 = vmul.f32 0.2, %v1823_v1  ;;  %v1889_v14 = vmul.f32 0.2, %v1825_v47 }
 0x473   :  { %v1891_v32 = vmul.f32 0.2, %v1827_v5 }
 0x474   :  { %v7290_v29 = vmax.f32 %v1821_v42, %v1885_v46  ;;  %v7296_v3 = vmax.f32 %v1823_v1, %v1887_v4  ;;  %v1888_v42 = vmul.f32 0.2, %v1824_v26  ;;  %v7306_v46 = vmax.f32 %v1825_v47, %v1889_v14 }
 0x475   :  { %v1826_v1 = vadd.f32 %v7276_v37, %v7197_v25  ;;  %v1830_v47 = vadd.f32 %v7276_v37, %v7204_v60  ;;  %v1895_v25 = vmul.f32 0.2, %v1831_v44 }
 0x476   :  { %v2012_v13 = vmax.f32 %v7288_v48, %v7290_v29  ;;  %v2015_v10 = vmax.f32 %v7300_v20, %v7296_v3 }
 0x477   :  { %v1890_v4 = vmul.f32 0.2, %v1826_v1  ;;  %v7326_v12 = vmax.f32 %v1831_v44, %v1895_v25  ;;  %v1839_v44 = vadd.f32 %v7278_v27, %v7244_v8 }
 0x478   :  { %2013 = vmax.xlane.f32.xlu1 %v2012_v13  ;;  %v7310_v13 = vmax.f32 %v1824_v26, %v1888_v42  ;;  %v1894_v42 = vmul.f32 0.2, %v1830_v47 }
 0x479   :  { %v7320_v14 = vmax.f32 %v1826_v1, %v1890_v4  ;;  %v1834_v1 = vadd.f32 %v7276_v37, %v7228_v7 }
 0x47a   :  { %v2018_v15 = vmax.f32 %v7310_v13, %v7306_v46  ;;  %v7332_v60 = vmax.f32 %v1830_v47, %v1894_v42  ;;  %v1838_v47 = vadd.f32 %v7276_v37, %v7244_v8  ;;  %v1837_v42 = vadd.f32 %v7278_v27, %v7234_v43 }
 0x47c   :  { %v2027_v4 = vmax.f32 %v7332_v60, %v7326_v12 }
 0x480   :  { %2016 = vmax.xlane.f32.xlu1 %v2015_v10  ;;  %v7316_v10 = vmax.f32 %v1827_v5, %v1891_v32  ;;  %v1832_v5 = vadd.f32 %v7276_v37, %v7214_v63  ;;  %v1835_v32 = vadd.f32 %v7278_v27, %v7228_v7 }
 0x482   :  { %v2021_v26 = vmax.f32 %v7320_v14, %v7316_v10  ;;  %v1896_v19 = vmul.f32 0.2, %v1832_v5  ;;  %v1899_v18 = vmul.f32 0.2, %v1835_v32 }
 0x484   :  { %v7346_v7 = vmax.f32 %v1832_v5, %v1896_v19  ;;  %v7348_v35 = vmax.f32 %v1835_v32, %v1899_v18  ;;  %v1902_v19 = vmul.f32 0.2, %v1838_v47  ;;  %v1901_v5 = vmul.f32 0.2, %v1837_v42 }
 0x485   :  { %v1828_v18 = vadd.f32 %v7276_v37, %v7201_v57 }
 0x486   :  { %v7370_v36 = vmax.f32 %v1838_v47, %v1902_v19  ;;  %v7372_v52 = vmax.f32 %v1837_v42, %v1901_v5 }
 0x487   :  { %v1892_v24 = vmul.f32 0.2, %v1828_v18 }
 0x488   :  { %2019 = vmax.xlane.f32.xlu1 %v2018_v15  ;;  %v1833_v15 = vadd.f32 %v7278_v27, %v7214_v63  ;;  %v1898_v63 = vmul.f32 0.2, %v1834_v1 }
 0x48a   :  { %v7354_v49 = vmax.f32 %v1834_v1, %v1898_v63  ;;  %v1844_v63 = vadd.f32 %v7276_v37, %v7246_v11 }
 0x48c   :  { %v2033_v8 = vmax.f32 %v7354_v49, %v7348_v35  ;;  %v1908_v53 = vmul.f32 0.2, %v1844_v63 }
 0x48e   :  { %v7396_v41 = vmax.f32 %v1844_v63, %v1908_v53 }
 0x490   :  { %2022 = vmax.xlane.f32.xlu1 %v2021_v26  ;;  %v1897_v26 = vmul.f32 0.2, %v1833_v15 }
 0x492   :  { %v7340_v25 = vmax.f32 %v1833_v15, %v1897_v26  ;;  %v1903_v15 = vmul.f32 0.2, %v1839_v44  ;;  %v1829_v26 = vadd.f32 %v7278_v27, %v7201_v57  ;;  %v1852_v57 = vadd.f32 %v7276_v37, %v7260_v50 }
 0x494   :  { %v2030_v34 = vmax.f32 %v7346_v7, %v7340_v25  ;;  %v7364_v32 = vmax.f32 %v1839_v44, %v1903_v15  ;;  %v1893_v9 = vmul.f32 0.2, %v1829_v26  ;;  %v1916_v31 = vmul.f32 0.2, %v1852_v57 }
 0x496   :  { %v7384_v42 = vmax.f32 %v1829_v26, %v1893_v9  ;;  %v1859_v9 = vadd.f32 %v7278_v27, %v7264_v16 }
 0x498   :  { %2028 = vmax.xlane.f32.xlu1 %v2027_v4  ;;  %v1836_v4 = vadd.f32 %v7276_v37, %v7234_v43  ;;  %v1845_v43 = vadd.f32 %v7278_v27, %v7246_v11  ;;  %v1841_v11 = vadd.f32 %v7278_v27, %v7248_v6 }
 0x49a   :  { %v1900_v1 = vmul.f32 0.2, %v1836_v4  ;;  %v1909_v15 = vmul.f32 0.2, %v1845_v43  ;;  %v1905_v59 = vmul.f32 0.2, %v1841_v11 }
 0x49c   :  { %v7378_v44 = vmax.f32 %v1836_v4, %v1900_v1  ;;  %v1847_v4 = vadd.f32 %v7278_v27, %v7250_v0  ;;  %v7390_v5 = vmax.f32 %v1845_v43, %v1909_v15  ;;  %v7392_v1 = vmax.f32 %v1828_v18, %v1892_v24 }
 0x49d   :  { %v1858_v43 = vadd.f32 %v7276_v37, %v7264_v16  ;;  %v7408_v18 = vmax.f32 %v1852_v57, %v1916_v31  ;;  %v1843_v15 = vadd.f32 %v7278_v27, %v7254_v39  ;;  %v1842_v16 = vadd.f32 %v7276_v37, %v7254_v39 }
 0x49e   :  { %v2036_v47 = vmax.f32 %v7378_v44, %v7372_v52  ;;  %v2048_v24 = vmax.f32 %v7396_v41, %v7390_v5  ;;  %v1911_v53 = vmul.f32 0.2, %v1847_v4  ;;  %v1851_v31 = vadd.f32 %v7278_v27, %v7256_v62 }
 0x49f   :  { %v1922_v23 = vmul.f32 0.2, %v1858_v43  ;;  %v1907_v39 = vmul.f32 0.2, %v1843_v15 }
 0x4a0   :  { %2031 = vmax.xlane.f32.xlu1 %v2030_v34  ;;  %v1853_v34 = vadd.f32 %v7278_v27, %v7260_v50  ;;  %v1840_v50 = vadd.f32 %v7276_v37, %v7248_v6  ;;  %v2024_v6 = vmax.f32 %v7392_v1, %v7384_v42  ;;  %v7420_v57 = vmax.f32 %v1847_v4, %v1911_v53 }
 0x4a1   :  { %v7434_v4 = vmax.f32 %v1858_v43, %v1922_v23  ;;  %v1906_v53 = vmul.f32 0.2, %v1842_v16 }
 0x4a2   :  { %v1917_v19 = vmul.f32 0.2, %v1853_v34 }
 0x4a3   :  { %10404 = vst [vmem:[#allocation68_spill] sm:$0xff] %v7434_v4  ;;  %v7448_v43 = vmax.f32 %v1842_v16, %v1906_v53 }
 0x4a4   :  { %v7402_v26 = vmax.f32 %v1853_v34, %v1917_v19  ;;  %v1923_v19 = vmul.f32 0.2, %v1859_v9 }
 0x4a6   :  { %2034 = vmax.xlane.f32.xlu2 %v2033_v8  ;;  %v2039_v8 = vmax.f32 %v7370_v36, %v7364_v32  ;;  %v2060_v34 = vmax.f32 %v7408_v18, %v7402_v26 }
 0x4a8   :  { %2040 = vmax.xlane.f32.xlu1 %v2039_v8  ;;  %v1846_v8 = vadd.f32 %v7276_v37, %v7250_v0  ;;  %v1904_v0 = vmul.f32 0.2, %v1840_v50 }
 0x4aa   :  { %v1910_v63 = vmul.f32 0.2, %v1846_v8 }
 0x4ac   :  { %v7426_v22 = vmax.f32 %v1846_v8, %v1910_v63  ;;  %v7440_v63 = vmax.f32 %v1843_v15, %v1907_v39 }
 0x4ae   :  { %2037 = vmax.xlane.f32.xlu2 %v2036_v47  ;;  %v7414_v47 = vmax.f32 %v1841_v11, %v1905_v59  ;;  %v7430_v11 = vmax.f32 %v1859_v9, %v1923_v19  ;;  %v2051_v61 = vmax.f32 %v7426_v22, %v7420_v57  ;;  %v1848_v9 = vadd.f32 %v7276_v37, %v7252_v40 }
 0x4af   :  { %v2045_v15 = vmax.f32 %v7448_v43, %v7440_v63 }
 0x4b0   :  { %2049 = vmax.xlane.f32.xlu1 %v2048_v24  ;;  %v1850_v24 = vadd.f32 %v7276_v37, %v7256_v62  ;;  %10403 = vst [vmem:[#allocation67_spill] sm:$0xff] %v7430_v11  ;;  %v2069_v62 = vmax.f32 %v7434_v4, %v7430_v11  ;;  %v1912_v11 = vmul.f32 0.2, %v1848_v9 }
 0x4b2   :  { %2025 = vmax.xlane.f32.xlu0 %v2024_v6  ;;  %v7422_v6 = vmax.f32 %v1840_v50, %v1904_v0  ;;  %v1915_v50 = vmul.f32 0.2, %v1851_v31  ;;  %v1849_v0 = vadd.f32 %v7278_v27, %v7252_v40  ;;  %v1914_v8 = vmul.f32 0.2, %v1850_v24 }
 0x4b3   :  { %v7466_v53 = vmax.f32 %v1848_v9, %v1912_v11 }
 0x4b4   :  { %v2042_v59 = vmax.f32 %v7422_v6, %v7414_v47  ;;  %v7446_v23 = vmax.f32 %v1851_v31, %v1915_v50  ;;  %v7452_v19 = vmax.f32 %v1850_v24, %v1914_v8  ;;  %v1857_v31 = vadd.f32 %v7278_v27, %v7262_v30 }
 0x4b6   :  { %2061 = vmax.xlane.f32.xlu2 %v2060_v34  ;;  %v1855_v34 = vadd.f32 %v7278_v27, %v7258_v56  ;;  %v2057_v40 = vmax.f32 %v7452_v19, %v7446_v23 }
 0x4b8   :  { %2052 = vmax.xlane.f32.xlu1 %v2051_v61  ;;  %v1854_v61 = vadd.f32 %v7276_v37, %v7258_v56  ;;  %v1919_v39 = vmul.f32 0.2, %v1855_v34  ;;  %v1856_v56 = vadd.f32 %v7276_v37, %v7262_v30 }
 0x4ba   :  { %2043 = vmax.xlane.f32.xlu0 %v2042_v59  ;;  %v1913_v59 = vmul.f32 0.2, %v1849_v0  ;;  %v1918_v16 = vmul.f32 0.2, %v1854_v61  ;;  %v7464_v24 = vmax.f32 %v1855_v34, %v1919_v39 }
 0x4bc   :  { %v7460_v50 = vmax.f32 %v1849_v0, %v1913_v59 }
 0x4be   :  { %2070 = vmax.xlane.f32.xlu2 %v2069_v62  ;;  %v7468_v62 = vmax.f32 %v1854_v61, %v1918_v16  ;;  %v2054_v8 = vmax.f32 %v7466_v53, %v7460_v50 }
 0x4c0   :  { %2058 = vmax.xlane.f32.xlu1 %v2057_v40  ;;  %v2063_v4 = vmax.f32 %v7468_v62, %v7464_v24  ;;  %v1920_v40 = vmul.f32 0.2, %v1856_v56 }
 0x4c2   :  { %2046 = vmax.xlane.f32.xlu0 %v2045_v15  ;;  %v1921_v15 = vmul.f32 0.2, %v1857_v31  ;;  %v7476_v59 = vmax.f32 %v1856_v56, %v1920_v40 }
 0x4c4   :  { %v7474_v0 = vmax.f32 %v1857_v31, %v1921_v15 }
 0x4c6   :  { %10405 = vst [vmem:[#allocation69_spill] sm:$0xff] %v7474_v0  ;;  %v2066_v30 = vmax.f32 %v7476_v59, %v7474_v0 }
 0x4c8   :  { %2064 = vmax.xlane.f32.xlu1 %v2063_v4  ;;  %v7485_v4 = vld [vmem:[%s10078_s0] sm:$0xff] }
 0x4c9   :  { %10406 = vst [vmem:[#allocation70_spill] sm:$0xff] %v7485_v4  ;;  %v10195_v16 = vunpack.c.l.bf16 %v7485_v4 }
 0x4ca   :  { %2055 = vmax.xlane.f32.xlu0 %v2054_v8 }
 0x4d2   :  { %2067 = vmax.xlane.f32.xlu0 %v2066_v30 }
 0x4eb   :  { %v2014_v11 = vpop.xlane.xlu1 %2013 }
 0x4ec   :  { %v2108_v9 = vsub.f32 %v7288_v48, %v2014_v11  ;;  %v2109_v34 = vsub.f32 %v7290_v29, %v2014_v11  ;;  %v10194_v48 = vunpack.c.h.bf16 %v7485_v4  ;;  %v1863_v29 = vadd.f32 %v7278_v27, %v7268_v33 }
 0x4ee   :  { %v2172_v61 = vmul.f32 1.442695, %v2108_v9  ;;  %v2174_v39 = vmul.f32 1.442695, %v2109_v34  ;;  %v1862_v34 = vadd.f32 %v7276_v37, %v7268_v33 }
 0x4f0   :  { %5924 = vpow2.f32 %v2172_v61 }
 0x4f1   :  { %5926 = vpow2.f32 %v2174_v39  ;;  %v1927_v39 = vmul.f32 0.2, %v1863_v29 }
 0x4f3   :  { %v2017_v31 = vpop.xlane.xlu1 %2016  ;;  %v7514_v4 = vmax.f32 %v1863_v29, %v1927_v39 }
 0x4f4   :  { %v2110_v56 = vsub.f32 %v7300_v20, %v2017_v31  ;;  %v2111_v8 = vsub.f32 %v7296_v3, %v2017_v31  ;;  %v7506_v3 = vld [vmem:[%s10078_s0 + $0x8] sm:$0xff] }
 0x4f5   :  { %10407 = vst [vmem:[#allocation71_spill] sm:$0xff] %v7506_v3 }
 0x4f6   :  { %v5925_v15 = vpop.eup %5924  ;;  %v2176_v40 = vmul.f32 1.442695, %v2110_v56  ;;  %v2178_v30 = vmul.f32 1.442695, %v2111_v8  ;;  %v10200_v56 = vunpack.c.l.bf16 %v7506_v3 }
 0x4f7   :  { %v5927_v11 = vpop.eup %5926  ;;  %v7495_v9 = vmul.f32 %v5925_v15, %v10195_v16  ;;  %v10199_v15 = vunpack.c.h.bf16 %v7506_v3 }
 0x4f8   :  { %5928 = vpow2.f32 %v2176_v40  ;;  %v7501_v20 = vmul.f32 %v5927_v11, %v10194_v48  ;;  %v1926_v40 = vmul.f32 0.2, %v1862_v34 }
 0x4f9   :  { %5930 = vpow2.f32 %v2178_v30 }
 0x4fa   :  { %v2428_v61 = vadd.f32 %v7501_v20, %v7495_v9 }
 0x4fb   :  { %v2020_v31 = vpop.xlane.xlu1 %2019 }
 0x4fc   :  { %v2112_v33 = vsub.f32 %v7310_v13, %v2020_v31  ;;  %v2113_v8 = vsub.f32 %v7306_v46, %v2020_v31  ;;  %2429 = vadd.xlane.f32.xlu1 %v2428_v61  ;;  %v7524_v46 = vmax.f32 %v1862_v34, %v1926_v40  ;;  %v7529_v61 = vld [vmem:[%s10078_s0 + $0x10] sm:$0xff] }
 0x4fd   :  { %10408 = vst [vmem:[#allocation72_spill] sm:$0xff] %v7529_v61 }
 0x4fe   :  { %v5929_v11 = vpop.eup %5928  ;;  %v2180_v48 = vmul.f32 1.442695, %v2112_v33  ;;  %v2182_v16 = vmul.f32 1.442695, %v2113_v8  ;;  %v2075_v39 = vmax.f32 %v7524_v46, %v7514_v4  ;;  %v10201_v8 = vunpack.c.h.bf16 %v7529_v61 }
 0x4ff   :  { %v5931_v30 = vpop.eup %5930  ;;  %v7518_v0 = vmul.f32 %v5929_v11, %v10200_v56 }
 0x500   :  { %5932 = vpow2.f32 %v2180_v48  ;;  %v7522_v13 = vmul.f32 %v5931_v30, %v10199_v15  ;;  %v10202_v48 = vunpack.c.l.bf16 %v7529_v61 }
 0x501   :  { %5934 = vpow2.f32 %v2182_v16 }
 0x502   :  { %v2431_v29 = vadd.f32 %v7522_v13, %v7518_v0 }
 0x503   :  { %v2023_v31 = vpop.xlane.xlu1 %2022 }
 0x504   :  { %2432 = vadd.xlane.f32.xlu0 %v2431_v29  ;;  %v2114_v33 = vsub.f32 %v7320_v14, %v2023_v31  ;;  %v2115_v34 = vsub.f32 %v7316_v10, %v2023_v31  ;;  %2076 = vmax.xlane.f32.xlu1 %v2075_v39  ;;  %v7550_v10 = vld [vmem:[%s10078_s0 + $0x18] sm:$0xff] }
 0x505   :  { %10409 = vst [vmem:[#allocation73_spill] sm:$0xff] %v7550_v10  ;;  %v10204_v39 = vunpack.c.l.bf16 %v7550_v10 }
 0x506   :  { %v5933_v40 = vpop.eup %5932  ;;  %v2184_v11 = vmul.f32 1.442695, %v2114_v33  ;;  %v2186_v16 = vmul.f32 1.442695, %v2115_v34  ;;  %v10203_v34 = vunpack.c.h.bf16 %v7550_v10 }
 0x507   :  { %v5935_v30 = vpop.eup %5934  ;;  %v7541_v15 = vmul.f32 %v5933_v40, %v10202_v48 }
 0x508   :  { %5936 = vpow2.f32 %v2184_v11  ;;  %v7545_v56 = vmul.f32 %v5935_v30, %v10201_v8 }
 0x509   :  { %5938 = vpow2.f32 %v2186_v16 }
 0x50a   :  { %v2434_v14 = vadd.f32 %v7545_v56, %v7541_v15 }
 0x50b   :  { %v2029_v29 = vpop.xlane.xlu1 %2028 }
 0x50c   :  { %2435 = vadd.xlane.f32.xlu2 %v2434_v14  ;;  %v2118_v31 = vsub.f32 %v7332_v60, %v2029_v29  ;;  %v2119_v33 = vsub.f32 %v7326_v12, %v2029_v29  ;;  %v7569_v60 = vld [vmem:[%s10078_s0 + $0x28] sm:$0xff] }
 0x50d   :  { %10410 = vst [vmem:[#allocation74_spill] sm:$0xff] %v7569_v60  ;;  %v10212_v29 = vunpack.c.l.bf16 %v7569_v60 }
 0x50e   :  { %v5937_v40 = vpop.eup %5936  ;;  %v2192_v11 = vmul.f32 1.442695, %v2118_v31  ;;  %v2194_v30 = vmul.f32 1.442695, %v2119_v33  ;;  %v10211_v31 = vunpack.c.h.bf16 %v7569_v60 }
 0x50f   :  { %v5939_v8 = vpop.eup %5938  ;;  %v7560_v16 = vmul.f32 %v5937_v40, %v10204_v39 }
 0x510   :  { %5940 = vpow2.f32 %v2192_v11  ;;  %v7564_v48 = vmul.f32 %v5939_v8, %v10203_v34 }
 0x511   :  { %5942 = vpow2.f32 %v2194_v30 }
 0x512   :  { %v2437_v12 = vadd.f32 %v7564_v48, %v7560_v16 }
 0x513   :  { %v7573_v14 = vpop.xlane.xlu1 %2031 }
 0x514   :  { %2438 = vadd.xlane.f32.xlu1 %v2437_v12 }
 0x516   :  { %v5941_v33 = vpop.eup %5940 }
 0x517   :  { %v5943_v40 = vpop.eup %5942  ;;  %v7579_v8 = vmul.f32 %v5941_v33, %v10212_v29  ;;  %v7592_v33 = vld [vmem:[%s10078_s0 + $0x48] sm:$0xff] }
 0x518   :  { %v7583_v11 = vmul.f32 %v5943_v40, %v10211_v31  ;;  %10411 = vst [vmem:[#allocation75_spill] sm:$0xff] %v7592_v33 }
 0x519   :  { %v2035_v3 = vpop.xlane.xlu2 %2034 }
 0x51a   :  { %v2443_v30 = vadd.f32 %v7583_v11, %v7579_v8 }
 0x51b   :  { %v2041_v34 = vpop.xlane.xlu1 %2040 }
 0x51c   :  { %v2126_v39 = vsub.f32 %v7370_v36, %v2041_v34  ;;  %v2127_v12 = vsub.f32 %v7364_v32, %v2041_v34  ;;  %2444 = vadd.xlane.f32.xlu1 %v2443_v30  ;;  %v2122_v36 = vsub.f32 %v7354_v49, %v2035_v3  ;;  %v10216_v32 = vunpack.c.l.bf16 %v7592_v33 }
 0x51d   :  { %v10215_v30 = vunpack.c.h.bf16 %v7592_v33 }
 0x51e   :  { %v2208_v10 = vmul.f32 1.442695, %v2126_v39  ;;  %v2210_v61 = vmul.f32 1.442695, %v2127_v12  ;;  %v2123_v39 = vsub.f32 %v7348_v35, %v2035_v3  ;;  %v2200_v49 = vmul.f32 1.442695, %v2122_v36 }
 0x520   :  { %5944 = vpow2.f32 %v2208_v10  ;;  %v2202_v35 = vmul.f32 1.442695, %v2123_v39 }
 0x521   :  { %5946 = vpow2.f32 %v2210_v61 }
 0x523   :  { %v2050_v60 = vpop.xlane.xlu1 %2049 }
 0x524   :  { %1791 = vperm.xlu2 %5918, %v7206_v54  }
 0x525   :  { %v2026_v40 = vpop.xlane.xlu0 %2025 }
 0x526   :  { %v2116_v31 = vsub.f32 %v7392_v1, %v2026_v40  ;;  %v2117_v29 = vsub.f32 %v7384_v42, %v2026_v40  ;;  %v5945_v12 = vpop.eup %5944  ;;  %v7604_v1 = vld [vmem:[%s10078_s0 + $0x20] sm:$0xff] }
 0x527   :  { %10412 = vst [vmem:[#allocation76_spill] sm:$0xff] %v7604_v1  ;;  %v5947_v42 = vpop.eup %5946  ;;  %v7608_v61 = vmul.f32 %v5945_v12, %v10216_v32  ;;  %v10219_v12 = vunpack.c.h.bf16 %v7604_v1  ;;  %v10413_v33 = vunpack.c.l.bf16 %v7604_v1 }
 0x528   :  { %v2188_v10 = vmul.f32 1.442695, %v2116_v31  ;;  %v2190_v34 = vmul.f32 1.442695, %v2117_v29  ;;  %v7612_v54 = vmul.f32 %v5947_v42, %v10215_v30  ;;  %v2132_v31 = vsub.f32 %v7396_v41, %v2050_v60  ;;  %v7624_v29 = vpop.xlane.xlu2 %2037 }
 0x52a   :  { %5948 = vpow2.f32 %v2188_v10  ;;  %v2455_v40 = vadd.f32 %v7612_v54, %v7608_v61 }
 0x52b   :  { %5950 = vpow2.f32 %v2190_v34  ;;  %v2133_v34 = vsub.f32 %v7390_v5, %v2050_v60  ;;  %v7621_v39 = vpop.xlane.xlu1 %2052  ;;  %v7633_v5 = vld [vmem:[%s10078_s0 + $0x38] sm:$0xff]  ;;  %v7638_v60 = vld [vmem:[%s10078_s0 + $0x50] sm:$0xff] }
 0x52c   :  { %5952 = vpow2.f32 %v2200_v49  ;;  %2456 = vadd.xlane.f32.xlu1 %v2455_v40  ;;  %10414 = vst [vmem:[#allocation77_spill] sm:$0xff] %v7633_v5 }
 0x52d   :  { %v2044_v3 = vpop.xlane.xlu0 %2043  ;;  %5954 = vpow2.f32 %v2202_v35  ;;  %10415 = vst [vmem:[#allocation78_spill] sm:$0xff] %v7638_v60  ;;  %v2222_v49 = vmul.f32 1.442695, %v2133_v34 }
 0x52e   :  { %v2128_v36 = vsub.f32 %v7422_v6, %v2044_v3  ;;  %v2129_v10 = vsub.f32 %v7414_v47, %v2044_v3  ;;  %v2220_v47 = vmul.f32 1.442695, %v2132_v31  ;;  %v10222_v3 = vunpack.c.l.bf16 %v7633_v5 }
 0x52f   :  { %v10223_v31 = vunpack.c.h.bf16 %v7633_v5 }
 0x530   :  { %v5949_v42 = vpop.eup %5948  ;;  %v2212_v30 = vmul.f32 1.442695, %v2128_v36  ;;  %v2214_v32 = vmul.f32 1.442695, %v2129_v10 }
 0x531   :  { %v5951_v41 = vpop.eup %5950  ;;  %v7628_v6 = vmul.f32 %v5949_v42, %v10413_v33 }
 0x532   :  { %5956 = vpow2.f32 %v2212_v30  ;;  %v7642_v35 = vmul.f32 %v5951_v41, %v10219_v12  ;;  %v5953_v33 = vpop.eup %5952 }
 0x533   :  { %5958 = vpow2.f32 %v2214_v32  ;;  %v5955_v36 = vpop.eup %5954  ;;  %v2059_v32 = vpop.xlane.xlu1 %2058  ;;  %v7654_v1 = vmul.f32 %v5953_v33, %v10222_v3 }
 0x534   :  { %v2440_v30 = vadd.f32 %v7642_v35, %v7628_v6  ;;  %5960 = vpow2.f32 %v2220_v47  ;;  %v2138_v42 = vsub.f32 %v7452_v19, %v2059_v32  ;;  %v2139_v41 = vsub.f32 %v7446_v23, %v2059_v32  ;;  %v2062_v33 = vpop.xlane.xlu2 %2061 }
 0x535   :  { %5962 = vpow2.f32 %v2222_v49  ;;  %v7658_v40 = vmul.f32 %v5955_v36, %v10223_v31  ;;  %v10416_v47 = vunpack.c.l.bf16 %v7638_v60  ;;  %v7667_v49 = vld [vmem:[%s10078_s0 + $0x60] sm:$0xff]  ;;  %v10418_v23 = vunpack.c.h.bf16 %v7638_v60 }
 0x536   :  { %2441 = vadd.xlane.f32.xlu0 %v2440_v30  ;;  %10417 = vst [vmem:[#allocation79_spill] sm:$0xff] %v7667_v49  ;;  %v2232_v19 = vmul.f32 1.442695, %v2138_v42  ;;  %v2234_v32 = vmul.f32 1.442695, %v2139_v41  ;;  %v10229_v31 = vunpack.c.l.bf16 %v7667_v49  ;;  %v2140_v42 = vsub.f32 %v7408_v18, %v2062_v33  ;;  %v7694_v18 = vld [vmem:[%s10078_s0 + $0x78] sm:$0xff] }
 0x537   :  { %v2449_v5 = vadd.f32 %v7658_v40, %v7654_v1  ;;  %v2120_v60 = vsub.f32 %v7346_v7, %v7573_v14  ;;  %10419 = vst [vmem:[#allocation80_spill] sm:$0xff] %v7694_v18  ;;  %v10232_v7 = vunpack.c.h.bf16 %v7694_v18 }
 0x538   :  { %v5957_v34 = vpop.eup %5956  ;;  %5964 = vpow2.f32 %v2232_v19 }
 0x539   :  { %v5959_v12 = vpop.eup %5958  ;;  %v7662_v10 = vmul.f32 %v5957_v34, %v10416_v47  ;;  %v10228_v34 = vunpack.c.h.bf16 %v7667_v49  ;;  %5966 = vpow2.f32 %v2234_v32 }
 0x53a   :  { %v7671_v30 = vmul.f32 %v5959_v12, %v10418_v23  ;;  %v5961_v3 = vpop.eup %5960  ;;  %v2141_v12 = vsub.f32 %v7402_v26, %v2062_v33  ;;  %v2121_v26 = vsub.f32 %v7340_v25, %v7573_v14 }
 0x53b   :  { %v5963_v47 = vpop.eup %5962  ;;  %v7683_v41 = vmul.f32 %v5961_v3, %v10229_v31  ;;  %v1861_v3 = vadd.f32 %v7278_v27, %v7266_v45  ;;  %v2196_v31 = vmul.f32 1.442695, %v2120_v60 }
 0x53c   :  { %v2458_v36 = vadd.f32 %v7671_v30, %v7662_v10  ;;  %v7687_v23 = vmul.f32 %v5963_v47, %v10228_v34  ;;  %v2238_v19 = vmul.f32 1.442695, %v2141_v12  ;;  %v1860_v34 = vadd.f32 %v7276_v37, %v7266_v45  ;;  %v7717_v45 = vld [vmem:[%s10078_s0 + $0x80] sm:$0xff] }
 0x53d   :  { %v2198_v49 = vmul.f32 1.442695, %v2121_v26  ;;  %v1925_v25 = vmul.f32 0.2, %v1861_v3  ;;  %10422 = vst [vmem:[#allocation83_spill] sm:$0xff] %v7717_v45 }
 0x53e   :  { %2459 = vadd.xlane.f32.xlu1 %v2458_v36  ;;  %2450 = vadd.xlane.f32.xlu0 %v2449_v5  ;;  %v2236_v5 = vmul.f32 1.442695, %v2140_v42  ;;  %v5965_v33 = vpop.eup %5964  ;;  %v2464_v32 = vadd.f32 %v7687_v23, %v7683_v41  ;;  %v10233_v36 = vunpack.c.l.bf16 %v7694_v18  ;;  %v1924_v12 = vmul.f32 0.2, %v1860_v34 }
 0x53f   :  { %v5967_v47 = vpop.eup %5966  ;;  %v7719_v60 = vmax.f32 %v1861_v3, %v1925_v25  ;;  %v1869_v18 = vadd.f32 %v7278_v27, %v7272_v55 }
 0x540   :  { %5968 = vpow2.f32 %v2236_v5  ;;  %v7708_v14 = vmul.f32 %v5965_v33, %v10233_v36  ;;  %v7712_v42 = vmul.f32 %v5967_v47, %v10232_v7  ;;  %v10240_v33 = vunpack.c.h.bf16 %v7717_v45 }
 0x541   :  { %5970 = vpow2.f32 %v2238_v19  ;;  %v7726_v19 = vld [vmem:[%s10078_s0 + $0x30] sm:$0xff]  ;;  %v7730_v47 = vmax.f32 %v1860_v34, %v1924_v12  ;;  %v1868_v12 = vadd.f32 %v7276_v37, %v7272_v55  ;;  %v1864_v55 = vadd.f32 %v7276_v37, %v7274_v21 }
 0x542   :  { %10420 = vst [vmem:[#allocation81_spill] sm:$0xff] %v7708_v14  ;;  %5972 = vpow2.f32 %v2196_v31  ;;  %v2473_v5 = vadd.f32 %v7712_v42, %v7708_v14  ;;  %v10237_v31 = vunpack.c.l.bf16 %v7717_v45  ;;  %v10242_v25 = vunpack.c.l.bf16 %v7726_v19 }
 0x543   :  { %10421 = vst [vmem:[#allocation82_spill] sm:$0xff] %v7712_v42  ;;  %5974 = vpow2.f32 %v2198_v49  ;;  %v2072_v3 = vmax.f32 %v7730_v47, %v7719_v60  ;;  %v1933_v45 = vmul.f32 0.2, %v1869_v18 }
 0x544   :  { %10423 = vst [vmem:[#allocation84_spill] sm:$0xff] %v7726_v19 }
 0x546   :  { %2465 = vadd.xlane.f32.xlu1 %v2464_v32  ;;  %v5969_v26 = vpop.eup %5968 }
 0x547   :  { %v5971_v32 = vpop.eup %5970  ;;  %v7740_v42 = vmul.f32 %v5969_v26, %v10237_v31  ;;  %v10426_v26 = vunpack.c.h.bf16 %v7726_v19 }
 0x548   :  { %v5973_v49 = vpop.eup %5972  ;;  %v7744_v34 = vmul.f32 %v5971_v32, %v10240_v33  ;;  %v2047_v33 = vpop.xlane.xlu0 %2046 }
 0x549   :  { %v5975_v36 = vpop.eup %5974  ;;  %10424 = vst [vmem:[#allocation85_spill] sm:$0xff] %v7740_v42  ;;  %v7753_v7 = vmul.f32 %v5973_v49, %v10242_v25  ;;  %v7765_v49 = vmax.f32 %v1869_v18, %v1933_v45  ;;  %v2130_v25 = vsub.f32 %v7448_v43, %v2047_v33  ;;  %v2131_v19 = vsub.f32 %v7440_v63, %v2047_v33 }
 0x54a   :  { %10425 = vst [vmem:[#allocation86_spill] sm:$0xff] %v7744_v34  ;;  %v7757_v31 = vmul.f32 %v5975_v36, %v10426_v26  ;;  %v2476_v32 = vadd.f32 %v7744_v34, %v7740_v42  ;;  %v1928_v36 = vmul.f32 0.2, %v1864_v55  ;;  %v1866_v18 = vadd.f32 %v7276_v37, %v7270_v38 }
 0x54b   :  { %v2216_v45 = vmul.f32 1.442695, %v2130_v25  ;;  %v2218_v43 = vmul.f32 1.442695, %v2131_v19  ;;  %v2125_v25 = vsub.f32 %v7372_v52, %v7624_v29 }
 0x54c   :  { %v7779_v42 = vmax.f32 %v1864_v55, %v1928_v36  ;;  %v1930_v33 = vmul.f32 0.2, %v1866_v18 }
 0x54d   :  { %2073 = vmax.xlane.f32.xlu2 %v2072_v3  ;;  %v1932_v3 = vmul.f32 0.2, %v1868_v12  ;;  %5976 = vpow2.f32 %v2216_v45 }
 0x54e   :  { %2474 = vadd.xlane.f32.xlu1 %v2473_v5  ;;  %v1865_v5 = vadd.f32 %v7278_v27, %v7274_v21  ;;  %v1867_v21 = vadd.f32 %v7278_v27, %v7270_v38  ;;  %5978 = vpow2.f32 %v2218_v43  ;;  %v2124_v38 = vsub.f32 %v7378_v44, %v7624_v29 }
 0x54f   :  { %v7768_v26 = vmax.f32 %v1868_v12, %v1932_v3  ;;  %v7792_v19 = vmax.f32 %v1866_v18, %v1930_v33  ;;  %v2206_v43 = vmul.f32 1.442695, %v2125_v25  ;;  %v2134_v29 = vsub.f32 %v7426_v22, %v7621_v39 }
 0x550   :  { %v1929_v14 = vmul.f32 0.2, %v1865_v5  ;;  %v1931_v63 = vmul.f32 0.2, %v1867_v21  ;;  %v2056_v45 = vpop.xlane.xlu0 %2055  ;;  %v2135_v18 = vsub.f32 %v7420_v57, %v7621_v39 }
 0x551   :  { %v2224_v33 = vmul.f32 1.442695, %v2134_v29 }
 0x552   :  { %1795 = vperm.xlu0 %5916, %v7210_v2   ;;  %v2446_v2 = vadd.f32 %v7757_v31, %v7753_v7  ;;  %v7773_v34 = vmax.f32 %v1865_v5, %v1929_v14  ;;  %v7783_v14 = vmax.f32 %v1867_v21, %v1931_v63  ;;  %v7788_v5 = vld [vmem:[%s10078_s0 + $0x58] sm:$0xff]  ;;  %v2226_v25 = vmul.f32 1.442695, %v2135_v18 }
 0x553   :  { %10427 = vst [vmem:[#allocation87_spill] sm:$0xff] %v7788_v5  ;;  %v5977_v55 = vpop.eup %5976  ;;  %v10251_v36 = vunpack.c.h.bf16 %v7788_v5 }
 0x554   :  { %v2078_v12 = vmax.f32 %v7779_v42, %v7773_v34  ;;  %v2081_v3 = vmax.f32 %v7792_v19, %v7783_v14  ;;  %v5979_v21 = vpop.eup %5978 }
 0x555   :  { %2447 = vadd.xlane.f32.xlu2 %v2446_v2  ;;  %v10252_v2 = vunpack.c.l.bf16 %v7788_v5  ;;  %v7806_v52 = vmul.f32 %v5979_v21, %v10251_v36  ;;  %v2136_v21 = vsub.f32 %v7466_v53, %v2056_v45 }
 0x556   :  { %2477 = vadd.xlane.f32.xlu1 %v2476_v32  ;;  %v2084_v32 = vmax.f32 %v7768_v26, %v7765_v49 }
 0x557   :  { %v7802_v44 = vmul.f32 %v5977_v55, %v10252_v2 }
 0x558   :  { %v7821_v22 = vpop.xlane.xlu0 %2067 }
 0x559   :  { %v2461_v63 = vadd.f32 %v7806_v52, %v7802_v44 }
 0x55d   :  { %2079 = vmax.xlane.f32.xlu2 %v2078_v12  ;;  %v7812_v12 = vpop.xlane.xlu1 %2064 }
 0x55e   :  { %2085 = vmax.xlane.f32.xlu1 %v2084_v32  ;;  %v2204_v32 = vmul.f32 1.442695, %v2124_v38  ;;  %v7819_v38 = vld [vmem:[%s10078_s0 + $0x40] sm:$0xff] }
 0x55f   :  { %10428 = vst [vmem:[#allocation88_spill] sm:$0xff] %v7819_v38  ;;  %v10250_v57 = vunpack.c.h.bf16 %v7819_v38 }
 0x560   :  { %5980 = vpow2.f32 %v2204_v32  ;;  %v2137_v32 = vsub.f32 %v7460_v50, %v2056_v45 }
 0x561   :  { %5982 = vpow2.f32 %v2206_v43 }
 0x562   :  { %5984 = vpow2.f32 %v2224_v33  ;;  %v2228_v33 = vmul.f32 1.442695, %v2136_v21 }
 0x563   :  { %5986 = vpow2.f32 %v2226_v25  ;;  %v2230_v25 = vmul.f32 1.442695, %v2137_v32  ;;  %v2071_v32 = vpop.xlane.xlu2 %2070 }
 0x565   :  { %2082 = vmax.xlane.f32.xlu2 %v2081_v3  ;;  %v10247_v3 = vunpack.c.l.bf16 %v7819_v38 }
 0x566   :  { %v5981_v55 = vpop.eup %5980 }
 0x567   :  { %v5983_v39 = vpop.eup %5982  ;;  %v7830_v29 = vmul.f32 %v5981_v55, %v10247_v3 }
 0x568   :  { %v7834_v18 = vmul.f32 %v5983_v39, %v10250_v57  ;;  %v5985_v53 = vpop.eup %5984 }
 0x569   :  { %v5987_v45 = vpop.eup %5986 }
 0x56a   :  { %v2452_v3 = vadd.f32 %v7834_v18, %v7830_v29 }
 0x56d   :  { %2462 = vadd.xlane.f32.xlu2 %v2461_v63  ;;  %v7839_v63 = vld [vmem:[%s10078_s0 + $0x68] sm:$0xff] }
 0x56e   :  { %10429 = vst [vmem:[#allocation89_spill] sm:$0xff] %v7839_v63  ;;  %v10248_v50 = vunpack.c.l.bf16 %v7839_v63 }
 0x56f   :  { %v2430_v43 = vpop.xlane.xlu1 %2429 }
 0x570   :  { %5988 = vrcp.f32 %v2430_v43  ;;  %v7847_v39 = vmul.f32 %v5985_v53, %v10248_v50  ;;  %v7857_v43 = vld [vmem:[%s10078_s0 + $0x70] sm:$0xff] }
 0x571   :  { %10430 = vst [vmem:[#allocation90_spill] sm:$0xff] %v7857_v43  ;;  %v10265_v53 = vunpack.c.l.bf16 %v7857_v43 }
 0x577   :  { %1799 = vperm.xlu1 %5917, %v7218_v58   ;;  %v10249_v58 = vunpack.c.h.bf16 %v7839_v63  ;;  %v2433_v55 = vpop.xlane.xlu0 %2432  ;;  %v7867_v36 = vpop.xlane.xlu1 %2076 }
 0x578   :  { %5990 = vrcp.f32 %v2433_v55  ;;  %v5989_v55 = vpop.eup %5988 }
 0x579   :  { %5992 = vpow2.f32 %v2228_v33  ;;  %v7851_v21 = vmul.f32 %v5987_v45, %v10249_v58  ;;  %v2556_v45 = vmul.f32 %v5989_v55, %v7495_v9  ;;  %v2557_v58 = vmul.f32 %v5989_v55, %v7501_v20 }
 0x57a   :  { %5994 = vpow2.f32 %v2230_v25  ;;  %v10431_v9 = vunpack.c.h.bf16 %v7857_v43 }
 0x57c   :  { %2453 = vadd.xlane.f32.xlu0 %v2452_v3  ;;  %v2467_v3 = vadd.f32 %v7851_v21, %v7847_v39 }
 0x57e   :  { %v5991_v33 = vpop.eup %5990 }
 0x57f   :  { %1811 = vperm.xlu1 %5917, %v7236_v51   ;;  %v5993_v50 = vpop.eup %5992  ;;  %v2558_v51 = vmul.f32 %v5991_v33, %v7518_v0  ;;  %v2559_v57 = vmul.f32 %v5991_v33, %v7522_v13  ;;  %v2436_v5 = vpop.xlane.xlu2 %2435  ;;  %v10433_v33 = vld [vmem:[#allocation67_spill] sm:$0xff] }
 0x580   :  { %v5995_v2 = vpop.eup %5994  ;;  %v7871_v25 = vmul.f32 %v5993_v50, %v10265_v53  ;;  %5996 = vrcp.f32 %v2436_v5 }
 0x581   :  { %v2620_v63 = vpack.c.bf16 %v2558_v51, %v2556_v45  ;;  %v2621_v38 = vpack.c.bf16 %v2559_v57, %v2557_v58  ;;  %v7875_v20 = vmul.f32 %v5995_v2, %v10431_v9  ;;  %v2142_v45 = vsub.f32 %v7468_v62, %v7812_v12 }
 0x583   :  { %2663 = vmatmul.bf16.vlgmr.msrb.gmra.mxu3 %v2620_v63  ;;  %2752 = vmatmul.bf16.vlgmr.msrb.gmra.mxu0 %v2621_v38  ;;  %v2470_v13 = vadd.f32 %v7875_v20, %v7871_v25  ;;  %v2240_v9 = vmul.f32 1.442695, %v2142_v45 }
 0x584   :  { %2468 = vadd.xlane.f32.xlu0 %v2467_v3  ;;  %v2147_v3 = vsub.f32 %v10433_v33, %v2071_v32 }
 0x585   :  { %1803 = vperm.xlu2 %5918, %v7224_v17   ;;  %v10432_v17 = vld [vmem:[#allocation68_spill] sm:$0xff] }
 0x586   :  { %v5997_v38 = vpop.eup %5996  ;;  %v2146_v5 = vsub.f32 %v10432_v17, %v2071_v32  ;;  %v10435_v32 = vld [vmem:[#allocation69_spill] sm:$0xff] }
 0x587   :  { %1815 = vperm.xlu1 %5917, %v7240_v28   ;;  %v2439_v0 = vpop.xlane.xlu1 %2438  ;;  %v2560_v63 = vmul.f32 %v5997_v38, %v7541_v15  ;;  %v2561_v2 = vmul.f32 %v5997_v38, %v7545_v56  ;;  %v2143_v15 = vsub.f32 %v7464_v24, %v7812_v12  ;;  %v2145_v38 = vsub.f32 %v10435_v32, %v7821_v22  ;;  %v7899_v24 = vld [vmem:[%s10078_s0 + $0x98] sm:$0xff]  ;;  %v7904_v12 = vld [vmem:[%s10078_s0 + $0x88] sm:$0xff] }
 0x588   :  { %5998 = vrcp.f32 %v2439_v0  ;;  %v2248_v51 = vmul.f32 1.442695, %v2146_v5  ;;  %10436 = vst [vmem:[#allocation68_spill] sm:$0xff] %v7899_v24 }
 0x589   :  { %v2242_v56 = vmul.f32 1.442695, %v2143_v15  ;;  %10437 = vst [vmem:[#allocation67_spill] sm:$0xff] %v7904_v12 }
 0x58a   :  { %6000 = vpow2.f32 %v2248_v51  ;;  %v7931_v51 = vld [vmem:[%s10078_s0 + $0x90] sm:$0xff] }
 0x58b   :  { %v10261_v32 = vunpack.c.h.bf16 %v7931_v51 }
 0x58c   :  { %2471 = vadd.xlane.f32.xlu0 %v2470_v13  ;;  %v10434_v13 = vld [vmem:[#allocation66_spill] sm:$0xff] }
 0x58d   :  { %10438 = vst [vmem:[#allocation66_spill] sm:$0xff] %v7931_v51 }
 0x58e   :  { %v5999_v57 = vpop.eup %5998 }
 0x58f   :  { %v2562_v50 = vmul.f32 %v5999_v57, %v7560_v16  ;;  %v2563_v58 = vmul.f32 %v5999_v57, %v7564_v48  ;;  %v2250_v16 = vmul.f32 1.442695, %v2147_v3  ;;  %v2144_v48 = vsub.f32 %v7476_v59, %v7821_v22  ;;  %v2445_v0 = vpop.xlane.xlu1 %2444 }
 0x590   :  { %v6001_v59 = vpop.eup %6000  ;;  %v2246_v57 = vmul.f32 1.442695, %v2145_v38  ;;  %v10264_v22 = vunpack.c.l.bf16 %v7904_v12 }
 0x591   :  { %v2622_v28 = vpack.c.bf16 %v2562_v50, %v2560_v63  ;;  %v2623_v55 = vpack.c.bf16 %v2563_v58, %v2561_v2  ;;  %6002 = vpow2.f32 %v2250_v16  ;;  %v2244_v62 = vmul.f32 1.442695, %v2144_v48 }
 0x592   :  { %6004 = vpow2.f32 %v2240_v9  ;;  %v10260_v50 = vunpack.c.l.bf16 %v7899_v24  ;;  %v10263_v58 = vunpack.c.h.bf16 %v7904_v12 }
 0x593   :  { %2668 = vmatmul.bf16.gmra.mxu3 %v2622_v28  ;;  %2757 = vmatmul.bf16.gmra.mxu0 %v2623_v55  ;;  %6006 = vpow2.f32 %v2242_v56  ;;  %v10259_v28 = vunpack.c.h.bf16 %v7899_v24 }
 0x594   :  { %6008 = vrcp.f32 %v2445_v0  ;;  %v7922_v45 = vmul.f32 %v6001_v59, %v10260_v50 }
 0x595   :  { %6010 = vpow2.f32 %v2244_v62 }
 0x596   :  { %6012 = vpow2.f32 %v2246_v57 }
 0x597   :  { %v6003_v63 = vpop.eup %6002 }
 0x598   :  { %v6005_v2 = vpop.eup %6004  ;;  %v7926_v15 = vmul.f32 %v6003_v63, %v10259_v28 }
 0x599   :  { %v6007_v55 = vpop.eup %6006  ;;  %v7914_v33 = vmul.f32 %v6005_v2, %v10264_v22 }
 0x59a   :  { %v7918_v3 = vmul.f32 %v6007_v55, %v10263_v58  ;;  %v6009_v16 = vpop.eup %6008  ;;  %v2485_v0 = vadd.f32 %v7926_v15, %v7922_v45 }
 0x59b   :  { %v6011_v9 = vpop.eup %6010  ;;  %v2566_v59 = vmul.f32 %v6009_v16, %v7579_v8  ;;  %v2567_v2 = vmul.f32 %v6009_v16, %v7583_v11 }
 0x59c   :  { %v6013_v56 = vpop.eup %6012  ;;  %v2479_v48 = vadd.f32 %v7918_v3, %v7914_v33 }
 0x59d   :  { %v7951_v50 = vmul.f32 %v6013_v56, %v10261_v32 }
 0x59f   :  { %v7910_v17 = vpop.xlane.xlu1 %2456 }
 0x5a0   :  { %1807 = vperm.xlu0 %5916, %v10434_v13   ;;  %v10262_v13 = vunpack.c.l.bf16 %v7931_v51 }
 0x5a2   :  { %v7947_v28 = vmul.f32 %v6011_v9, %v10262_v13 }
 0x5a4   :  { %v2482_v8 = vadd.f32 %v7951_v50, %v7947_v28 }
 0x5a9   :  { %v2442_v5 = vpop.xlane.xlu0 %2441 }
 0x5aa   :  { %6014 = vrcp.f32 %v2442_v5 }
 0x5ae   :  { %2480 = vadd.xlane.f32.xlu2 %v2479_v48 }
 0x5b0   :  { %v6015_v38 = vpop.eup %6014 }
 0x5b1   :  { %v7939_v62 = vpop.xlane.xlu1 %2459  ;;  %2486 = vadd.xlane.f32.xlu1 %v2485_v0  ;;  %v2564_v57 = vmul.f32 %v6015_v38, %v7628_v6  ;;  %v2565_v63 = vmul.f32 %v6015_v38, %v7642_v35  ;;  %v1792_v35 = vpop.permute.xlu2 %1791 }
 0x5b2   :  { %v1870_v11 = vadd.f32 %v7276_v37, %v1792_v35  ;;  %v1871_v16 = vadd.f32 %v7278_v27, %v1792_v35  ;;  %v2451_v48 = vpop.xlane.xlu0 %2450 }
 0x5b3   :  { %v2624_v55 = vpack.c.bf16 %v2566_v59, %v2564_v57  ;;  %v2625_v5 = vpack.c.bf16 %v2567_v2, %v2565_v63  ;;  %6016 = vrcp.f32 %v2451_v48 }
 0x5b4   :  { %v1934_v0 = vmul.f32 0.2, %v1870_v11  ;;  %v1935_v38 = vmul.f32 0.2, %v1871_v16 }
 0x5b5   :  { %2673 = vmatmul.bf16.gmra.mxu3 %v2624_v55  ;;  %2762 = vmatmul.bf16.gmra.mxu0 %v2625_v5 }
 0x5b6   :  { %2483 = vadd.xlane.f32.xlu2 %v2482_v8  ;;  %v7963_v2 = vmax.f32 %v1870_v11, %v1934_v0  ;;  %v7965_v55 = vmax.f32 %v1871_v16, %v1935_v38 }
 0x5b9   :  { %v7955_v6 = vpop.xlane.xlu1 %2465 }
 0x5c0   :  { %v2074_v56 = vpop.xlane.xlu2 %2073 }
 0x5c1   :  { %v7959_v9 = vpop.xlane.xlu1 %2474  ;;  %v2148_v59 = vsub.f32 %v7730_v47, %v2074_v56  ;;  %v2149_v57 = vsub.f32 %v7719_v60, %v2074_v56  ;;  %v2087_v60 = vmax.f32 %v7963_v2, %v7965_v55  ;;  %v7976_v47 = vld [vmem:[%s10078_s0 + $0xa0] sm:$0xff] }
 0x5c2   :  { %10439 = vst [vmem:[#allocation69_spill] sm:$0xff] %v7976_v47  ;;  %v10266_v38 = vunpack.c.l.bf16 %v7976_v47  ;;  %v10269_v56 = vunpack.c.h.bf16 %v7976_v47 }
 0x5c3   :  { %v2252_v35 = vmul.f32 1.442695, %v2148_v59  ;;  %v2254_v32 = vmul.f32 1.442695, %v2149_v57  ;;  %v6017_v59 = vpop.eup %6016 }
 0x5c4   :  { %v1796_v63 = vpop.permute.xlu0 %1795 }
 0x5c5   :  { %v1872_v5 = vadd.f32 %v7276_v37, %v1796_v63  ;;  %v1873_v8 = vadd.f32 %v7278_v27, %v1796_v63  ;;  %6018 = vpow2.f32 %v2252_v35 }
 0x5c6   :  { %6020 = vpow2.f32 %v2254_v32 }
 0x5c7   :  { %v1936_v13 = vmul.f32 0.2, %v1872_v5  ;;  %v1937_v58 = vmul.f32 0.2, %v1873_v8 }
 0x5c8   :  { %v2448_v48 = vpop.xlane.xlu2 %2447 }
 0x5c9   :  { %v7969_v22 = vpop.xlane.xlu1 %2477  ;;  %v7978_v11 = vmax.f32 %v1872_v5, %v1936_v13  ;;  %v7980_v16 = vmax.f32 %v1873_v8, %v1937_v58  ;;  %6022 = vrcp.f32 %v2448_v48  ;;  %v2571_v48 = vmul.f32 %v6017_v59, %v7658_v40 }
 0x5ca   :  { %2088 = vmax.xlane.f32.xlu0 %v2087_v60  ;;  %v2570_v60 = vmul.f32 %v6017_v59, %v7654_v1  ;;  %v8005_v1 = vld [vmem:[%s10078_s0 + $0xc0] sm:$0xff] }
 0x5cb   :  { %v2090_v0 = vmax.f32 %v7978_v11, %v7980_v16  ;;  %v6019_v57 = vpop.eup %6018  ;;  %10440 = vst [vmem:[#allocation91_spill] sm:$0xff] %v8005_v1  ;;  %v10271_v40 = vunpack.c.l.bf16 %v8005_v1 }
 0x5cc   :  { %v6021_v63 = vpop.eup %6020  ;;  %v7988_v13 = vmul.f32 %v6019_v57, %v10266_v38 }
 0x5cd   :  { %2091 = vmax.xlane.f32.xlu2 %v2090_v0  ;;  %v7992_v32 = vmul.f32 %v6021_v63, %v10269_v56 }
 0x5cf   :  { %v6023_v35 = vpop.eup %6022  ;;  %v2488_v0 = vadd.f32 %v7992_v32, %v7988_v13 }
 0x5d0   :  { %v2080_v53 = vpop.xlane.xlu2 %2079  ;;  %v2568_v51 = vmul.f32 %v6023_v35, %v7753_v7  ;;  %v2569_v63 = vmul.f32 %v6023_v35, %v7757_v31 }
 0x5d1   :  { %v2086_v58 = vpop.xlane.xlu1 %2085 }
 0x5d2   :  { %v2156_v5 = vsub.f32 %v7768_v26, %v2086_v58  ;;  %v2157_v8 = vsub.f32 %v7765_v49, %v2086_v58  ;;  %v2626_v56 = vpack.c.bf16 %v2570_v60, %v2568_v51  ;;  %v2627_v26 = vpack.c.bf16 %v2571_v48, %v2569_v63 }
 0x5d3   :  { %v10270_v49 = vunpack.c.h.bf16 %v8005_v1  ;;  %v2152_v48 = vsub.f32 %v7779_v42, %v2080_v53 }
 0x5d4   :  { %v2268_v57 = vmul.f32 1.442695, %v2156_v5  ;;  %v2270_v38 = vmul.f32 1.442695, %v2157_v8  ;;  %2678 = vmatmul.bf16.gmra.mxu3 %v2626_v56  ;;  %2767 = vmatmul.bf16.gmra.mxu0 %v2627_v26  ;;  %v2151_v5 = vsub.f32 %v7514_v4, %v7867_v36  ;;  %v8032_v4 = vld [vmem:[%s10078_s0 + $0xa8] sm:$0xff] }
 0x5d5   :  { %2489 = vadd.xlane.f32.xlu2 %v2488_v0  ;;  %v2153_v0 = vsub.f32 %v7773_v34, %v2080_v53  ;;  %10441 = vst [vmem:[#allocation92_spill] sm:$0xff] %v8032_v4  ;;  %v10273_v53 = vunpack.c.l.bf16 %v8032_v4 }
 0x5d6   :  { %6024 = vpow2.f32 %v2268_v57  ;;  %v2258_v60 = vmul.f32 1.442695, %v2151_v5  ;;  %v2260_v57 = vmul.f32 1.442695, %v2152_v48 }
 0x5d7   :  { %6026 = vpow2.f32 %v2270_v38  ;;  %v2150_v38 = vsub.f32 %v7524_v46, %v7867_v36  ;;  %v2262_v26 = vmul.f32 1.442695, %v2153_v0 }
 0x5d8   :  { %v8009_v7 = vpop.xlane.xlu2 %2082 }
 0x5d9   :  { %v2256_v8 = vmul.f32 1.442695, %v2150_v38 }
 0x5db   :  { %6028 = vpow2.f32 %v2256_v8 }
 0x5dc   :  { %v6025_v59 = vpop.eup %6024  ;;  %6030 = vpow2.f32 %v2258_v60  ;;  %v10272_v60 = vunpack.c.h.bf16 %v8032_v4 }
 0x5dd   :  { %v6027_v31 = vpop.eup %6026  ;;  %v8013_v51 = vmul.f32 %v6025_v59, %v10271_v40  ;;  %6032 = vpow2.f32 %v2260_v57 }
 0x5de   :  { %v8017_v58 = vmul.f32 %v6027_v31, %v10270_v49  ;;  %6034 = vpow2.f32 %v2262_v26 }
 0x5df   :  { %6036 = vrcp.f32 %v7910_v17 }
 0x5e0   :  { %v2500_v56 = vadd.f32 %v8017_v58, %v8013_v51  ;;  %v2463_v35 = vpop.xlane.xlu2 %2462 }
 0x5e2   :  { %2501 = vadd.xlane.f32.xlu1 %v2500_v56  ;;  %v6029_v56 = vpop.eup %6028 }
 0x5e3   :  { %v6031_v48 = vpop.eup %6030  ;;  %v8056_v17 = vmul.f32 %v6029_v56, %v10273_v53 }
 0x5e8   :  { %v1804_v36 = vpop.permute.xlu2 %1803 }
 0x5e9   :  { %v1800_v63 = vpop.permute.xlu1 %1799  ;;  %v1876_v42 = vadd.f32 %v7276_v37, %v1804_v36  ;;  %v1877_v34 = vadd.f32 %v7278_v27, %v1804_v36  ;;  %v8048_v36 = vld [vmem:[%s10078_s0 + $0xb0] sm:$0xff] }
 0x5ea   :  { %v1874_v46 = vadd.f32 %v7276_v37, %v1800_v63  ;;  %v1875_v59 = vadd.f32 %v7278_v27, %v1800_v63  ;;  %10442 = vst [vmem:[#allocation93_spill] sm:$0xff] %v8048_v36  ;;  %v10284_v40 = vunpack.c.l.bf16 %v8048_v36 }
 0x5eb   :  { %v1940_v0 = vmul.f32 0.2, %v1876_v42  ;;  %v1941_v63 = vmul.f32 0.2, %v1877_v34 }
 0x5ec   :  { %v1938_v31 = vmul.f32 0.2, %v1874_v46  ;;  %v1939_v38 = vmul.f32 0.2, %v1875_v59 }
 0x5ed   :  { %v8050_v26 = vmax.f32 %v1876_v42, %v1940_v0  ;;  %v10299_v42 = vunpack.c.h.bf16 %v8048_v36  ;;  %v10483_v36 = vld [vmem:[#allocation64_spill] sm:$0xff] }
 0x5ee   :  { %v8037_v5 = vmax.f32 %v1874_v46, %v1938_v31  ;;  %v8039_v8 = vmax.f32 %v1875_v59, %v1939_v38  ;;  %v8052_v46 = vmax.f32 %v1877_v34, %v1941_v63  ;;  %v8060_v59 = vmul.f32 %v6031_v48, %v10272_v60  ;;  %v6033_v31 = vpop.eup %6032 }
 0x5ef   :  { %v2454_v57 = vpop.xlane.xlu0 %2453  ;;  %v6035_v0 = vpop.eup %6034  ;;  %v8072_v60 = vmul.f32 %v6033_v31, %v10284_v40 }
 0x5f0   :  { %v2093_v49 = vmax.f32 %v8037_v5, %v8039_v8  ;;  %6038 = vrcp.f32 %v2454_v57  ;;  %v2096_v38 = vmax.f32 %v8050_v26, %v8052_v46  ;;  %v6037_v63 = vpop.eup %6036  ;;  %v8076_v53 = vmul.f32 %v6035_v0, %v10299_v42 }
 0x5f1   :  { %v1812_v34 = vpop.permute.xlu1 %1811  ;;  %v2575_v47 = vmul.f32 %v6037_v63, %v7612_v54  ;;  %6040 = vrcp.f32 %v2463_v35 }
 0x5f2   :  { %2094 = vmax.xlane.f32.xlu0 %v2093_v49  ;;  %2097 = vmax.xlane.f32.xlu2 %v2096_v38  ;;  %v2491_v49 = vadd.f32 %v8060_v59, %v8056_v17  ;;  %v1880_v57 = vadd.f32 %v7276_v37, %v1812_v34  ;;  %v1881_v48 = vadd.f32 %v7278_v27, %v1812_v34  ;;  %6042 = vrcp.f32 %v7939_v62 }
 0x5f3   :  { %v2574_v38 = vmul.f32 %v6037_v63, %v7608_v61  ;;  %v2494_v34 = vadd.f32 %v8076_v53, %v8072_v60 }
 0x5f4   :  { %v1944_v31 = vmul.f32 0.2, %v1880_v57  ;;  %v1945_v40 = vmul.f32 0.2, %v1881_v48 }
 0x5f6   :  { %v6039_v56 = vpop.eup %6038  ;;  %v8087_v61 = vmax.f32 %v1881_v48, %v1945_v40 }
 0x5f7   :  { %v2572_v1 = vmul.f32 %v6039_v56, %v7830_v29  ;;  %v2573_v4 = vmul.f32 %v6039_v56, %v7834_v18  ;;  %v8085_v29 = vmax.f32 %v1880_v57, %v1944_v31  ;;  %v2469_v18 = vpop.xlane.xlu0 %2468  ;;  %v6041_v54 = vpop.eup %6040 }
 0x5f8   :  { %6044 = vrcp.f32 %v2469_v18 }
 0x5f9   :  { %v2628_v24 = vpack.c.bf16 %v2574_v38, %v2572_v1  ;;  %v2629_v12 = vpack.c.bf16 %v2575_v47, %v2573_v4  ;;  %v2102_v47 = vmax.f32 %v8085_v29, %v8087_v61  ;;  %v6043_v1 = vpop.eup %6042  ;;  %v2578_v4 = vmul.f32 %v6041_v54, %v7802_v44 }
 0x5fa   :  { %2492 = vadd.xlane.f32.xlu0 %v2491_v49  ;;  %2495 = vadd.xlane.f32.xlu2 %v2494_v34  ;;  %v2576_v40 = vmul.f32 %v6043_v1, %v7662_v10  ;;  %v2577_v35 = vmul.f32 %v6043_v1, %v7671_v30  ;;  %v2154_v44 = vsub.f32 %v7792_v19, %v8009_v7  ;;  %6046 = vrcp.f32 %v7955_v6 }
 0x5fb   :  { %2683 = vmatmul.bf16.gmra.mxu3 %v2628_v24  ;;  %2772 = vmatmul.bf16.gmra.mxu0 %v2629_v12  ;;  %v2579_v24 = vmul.f32 %v6041_v54, %v7806_v52  ;;  %v8096_v12 = vld [vmem:[%s10084_s7] ss:$0 sm:$0xff]  ;;  %v2155_v52 = vsub.f32 %v7783_v14, %v8009_v7 }
 0x5fc   :  { %v2630_v63 = vpack.c.bf16 %v2578_v4, %v2576_v40  ;;  %v2264_v10 = vmul.f32 1.442695, %v2154_v44 }
 0x5fd   :  { %v2631_v49 = vpack.c.bf16 %v2579_v24, %v2577_v35  ;;  %v2266_v30 = vmul.f32 1.442695, %v2155_v52  ;;  %v8125_v35 = vld [vmem:[%s10078_s0 + $0xb8] sm:$0xff]  ;;  %v1816_v52 = vpop.permute.xlu1 %1815 }
 0x5fe   :  { %v6045_v31 = vpop.eup %6044  ;;  %6048 = vpow2.f32 %v2264_v10  ;;  %10443 = vst [vmem:[#allocation94_spill] sm:$0xff] %v8125_v35  ;;  %v10295_v44 = vunpack.c.h.bf16 %v8125_v35 }
 0x5ff   :  { %v2472_v56 = vpop.xlane.xlu0 %2471  ;;  %6050 = vpow2.f32 %v2266_v30  ;;  %v2582_v14 = vmul.f32 %v6045_v31, %v7847_v39  ;;  %v2583_v7 = vmul.f32 %v6045_v31, %v7851_v21  ;;  %v1882_v31 = vadd.f32 %v7276_v37, %v1816_v52 }
 0x600   :  { %v2753_v62 = vpop.f32.mrf.mxu0  ;;  %v6047_v1 = vpop.eup %6046  ;;  %6052 = vrcp.f32 %v2472_v56 }
 0x601   :  { %v2580_v4 = vmul.f32 %v6047_v1, %v7683_v41  ;;  %v2581_v24 = vmul.f32 %v6047_v1, %v7687_v23  ;;  %v10296_v23 = vunpack.c.l.bf16 %v8125_v35  ;;  %6054 = vrcp.f32 %v7959_v9 }
 0x602   :  { %2103 = vmax.xlane.f32.xlu2 %v2102_v47 }
 0x603   :  { %v2632_v39 = vpack.c.bf16 %v2582_v14, %v2580_v4  ;;  %v1946_v14 = vmul.f32 0.2, %v1882_v31  ;;  %v10444_v4 = vld [vmem:[#allocation81_spill] sm:$0xff] }
 0x605   :  { %v8149_v9 = vmax.f32 %v1882_v31, %v1946_v14 }
 0x606   :  { %v2664_v0 = vpop.f32.mrf.mxu3 }
 0x607   :  { %v2665_v57 = vadd.f32 %v8096_v12, %v2664_v0  ;;  %v6049_v0 = vpop.eup %6048 }
 0x608   :  { %v8108_v38 = vpop.f32.mrf.mxu0 }
 0x609   :  { %v8105_v48 = vadd.f32 %v2753_v62, %v2665_v57  ;;  %v6051_v57 = vpop.eup %6050 }
 0x60a   :  { %v6053_v1 = vpop.eup %6052 }
 0x60b   :  { %2688 = vmatmul.bf16.gmra.mxu3 %v2630_v63  ;;  %2777 = vmatmul.bf16.gmra.mxu0 %v2631_v49  ;;  %v2633_v49 = vpack.c.bf16 %v2583_v7, %v2581_v24 }
 0x60e   :  { %v8110_v34 = vpop.f32.mrf.mxu3 }
 0x610   :  { %v2758_v10 = vpop.f32.mrf.mxu0 }
 0x612   :  { %v1808_v54 = vpop.permute.xlu0 %1807 }
 0x613   :  { %v1878_v19 = vadd.f32 %v7276_v37, %v1808_v54  ;;  %v1879_v47 = vadd.f32 %v7278_v27, %v1808_v54  ;;  %v1883_v54 = vadd.f32 %v7278_v27, %v1816_v52  ;;  %v2584_v37 = vmul.f32 %v6053_v1, %v7871_v25 }
 0x614   :  { %v2585_v27 = vmul.f32 %v6053_v1, %v7875_v20 }
 0x615   :  { %v1942_v6 = vmul.f32 0.2, %v1878_v19  ;;  %v1943_v18 = vmul.f32 0.2, %v1879_v47  ;;  %v1947_v7 = vmul.f32 0.2, %v1883_v54 }
 0x616   :  { %v2669_v63 = vpop.f32.mrf.mxu3 }
 0x617   :  { %v8118_v62 = vmax.f32 %v1878_v19, %v1942_v6  ;;  %v8120_v40 = vmax.f32 %v1879_v47, %v1943_v18  ;;  %v2670_v41 = vadd.f32 %v8096_v12, %v2669_v63  ;;  %v8139_v19 = vmul.f32 %v6049_v0, %v10296_v23  ;;  %v6055_v6 = vpop.eup %6054  ;;  %v10445_v0 = vld [vmem:[#allocation82_spill] sm:$0xff] }
 0x618   :  { %v8143_v47 = vmul.f32 %v6051_v57, %v10295_v44  ;;  %v8151_v18 = vmax.f32 %v1883_v54, %v1947_v7  ;;  %v2586_v24 = vmul.f32 %v6055_v6, %v10444_v4  ;;  %v2587_v63 = vmul.f32 %v6055_v6, %v10445_v0  ;;  %v10446_v54 = vld [vmem:[#allocation85_spill] sm:$0xff] }
 0x619   :  { %v2099_v21 = vmax.f32 %v8118_v62, %v8120_v40  ;;  %v8132_v30 = vadd.f32 %v2758_v10, %v2670_v41  ;;  %v8160_v41 = vpop.f32.mrf.mxu0 }
 0x61a   :  { %v2497_v56 = vadd.f32 %v8143_v47, %v8139_v19  ;;  %v2105_v57 = vmax.f32 %v8149_v9, %v8151_v18 }
 0x61b   :  { %2693 = vmatmul.bf16.gmra.mxu3 %v2632_v39  ;;  %2782 = vmatmul.bf16.gmra.mxu0 %v2633_v49  ;;  %v2634_v49 = vpack.c.bf16 %v2586_v24, %v2584_v37 }
 0x61c   :  { %2100 = vmax.xlane.f32.xlu0 %v2099_v21  ;;  %v2635_v21 = vpack.c.bf16 %v2587_v63, %v2585_v27 }
 0x61e   :  { %v8158_v25 = vpop.f32.mrf.mxu3 }
 0x621   :  { %v2481_v39 = vpop.xlane.xlu2 %2480 }
 0x622   :  { %6056 = vrcp.f32 %v2481_v39 }
 0x623   :  { %6058 = vrcp.f32 %v7969_v22 }
 0x624   :  { %2498 = vadd.xlane.f32.xlu0 %v2497_v56  ;;  %v10447_v56 = vld [vmem:[#allocation86_spill] sm:$0xff]  ;;  %v2487_v24 = vpop.xlane.xlu1 %2486 }
 0x628   :  { %v6057_v20 = vpop.eup %6056 }
 0x629   :  { %v6059_v52 = vpop.eup %6058  ;;  %v2590_v10 = vmul.f32 %v6057_v20, %v7914_v33  ;;  %v2591_v31 = vmul.f32 %v6057_v20, %v7918_v3  ;;  %v2484_v7 = vpop.xlane.xlu2 %2483 }
 0x62a   :  { %v2588_v1 = vmul.f32 %v6059_v52, %v10446_v54  ;;  %v2589_v14 = vmul.f32 %v6059_v52, %v10447_v56  ;;  %6060 = vrcp.f32 %v2484_v7 }
 0x62b   :  { %2698 = vmatmul.bf16.gmra.mxu3 %v2634_v49  ;;  %2787 = vmatmul.bf16.gmra.mxu0 %v2635_v21  ;;  %6062 = vrcp.f32 %v2487_v24 }
 0x62c   :  { %2106 = vmax.xlane.f32.xlu0 %v2105_v57  ;;  %v2636_v27 = vpack.c.bf16 %v2590_v10, %v2588_v1  ;;  %v2637_v22 = vpack.c.bf16 %v2591_v31, %v2589_v14  ;;  %v8176_v10 = vld [vmem:[%s10078_s0 + $0xc8] sm:$0xff] }
 0x62d   :  { %10448 = vst [vmem:[#allocation81_spill] sm:$0xff] %v8176_v10  ;;  %v10293_v56 = vunpack.c.h.bf16 %v8176_v10 }
 0x630   :  { %v6061_v52 = vpop.eup %6060 }
 0x631   :  { %v2593_v1 = vmul.f32 %v6061_v52, %v7951_v50 }
 0x632   :  { %v2763_v4 = vpop.f32.mrf.mxu0 }
 0x638   :  { %v2674_v6 = vpop.f32.mrf.mxu3 }
 0x639   :  { %v2675_v37 = vadd.f32 %v8096_v12, %v2674_v6 }
 0x63b   :  { %v8167_v0 = vadd.f32 %v2763_v4, %v2675_v37  ;;  %2703 = vmatmul.bf16.gmra.mxu3 %v2636_v27  ;;  %2792 = vmatmul.bf16.gmra.mxu0 %v2637_v22 }
 0x63d   :  { %v2089_v33 = vpop.xlane.xlu0 %2088 }
 0x63e   :  { %v2158_v3 = vsub.f32 %v7963_v2, %v2089_v33  ;;  %v2159_v63 = vsub.f32 %v7965_v55, %v2089_v33  ;;  %v6063_v2 = vpop.eup %6062  ;;  %v2592_v55 = vmul.f32 %v6061_v52, %v7947_v28 }
 0x63f   :  { %v2594_v14 = vmul.f32 %v6063_v2, %v7922_v45  ;;  %v2595_v7 = vmul.f32 %v6063_v2, %v7926_v15 }
 0x640   :  { %v2272_v39 = vmul.f32 1.442695, %v2158_v3  ;;  %v2274_v49 = vmul.f32 1.442695, %v2159_v63  ;;  %v2092_v21 = vpop.xlane.xlu2 %2091 }
 0x641   :  { %v2160_v57 = vsub.f32 %v7978_v11, %v2092_v21  ;;  %v2161_v20 = vsub.f32 %v7980_v16, %v2092_v21  ;;  %v10294_v11 = vunpack.c.l.bf16 %v8176_v10  ;;  %v8184_v16 = vld [vmem:[%s10078_s0 + $0xd0] sm:$0xff]  ;;  %v2638_v27 = vpack.c.bf16 %v2594_v14, %v2592_v55  ;;  %v8213_v21 = vpop.f32.mrf.mxu0 }
 0x642   :  { %6064 = vpow2.f32 %v2272_v39  ;;  %10449 = vst [vmem:[#allocation82_spill] sm:$0xff] %v8184_v16  ;;  %v10292_v37 = vunpack.c.l.bf16 %v8184_v16  ;;  %v2639_v50 = vpack.c.bf16 %v2595_v7, %v2593_v1  ;;  %v10288_v4 = vunpack.c.h.bf16 %v8184_v16 }
 0x643   :  { %6066 = vpow2.f32 %v2274_v49  ;;  %v2276_v31 = vmul.f32 1.442695, %v2160_v57  ;;  %v2278_v54 = vmul.f32 1.442695, %v2161_v20  ;;  %v8211_v49 = vpop.f32.mrf.mxu3 }
 0x645   :  { %6068 = vpow2.f32 %v2276_v31 }
 0x646   :  { %6070 = vpow2.f32 %v2278_v54 }
 0x648   :  { %v6065_v6 = vpop.eup %6064  ;;  %v2490_v54 = vpop.xlane.xlu2 %2489 }
 0x649   :  { %v6067_v28 = vpop.eup %6066  ;;  %v8192_v22 = vmul.f32 %v6065_v6, %v10294_v11 }
 0x64a   :  { %v8197_v24 = vmul.f32 %v6067_v28, %v10293_v56 }
 0x64b   :  { %v6069_v33 = vpop.eup %6068  ;;  %2708 = vmatmul.bf16.gmra.mxu3 %v2638_v27  ;;  %2797 = vmatmul.bf16.gmra.mxu0 %v2639_v50  ;;  %v8225_v50 = vld [vmem:[%s10078_s0 + $0xd8] sm:$0xff] }
 0x64c   :  { %v6071_v45 = vpop.eup %6070  ;;  %v2503_v15 = vadd.f32 %v8197_v24, %v8192_v22  ;;  %v8203_v3 = vmul.f32 %v6069_v33, %v10292_v37  ;;  %10450 = vst [vmem:[#allocation85_spill] sm:$0xff] %v8225_v50 }
 0x64d   :  { %v8207_v63 = vmul.f32 %v6071_v45, %v10288_v4 }
 0x64e   :  { %2504 = vadd.xlane.f32.xlu2 %v2503_v15 }
 0x64f   :  { %v2506_v39 = vadd.f32 %v8207_v63, %v8203_v3 }
 0x651   :  { %2507 = vadd.xlane.f32.xlu0 %v2506_v39  ;;  %v2768_v52 = vpop.f32.mrf.mxu0 }
 0x657   :  { %v2679_v57 = vpop.f32.mrf.mxu3 }
 0x658   :  { %v2680_v20 = vadd.f32 %v8096_v12, %v2679_v57 }
 0x65a   :  { %v8216_v31 = vadd.f32 %v2768_v52, %v2680_v20  ;;  %v8235_v52 = vpop.f32.mrf.mxu0 }
 0x665   :  { %v2095_v2 = vpop.xlane.xlu0 %2094  ;;  %v2098_v14 = vpop.xlane.xlu2 %2097 }
 0x666   :  { %v2162_v55 = vsub.f32 %v8037_v5, %v2095_v2  ;;  %v2163_v1 = vsub.f32 %v8039_v8, %v2095_v2  ;;  %v2164_v28 = vsub.f32 %v8050_v26, %v2098_v14  ;;  %v2165_v27 = vsub.f32 %v8052_v46, %v2098_v14  ;;  %v8230_v8 = vld [vmem:[%s10078_s0 + $0xe0] sm:$0xff] }
 0x667   :  { %10451 = vst [vmem:[#allocation86_spill] sm:$0xff] %v8230_v8  ;;  %v10287_v26 = vunpack.c.l.bf16 %v8225_v50  ;;  %v10285_v46 = vunpack.c.h.bf16 %v8225_v50  ;;  %v10286_v57 = vunpack.c.l.bf16 %v8230_v8 }
 0x668   :  { %v2280_v7 = vmul.f32 1.442695, %v2162_v55  ;;  %v2282_v6 = vmul.f32 1.442695, %v2163_v1  ;;  %v2284_v33 = vmul.f32 1.442695, %v2164_v28 }
 0x669   :  { %v2286_v45 = vmul.f32 1.442695, %v2165_v27 }
 0x66a   :  { %6072 = vpow2.f32 %v2280_v7 }
 0x66b   :  { %6074 = vpow2.f32 %v2282_v6 }
 0x66c   :  { %6076 = vrcp.f32 %v2490_v54  ;;  %v10291_v54 = vunpack.c.h.bf16 %v8230_v8 }
 0x66d   :  { %6078 = vpow2.f32 %v2284_v33  ;;  %v2493_v5 = vpop.xlane.xlu0 %2492  ;;  %v2496_v39 = vpop.xlane.xlu2 %2495 }
 0x66e   :  { %6080 = vpow2.f32 %v2286_v45 }
 0x66f   :  { %6082 = vrcp.f32 %v2493_v5 }
 0x670   :  { %v6073_v15 = vpop.eup %6072 }
 0x671   :  { %v6075_v20 = vpop.eup %6074  ;;  %v8240_v2 = vmul.f32 %v6073_v15, %v10287_v26 }
 0x672   :  { %v6077_v55 = vpop.eup %6076  ;;  %v8244_v1 = vmul.f32 %v6075_v20, %v10285_v46  ;;  %v8260_v46 = vpop.f32.mrf.mxu3 }
 0x673   :  { %v6079_v14 = vpop.eup %6078  ;;  %v2596_v45 = vmul.f32 %v6077_v55, %v7988_v13  ;;  %v2597_v15 = vmul.f32 %v6077_v55, %v7992_v32 }
 0x674   :  { %v6081_v7 = vpop.eup %6080  ;;  %v8248_v6 = vmul.f32 %v6079_v14, %v10286_v57  ;;  %v2509_v28 = vadd.f32 %v8244_v1, %v8240_v2 }
 0x675   :  { %v6083_v27 = vpop.eup %6082  ;;  %v8254_v33 = vmul.f32 %v6081_v7, %v10291_v54  ;;  %v2104_v57 = vpop.xlane.xlu2 %2103 }
 0x676   :  { %2510 = vadd.xlane.f32.xlu1 %v2509_v28  ;;  %v2598_v5 = vmul.f32 %v6083_v27, %v8056_v17  ;;  %v2599_v20 = vmul.f32 %v6083_v27, %v8060_v59  ;;  %v2168_v7 = vsub.f32 %v8085_v29, %v2104_v57  ;;  %v2169_v28 = vsub.f32 %v8087_v61, %v2104_v57  ;;  %v8271_v59 = vld [vmem:[%s10078_s0 + $0xf0] sm:$0xff] }
 0x677   :  { %v2512_v14 = vadd.f32 %v8254_v33, %v8248_v6  ;;  %10452 = vst [vmem:[#allocation95_spill] sm:$0xff] %v8271_v59  ;;  %v10290_v27 = vunpack.c.l.bf16 %v8271_v59  ;;  %v10289_v61 = vunpack.c.h.bf16 %v8271_v59 }
 0x678   :  { %v2640_v26 = vpack.c.bf16 %v2598_v5, %v2596_v45  ;;  %v2641_v4 = vpack.c.bf16 %v2599_v20, %v2597_v15  ;;  %v8266_v13 = vpop.f32.mrf.mxu0  ;;  %v2292_v32 = vmul.f32 1.442695, %v2168_v7  ;;  %v2294_v17 = vmul.f32 1.442695, %v2169_v28 }
 0x679   :  { %2513 = vadd.xlane.f32.xlu2 %v2512_v14 }
 0x67a   :  { %2713 = vmatmul.bf16.gmra.mxu3 %v2640_v26  ;;  %2802 = vmatmul.bf16.gmra.mxu0 %v2641_v4  ;;  %6084 = vpow2.f32 %v2292_v32 }
 0x67b   :  { %6086 = vpow2.f32 %v2294_v17 }
 0x67e   :  { %v8273_v55 = vpop.f32.mrf.mxu3 }
 0x680   :  { %v8276_v29 = vpop.f32.mrf.mxu0  ;;  %v6085_v57 = vpop.eup %6084 }
 0x681   :  { %v6087_v26 = vpop.eup %6086  ;;  %v8281_v4 = vmul.f32 %v6085_v57, %v10290_v27 }
 0x682   :  { %v8285_v45 = vmul.f32 %v6087_v26, %v10289_v61  ;;  %v8302_v61 = vld [vmem:[%s10078_s0 + $0xe8] sm:$0xff] }
 0x683   :  { %10453 = vst [vmem:[#allocation96_spill] sm:$0xff] %v8302_v61  ;;  %v10297_v54 = vunpack.c.l.bf16 %v8302_v61 }
 0x684   :  { %v2518_v5 = vadd.f32 %v8285_v45, %v8281_v4 }
 0x686   :  { %v8289_v15 = vpop.f32.mrf.mxu3  ;;  %2519 = vadd.xlane.f32.xlu1 %v2518_v5 }
 0x688   :  { %v8291_v20 = vpop.f32.mrf.mxu0 }
 0x68e   :  { %v8293_v14 = vpop.f32.mrf.mxu3 }
 0x68f   :  { %v2101_v7 = vpop.xlane.xlu0 %2100 }
 0x690   :  { %v2166_v28 = vsub.f32 %v8118_v62, %v2101_v7  ;;  %v2167_v32 = vsub.f32 %v8120_v40, %v2101_v7  ;;  %v8297_v17 = vpop.f32.mrf.mxu0  ;;  %v10298_v62 = vunpack.c.h.bf16 %v8302_v61 }
 0x692   :  { %v2288_v57 = vmul.f32 1.442695, %v2166_v28  ;;  %v2290_v26 = vmul.f32 1.442695, %v2167_v32 }
 0x694   :  { %6088 = vpow2.f32 %v2288_v57 }
 0x695   :  { %6090 = vpow2.f32 %v2290_v26 }
 0x696   :  { %6092 = vrcp.f32 %v2496_v39  ;;  %v2691_v5 = vpop.f32.mrf.mxu3 }
 0x697   :  { %v2499_v27 = vpop.xlane.xlu0 %2498 }
 0x698   :  { %6094 = vrcp.f32 %v2499_v27  ;;  %v2783_v7 = vpop.f32.mrf.mxu0 }
 0x69a   :  { %v6089_v40 = vpop.eup %6088 }
 0x69b   :  { %v6091_v37 = vpop.eup %6090  ;;  %v8308_v28 = vmul.f32 %v6089_v40, %v10297_v54 }
 0x69c   :  { %v6093_v32 = vpop.eup %6092  ;;  %v8312_v57 = vmul.f32 %v6091_v37, %v10298_v62 }
 0x69d   :  { %v2600_v11 = vmul.f32 %v6093_v32, %v8072_v60  ;;  %v2601_v23 = vmul.f32 %v6093_v32, %v8076_v53  ;;  %v8325_v60 = vld [vmem:[%s10078_s0 + $0xf8] sm:$0xff] }
 0x69e   :  { %v6095_v39 = vpop.eup %6094  ;;  %v2694_v26 = vpop.f32.mrf.mxu3  ;;  %v2515_v56 = vadd.f32 %v8312_v57, %v8308_v28  ;;  %10454 = vst [vmem:[#allocation97_spill] sm:$0xff] %v8325_v60 }
 0x69f   :  { %v2107_v27 = vpop.xlane.xlu0 %2106  ;;  %v2602_v44 = vmul.f32 %v6095_v39, %v8139_v19  ;;  %v2603_v40 = vmul.f32 %v6095_v39, %v8143_v47  ;;  %v10307_v19 = vunpack.c.l.bf16 %v8325_v60  ;;  %v10306_v47 = vunpack.c.h.bf16 %v8325_v60 }
 0x6a0   :  { %2516 = vadd.xlane.f32.xlu0 %v2515_v56  ;;  %v2170_v54 = vsub.f32 %v8149_v9, %v2107_v27  ;;  %v2171_v37 = vsub.f32 %v8151_v18, %v2107_v27  ;;  %v2785_v8 = vpop.f32.mrf.mxu0  ;;  %v2692_v39 = vadd.f32 %v8096_v12, %v2691_v5 }
 0x6a1   :  { %v2642_v62 = vpack.c.bf16 %v2602_v44, %v2600_v11  ;;  %v2643_v42 = vpack.c.bf16 %v2603_v40, %v2601_v23 }
 0x6a2   :  { %v2296_v59 = vmul.f32 1.442695, %v2170_v54  ;;  %v2298_v61 = vmul.f32 1.442695, %v2171_v37 }
 0x6a3   :  { %2718 = vmatmul.bf16.gmra.mxu3 %v2642_v62  ;;  %2807 = vmatmul.bf16.gmra.mxu0 %v2643_v42 }
 0x6a4   :  { %6096 = vpow2.f32 %v2296_v59 }
 0x6a5   :  { %6098 = vpow2.f32 %v2298_v61  ;;  %v2695_v61 = vadd.f32 %v8096_v12, %v2694_v26  ;;  %v2687_v26 = vadd.f32 %v8096_v12, %v8289_v15 }
 0x6a6   :  { %v2696_v53 = vpop.f32.mrf.mxu3 }
 0x6a7   :  { %v2697_v59 = vadd.f32 %v8096_v12, %v2696_v53  ;;  %v2776_v15 = vadd.f32 %v8276_v29, %v2687_v26 }
 0x6a8   :  { %v2788_v18 = vpop.f32.mrf.mxu0 }
 0x6a9   :  { %v2786_v27 = vadd.f32 %v2785_v8, %v2697_v59 }
 0x6aa   :  { %v6097_v9 = vpop.eup %6096 }
 0x6ab   :  { %v6099_v44 = vpop.eup %6098  ;;  %v8331_v23 = vmul.f32 %v6097_v9, %v10307_v19  ;;  %v2690_v9 = vadd.f32 %v8096_v12, %v8293_v14  ;;  %v2846_v19 = vmax.f32 %v2786_v27, 0.0  ;;  %v2685_v14 = vadd.f32 %v8096_v12, %v8273_v55  ;;  %v10459_v55 = vld [vmem:[#allocation45_spill] sm:$0xff] }
 0x6ac   :  { %v8335_v42 = vmul.f32 %v6099_v44, %v10306_v47  ;;  %v2784_v44 = vadd.f32 %v2783_v7, %v2695_v61 }
 0x6ad   :  { %v2779_v5 = vadd.f32 %v8291_v20, %v2690_v9 }
 0x6ae   :  { %v2699_v11 = vpop.f32.mrf.mxu3  ;;  %v2521_v56 = vadd.f32 %v8335_v42, %v8331_v23  ;;  %v2845_v8 = vmax.f32 %v2784_v44, 0.0 }
 0x6af   :  { %v2700_v54 = vadd.f32 %v8096_v12, %v2699_v11  ;;  %v2781_v11 = vadd.f32 %v8297_v17, %v2692_v39  ;;  %v2682_v39 = vadd.f32 %v8096_v12, %v8260_v46  ;;  %v2843_v27 = vmax.f32 %v2779_v5, 0.0  ;;  %v10460_v46 = vld [vmem:[#allocation44_spill] sm:$0xff] }
 0x6b0   :  { %2522 = vadd.xlane.f32.xlu2 %v2521_v56  ;;  %v2790_v37 = vpop.f32.mrf.mxu0 }
 0x6b1   :  { %v2789_v62 = vadd.f32 %v2788_v18, %v2700_v54  ;;  %v2502_v18 = vpop.xlane.xlu1 %2501  ;;  %v10455_v54 = vld [vmem:[#allocation48_spill] sm:$0xff]  ;;  %v2844_v7 = vmax.f32 %v2781_v11, 0.0  ;;  %v2875_v29 = vmul.f32 %v2843_v27, %v10460_v46 }
 0x6b2   :  { %6100 = vrcp.f32 %v2502_v18 }
 0x6b3   :  { %v2847_v47 = vmax.f32 %v2789_v62, 0.0  ;;  %v10457_v62 = vld [vmem:[#allocation47_spill] sm:$0xff]  ;;  %v2876_v44 = vmul.f32 %v2844_v7, %v10459_v55 }
 0x6b4   :  { %v2878_v17 = vmul.f32 %v2846_v19, %v10457_v62  ;;  %v2771_v19 = vadd.f32 %v8235_v52, %v2682_v39  ;;  %v10462_v39 = vld [vmem:[#allocation42_spill] sm:$0xff] }
 0x6b5   :  { %v2879_v59 = vmul.f32 %v2847_v47, %v10455_v54  ;;  %v2902_v26 = vpack.c.bf16 %v2876_v44, %v2875_v29 }
 0x6b6   :  { %v2701_v32 = vpop.f32.mrf.mxu3 }
 0x6b7   :  { %v2702_v40 = vadd.f32 %v8096_v12, %v2701_v32  ;;  %v10456_v32 = vld [vmem:[#allocation49_spill] sm:$0xff] }
 0x6b8   :  { %v6101_v11 = vpop.eup %6100 }
 0x6b9   :  { %v2791_v56 = vadd.f32 %v2790_v37, %v2702_v40  ;;  %v10458_v40 = vld [vmem:[#allocation46_spill] sm:$0xff]  ;;  %v2774_v37 = vadd.f32 %v8266_v13, %v2685_v14  ;;  %v2672_v13 = vadd.f32 %v8096_v12, %v8158_v25  ;;  %v2605_v7 = vmul.f32 %v6101_v11, %v8017_v58 }
 0x6ba   :  { %v2877_v47 = vmul.f32 %v2845_v8, %v10458_v40  ;;  %v2840_v8 = vmax.f32 %v2771_v19, 0.0  ;;  %v2667_v25 = vadd.f32 %v8096_v12, %v8110_v34  ;;  %v2837_v58 = vmax.f32 %v8167_v0, 0.0  ;;  %v10465_v34 = vld [vmem:[#allocation40_spill] sm:$0xff] }
 0x6bb   :  { %v2848_v53 = vmax.f32 %v2791_v56, 0.0  ;;  %v2842_v56 = vmax.f32 %v2776_v15, 0.0  ;;  %v2833_v0 = vmax.f32 %v8105_v48, 0.0 }
 0x6bc   :  { %v2903_v9 = vpack.c.bf16 %v2878_v17, %v2877_v47  ;;  %v2839_v17 = vmax.f32 %v8216_v31, 0.0  ;;  %v2756_v31 = vadd.f32 %v8108_v38, %v2667_v25  ;;  %v10469_v38 = vld [vmem:[#allocation36_spill] sm:$0xff] }
 0x6bd   :  { %v2880_v60 = vmul.f32 %v2848_v53, %v10456_v32  ;;  %v2841_v53 = vmax.f32 %v2774_v37, 0.0 }
 0x6bf   :  { %v2904_v61 = vpack.c.bf16 %v2880_v60, %v2879_v59  ;;  %v2677_v60 = vadd.f32 %v8096_v12, %v8211_v49  ;;  %v10461_v59 = vld [vmem:[#allocation43_spill] sm:$0xff]  ;;  %v2604_v49 = vmul.f32 %v6101_v11, %v8013_v51  ;;  %v2873_v15 = vmul.f32 %v2841_v53, %v10462_v39  ;;  %v10463_v51 = vld [vmem:[#allocation41_spill] sm:$0xff] }
 0x6c0   :  { %v2874_v14 = vmul.f32 %v2842_v56, %v10461_v59  ;;  %v2835_v56 = vmax.f32 %v8132_v30, 0.0  ;;  %v2834_v11 = vmax.f32 %v2756_v31, 0.0  ;;  %v10471_v30 = vld [vmem:[#allocation2_spill] sm:$0xff]  ;;  %v10474_v31 = vld [vmem:[#allocation8_spill] sm:$0xff] }
 0x6c1   :  { %v2505_v20 = vpop.xlane.xlu2 %2504  ;;  %2913 = vmatpush.bf16.msrb.mxu1 %v2904_v61  ;;  %v2766_v5 = vadd.f32 %v8213_v21, %v2677_v60 }
 0x6c2   :  { %6102 = vrcp.f32 %v2505_v20  ;;  %v2761_v20 = vadd.f32 %v8160_v41, %v2672_v13  ;;  %v2901_v37 = vpack.c.bf16 %v2874_v14, %v2873_v15  ;;  %v10466_v41 = vld [vmem:[#allocation37_spill] sm:$0xff]  ;;  %v10468_v13 = vld [vmem:[#allocation35_spill] sm:$0xff]  ;;  %v2866_v14 = vmul.f32 %v2834_v11, %v10469_v38 }
 0x6c3   :  { %v2838_v47 = vmax.f32 %v2766_v5, 0.0  ;;  %v2869_v29 = vmul.f32 %v2837_v58, %v10466_v41  ;;  %v2867_v5 = vmul.f32 %v2835_v56, %v10468_v13  ;;  %v10473_v58 = vld [vmem:[#allocation6_spill] sm:$0xff] }
 0x6c4   :  { %v2836_v44 = vmax.f32 %v2761_v20, 0.0 }
 0x6c5   :  { %2914 = vmatpush.bf16.msrb.mxu1 %v2903_v9  ;;  %v2872_v9 = vmul.f32 %v2840_v8, %v10463_v51  ;;  %v2870_v19 = vmul.f32 %v2838_v47, %v10465_v34  ;;  %v10472_v47 = vld [vmem:[#allocation4_spill] sm:$0xff] }
 0x6c7   :  { %v2899_v53 = vpack.c.bf16 %v2870_v19, %v2869_v29 }
 0x6c8   :  { %v6103_v18 = vpop.eup %6102 }
 0x6c9   :  { %2915 = vmatpush.bf16.msrb.mxu1 %v2902_v26  ;;  %v2606_v52 = vmul.f32 %v6103_v18, %v8192_v22  ;;  %v2607_v61 = vmul.f32 %v6103_v18, %v8197_v24  ;;  %v10464_v22 = vld [vmem:[#allocation39_spill] sm:$0xff]  ;;  %v10467_v26 = vld [vmem:[#allocation38_spill] sm:$0xff] }
 0x6ca   :  { %v2871_v24 = vmul.f32 %v2839_v17, %v10464_v22  ;;  %v2868_v18 = vmul.f32 %v2836_v44, %v10467_v26 }
 0x6cb   :  { %v2644_v21 = vpack.c.bf16 %v2606_v52, %v2604_v49  ;;  %v2645_v27 = vpack.c.bf16 %v2607_v61, %v2605_v7  ;;  %v10470_v49 = vld [vmem:[#allocation34_spill] sm:$0xff]  ;;  %v2508_v61 = vpop.xlane.xlu0 %2507 }
 0x6cc   :  { %v2900_v60 = vpack.c.bf16 %v2872_v9, %v2871_v24  ;;  %v2898_v8 = vpack.c.bf16 %v2868_v18, %v2867_v5  ;;  %v2865_v52 = vmul.f32 %v2833_v0, %v10470_v49  ;;  %6104 = vrcp.f32 %v2508_v61 }
 0x6cd   :  { %2723 = vmatmul.bf16.gmra.mxu3 %v2644_v21  ;;  %2812 = vmatmul.bf16.gmra.mxu0 %v2645_v27 }
 0x6ce   :  { %2916 = vmatpush.bf16.msrb.mxu1 %v2901_v37  ;;  %v2897_v7 = vpack.c.bf16 %v2866_v14, %v2865_v52  ;;  %v8407_v52 = vpop.f32.mrf.mxu0 }
 0x6d2   :  { %2917 = vmatpush.bf16.msrb.mxu1 %v2900_v60  ;;  %v6105_v15 = vpop.eup %6104 }
 0x6d3   :  { %v2608_v48 = vmul.f32 %v6105_v15, %v8203_v3  ;;  %v2609_v27 = vmul.f32 %v6105_v15, %v8207_v63  ;;  %v10478_v15 = vld [vmem:[#allocation16_spill] sm:$0xff] }
 0x6d6   :  { %2918 = vmatpush.bf16.msrb.mxu1 %v2899_v53  ;;  %v10475_v53 = vld [vmem:[#allocation10_spill] sm:$0xff]  ;;  %v8412_v61 = vpop.f32.mrf.mxu0 }
 0x6da   :  { %2919 = vmatpush.bf16.msrb.mxu1 %v2898_v8 }
 0x6de   :  { %2920 = vmatpush.bf16.msrb.mxu1 %v2897_v7  ;;  %v10476_v7 = vld [vmem:[#allocation12_spill] sm:$0xff] }
 0x6e1   :  { %2921 = vmatmul.bf16.vlgmr.msrb.gmra.mxu1 %v10471_v30  ;;  %v8410_v30 = vpop.f32.mrf.mxu3 }
 0x6e9   :  { %v2511_v17 = vpop.xlane.xlu1 %2510 }
 0x6ea   :  { %6106 = vrcp.f32 %v2511_v17  ;;  %v8414_v17 = vpop.f32.mrf.mxu3 }
 0x6ec   :  { %v2514_v24 = vpop.xlane.xlu2 %2513 }
 0x6ed   :  { %6108 = vrcp.f32 %v2514_v24 }
 0x6f0   :  { %v6107_v25 = vpop.eup %6106 }
 0x6f1   :  { %v2610_v21 = vmul.f32 %v6107_v25, %v8240_v2  ;;  %v2611_v20 = vmul.f32 %v6107_v25, %v8244_v1  ;;  %2926 = vmatmul.bf16.gmra.mxu1 %v10472_v47 }
 0x6f3   :  { %v2646_v37 = vpack.c.bf16 %v2610_v21, %v2608_v48  ;;  %v2647_v9 = vpack.c.bf16 %v2611_v20, %v2609_v27  ;;  %v6109_v3 = vpop.eup %6108  ;;  %v10479_v20 = vld [vmem:[#allocation18_spill] sm:$0xff] }
 0x6f4   :  { %v2612_v63 = vmul.f32 %v6109_v3, %v8248_v6  ;;  %v2613_v60 = vmul.f32 %v6109_v3, %v8254_v33 }
 0x6f5   :  { %2728 = vmatmul.bf16.gmra.mxu3 %v2646_v37  ;;  %2817 = vmatmul.bf16.gmra.mxu0 %v2647_v9 }
 0x6f9   :  { %v2520_v11 = vpop.xlane.xlu1 %2519 }
 0x701   :  { %2931 = vmatmul.bf16.gmra.mxu1 %v10473_v58  ;;  %v10480_v58 = vld [vmem:[#allocation20_spill] sm:$0xff] }
 0x711   :  { %2936 = vmatmul.bf16.gmra.mxu1 %v10474_v31 }
 0x713   :  { %v2517_v44 = vpop.xlane.xlu0 %2516 }
 0x714   :  { %6110 = vrcp.f32 %v2517_v44 }
 0x715   :  { %6112 = vrcp.f32 %v2520_v11 }
 0x71a   :  { %v6111_v2 = vpop.eup %6110 }
 0x71b   :  { %v2614_v1 = vmul.f32 %v6111_v2, %v8308_v28  ;;  %v2615_v19 = vmul.f32 %v6111_v2, %v8312_v57  ;;  %v6113_v0 = vpop.eup %6112  ;;  %v10481_v2 = vld [vmem:[#allocation22_spill] sm:$0xff] }
 0x71c   :  { %v2616_v6 = vmul.f32 %v6113_v0, %v8281_v4  ;;  %v2617_v33 = vmul.f32 %v6113_v0, %v8285_v45  ;;  %v10477_v4 = vld [vmem:[#allocation14_spill] sm:$0xff]  ;;  %v8419_v45 = vpop.f32.mrf.mxu3 }
 0x71d   :  { %v2648_v56 = vpack.c.bf16 %v2614_v1, %v2612_v63  ;;  %v2649_v29 = vpack.c.bf16 %v2615_v19, %v2613_v60 }
 0x71f   :  { %2733 = vmatmul.bf16.gmra.mxu3 %v2648_v56  ;;  %2822 = vmatmul.bf16.gmra.mxu0 %v2649_v29  ;;  %v10482_v56 = vld [vmem:[#allocation24_spill] sm:$0xff] }
 0x721   :  { %2941 = vmatmul.bf16.gmra.mxu1 %v10475_v53 }
 0x723   :  { %v2523_v18 = vpop.xlane.xlu2 %2522 }
 0x724   :  { %6114 = vrcp.f32 %v2523_v18  ;;  %v8424_v25 = vpop.f32.mrf.mxu3 }
 0x72a   :  { %v6115_v5 = vpop.eup %6114 }
 0x72b   :  { %v2618_v28 = vmul.f32 %v6115_v5, %v8331_v23  ;;  %v2619_v57 = vmul.f32 %v6115_v5, %v8335_v42  ;;  %v8417_v23 = vpop.f32.mrf.mxu0 }
 0x72c   :  { %v2714_v21 = vpop.f32.mrf.mxu3 }
 0x72d   :  { %v2650_v8 = vpack.c.bf16 %v2618_v28, %v2616_v6  ;;  %v2651_v14 = vpack.c.bf16 %v2619_v57, %v2617_v33 }
 0x72f   :  { %2738 = vmatmul.bf16.gmra.mxu3 %v2650_v8  ;;  %2827 = vmatmul.bf16.gmra.mxu0 %v2651_v14 }
 0x731   :  { %2946 = vmatmul.bf16.gmra.mxu1 %v10476_v7 }
 0x733   :  { %v8421_v42 = vpop.f32.mrf.mxu0 }
 0x734   :  { %v2716_v47 = vpop.f32.mrf.mxu3 }
 0x73b   :  { %v8426_v48 = vpop.f32.mrf.mxu0 }
 0x73c   :  { %v2719_v9 = vpop.f32.mrf.mxu3 }
 0x741   :  { %2951 = vmatmul.bf16.gmra.mxu1 %v10477_v4 }
 0x743   :  { %v8428_v27 = vpop.f32.mrf.mxu0 }
 0x744   :  { %v2721_v31 = vpop.f32.mrf.mxu3 }
 0x74b   :  { %v2808_v37 = vpop.f32.mrf.mxu0 }
 0x750   :  { %v2724_v3 = vpop.f32.mrf.mxu3 }
 0x751   :  { %2956 = vmatmul.bf16.gmra.mxu1 %v10478_v15 }
 0x753   :  { %v2810_v24 = vpop.f32.mrf.mxu0 }
 0x758   :  { %v2726_v1 = vpop.f32.mrf.mxu3 }
 0x759   :  { %v2727_v10 = vadd.f32 %v8096_v12, %v2726_v1  ;;  %v2720_v1 = vadd.f32 %v8096_v12, %v2719_v9  ;;  %v2712_v9 = vadd.f32 %v8096_v12, %v8424_v25 }
 0x75b   :  { %v2813_v44 = vpop.f32.mrf.mxu0  ;;  %v2801_v25 = vadd.f32 %v8421_v42, %v2712_v9  ;;  %v10498_v9 = vld [vmem:[#allocation50_spill] sm:$0xff] }
 0x761   :  { %2961 = vmatmul.bf16.gmra.mxu1 %v10479_v20 }
 0x763   :  { %v2815_v63 = vpop.f32.mrf.mxu0 }
 0x764   :  { %v2816_v43 = vadd.f32 %v2815_v63, %v2727_v10  ;;  %v2715_v10 = vadd.f32 %v8096_v12, %v2714_v21 }
 0x771   :  { %2966 = vmatmul.bf16.gmra.mxu1 %v10480_v58 }
 0x772   :  { %v2818_v60 = vpop.f32.mrf.mxu0 }
 0x778   :  { %v2729_v19 = vpop.f32.mrf.mxu3 }
 0x77a   :  { %v2820_v29 = vpop.f32.mrf.mxu0 }
 0x780   :  { %v2731_v11 = vpop.f32.mrf.mxu3 }
 0x781   :  { %2971 = vmatmul.bf16.gmra.mxu1 %v10481_v2  ;;  %v2732_v4 = vadd.f32 %v8096_v12, %v2731_v11  ;;  %v2730_v2 = vadd.f32 %v8096_v12, %v2729_v19 }
 0x791   :  { %2976 = vmatmul.bf16.gmra.mxu1 %v10482_v56 }
 0x79c   :  { %v2823_v53 = vpop.f32.mrf.mxu0 }
 0x7a2   :  { %v2734_v18 = vpop.f32.mrf.mxu3 }
 0x7a3   :  { %v2735_v8 = vadd.f32 %v8096_v12, %v2734_v18  ;;  %v2725_v18 = vadd.f32 %v8096_v12, %v2724_v3 }
 0x7a4   :  { %v2825_v0 = vpop.f32.mrf.mxu0 }
 0x7a5   :  { %v2824_v56 = vadd.f32 %v2823_v53, %v2735_v8  ;;  %v10485_v8 = vld [vmem:[#allocation63_spill] sm:$0xff] }
 0x7aa   :  { %v2736_v5 = vpop.f32.mrf.mxu3 }
 0x7ab   :  { %v2737_v57 = vadd.f32 %v8096_v12, %v2736_v5 }
 0x7ac   :  { %v2828_v6 = vpop.f32.mrf.mxu0 }
 0x7ad   :  { %v2826_v15 = vadd.f32 %v2825_v0, %v2737_v57  ;;  %v10484_v0 = vld [vmem:[#allocation65_spill] sm:$0xff] }
 0x7af   :  { %v2862_v35 = vmax.f32 %v2826_v15, 0.0 }
 0x7b2   :  { %v2739_v28 = vpop.f32.mrf.mxu3 }
 0x7b3   :  { %v2740_v33 = vadd.f32 %v8096_v12, %v2739_v28  ;;  %v2821_v28 = vadd.f32 %v2820_v29, %v2732_v4  ;;  %v2814_v29 = vadd.f32 %v2813_v44, %v2725_v18  ;;  %v2804_v18 = vadd.f32 %v8426_v48, %v2715_v10  ;;  %v10492_v48 = vld [vmem:[#allocation56_spill] sm:$0xff] }
 0x7b4   :  { %v2830_v58 = vpop.f32.mrf.mxu0  ;;  %v10496_v10 = vld [vmem:[#allocation52_spill] sm:$0xff] }
 0x7b5   :  { %v2829_v14 = vadd.f32 %v2828_v6, %v2740_v33  ;;  %v2819_v6 = vadd.f32 %v2818_v60, %v2730_v2  ;;  %v2861_v33 = vmax.f32 %v2824_v56, 0.0  ;;  %v2860_v19 = vmax.f32 %v2821_v28, 0.0 }
 0x7b6   :  { %v2717_v60 = vadd.f32 %v8096_v12, %v2716_v47  ;;  %v2857_v63 = vmax.f32 %v2814_v29, 0.0  ;;  %v10489_v47 = vld [vmem:[#allocation59_spill] sm:$0xff]  ;;  %v2852_v29 = vmax.f32 %v2801_v25, 0.0  ;;  %v3093_v25 = vld [vmem:[%s10085_s8 + $0x10] sm:$0xff] }
 0x7b7   :  { %v2863_v50 = vmax.f32 %v2829_v14, 0.0  ;;  %v2894_v14 = vmul.f32 %v2862_v35, %v10485_v8  ;;  %v2859_v4 = vmax.f32 %v2819_v6, 0.0  ;;  %v10488_v35 = vld [vmem:[#allocation60_spill] sm:$0xff] }
 0x7b8   :  { %v2806_v44 = vadd.f32 %v8428_v27, %v2717_v60 }
 0x7b9   :  { %v2895_v11 = vmul.f32 %v2863_v50, %v10483_v36  ;;  %v2858_v50 = vmax.f32 %v2816_v43, 0.0  ;;  %v2891_v56 = vmul.f32 %v2859_v4, %v10488_v35  ;;  %v2710_v43 = vadd.f32 %v8096_v12, %v8419_v45 }
 0x7ba   :  { %v2741_v7 = vpop.f32.mrf.mxu3 }
 0x7bb   :  { %v2742_v20 = vadd.f32 %v8096_v12, %v2741_v7  ;;  %v2722_v7 = vadd.f32 %v8096_v12, %v2721_v31  ;;  %v2809_v31 = vadd.f32 %v2808_v37, %v2720_v1  ;;  %v10490_v37 = vld [vmem:[#allocation58_spill] sm:$0xff]  ;;  %v2799_v45 = vadd.f32 %v8417_v23, %v2710_v43  ;;  %v10502_v43 = vld [vmem:[#allocation9_spill] sm:$0xff] }
 0x7bc   :  { %v2889_v6 = vmul.f32 %v2857_v63, %v10490_v37 }
 0x7bd   :  { %v2831_v16 = vadd.f32 %v2830_v58, %v2742_v20  ;;  %v2811_v15 = vadd.f32 %v2810_v24, %v2722_v7  ;;  %v10487_v58 = vld [vmem:[#allocation61_spill] sm:$0xff]  ;;  %v2890_v24 = vmul.f32 %v2858_v50, %v10489_v47  ;;  %v2855_v21 = vmax.f32 %v2809_v31, 0.0 }
 0x7be   :  { %v2892_v2 = vmul.f32 %v2860_v19, %v10487_v58  ;;  %v2705_v19 = vadd.f32 %v8096_v12, %v8410_v30  ;;  %v2851_v60 = vmax.f32 %v2799_v45, 0.0  ;;  %v10495_v30 = vld [vmem:[#allocation53_spill] sm:$0xff]  ;;  %v10506_v45 = vld [vmem:[#allocation26_spill] sm:$0xff] }
 0x7bf   :  { %v2864_v5 = vmax.f32 %v2831_v16, 0.0  ;;  %v10486_v16 = vld [vmem:[#allocation62_spill] sm:$0xff]  ;;  %v2856_v28 = vmax.f32 %v2811_v15, 0.0  ;;  %v2909_v27 = vpack.c.bf16 %v2890_v24, %v2889_v6  ;;  %v2884_v23 = vmul.f32 %v2852_v29, %v10495_v30  ;;  %v10501_v24 = vld [vmem:[#allocation7_spill] sm:$0xff]  ;;  %v10504_v6 = vld [vmem:[#allocation13_spill] sm:$0xff] }
 0x7c0   :  { %v2893_v3 = vmul.f32 %v2861_v33, %v10486_v16  ;;  %v2707_v33 = vadd.f32 %v8096_v12, %v8414_v17  ;;  %v10493_v17 = vld [vmem:[#allocation55_spill] sm:$0xff]  ;;  %v2794_v42 = vadd.f32 %v8407_v52, %v2705_v19  ;;  %v10494_v15 = vld [vmem:[#allocation54_spill] sm:$0xff]  ;;  %v2883_v31 = vmul.f32 %v2851_v60, %v10496_v10  ;;  %v10508_v29 = vld [vmem:[#allocation28_spill] sm:$0xff] }
 0x7c1   :  { %v2896_v57 = vmul.f32 %v2864_v5, %v10484_v0  ;;  %v2910_v5 = vpack.c.bf16 %v2892_v2, %v2891_v56  ;;  %v10499_v52 = vld [vmem:[#allocation3_spill] sm:$0xff] }
 0x7c2   :  { %v2911_v20 = vpack.c.bf16 %v2894_v14, %v2893_v3  ;;  %v2887_v14 = vmul.f32 %v2855_v21, %v10492_v48  ;;  %v2796_v1 = vadd.f32 %v8412_v61, %v2707_v33  ;;  %v2849_v2 = vmax.f32 %v2794_v42, 0.0  ;;  %v10497_v61 = vld [vmem:[#allocation51_spill] sm:$0xff]  ;;  %v3094_v21 = vld [vmem:[%s10085_s8 + $0x18] sm:$0xff] }
 0x7c3   :  { %v2912_v53 = vpack.c.bf16 %v2896_v57, %v2895_v11  ;;  %v2854_v11 = vmax.f32 %v2806_v44, 0.0  ;;  %v10491_v57 = vld [vmem:[#allocation57_spill] sm:$0xff]  ;;  %v2906_v63 = vpack.c.bf16 %v2884_v23, %v2883_v31  ;;  %3203 = vmatpush.msra.mxu3 %v3094_v21  ;;  %v10505_v33 = vld [vmem:[#allocation15_spill] sm:$0xff] }
 0x7c4   :  { %v2888_v7 = vmul.f32 %v2856_v28, %v10491_v57  ;;  %v2881_v44 = vmul.f32 %v2849_v2, %v10498_v9  ;;  %v10511_v2 = vld [vmem:[#allocation21_spill] sm:$0xff] }
 0x7c5   :  { %3002 = vmatpush.bf16.msra.mxu2 %v2912_v53  ;;  %v2853_v53 = vmax.f32 %v2804_v18, 0.0  ;;  %v2886_v3 = vmul.f32 %v2854_v11, %v10493_v17  ;;  %v10503_v18 = vld [vmem:[#allocation11_spill] sm:$0xff]  ;;  %v2922_v11 = vpop.f32.mrf.mxu1  ;;  %3204 = vmatpush.msra.mxu3 %v3093_v25 }
 0x7c6   :  { %v2908_v4 = vpack.c.bf16 %v2888_v7, %v2887_v14  ;;  %v3091_v7 = vld [vmem:[%s10085_s8] sm:$0xff] }
 0x7c7   :  { %v2885_v50 = vmul.f32 %v2853_v53, %v10494_v15  ;;  %v10507_v53 = vld [vmem:[#allocation17_spill] sm:$0xff] }
 0x7c9   :  { %3003 = vmatpush.bf16.msra.mxu2 %v2911_v20  ;;  %v2850_v20 = vmax.f32 %v2796_v1, 0.0  ;;  %v2907_v12 = vpack.c.bf16 %v2886_v3, %v2885_v50 }
 0x7cb   :  { %v2882_v56 = vmul.f32 %v2850_v20, %v10497_v61  ;;  %v10510_v20 = vld [vmem:[#allocation30_spill] sm:$0xff] }
 0x7cd   :  { %3004 = vmatpush.bf16.msra.mxu2 %v2910_v5  ;;  %v2905_v28 = vpack.c.bf16 %v2882_v56, %v2881_v44  ;;  %v10500_v5 = vld [vmem:[#allocation5_spill] sm:$0xff]  ;;  %v2924_v19 = vpop.f32.mrf.mxu1  ;;  %2981 = vmatmul.bf16.gmra.mxu1 %v10506_v45 }
 0x7d1   :  { %3005 = vmatpush.bf16.msra.mxu2 %v2909_v27  ;;  %v3092_v27 = vld [vmem:[%s10085_s8 + $0x8] sm:$0xff] }
 0x7d2   :  { %3205 = vmatpush.msra.mxu3 %v3092_v27 }
 0x7d4   :  { %3206 = vmatpush.msra.mxu3 %v3091_v7 }
 0x7d5   :  { %3006 = vmatpush.bf16.msra.mxu2 %v2908_v4  ;;  %v2927_v14 = vpop.f32.mrf.mxu1  ;;  %v10509_v4 = vld [vmem:[#allocation19_spill] sm:$0xff] }
 0x7d9   :  { %3007 = vmatpush.bf16.msra.mxu2 %v2907_v12 }
 0x7dd   :  { %3008 = vmatpush.bf16.msra.mxu2 %v2906_v63  ;;  %v2929_v1 = vpop.f32.mrf.mxu1  ;;  %2986 = vmatmul.bf16.gmra.mxu1 %v10508_v29 }
 0x7e1   :  { %3009 = vmatpush.bf16.msra.mxu2 %v2905_v28  ;;  %v10512_v28 = vld [vmem:[#allocation32_spill] sm:$0xff] }
 0x7e4   :  { %3010 = vmatmul.bf16.vlgmr.msra.gmra.mxu2 %v10499_v52 }
 0x7e5   :  { %v2932_v3 = vpop.f32.mrf.mxu1 }
 0x7ed   :  { %v2934_v50 = vpop.f32.mrf.mxu1  ;;  %2991 = vmatmul.bf16.gmra.mxu1 %v10510_v20  ;;  %v10516_v20 = vld [vmem:[#allocation29_spill] sm:$0xff] }
 0x7f4   :  { %3015 = vmatmul.bf16.gmra.mxu2 %v10500_v5 }
 0x7f5   :  { %v2937_v31 = vpop.f32.mrf.mxu1 }
 0x7fd   :  { %v2939_v44 = vpop.f32.mrf.mxu1  ;;  %2996 = vmatmul.bf16.gmra.mxu1 %v10512_v28 }
 0x804   :  { %3020 = vmatmul.bf16.gmra.mxu2 %v10501_v24  ;;  %v10513_v24 = vld [vmem:[#allocation23_spill] sm:$0xff] }
 0x814   :  { %3025 = vmatmul.bf16.gmra.mxu2 %v10502_v43  ;;  %v2942_v43 = vpop.f32.mrf.mxu1 }
 0x824   :  { %3030 = vmatmul.bf16.gmra.mxu2 %v10503_v18 }
 0x834   :  { %3035 = vmatmul.bf16.gmra.mxu2 %v10504_v6  ;;  %v2944_v6 = vpop.f32.mrf.mxu1 }
 0x83c   :  { %v2947_v27 = vpop.f32.mrf.mxu1 }
 0x844   :  { %3040 = vmatmul.bf16.gmra.mxu2 %v10505_v33  ;;  %v2949_v45 = vpop.f32.mrf.mxu1 }
 0x84c   :  { %v2952_v29 = vpop.f32.mrf.mxu1 }
 0x854   :  { %3045 = vmatmul.bf16.gmra.mxu2 %v10507_v53 }
 0x864   :  { %3050 = vmatmul.bf16.gmra.mxu2 %v10509_v4 }
 0x867   :  { %v3011_v42 = vpop.f32.mrf.mxu2 }
 0x868   :  { %v3012_v60 = vadd.f32 %v3011_v42, %v2922_v11  ;;  %v10514_v11 = vld [vmem:[#allocation25_spill] sm:$0xff]  ;;  %v2954_v42 = vpop.f32.mrf.mxu1 }
 0x86a   :  { %5728 = vmatmul.msk.f32.vlgmr.msra.gmra.mxu3 %vm1058_vm1, %v3012_v60 }
 0x86f   :  { %v3013_v12 = vpop.f32.mrf.mxu2 }
 0x870   :  { %v3014_v23 = vadd.f32 %v3013_v12, %v2924_v19  ;;  %v2957_v12 = vpop.f32.mrf.mxu1 }
 0x872   :  { %5729 = vmatmul.msk.f32.gmra.mxu3 %vm1058_vm1, %v3014_v23 }
 0x874   :  { %3055 = vmatmul.bf16.gmra.mxu2 %v10511_v2 }
 0x877   :  { %v3016_v63 = vpop.f32.mrf.mxu2 }
 0x878   :  { %v3017_v56 = vadd.f32 %v3016_v63, %v2927_v14  ;;  %v2959_v63 = vpop.f32.mrf.mxu1 }
 0x87a   :  { %5730 = vmatmul.msk.f32.gmra.mxu3 %vm1058_vm1, %v3017_v56 }
 0x87f   :  { %v3018_v52 = vpop.f32.mrf.mxu2 }
 0x880   :  { %v3019_v5 = vadd.f32 %v3018_v52, %v2929_v1  ;;  %v10515_v1 = vld [vmem:[#allocation27_spill] sm:$0xff] }
 0x882   :  { %5731 = vmatmul.msk.f32.gmra.mxu3 %vm1058_vm1, %v3019_v5  ;;  %v2962_v5 = vpop.f32.mrf.mxu1 }
 0x884   :  { %3060 = vmatmul.bf16.gmra.mxu2 %v10513_v24 }
 0x887   :  { %v3021_v18 = vpop.f32.mrf.mxu2 }
 0x888   :  { %v3022_v21 = vadd.f32 %v3021_v18, %v2932_v3  ;;  %v3407_v18 = vld [vmem:[%s10087_s10 + $0x18] sm:$0xff] }
 0x889   :  { %3516 = vmatpush.msra.mxu0 %v3407_v18  ;;  %5910 = vmatpush.msra.mxu1 %v3407_v18 }
 0x88a   :  { %5732 = vmatmul.msk.f32.gmra.mxu3 %vm1058_vm1, %v3022_v21  ;;  %v3406_v21 = vld [vmem:[%s10087_s10 + $0x10] sm:$0xff] }
 0x88b   :  { %3517 = vmatpush.msra.mxu0 %v3406_v21  ;;  %5911 = vmatpush.msra.mxu1 %v3406_v21 }
 0x88f   :  { %v3023_v33 = vpop.f32.mrf.mxu2 }
 0x890   :  { %v3024_v25 = vadd.f32 %v3023_v33, %v2934_v50  ;;  %v10518_v33 = vld [vmem:[#allocation33_spill] sm:$0xff] }
 0x892   :  { %5733 = vmatmul.msk.f32.gmra.mxu3 %vm1058_vm1, %v3024_v25  ;;  %v3405_v25 = vld [vmem:[%s10087_s10 + $0x8] sm:$0xff] }
 0x893   :  { %3518 = vmatpush.msra.mxu0 %v3405_v25  ;;  %5912 = vmatpush.msra.mxu1 %v3405_v25 }
 0x894   :  { %3065 = vmatmul.bf16.gmra.mxu2 %v10514_v11  ;;  %v3404_v11 = vld [vmem:[%s10087_s10] sm:$0xff] }
 0x895   :  { %3519 = vmatpush.msra.mxu0 %v3404_v11  ;;  %5913 = vmatpush.msra.mxu1 %v3404_v11 }
 0x897   :  { %v3026_v7 = vpop.f32.mrf.mxu2 }
 0x898   :  { %v3027_v19 = vadd.f32 %v3026_v7, %v2937_v31 }
 0x89a   :  { %5734 = vmatmul.msk.f32.gmra.mxu3 %vm1058_vm1, %v3027_v19 }
 0x89f   :  { %v3028_v53 = vpop.f32.mrf.mxu2 }
 0x8a0   :  { %v3029_v14 = vadd.f32 %v3028_v53, %v2939_v44  ;;  %v10517_v44 = vld [vmem:[#allocation31_spill] sm:$0xff] }
 0x8a2   :  { %5735 = vmatmul.msk.f32.gmra.mxu3 %vm1058_vm1, %v3029_v14 }
 0x8a4   :  { %3070 = vmatmul.bf16.gmra.mxu2 %v10515_v1 }
 0x8a7   :  { %v3031_v4 = vpop.f32.mrf.mxu2 }
 0x8a8   :  { %v3032_v3 = vadd.f32 %v3031_v4, %v2942_v43  ;;  %v8540_v4 = vld [vmem:[%s10086_s9] ss:$0 sm:$0xff] }
 0x8aa   :  { %5736 = vmatmul.msk.f32.gmra.mxu3 %vm1058_vm1, %v3032_v3 }
 0x8af   :  { %v3033_v60 = vpop.f32.mrf.mxu2 }
 0x8b0   :  { %v3034_v50 = vadd.f32 %v3033_v60, %v2944_v6  ;;  %v2964_v6 = vpop.f32.mrf.mxu1 }
 0x8b2   :  { %5737 = vmatmul.msk.f32.gmra.mxu3 %vm1058_vm1, %v3034_v50 }
 0x8b4   :  { %3075 = vmatmul.bf16.gmra.mxu2 %v10516_v20 }
 0x8b7   :  { %v3036_v23 = vpop.f32.mrf.mxu2 }
 0x8b8   :  { %v3037_v2 = vadd.f32 %v3036_v23, %v2947_v27  ;;  %v2967_v19 = vpop.f32.mrf.mxu1 }
 0x8ba   :  { %5738 = vmatmul.msk.f32.gmra.mxu3 %vm1058_vm1, %v3037_v2 }
 0x8bf   :  { %v3038_v31 = vpop.f32.mrf.mxu2 }
 0x8c0   :  { %v3039_v56 = vadd.f32 %v3038_v31, %v2949_v45  ;;  %v2969_v1 = vpop.f32.mrf.mxu1 }
 0x8c2   :  { %5739 = vmatmul.msk.f32.gmra.mxu3 %vm1058_vm1, %v3039_v56 }
 0x8c4   :  { %3080 = vmatmul.bf16.gmra.mxu2 %v10517_v44 }
 0x8c7   :  { %v3041_v28 = vpop.f32.mrf.mxu2 }
 0x8c8   :  { %v3042_v52 = vadd.f32 %v3041_v28, %v2952_v29 }
 0x8ca   :  { %5740 = vmatmul.msk.f32.gmra.mxu3 %vm1058_vm1, %v3042_v52 }
 0x8cf   :  { %v3043_v24 = vpop.f32.mrf.mxu2 }
 0x8d0   :  { %v3044_v43 = vadd.f32 %v3043_v24, %v2954_v42 }
 0x8d2   :  { %5741 = vmatmul.msk.f32.gmra.mxu3 %vm1058_vm1, %v3044_v43 }
 0x8d4   :  { %3085 = vmatmul.bf16.gmra.mxu2 %v10518_v33 }
 0x8d7   :  { %v3046_v27 = vpop.f32.mrf.mxu2 }
 0x8d8   :  { %v3047_v7 = vadd.f32 %v3046_v27, %v2957_v12  ;;  %v2972_v12 = vpop.f32.mrf.mxu1 }
 0x8da   :  { %5742 = vmatmul.msk.f32.gmra.mxu3 %vm1058_vm1, %v3047_v7 }
 0x8df   :  { %v3048_v45 = vpop.f32.mrf.mxu2 }
 0x8e0   :  { %v3049_v53 = vadd.f32 %v3048_v45, %v2959_v63 }
 0x8e2   :  { %5743 = vmatmul.msk.f32.gmra.mxu3 %vm1058_vm1, %v3049_v53 }
 0x8e7   :  { %v3051_v14 = vpop.f32.mrf.mxu2 }
 0x8e8   :  { %v3052_v29 = vadd.f32 %v3051_v14, %v2962_v5 }
 0x8ea   :  { %5744 = vmatmul.msk.f32.gmra.mxu3 %vm1058_vm1, %v3052_v29 }
 0x8ed   :  { %v3208_v3 = vpop.f32.mrf.mxu3 }
 0x8ee   :  { %v3304_v42 = vmul.f32 %v3208_v3, %v10470_v49  ;;  %v2974_v49 = vpop.f32.mrf.mxu1 }
 0x8ef   :  { %v3053_v60 = vpop.f32.mrf.mxu2 }
 0x8f0   :  { %v3340_v50 = vadd.f32 %v8540_v4, %v3304_v42  ;;  %v3054_v20 = vadd.f32 %v3053_v60, %v2964_v6 }
 0x8f2   :  { %v3372_v23 = vmax.f32 %v3340_v50, 0.0  ;;  %5745 = vmatmul.msk.f32.gmra.mxu3 %vm1058_vm1, %v3054_v20 }
 0x8f4   :  { %5760 = vmatmul.msk.f32.vlgmr.msra.gmra.mxu0 %vm1058_vm1, %v3372_v23 }
 0x8f5   :  { %v3211_v2 = vpop.f32.mrf.mxu3 }
 0x8f6   :  { %v3305_v31 = vmul.f32 %v3211_v2, %v10469_v38  ;;  %v2977_v6 = vpop.f32.mrf.mxu1 }
 0x8f7   :  { %v3056_v63 = vpop.f32.mrf.mxu2 }
 0x8f8   :  { %v3341_v56 = vadd.f32 %v8540_v4, %v3305_v31  ;;  %v3057_v44 = vadd.f32 %v3056_v63, %v2967_v19 }
 0x8fa   :  { %v3373_v28 = vmax.f32 %v3341_v56, 0.0  ;;  %5746 = vmatmul.msk.f32.gmra.mxu3 %vm1058_vm1, %v3057_v44 }
 0x8fc   :  { %5761 = vmatmul.msk.f32.gmra.mxu0 %vm1058_vm1, %v3373_v28 }
 0x8fd   :  { %v3214_v52 = vpop.f32.mrf.mxu3 }
 0x8fe   :  { %v3306_v5 = vmul.f32 %v3214_v52, %v10468_v13  ;;  %v2979_v53 = vpop.f32.mrf.mxu1 }
 0x8ff   :  { %v3058_v24 = vpop.f32.mrf.mxu2 }
 0x900   :  { %v3342_v43 = vadd.f32 %v8540_v4, %v3306_v5  ;;  %v3059_v18 = vadd.f32 %v3058_v24, %v2969_v1 }
 0x902   :  { %v3374_v21 = vmax.f32 %v3342_v43, 0.0  ;;  %5747 = vmatmul.msk.f32.gmra.mxu3 %vm1058_vm1, %v3059_v18 }
 0x904   :  { %5762 = vmatmul.msk.f32.gmra.mxu0 %vm1058_vm1, %v3374_v21 }
 0x905   :  { %v3217_v38 = vpop.f32.mrf.mxu3 }
 0x906   :  { %v3307_v33 = vmul.f32 %v3217_v38, %v10467_v26  ;;  %v2982_v20 = vpop.f32.mrf.mxu1 }
 0x907   :  { %v3061_v25 = vpop.f32.mrf.mxu2 }
 0x908   :  { %v3343_v11 = vadd.f32 %v8540_v4, %v3307_v33  ;;  %v3062_v27 = vadd.f32 %v3061_v25, %v2972_v12 }
 0x90a   :  { %v3375_v7 = vmax.f32 %v3343_v11, 0.0  ;;  %5748 = vmatmul.msk.f32.gmra.mxu3 %vm1058_vm1, %v3062_v27 }
 0x90c   :  { %5763 = vmatmul.msk.f32.gmra.mxu0 %vm1058_vm1, %v3375_v7 }
 0x90d   :  { %v3220_v13 = vpop.f32.mrf.mxu3 }
 0x90e   :  { %v3308_v19 = vmul.f32 %v3220_v13, %v10466_v41 }
 0x90f   :  { %v3063_v45 = vpop.f32.mrf.mxu2 }
 0x910   :  { %v3344_v14 = vadd.f32 %v8540_v4, %v3308_v19  ;;  %v3064_v1 = vadd.f32 %v3063_v45, %v2974_v49 }
 0x912   :  { %v3376_v29 = vmax.f32 %v3344_v14, 0.0  ;;  %5749 = vmatmul.msk.f32.gmra.mxu3 %vm1058_vm1, %v3064_v1 }
 0x914   :  { %5764 = vmatmul.msk.f32.gmra.mxu0 %vm1058_vm1, %v3376_v29 }
 0x915   :  { %v3223_v26 = vpop.f32.mrf.mxu3 }
 0x916   :  { %v3309_v3 = vmul.f32 %v3223_v26, %v10465_v34  ;;  %v2984_v34 = vpop.f32.mrf.mxu1 }
 0x917   :  { %v3066_v42 = vpop.f32.mrf.mxu2 }
 0x918   :  { %v3345_v60 = vadd.f32 %v8540_v4, %v3309_v3  ;;  %v3067_v50 = vadd.f32 %v3066_v42, %v2977_v6 }
 0x91a   :  { %v3377_v12 = vmax.f32 %v3345_v60, 0.0  ;;  %5750 = vmatmul.msk.f32.gmra.mxu3 %vm1058_vm1, %v3067_v50 }
 0x91c   :  { %5765 = vmatmul.msk.f32.gmra.mxu0 %vm1058_vm1, %v3377_v12 }
 0x91d   :  { %v3226_v41 = vpop.f32.mrf.mxu3 }
 0x91e   :  { %v3310_v23 = vmul.f32 %v3226_v41, %v10464_v22  ;;  %v2987_v43 = vpop.f32.mrf.mxu1 }
 0x91f   :  { %v3068_v2 = vpop.f32.mrf.mxu2 }
 0x920   :  { %v3346_v31 = vadd.f32 %v8540_v4, %v3310_v23  ;;  %v3069_v63 = vadd.f32 %v3068_v2, %v2979_v53 }
 0x922   :  { %v3378_v56 = vmax.f32 %v3346_v31, 0.0  ;;  %5751 = vmatmul.msk.f32.gmra.mxu3 %vm1058_vm1, %v3069_v63 }
 0x924   :  { %5766 = vmatmul.msk.f32.gmra.mxu0 %vm1058_vm1, %v3378_v56 }
 0x925   :  { %v3229_v44 = vpop.f32.mrf.mxu3 }
 0x926   :  { %v3311_v28 = vmul.f32 %v3229_v44, %v10463_v51  ;;  %v2989_v27 = vpop.f32.mrf.mxu1 }
 0x927   :  { %v3071_v49 = vpop.f32.mrf.mxu2 }
 0x928   :  { %v3347_v52 = vadd.f32 %v8540_v4, %v3311_v28  ;;  %v3072_v5 = vadd.f32 %v3071_v49, %v2982_v20 }
 0x92a   :  { %v3379_v24 = vmax.f32 %v3347_v52, 0.0  ;;  %5752 = vmatmul.msk.f32.gmra.mxu3 %vm1058_vm1, %v3072_v5 }
 0x92c   :  { %5767 = vmatmul.msk.f32.gmra.mxu0 %vm1058_vm1, %v3379_v24 }
 0x92d   :  { %v3232_v22 = vpop.f32.mrf.mxu3 }
 0x92e   :  { %v3312_v18 = vmul.f32 %v3232_v22, %v10462_v39  ;;  %v2992_v29 = vpop.f32.mrf.mxu1 }
 0x92f   :  { %v3073_v21 = vpop.f32.mrf.mxu2 }
 0x930   :  { %v3348_v38 = vadd.f32 %v8540_v4, %v3312_v18  ;;  %v3074_v6 = vadd.f32 %v3073_v21, %v2984_v34 }
 0x932   :  { %v3380_v33 = vmax.f32 %v3348_v38, 0.0  ;;  %5753 = vmatmul.msk.f32.gmra.mxu3 %vm1058_vm1, %v3074_v6 }
 0x934   :  { %5768 = vmatmul.msk.f32.gmra.mxu0 %vm1058_vm1, %v3380_v33 }
 0x935   :  { %v3235_v51 = vpop.f32.mrf.mxu3 }
 0x936   :  { %v3313_v25 = vmul.f32 %v3235_v51, %v10461_v59 }
 0x937   :  { %v3076_v11 = vpop.f32.mrf.mxu2 }
 0x938   :  { %v3349_v7 = vadd.f32 %v8540_v4, %v3313_v25  ;;  %v3077_v13 = vadd.f32 %v3076_v11, %v2987_v43 }
 0x93a   :  { %v3381_v19 = vmax.f32 %v3349_v7, 0.0  ;;  %5754 = vmatmul.msk.f32.gmra.mxu3 %vm1058_vm1, %v3077_v13 }
 0x93c   :  { %5769 = vmatmul.msk.f32.gmra.mxu0 %vm1058_vm1, %v3381_v19 }
 0x93d   :  { %v3238_v39 = vpop.f32.mrf.mxu3 }
 0x93e   :  { %v3314_v45 = vmul.f32 %v3238_v39, %v10460_v46  ;;  %v2994_v46 = vpop.f32.mrf.mxu1 }
 0x93f   :  { %v3078_v53 = vpop.f32.mrf.mxu2 }
 0x940   :  { %v3350_v14 = vadd.f32 %v8540_v4, %v3314_v45  ;;  %v3079_v1 = vadd.f32 %v3078_v53, %v2989_v27 }
 0x942   :  { %v3382_v26 = vmax.f32 %v3350_v14, 0.0  ;;  %5755 = vmatmul.msk.f32.gmra.mxu3 %vm1058_vm1, %v3079_v1 }
 0x944   :  { %5770 = vmatmul.msk.f32.gmra.mxu0 %vm1058_vm1, %v3382_v26 }
 0x945   :  { %v3241_v59 = vpop.f32.mrf.mxu3 }
 0x946   :  { %v3315_v3 = vmul.f32 %v3241_v59, %v10459_v55  ;;  %v2997_v56 = vpop.f32.mrf.mxu1 }
 0x947   :  { %v3081_v42 = vpop.f32.mrf.mxu2 }
 0x948   :  { %v3351_v60 = vadd.f32 %v8540_v4, %v3315_v3  ;;  %v3082_v50 = vadd.f32 %v3081_v42, %v2992_v29 }
 0x94a   :  { %v3383_v20 = vmax.f32 %v3351_v60, 0.0  ;;  %5756 = vmatmul.msk.f32.gmra.mxu3 %vm1058_vm1, %v3082_v50 }
 0x94c   :  { %5771 = vmatmul.msk.f32.gmra.mxu0 %vm1058_vm1, %v3383_v20 }
 0x94d   :  { %v3244_v12 = vpop.f32.mrf.mxu3 }
 0x94e   :  { %v3316_v41 = vmul.f32 %v3244_v12, %v10458_v40  ;;  %v2999_v24 = vpop.f32.mrf.mxu1 }
 0x94f   :  { %v3083_v23 = vpop.f32.mrf.mxu2 }
 0x950   :  { %v3352_v2 = vadd.f32 %v8540_v4, %v3316_v41  ;;  %v3084_v31 = vadd.f32 %v3083_v23, %v2994_v46 }
 0x952   :  { %v3384_v63 = vmax.f32 %v3352_v2, 0.0  ;;  %5757 = vmatmul.msk.f32.gmra.mxu3 %vm1058_vm1, %v3084_v31 }
 0x954   :  { %5772 = vmatmul.msk.f32.gmra.mxu0 %vm1058_vm1, %v3384_v63 }
 0x955   :  { %v3247_v55 = vpop.f32.mrf.mxu3 }
 0x956   :  { %v3317_v34 = vmul.f32 %v3247_v55, %v10457_v62 }
 0x957   :  { %v3086_v44 = vpop.f32.mrf.mxu2 }
 0x958   :  { %v3353_v28 = vadd.f32 %v8540_v4, %v3317_v34  ;;  %v3087_v49 = vadd.f32 %v3086_v44, %v2997_v56 }
 0x95a   :  { %v3385_v52 = vmax.f32 %v3353_v28, 0.0  ;;  %5758 = vmatmul.msk.f32.gmra.mxu3 %vm1058_vm1, %v3087_v49 }
 0x95c   :  { %5773 = vmatmul.msk.f32.gmra.mxu0 %vm1058_vm1, %v3385_v52 }
 0x95d   :  { %v3250_v40 = vpop.f32.mrf.mxu3 }
 0x95e   :  { %v3318_v5 = vmul.f32 %v3250_v40, %v10455_v54 }
 0x95f   :  { %v3088_v22 = vpop.f32.mrf.mxu2 }
 0x960   :  { %v3354_v43 = vadd.f32 %v8540_v4, %v3318_v5  ;;  %v3089_v18 = vadd.f32 %v3088_v22, %v2999_v24 }
 0x962   :  { %v3386_v21 = vmax.f32 %v3354_v43, 0.0  ;;  %5759 = vmatmul.msk.f32.gmra.mxu3 %vm1058_vm1, %v3089_v18 }
 0x964   :  { %5774 = vmatmul.msk.f32.gmra.mxu0 %vm1058_vm1, %v3386_v21 }
 0x965   :  { %v3253_v62 = vpop.f32.mrf.mxu3 }
 0x966   :  { %v3319_v38 = vmul.f32 %v3253_v62, %v10456_v32 }
 0x968   :  { %v3355_v6 = vadd.f32 %v8540_v4, %v3319_v38 }
 0x96a   :  { %v3387_v33 = vmax.f32 %v3355_v6, 0.0 }
 0x96c   :  { %5775 = vmatmul.msk.f32.gmra.mxu0 %vm1058_vm1, %v3387_v33 }
 0x96d   :  { %v3256_v51 = vpop.f32.mrf.mxu3 }
 0x96e   :  { %v3320_v54 = vmul.f32 %v3256_v51, %v10498_v9 }
 0x970   :  { %v3356_v25 = vadd.f32 %v8540_v4, %v3320_v54 }
 0x971   :  { %v8607_v11 = vpop.f32.mrf.mxu0 }
 0x972   :  { %v3388_v27 = vmax.f32 %v3356_v25, 0.0 }
 0x974   :  { %5776 = vmatmul.msk.f32.gmra.mxu0 %vm1058_vm1, %v3388_v27  ;;  %v3619_v27 = vld [vmem:[%s10088_s11 + $0x10] sm:$0xff] }
 0x975   :  { %v3259_v7 = vpop.f32.mrf.mxu3 }
 0x976   :  { %v3321_v13 = vmul.f32 %v3259_v7, %v10497_v61 }
 0x978   :  { %v3357_v32 = vadd.f32 %v8540_v4, %v3321_v13 }
 0x979   :  { %v8612_v19 = vpop.f32.mrf.mxu0 }
 0x97a   :  { %v3389_v39 = vmax.f32 %v3357_v32, 0.0 }
 0x97c   :  { %5777 = vmatmul.msk.f32.gmra.mxu0 %vm1058_vm1, %v3389_v39  ;;  %v3618_v39 = vld [vmem:[%s10088_s11 + $0x8] sm:$0xff] }
 0x97d   :  { %v3262_v45 = vpop.f32.mrf.mxu3 }
 0x97e   :  { %v3322_v9 = vmul.f32 %v3262_v45, %v10496_v10 }
 0x980   :  { %v3358_v53 = vadd.f32 %v8540_v4, %v3322_v9  ;;  %v3617_v9 = vld [vmem:[%s10088_s11] sm:$0xff] }
 0x981   :  { %v8617_v14 = vpop.f32.mrf.mxu0 }
 0x982   :  { %v3390_v1 = vmax.f32 %v3358_v53, 0.0 }
 0x984   :  { %5778 = vmatmul.msk.f32.gmra.mxu0 %vm1058_vm1, %v3390_v1 }
 0x985   :  { %v3265_v29 = vpop.f32.mrf.mxu3 }
 0x986   :  { %v3323_v61 = vmul.f32 %v3265_v29, %v10495_v30 }
 0x988   :  { %v3359_v26 = vadd.f32 %v8540_v4, %v3323_v61 }
 0x989   :  { %v8622_v59 = vpop.f32.mrf.mxu0 }
 0x98a   :  { %v3391_v3 = vmax.f32 %v3359_v26, 0.0 }
 0x98c   :  { %5779 = vmatmul.msk.f32.gmra.mxu0 %vm1058_vm1, %v3391_v3 }
 0x98d   :  { %v3268_v42 = vpop.f32.mrf.mxu3 }
 0x98e   :  { %v3324_v10 = vmul.f32 %v3268_v42, %v10494_v15 }
 0x990   :  { %v3360_v60 = vadd.f32 %v8540_v4, %v3324_v10 }
 0x991   :  { %v8627_v50 = vpop.f32.mrf.mxu0 }
 0x992   :  { %v3392_v20 = vmax.f32 %v3360_v60, 0.0 }
 0x994   :  { %5780 = vmatmul.msk.f32.gmra.mxu0 %vm1058_vm1, %v3392_v20 }
 0x995   :  { %v3271_v46 = vpop.f32.mrf.mxu3 }
 0x996   :  { %v3325_v30 = vmul.f32 %v3271_v46, %v10493_v17 }
 0x998   :  { %v3361_v12 = vadd.f32 %v8540_v4, %v3325_v30 }
 0x999   :  { %v8632_v41 = vpop.f32.mrf.mxu0 }
 0x99a   :  { %v3393_v23 = vmax.f32 %v3361_v12, 0.0 }
 0x99c   :  { %5781 = vmatmul.msk.f32.gmra.mxu0 %vm1058_vm1, %v3393_v23 }
 0x99d   :  { %v3274_v2 = vpop.f32.mrf.mxu3 }
 0x99e   :  { %v3326_v15 = vmul.f32 %v3274_v2, %v10492_v48 }
 0x9a0   :  { %v3362_v31 = vadd.f32 %v8540_v4, %v3326_v15  ;;  %v4024_v15 = vpack.c.bf16 %v8632_v41, %v8627_v50 }
 0x9a1   :  { %v8637_v63 = vpop.f32.mrf.mxu0 }
 0x9a2   :  { %v3394_v55 = vmax.f32 %v3362_v31, 0.0  ;;  %v4023_v31 = vpack.c.bf16 %v8622_v59, %v8617_v14 }
 0x9a4   :  { %5782 = vmatmul.msk.f32.gmra.mxu0 %vm1058_vm1, %v3394_v55  ;;  %v4022_v55 = vpack.c.bf16 %v8612_v19, %v8607_v11 }
 0x9a5   :  { %v3277_v56 = vpop.f32.mrf.mxu3 }
 0x9a6   :  { %v3327_v17 = vmul.f32 %v3277_v56, %v10491_v57 }
 0x9a8   :  { %v3363_v34 = vadd.f32 %v8540_v4, %v3327_v17 }
 0x9a9   :  { %v8642_v44 = vpop.f32.mrf.mxu0 }
 0x9aa   :  { %v3395_v28 = vmax.f32 %v3363_v34, 0.0 }
 0x9ac   :  { %5783 = vmatmul.msk.f32.vlgmr.msra.gmra.mxu1 %vm1058_vm1, %v3395_v28 }
 0x9ad   :  { %v3280_v49 = vpop.f32.mrf.mxu3 }
 0x9ae   :  { %v3328_v48 = vmul.f32 %v3280_v49, %v10490_v37 }
 0x9b0   :  { %v3364_v52 = vadd.f32 %v8540_v4, %v3328_v48 }
 0x9b1   :  { %v8647_v40 = vpop.f32.mrf.mxu0 }
 0x9b2   :  { %v3396_v5 = vmax.f32 %v3364_v52, 0.0 }
 0x9b4   :  { %5784 = vmatmul.msk.f32.gmra.mxu1 %vm1058_vm1, %v3396_v5 }
 0x9b5   :  { %v3283_v24 = vpop.f32.mrf.mxu3 }
 0x9b6   :  { %v3329_v57 = vmul.f32 %v3283_v24, %v10489_v47 }
 0x9b8   :  { %v3365_v22 = vadd.f32 %v8540_v4, %v3329_v57 }
 0x9b9   :  { %v8652_v43 = vpop.f32.mrf.mxu0 }
 0x9ba   :  { %v3397_v18 = vmax.f32 %v3365_v22, 0.0 }
 0x9bc   :  { %5785 = vmatmul.msk.f32.gmra.mxu1 %vm1058_vm1, %v3397_v18 }
 0x9bd   :  { %v3286_v21 = vpop.f32.mrf.mxu3 }
 0x9be   :  { %v3330_v37 = vmul.f32 %v3286_v21, %v10488_v35  ;;  %v3620_v35 = vld [vmem:[%s10088_s11 + $0x18] sm:$0xff] }
 0x9bf   :  { %3729 = vmatpush.msrb.mxu1 %v3620_v35 }
 0x9c0   :  { %v3366_v62 = vadd.f32 %v8540_v4, %v3330_v37 }
 0x9c1   :  { %v8657_v38 = vpop.f32.mrf.mxu0  ;;  %3730 = vmatpush.msrb.mxu1 %v3619_v27 }
 0x9c2   :  { %v3398_v6 = vmax.f32 %v3366_v62, 0.0 }
 0x9c3   :  { %3731 = vmatpush.msrb.mxu1 %v3618_v39 }
 0x9c4   :  { %5786 = vmatmul.msk.f32.gmra.mxu1 %vm1058_vm1, %v3398_v6 }
 0x9c5   :  { %v3289_v33 = vpop.f32.mrf.mxu3  ;;  %3732 = vmatpush.msrb.mxu1 %v3617_v9 }
 0x9c6   :  { %v3331_v47 = vmul.f32 %v3289_v33, %v10487_v58 }
 0x9c8   :  { %v3367_v51 = vadd.f32 %v8540_v4, %v3331_v47 }
 0x9c9   :  { %v8662_v54 = vpop.f32.mrf.mxu0 }
 0x9ca   :  { %v3399_v25 = vmax.f32 %v3367_v51, 0.0 }
 0x9cc   :  { %5787 = vmatmul.msk.f32.gmra.mxu1 %vm1058_vm1, %v3399_v25 }
 0x9cd   :  { %v3292_v7 = vpop.f32.mrf.mxu3 }
 0x9ce   :  { %v3332_v13 = vmul.f32 %v3292_v7, %v10486_v16 }
 0x9d0   :  { %v3368_v58 = vadd.f32 %v8540_v4, %v3332_v13 }
 0x9d1   :  { %v3557_v32 = vpop.f32.mrf.mxu0 }
 0x9d2   :  { %v3400_v45 = vmax.f32 %v3368_v58, 0.0 }
 0x9d4   :  { %5788 = vmatmul.msk.f32.gmra.mxu1 %vm1058_vm1, %v3400_v45 }
 0x9d5   :  { %v3295_v53 = vpop.f32.mrf.mxu3 }
 0x9d6   :  { %v3333_v16 = vmul.f32 %v3295_v53, %v10485_v8 }
 0x9d8   :  { %v3369_v1 = vadd.f32 %v8540_v4, %v3333_v16 }
 0x9d9   :  { %v3560_v29 = vpop.f32.mrf.mxu0 }
 0x9da   :  { %v3401_v61 = vmax.f32 %v3369_v1, 0.0  ;;  %v4028_v2 = vpack.c.bf16 %v3560_v29, %v3557_v32 }
 0x9dc   :  { %5789 = vmatmul.msk.f32.gmra.mxu1 %vm1058_vm1, %v3401_v61 }
 0x9dd   :  { %v3298_v26 = vpop.f32.mrf.mxu3 }
 0x9de   :  { %v3334_v3 = vmul.f32 %v3298_v26, %v10483_v36  ;;  %v4027_v36 = vpack.c.bf16 %v8662_v54, %v8657_v38 }
 0x9e0   :  { %v3370_v42 = vadd.f32 %v8540_v4, %v3334_v3 }
 0x9e1   :  { %v3563_v10 = vpop.f32.mrf.mxu0 }
 0x9e2   :  { %v3402_v60 = vmax.f32 %v3370_v42, 0.0 }
 0x9e4   :  { %5790 = vmatmul.msk.f32.gmra.mxu1 %vm1058_vm1, %v3402_v60 }
 0x9e5   :  { %v3301_v20 = vpop.f32.mrf.mxu3 }
 0x9e6   :  { %v3335_v46 = vmul.f32 %v3301_v20, %v10484_v0  ;;  %v4026_v0 = vpack.c.bf16 %v8652_v43, %v8647_v40 }
 0x9e8   :  { %v3371_v8 = vadd.f32 %v8540_v4, %v3335_v46  ;;  %v4025_v4 = vpack.c.bf16 %v8642_v44, %v8637_v63 }
 0x9e9   :  { %v3566_v30 = vpop.f32.mrf.mxu0 }
 0x9ea   :  { %v3403_v12 = vmax.f32 %v3371_v8, 0.0  ;;  %v4029_v23 = vpack.c.bf16 %v3566_v30, %v3563_v10 }
 0x9ec   :  { %5791 = vmatmul.msk.f32.gmra.mxu1 %vm1058_vm1, %v3403_v12  ;;  %4940 = vmatpush.bf16.msrb.mxu2 %v4029_v23 }
 0x9f0   :  { %4941 = vmatpush.bf16.msrb.mxu2 %v4028_v2 }
 0x9f4   :  { %5792 = vmatmul.msk.f32.vlgmr.msrb.gmra.mxu1 %vm1058_vm1, %v8607_v11  ;;  %4942 = vmatpush.bf16.msrb.mxu2 %v4027_v36 }
 0x9f8   :  { %4943 = vmatpush.bf16.msrb.mxu2 %v4026_v0 }
 0x9fc   :  { %5793 = vmatmul.msk.f32.gmra.mxu1 %vm1058_vm1, %v8612_v19  ;;  %4944 = vmatpush.bf16.msrb.mxu2 %v4025_v4  ;;  %v3569_v19 = vpop.f32.mrf.mxu0 }
 0xa00   :  { %4945 = vmatpush.bf16.msrb.mxu2 %v4024_v15 }
 0xa04   :  { %5794 = vmatmul.msk.f32.gmra.mxu1 %vm1058_vm1, %v8617_v14  ;;  %4946 = vmatpush.bf16.msrb.mxu2 %v4023_v31 }
 0xa08   :  { %4947 = vmatpush.bf16.msrb.mxu2 %v4022_v55 }
 0xa0c   :  { %5795 = vmatmul.msk.f32.gmra.mxu1 %vm1058_vm1, %v8622_v59 }
 0xa14   :  { %5796 = vmatmul.msk.f32.gmra.mxu1 %vm1058_vm1, %v8627_v50  ;;  %v3572_v50 = vpop.f32.mrf.mxu0 }
 0xa15   :  { %v4030_v6 = vpack.c.bf16 %v3572_v50, %v3569_v19 }
 0xa1c   :  { %5797 = vmatmul.msk.f32.gmra.mxu1 %vm1058_vm1, %v8632_v41 }
 0xa24   :  { %5798 = vmatmul.msk.f32.gmra.mxu1 %vm1058_vm1, %v8637_v63  ;;  %v3575_v63 = vpop.f32.mrf.mxu0 }
 0xa29   :  { %v8715_v56 = vpop.f32.mrf.mxu1 }
 0xa2c   :  { %5799 = vmatmul.msk.f32.gmra.mxu1 %vm1058_vm1, %v8642_v44  ;;  %v3578_v44 = vpop.f32.mrf.mxu0 }
 0xa31   :  { %v8719_v14 = vpop.f32.mrf.mxu1 }
 0xa34   :  { %5800 = vmatmul.msk.f32.gmra.mxu1 %vm1058_vm1, %v8647_v40  ;;  %v3581_v49 = vpop.f32.mrf.mxu0 }
 0xa39   :  { %v8723_v11 = vpop.f32.mrf.mxu1 }
 0xa3a   :  { %v4034_v22 = vpack.c.bf16 %v8723_v11, %v8719_v14 }
 0xa3c   :  { %5801 = vmatmul.msk.f32.gmra.mxu1 %vm1058_vm1, %v8652_v43  ;;  %v3584_v5 = vpop.f32.mrf.mxu0 }
 0xa3d   :  { %v4032_v37 = vpack.c.bf16 %v3584_v5, %v3581_v49 }
 0xa41   :  { %v8727_v59 = vpop.f32.mrf.mxu1 }
 0xa44   :  { %5802 = vmatmul.msk.f32.gmra.mxu1 %vm1058_vm1, %v8657_v38  ;;  %v3587_v43 = vpop.f32.mrf.mxu0  ;;  %v4031_v38 = vpack.c.bf16 %v3578_v44, %v3575_v63 }
 0xa45   :  { %v4033_v21 = vpack.c.bf16 %v8715_v56, %v3587_v43 }
 0xa49   :  { %v8731_v41 = vpop.f32.mrf.mxu1 }
 0xa4a   :  { %v4035_v57 = vpack.c.bf16 %v8731_v41, %v8727_v59 }
 0xa4c   :  { %5803 = vmatmul.msk.f32.gmra.mxu1 %vm1058_vm1, %v8662_v54 }
 0xa51   :  { %v8735_v17 = vpop.f32.mrf.mxu1 }
 0xa54   :  { %5804 = vmatmul.msk.f32.gmra.mxu1 %vm1058_vm1, %v3557_v32 }
 0xa59   :  { %v8738_v34 = vpop.f32.mrf.mxu1 }
 0xa5a   :  { %v4036_v40 = vpack.c.bf16 %v8738_v34, %v8735_v17 }
 0xa5c   :  { %5805 = vmatmul.msk.f32.gmra.mxu1 %vm1058_vm1, %v3560_v29 }
 0xa61   :  { %v8741_v28 = vpop.f32.mrf.mxu1 }
 0xa64   :  { %5806 = vmatmul.msk.f32.gmra.mxu1 %vm1058_vm1, %v3563_v10 }
 0xa69   :  { %v8744_v48 = vpop.f32.mrf.mxu1 }
 0xa6a   :  { %v4037_v52 = vpack.c.bf16 %v8744_v48, %v8741_v28 }
 0xa6c   :  { %5807 = vmatmul.msk.f32.gmra.mxu1 %vm1058_vm1, %v3566_v30  ;;  %5029 = vmatpush.bf16.msrb.mxu3 %v4037_v52 }
 0xa70   :  { %5030 = vmatpush.bf16.msrb.mxu3 %v4036_v40 }
 0xa71   :  { %v3734_v24 = vpop.f32.mrf.mxu1 }
 0xa72   :  { %4040 = vperm.xlu1 %5917, %v3734_v24   ;;  %3862 = vrot.lane.b32.xlu0 %v3734_v24, %s6310_s6 }
 0xa74   :  { %5808 = vmatmul.msk.f32.gmra.mxu1 %vm1058_vm1, %v3569_v19  ;;  %5031 = vmatpush.bf16.msrb.mxu3 %v4035_v57 }
 0xa78   :  { %5032 = vmatpush.bf16.msrb.mxu3 %v4034_v22 }
 0xa79   :  { %v3737_v18 = vpop.f32.mrf.mxu1 }
 0xa7a   :  { %3864 = vrot.lane.b32.xlu2 %v3737_v18, %s6310_s6 }
 0xa7c   :  { %5809 = vmatmul.msk.f32.gmra.mxu1 %vm1058_vm1, %v3572_v50  ;;  %5033 = vmatpush.bf16.msrb.mxu3 %v4033_v21 }
 0xa80   :  { %5034 = vmatpush.bf16.msrb.mxu3 %v4032_v37 }
 0xa81   :  { %v3740_v62 = vpop.f32.mrf.mxu1 }
 0xa82   :  { %4044 = vperm.xlu2 %5918, %v3737_v18   ;;  %3866 = vrot.lane.b32.xlu0 %v3740_v62, %s6310_s6 }
 0xa84   :  { %5810 = vmatmul.msk.f32.gmra.mxu1 %vm1058_vm1, %v3575_v63  ;;  %5035 = vmatpush.bf16.msrb.mxu3 %v4031_v38 }
 0xa88   :  { %5036 = vmatpush.bf16.msrb.mxu3 %v4030_v6 }
 0xa89   :  { %v3743_v33 = vpop.f32.mrf.mxu1 }
 0xa8a   :  { %4048 = vperm.xlu0 %5916, %v3740_v62   ;;  %4052 = vperm.xlu1 %5917, %v3743_v33  }
 0xa8b   :  { %3868 = vrot.lane.b32.xlu2 %v3743_v33, %s6310_s6 }
 0xa8c   :  { %5811 = vmatmul.msk.f32.gmra.mxu1 %vm1058_vm1, %v3578_v44 }
 0xa91   :  { %v3746_v47 = vpop.f32.mrf.mxu1 }
 0xa92   :  { %3870 = vrot.lane.b32.xlu1 %v3746_v47, %s6310_s6 }
 0xa94   :  { %5812 = vmatmul.msk.f32.gmra.mxu1 %vm1058_vm1, %v3581_v49 }
 0xa99   :  { %v3749_v51 = vpop.f32.mrf.mxu1 }
 0xa9a   :  { %4056 = vperm.xlu1 %5917, %v3746_v47   ;;  %3872 = vrot.lane.b32.xlu0 %v3749_v51, %s6310_s6 }
 0xa9c   :  { %5813 = vmatmul.msk.f32.gmra.mxu1 %vm1058_vm1, %v3584_v5 }
 0xaa1   :  { %v3752_v54 = vpop.f32.mrf.mxu1 }
 0xaa2   :  { %4060 = vperm.xlu1 %5917, %v3749_v51   ;;  %3874 = vrot.lane.b32.xlu2 %v3752_v54, %s6310_s6 }
 0xaa4   :  { %5814 = vmatmul.msk.f32.gmra.mxu1 %vm1058_vm1, %v3587_v43 }
 0xaa9   :  { %v3755_v25 = vpop.f32.mrf.mxu1 }
 0xaaa   :  { %4064 = vperm.xlu1 %5917, %v3752_v54  }
 0xaac   :  { %5815 = vmatmul.msk.f32.gmra.mxu1 %vm1058_vm1, %v8715_v56 }
 0xab1   :  { %v3758_v35 = vpop.f32.mrf.mxu1 }
 0xab2   :  { %3876 = vrot.lane.b32.xlu1 %v3755_v25, %s6310_s6  ;;  %3878 = vrot.lane.b32.xlu0 %v3758_v35, %s6310_s6 }
 0xab4   :  { %5816 = vmatmul.msk.f32.gmra.mxu1 %vm1058_vm1, %v8719_v14 }
 0xab9   :  { %v3761_v27 = vpop.f32.mrf.mxu1 }
 0xaba   :  { %4068 = vperm.xlu1 %5917, %v3755_v25   ;;  %3880 = vrot.lane.b32.xlu2 %v3761_v27, %s6310_s6 }
 0xabc   :  { %5817 = vmatmul.msk.f32.gmra.mxu1 %vm1058_vm1, %v8723_v11 }
 0xac1   :  { %v3764_v7 = vpop.f32.mrf.mxu1 }
 0xac2   :  { %4072 = vperm.xlu1 %5917, %v3758_v35   ;;  %4076 = vperm.xlu2 %5918, %v3761_v27  }
 0xac4   :  { %5818 = vmatmul.msk.f32.gmra.mxu1 %vm1058_vm1, %v8727_v59 }
 0xac9   :  { %v3767_v13 = vpop.f32.mrf.mxu1 }
 0xaca   :  { %3882 = vrot.lane.b32.xlu1 %v3764_v7, %s6310_s6  ;;  %3884 = vrot.lane.b32.xlu0 %v3767_v13, %s6310_s6 }
 0xacc   :  { %5819 = vmatmul.msk.f32.gmra.mxu1 %vm1058_vm1, %v8731_v41 }
 0xad1   :  { %v3770_v58 = vpop.f32.mrf.mxu1 }
 0xad2   :  { %4080 = vperm.xlu1 %5917, %v3764_v7   ;;  %4088 = vperm.xlu0 %5916, %v3770_v58  }
 0xad3   :  { %3886 = vrot.lane.b32.xlu2 %v3770_v58, %s6310_s6 }
 0xad4   :  { %5820 = vmatmul.msk.f32.gmra.mxu1 %vm1058_vm1, %v8735_v17  ;;  %v3865_v15 = vpop.permute.xlu2 %3864 }
 0xad9   :  { %v3773_v32 = vpop.f32.mrf.mxu1 }
 0xada   :  { %4084 = vperm.xlu1 %5917, %v3767_v13   ;;  %4092 = vperm.xlu0 %5916, %v3773_v32  }
 0xadc   :  { %5821 = vmatmul.msk.f32.gmra.mxu1 %vm1058_vm1, %v8738_v34  ;;  %v8835_v11 = vpop.permute.xlu2 %4044 }
 0xae1   :  { %v3776_v39 = vpop.f32.mrf.mxu1 }
 0xae2   :  { %3888 = vrot.lane.b32.xlu1 %v3773_v32, %s6310_s6  ;;  %4096 = vperm.xlu2 %5918, %v3776_v39  }
 0xae3   :  { %3890 = vrot.lane.b32.xlu0 %v3776_v39, %s6310_s6 }
 0xae4   :  { %5822 = vmatmul.msk.f32.gmra.mxu1 %vm1058_vm1, %v8741_v28  ;;  %v8799_v16 = vpop.permute.xlu1 %4040  ;;  %v3863_v12 = vpop.permute.xlu0 %3862 }
 0xae5   :  { %v3869_v63 = vpop.permute.xlu2 %3868 }
 0xae9   :  { %v3779_v45 = vpop.f32.mrf.mxu1 }
 0xaea   :  { %4100 = vperm.xlu1 %5917, %v3779_v45   ;;  %3892 = vrot.lane.b32.xlu2 %v3779_v45, %s6310_s6 }
 0xaec   :  { %5823 = vmatmul.msk.f32.gmra.mxu1 %vm1058_vm1, %v8744_v48 }
 0xaf1   :  { %v3782_v9 = vpop.f32.mrf.mxu1 }
 0xaf2   :  { %4104 = vperm.xlu0 %5916, %v3782_v9   ;;  %3894 = vrot.lane.b32.xlu1 %v3782_v9, %s6310_s6 }
 0xaf4   :  { %v3867_v36 = vpop.permute.xlu0 %3866 }
 0xaf9   :  { %v3785_v53 = vpop.f32.mrf.mxu1 }
 0xafa   :  { %4108 = vperm.xlu2 %5918, %v3785_v53   ;;  %3896 = vrot.lane.b32.xlu0 %v3785_v53, %s6310_s6 }
 0xafc   :  { %v8802_v29 = vpop.permute.xlu1 %4052  ;;  %v8829_v55 = vpop.permute.xlu0 %4048 }
 0xafd   :  { %v3875_v28 = vpop.permute.xlu2 %3874 }
 0xb01   :  { %v3788_v1 = vpop.f32.mrf.mxu1 }
 0xb02   :  { %4112 = vperm.xlu2 %5918, %v3788_v1   ;;  %3898 = vrot.lane.b32.xlu1 %v3788_v1, %s6310_s6 }
 0xb04   :  { %v8806_v3 = vpop.permute.xlu1 %3870 }
 0xb09   :  { %v3791_v61 = vpop.f32.mrf.mxu1 }
 0xb0a   :  { %4116 = vperm.xlu1 %5917, %v3791_v61   ;;  %3900 = vrot.lane.b32.xlu0 %v3791_v61, %s6310_s6 }
 0xb0c   :  { %v8809_v10 = vpop.permute.xlu1 %4056  ;;  %v3873_v19 = vpop.permute.xlu0 %3872 }
 0xb11   :  { %v3794_v26 = vpop.f32.mrf.mxu1 }
 0xb12   :  { %4120 = vperm.xlu0 %5916, %v3794_v26   ;;  %3902 = vrot.lane.b32.xlu2 %v3794_v26, %s6310_s6 }
 0xb14   :  { %v8812_v20 = vpop.permute.xlu1 %4060  ;;  %v3881_v48 = vpop.permute.xlu2 %3880 }
 0xb19   :  { %v3797_v42 = vpop.f32.mrf.mxu1 }
 0xb1a   :  { %4124 = vperm.xlu2 %5918, %v3797_v42   ;;  %3904 = vrot.lane.b32.xlu1 %v3797_v42, %s6310_s6 }
 0xb1c   :  { %v8815_v8 = vpop.permute.xlu1 %4064  ;;  %v8857_v5 = vpop.permute.xlu2 %4076 }
 0xb21   :  { %v3800_v60 = vpop.f32.mrf.mxu1 }
 0xb22   :  { %4128 = vperm.xlu1 %5917, %v3800_v60   ;;  %3906 = vrot.lane.b32.xlu0 %v3800_v60, %s6310_s6 }
 0xb24   :  { %v3877_v2 = vpop.permute.xlu1 %3876  ;;  %v3879_v41 = vpop.permute.xlu0 %3878 }
 0xb29   :  { %v3803_v46 = vpop.f32.mrf.mxu1 }
 0xb2a   :  { %4132 = vperm.xlu0 %5916, %v3803_v46   ;;  %3908 = vrot.lane.b32.xlu2 %v3803_v46, %s6310_s6 }
 0xb2c   :  { %v8823_v4 = vpop.permute.xlu1 %4068 }
 0xb2d   :  { %v3887_v22 = vpop.permute.xlu2 %3886 }
 0xb31   :  { %v3806_v30 = vpop.f32.mrf.mxu1 }
 0xb32   :  { %4136 = vperm.xlu2 %5918, %v3806_v30   ;;  %3910 = vrot.lane.b32.xlu1 %v3806_v30, %s6310_s6 }
 0xb34   :  { %v8831_v56 = vpop.permute.xlu1 %4072 }
 0xb39   :  { %v3809_v23 = vpop.f32.mrf.mxu1 }
 0xb3a   :  { %4140 = vperm.xlu1 %5917, %v3809_v23   ;;  %3912 = vrot.lane.b32.xlu0 %v3809_v23, %s6310_s6 }
 0xb3c   :  { %v3883_v59 = vpop.permute.xlu1 %3882  ;;  %v3885_v34 = vpop.permute.xlu0 %3884 }
 0xb3d   :  { %v8863_v21 = vpop.permute.xlu2 %4096 }
 0xb41   :  { %v8819_v0 = vpop.f32.mrf.mxu1 }
 0xb42   :  { %3914 = vrot.lane.b32.xlu2 %v8819_v0, %s6310_s6 }
 0xb44   :  { %v8847_v44 = vpop.permute.xlu1 %4080  ;;  %v8853_v52 = vpop.permute.xlu0 %4088 }
 0xb45   :  { %v3893_v38 = vpop.permute.xlu2 %3892 }
 0xb49   :  { %v8825_v31 = vpop.f32.mrf.mxu1 }
 0xb4a   :  { %3916 = vrot.lane.b32.xlu1 %v8825_v31, %s6310_s6 }
 0xb4c   :  { %v8855_v40 = vpop.permute.xlu1 %4084  ;;  %v8859_v24 = vpop.permute.xlu0 %4092 }
 0xb51   :  { %v8833_v14 = vpop.f32.mrf.mxu1 }
 0xb52   :  { %3918 = vrot.lane.b32.xlu0 %v8833_v14, %s6310_s6 }
 0xb54   :  { %v3889_v57 = vpop.permute.xlu1 %3888  ;;  %v8867_v33 = vpop.permute.xlu2 %4108 }
 0xb55   :  { %v3891_v43 = vpop.permute.xlu0 %3890 }
 0xb59   :  { %v8839_v50 = vpop.f32.mrf.mxu1 }
 0xb5a   :  { %3920 = vrot.lane.b32.xlu2 %v8839_v50, %s6310_s6 }
 0xb5c   :  { %v8861_v18 = vpop.permute.xlu1 %4100  ;;  %v8870_v51 = vpop.permute.xlu2 %4112 }
 0xb61   :  { %v8843_v17 = vpop.f32.mrf.mxu1 }
 0xb62   :  { %10519 = vst [vmem:[#allocation48_spill] sm:$0xff] %v8843_v17  ;;  %3922 = vrot.lane.b32.xlu1 %v8843_v17, %s6310_s6 }
 0xb64   :  { %v8865_v37 = vpop.permute.xlu0 %4104  ;;  %v3895_v62 = vpop.permute.xlu1 %3894 }
 0xb69   :  { %v8849_v49 = vpop.f32.mrf.mxu1 }
 0xb6a   :  { %10520 = vst [vmem:[#allocation49_spill] sm:$0xff] %v8849_v49  ;;  %3924 = vrot.lane.b32.xlu0 %v8849_v49, %s6310_s6 }
 0xb6c   :  { %v3897_v6 = vpop.permute.xlu0 %3896  ;;  %v3903_v25 = vpop.permute.xlu2 %3902 }
 0xb74   :  { %v3899_v47 = vpop.permute.xlu1 %3898  ;;  %v8876_v13 = vpop.permute.xlu2 %4124 }
 0xb7c   :  { %v3901_v54 = vpop.permute.xlu0 %3900  ;;  %v8872_v35 = vpop.permute.xlu1 %4116 }
 0xb80   :  { %3958 = vxpose.xlu2.b32.start [1/16] (narrow) %v3863_v12, 8 }
 0xb84   :  { %v8874_v27 = vpop.permute.xlu0 %4120  ;;  %v3909_v32 = vpop.permute.xlu2 %3908 }
 0xb88   :  { %3959 = vxpose.xlu2.b32.cont [2/16] (narrow) %v3865_v15, 8 }
 0xb8c   :  { %3990 = vxpose.xlu0.b32.start [1/16] (narrow) %v3895_v62, 8  ;;  %v3905_v7 = vpop.permute.xlu1 %3904  ;;  %v8882_v53 = vpop.permute.xlu2 %4136 }
 0xb8d   :  { %10521 = vst [vmem:[#allocation47_spill] sm:$0xff] %v8882_v53 }
 0xb90   :  { %3960 = vxpose.xlu2.b32.cont [3/16] (narrow) %v3867_v36, 8 }
 0xb94   :  { %3991 = vxpose.xlu0.b32.cont [2/16] (narrow) %v3897_v6, 8  ;;  %v3907_v58 = vpop.permute.xlu0 %3906  ;;  %v8878_v39 = vpop.permute.xlu1 %4128 }
 0xb98   :  { %3961 = vxpose.xlu2.b32.cont [4/16] (narrow) %v3869_v63, 8 }
 0xb9c   :  { %3992 = vxpose.xlu0.b32.cont [3/16] (narrow) %v3899_v47, 8  ;;  %v8880_v45 = vpop.permute.xlu0 %4132  ;;  %v3915_v61 = vpop.permute.xlu2 %3914 }
 0xba0   :  { %3962 = vxpose.xlu2.b32.cont [5/16] (narrow) %v8806_v3, 8 }
 0xba4   :  { %3993 = vxpose.xlu0.b32.cont [4/16] (narrow) %v3901_v54, 8  ;;  %v3911_v9 = vpop.permute.xlu1 %3910 }
 0xba8   :  { %3963 = vxpose.xlu2.b32.cont [6/16] (narrow) %v3873_v19, 8 }
 0xbac   :  { %3994 = vxpose.xlu0.b32.cont [5/16] (narrow) %v3903_v25, 8  ;;  %v3913_v1 = vpop.permute.xlu0 %3912  ;;  %v8884_v26 = vpop.permute.xlu1 %4140 }
 0xbb0   :  { %3964 = vxpose.xlu2.b32.cont [7/16] (narrow) %v3875_v28, 8 }
 0xbb4   :  { %3995 = vxpose.xlu0.b32.cont [6/16] (narrow) %v3905_v7, 8  ;;  %v3921_v60 = vpop.permute.xlu2 %3920 }
 0xbb8   :  { %3965 = vxpose.xlu2.b32.cont [8/16] (narrow) %v3877_v2, 8 }
 0xbbc   :  { %3996 = vxpose.xlu0.b32.cont [7/16] (narrow) %v3907_v58, 8  ;;  %v3917_v3 = vpop.permute.xlu1 %3916 }
 0xbc0   :  { %3966 = vxpose.xlu2.b32.cont [9/16] (narrow) %v3879_v41, 8 }
 0xbc4   :  { %3997 = vxpose.xlu0.b32.cont [8/16] (narrow) %v3909_v32, 8  ;;  %v3919_v42 = vpop.permute.xlu0 %3918 }
 0xbc8   :  { %3967 = vxpose.xlu2.b32.cont [10/16] (narrow) %v3881_v48, 8 }
 0xbcc   :  { %3998 = vxpose.xlu0.b32.cont [9/16] (narrow) %v3911_v9, 8 }
 0xbd0   :  { %3968 = vxpose.xlu2.b32.cont [11/16] (narrow) %v3883_v59, 8 }
 0xbd4   :  { %3999 = vxpose.xlu0.b32.cont [10/16] (narrow) %v3913_v1, 8  ;;  %v3923_v46 = vpop.permute.xlu1 %3922 }
 0xbd8   :  { %3969 = vxpose.xlu2.b32.cont [12/16] (narrow) %v3885_v34, 8 }
 0xbdc   :  { %4000 = vxpose.xlu0.b32.cont [11/16] (narrow) %v3915_v61, 8  ;;  %v3925_v30 = vpop.permute.xlu0 %3924 }
 0xbe0   :  { %3970 = vxpose.xlu2.b32.cont [13/16] (narrow) %v3887_v22, 8 }
 0xbe4   :  { %4001 = vxpose.xlu0.b32.cont [12/16] (narrow) %v3917_v3, 8 }
 0xbe8   :  { %3971 = vxpose.xlu2.b32.cont [14/16] (narrow) %v3889_v57, 8 }
 0xbec   :  { %4002 = vxpose.xlu0.b32.cont [13/16] (narrow) %v3919_v42, 8 }
 0xbf0   :  { %3972 = vxpose.xlu2.b32.cont [15/16] (narrow) %v3891_v43, 8 }
 0xbf4   :  { %4003 = vxpose.xlu0.b32.cont [14/16] (narrow) %v3921_v60, 8 }
 0xbf8   :  { %3973 = vxpose.xlu2.b32.end [16/16] (narrow) %v3893_v38, 8 }
 0xbfc   :  { %4004 = vxpose.xlu0.b32.cont [15/16] (narrow) %v3923_v46, 8 }
 0xc04   :  { %4005 = vxpose.xlu0.b32.end [16/16] (narrow) %v3925_v30, 8 }
 0xc19   :  { %v3974_v12 = vpop.trf.xlu2 }
 0xc1a   :  { %v8886_v23 = vperm.slane %v3974_v12, 0 }
 0xc1c   :  { %v4169_v15 = vadd.f32 %v8886_v23, %v8799_v16  ;;  %v4171_v34 = vadd.f32 %v8886_v23, %v8835_v11  ;;  %v4173_v38 = vadd.f32 %v8886_v23, %v8829_v55  ;;  %v4175_v58 = vadd.f32 %v8886_v23, %v8802_v29 }
 0xc1d   :  { %v4179_v42 = vadd.f32 %v8886_v23, %v8812_v20 }
 0xc1e   :  { %v4233_v59 = vmul.f32 0.2, %v4169_v15  ;;  %v4235_v43 = vmul.f32 0.2, %v4171_v34  ;;  %v4237_v54 = vmul.f32 0.2, %v4173_v38 }
 0xc1f   :  { %v4239_v1 = vmul.f32 0.2, %v4175_v58  ;;  %v4243_v30 = vmul.f32 0.2, %v4179_v42 }
 0xc20   :  { %v8898_v28 = vmax.f32 %v4169_v15, %v4233_v59  ;;  %v8910_v6 = vmax.f32 %v4171_v34, %v4235_v43  ;;  %v8920_v32 = vmax.f32 %v4173_v38, %v4237_v54  ;;  %v4181_v15 = vadd.f32 %v8886_v23, %v8815_v8 }
 0xc21   :  { %v8930_v60 = vmax.f32 %v4175_v58, %v4239_v1  ;;  %v4183_v59 = vadd.f32 %v8886_v23, %v8823_v4 }
 0xc22   :  { %v4245_v34 = vmul.f32 0.2, %v4181_v15 }
 0xc23   :  { %v4247_v43 = vmul.f32 0.2, %v4183_v59 }
 0xc30   :  { %v4006_v2 = vpop.trf.xlu0 }
 0xc31   :  { %v8888_v36 = vperm.slane %v4006_v2, 0 }
 0xc33   :  { %v4170_v19 = vadd.f32 %v8888_v36, %v8799_v16  ;;  %v4172_v41 = vadd.f32 %v8888_v36, %v8835_v11  ;;  %v4174_v16 = vadd.f32 %v8888_v36, %v8829_v55  ;;  %v4176_v25 = vadd.f32 %v8888_v36, %v8802_v29 }
 0xc34   :  { %v4180_v61 = vadd.f32 %v8888_v36, %v8812_v20  ;;  %v4182_v12 = vadd.f32 %v8888_v36, %v8815_v8  ;;  %v8942_v20 = vmax.f32 %v4179_v42, %v4243_v30  ;;  %v4186_v38 = vadd.f32 %v8888_v36, %v8831_v56 }
 0xc35   :  { %v4234_v63 = vmul.f32 0.2, %v4170_v19  ;;  %v4236_v22 = vmul.f32 0.2, %v4172_v41  ;;  %v4238_v11 = vmul.f32 0.2, %v4174_v16  ;;  %v4202_v30 = vadd.f32 %v8888_v36, %v8865_v37 }
 0xc36   :  { %v4240_v9 = vmul.f32 0.2, %v4176_v25  ;;  %v4244_v46 = vmul.f32 0.2, %v4180_v61 }
 0xc37   :  { %v8900_v48 = vmax.f32 %v4170_v19, %v4234_v63  ;;  %v8906_v62 = vmax.f32 %v4172_v41, %v4236_v22  ;;  %v8916_v7 = vmax.f32 %v4174_v16, %v4238_v11  ;;  %v4184_v19 = vadd.f32 %v8888_v36, %v8823_v4 }
 0xc38   :  { %v8926_v3 = vmax.f32 %v4176_v25, %v4240_v9  ;;  %v8936_v2 = vmax.f32 %v4180_v61, %v4244_v46  ;;  %v4246_v41 = vmul.f32 0.2, %v4182_v12  ;;  %v4188_v22 = vadd.f32 %v8888_v36, %v8857_v5 }
 0xc39   :  { %v4361_v57 = vmax.f32 %v8898_v28, %v8900_v48  ;;  %v4364_v47 = vmax.f32 %v8910_v6, %v8906_v62  ;;  %v4367_v55 = vmax.f32 %v8920_v32, %v8916_v7  ;;  %v4187_v16 = vadd.f32 %v8886_v23, %v8857_v5 }
 0xc3a   :  { %v4370_v29 = vmax.f32 %v8930_v60, %v8926_v3  ;;  %v4376_v63 = vmax.f32 %v8942_v20, %v8936_v2  ;;  %v8950_v8 = vmax.f32 %v4182_v12, %v4246_v41  ;;  %v8956_v4 = vmax.f32 %v4181_v15, %v4245_v34 }
 0xc3b   :  { %4362 = vmax.xlane.f32.xlu1 %v4361_v57  ;;  %v4248_v57 = vmul.f32 0.2, %v4184_v19  ;;  %v4252_v54 = vmul.f32 0.2, %v4188_v22  ;;  %v8962_v25 = vmax.f32 %v4183_v59, %v4247_v43  ;;  %v4178_v9 = vadd.f32 %v8888_v36, %v8809_v10 }
 0xc3c   :  { %v4379_v58 = vmax.f32 %v8956_v4, %v8950_v8  ;;  %v4251_v5 = vmul.f32 0.2, %v4187_v16  ;;  %v4177_v61 = vadd.f32 %v8886_v23, %v8809_v10  ;;  %v4201_v10 = vadd.f32 %v8886_v23, %v8865_v37 }
 0xc3d   :  { %v8958_v11 = vmax.f32 %v4184_v19, %v4248_v57  ;;  %v8974_v46 = vmax.f32 %v4188_v22, %v4252_v54  ;;  %v4242_v12 = vmul.f32 0.2, %v4178_v9  ;;  %v4266_v22 = vmul.f32 0.2, %v4202_v30 }
 0xc3e   :  { %v8980_v15 = vmax.f32 %v4187_v16, %v4251_v5  ;;  %v4241_v59 = vmul.f32 0.2, %v4177_v61  ;;  %v4189_v37 = vadd.f32 %v8886_v23, %v8847_v44 }
 0xc3f   :  { %v4382_v1 = vmax.f32 %v8962_v25, %v8958_v11  ;;  %v8992_v43 = vmax.f32 %v4178_v9, %v4242_v12  ;;  %v4195_v9 = vadd.f32 %v8886_v23, %v8859_v24 }
 0xc40   :  { %v4388_v34 = vmax.f32 %v8980_v15, %v8974_v46  ;;  %v9000_v54 = vmax.f32 %v4177_v61, %v4241_v59  ;;  %v4207_v61 = vadd.f32 %v8886_v23, %v8872_v35 }
 0xc43   :  { %4365 = vmax.xlane.f32.xlu1 %v4364_v47  ;;  %v4185_v47 = vadd.f32 %v8886_v23, %v8831_v56  ;;  %v4194_v56 = vadd.f32 %v8888_v36, %v8853_v52 }
 0xc45   :  { %v4249_v42 = vmul.f32 0.2, %v4185_v47  ;;  %v4258_v41 = vmul.f32 0.2, %v4194_v56 }
 0xc4b   :  { %4368 = vmax.xlane.f32.xlu1 %v4367_v55  ;;  %v4250_v55 = vmul.f32 0.2, %v4186_v38 }
 0xc4d   :  { %v8982_v19 = vmax.f32 %v4186_v38, %v4250_v55  ;;  %v4196_v38 = vadd.f32 %v8888_v36, %v8859_v24  ;;  %v4208_v55 = vadd.f32 %v8888_v36, %v8872_v35  ;;  %v4191_v35 = vadd.f32 %v8886_v23, %v8855_v40 }
 0xc4f   :  { %v4260_v12 = vmul.f32 0.2, %v4196_v38  ;;  %v4255_v17 = vmul.f32 0.2, %v4191_v35 }
 0xc53   :  { %4371 = vmax.xlane.f32.xlu1 %v4370_v29  ;;  %v4193_v29 = vadd.f32 %v8886_v23, %v8853_v52  ;;  %v4190_v52 = vadd.f32 %v8888_v36, %v8847_v44  ;;  %v4373_v44 = vmax.f32 %v9000_v54, %v8992_v43 }
 0xc55   :  { %v4257_v57 = vmul.f32 0.2, %v4193_v29 }
 0xc57   :  { %v9006_v5 = vmax.f32 %v4193_v29, %v4257_v57  ;;  %v4259_v29 = vmul.f32 0.2, %v4195_v9 }
 0xc5b   :  { %4377 = vmax.xlane.f32.xlu1 %v4376_v63  ;;  %v8986_v63 = vmax.f32 %v4185_v47, %v4249_v42  ;;  %v4265_v47 = vmul.f32 0.2, %v4201_v10  ;;  %v9010_v42 = vmax.f32 %v4202_v30, %v4266_v22  ;;  %v4272_v30 = vmul.f32 0.2, %v4208_v55 }
 0xc5c   :  { %v4271_v22 = vmul.f32 0.2, %v4207_v61 }
 0xc5d   :  { %v4385_v16 = vmax.f32 %v8986_v63, %v8982_v19  ;;  %v9016_v59 = vmax.f32 %v4201_v10, %v4265_v47  ;;  %v4200_v10 = vadd.f32 %v8888_v36, %v8861_v18  ;;  %v9032_v47 = vmax.f32 %v4196_v38, %v4260_v12 }
 0xc5e   :  { %v9042_v49 = vmax.f32 %v4207_v61, %v4271_v22  ;;  %v4198_v38 = vadd.f32 %v8888_v36, %v8863_v21  ;;  %v4204_v61 = vadd.f32 %v8888_v36, %v8867_v33  ;;  %v9056_v12 = vmax.f32 %v4191_v35, %v4255_v17 }
 0xc5f   :  { %v4409_v57 = vmax.f32 %v9016_v59, %v9010_v42  ;;  %v4264_v53 = vmul.f32 0.2, %v4200_v10  ;;  %v4206_v17 = vadd.f32 %v8888_v36, %v8870_v51 }
 0xc63   :  { %4380 = vmax.xlane.f32.xlu1 %v4379_v58  ;;  %v9002_v58 = vmax.f32 %v4194_v56, %v4258_v41  ;;  %v4253_v56 = vmul.f32 0.2, %v4189_v37  ;;  %v4192_v41 = vadd.f32 %v8888_v36, %v8855_v40 }
 0xc65   :  { %v4397_v24 = vmax.f32 %v9006_v5, %v9002_v58 }
 0xc69   :  { %4383 = vmax.xlane.f32.xlu2 %v4382_v1  ;;  %v4254_v1 = vmul.f32 0.2, %v4190_v52 }
 0xc6b   :  { %4389 = vmax.xlane.f32.xlu1 %v4388_v34  ;;  %v9022_v34 = vmax.f32 %v4190_v52, %v4254_v1  ;;  %v4199_v52 = vadd.f32 %v8886_v23, %v8861_v18  ;;  %v4256_v1 = vmul.f32 0.2, %v4192_v41 }
 0xc6d   :  { %v4263_v18 = vmul.f32 0.2, %v4199_v52 }
 0xc71   :  { %4386 = vmax.xlane.f32.xlu2 %v4385_v16  ;;  %v9030_v16 = vmax.f32 %v4189_v37, %v4253_v56  ;;  %v9048_v56 = vmax.f32 %v4192_v41, %v4256_v1  ;;  %v4262_v41 = vmul.f32 0.2, %v4198_v38 }
 0xc73   :  { %4398 = vmax.xlane.f32.xlu1 %v4397_v24  ;;  %v9038_v24 = vmax.f32 %v4208_v55, %v4272_v30  ;;  %v4391_v40 = vmax.f32 %v9030_v16, %v9022_v34  ;;  %v4197_v55 = vadd.f32 %v8886_v23, %v8863_v21  ;;  %v4203_v30 = vadd.f32 %v8886_v23, %v8867_v33 }
 0xc74   :  { %v4394_v22 = vmax.f32 %v9056_v12, %v9048_v56  ;;  %v9070_v35 = vmax.f32 %v4198_v38, %v4262_v41  ;;  %v4205_v33 = vadd.f32 %v8886_v23, %v8870_v51  ;;  %v4210_v38 = vadd.f32 %v8888_v36, %v8874_v27 }
 0xc75   :  { %4374 = vmax.xlane.f32.xlu0 %v4373_v44  ;;  %v9036_v44 = vmax.f32 %v4195_v9, %v4259_v29  ;;  %10522 = vst [vmem:[#allocation46_spill] sm:$0xff] %v9038_v24  ;;  %v4418_v9 = vmax.f32 %v9042_v49, %v9038_v24  ;;  %v9058_v29 = vmax.f32 %v4200_v10, %v4264_v53  ;;  %v4261_v1 = vmul.f32 0.2, %v4197_v55 }
 0xc76   :  { %v4267_v53 = vmul.f32 0.2, %v4203_v30  ;;  %v4209_v51 = vadd.f32 %v8886_v23, %v8874_v27 }
 0xc77   :  { %v4400_v37 = vmax.f32 %v9036_v44, %v9032_v47  ;;  %v9074_v10 = vmax.f32 %v4197_v55, %v4261_v1 }
 0xc78   :  { %v4273_v1 = vmul.f32 0.2, %v4209_v51 }
 0xc79   :  { %4410 = vmax.xlane.f32.xlu2 %v4409_v57  ;;  %v9062_v57 = vmax.f32 %v4199_v52, %v4263_v18  ;;  %v9078_v18 = vmax.f32 %v4203_v30, %v4267_v53 }
 0xc7b   :  { %4401 = vmax.xlane.f32.xlu1 %v4400_v37  ;;  %v4406_v21 = vmax.f32 %v9062_v57, %v9058_v29  ;;  %v4270_v37 = vmul.f32 0.2, %v4206_v17 }
 0xc7d   :  { %4392 = vmax.xlane.f32.xlu0 %v4391_v40  ;;  %v4268_v40 = vmul.f32 0.2, %v4204_v61  ;;  %v9086_v41 = vmax.f32 %v4206_v17, %v4270_v37  ;;  %v4211_v17 = vadd.f32 %v8886_v23, %v8876_v13 }
 0xc7f   :  { %v9076_v52 = vmax.f32 %v4204_v61, %v4268_v40  ;;  %10523 = vst [vmem:[#allocation45_spill] sm:$0xff] %v9086_v41  ;;  %v4274_v61 = vmul.f32 0.2, %v4210_v38  ;;  %v4212_v40 = vadd.f32 %v8888_v36, %v8876_v13 }
 0xc81   :  { %4419 = vmax.xlane.f32.xlu2 %v4418_v9  ;;  %v4403_v9 = vmax.f32 %v9074_v10, %v9070_v35  ;;  %v4412_v24 = vmax.f32 %v9078_v18, %v9076_v52  ;;  %v4276_v53 = vmul.f32 0.2, %v4212_v40 }
 0xc83   :  { %4407 = vmax.xlane.f32.xlu1 %v4406_v21  ;;  %v9096_v21 = vmax.f32 %v4210_v38, %v4274_v61  ;;  %v9104_v37 = vmax.f32 %v4212_v40, %v4276_v53 }
 0xc85   :  { %4395 = vmax.xlane.f32.xlu0 %v4394_v22  ;;  %v4269_v22 = vmul.f32 0.2, %v4205_v33  ;;  %10524 = vst [vmem:[#allocation44_spill] sm:$0xff] %v9104_v37 }
 0xc87   :  { %v9090_v55 = vmax.f32 %v4205_v33, %v4269_v22  ;;  %v4275_v33 = vmul.f32 0.2, %v4211_v17 }
 0xc89   :  { %v4415_v30 = vmax.f32 %v9090_v55, %v9086_v41 }
 0xc8b   :  { %4413 = vmax.xlane.f32.xlu1 %v4412_v24  ;;  %v9100_v24 = vmax.f32 %v4209_v51, %v4273_v1 }
 0xc8d   :  { %4404 = vmax.xlane.f32.xlu0 %v4403_v9  ;;  %v4421_v27 = vmax.f32 %v9100_v24, %v9096_v21  ;;  %v9106_v9 = vmax.f32 %v4211_v17, %v4275_v33 }
 0xc8f   :  { %10525 = vst [vmem:[#allocation43_spill] sm:$0xff] %v9106_v9  ;;  %v4424_v22 = vmax.f32 %v9106_v9, %v9104_v37  ;;  %v10526_v37 = vld [vmem:[#allocation70_spill] sm:$0xff] }
 0xc95   :  { %4416 = vmax.xlane.f32.xlu0 %v4415_v30 }
 0xc9d   :  { %4422 = vmax.xlane.f32.xlu0 %v4421_v27 }
 0xca5   :  { %4425 = vmax.xlane.f32.xlu0 %v4424_v22  ;;  %v10527_v22 = vunpack.c.l.bf16 %v10526_v37 }
 0xcae   :  { %v4363_v38 = vpop.xlane.xlu1 %4362 }
 0xcaf   :  { %v4457_v61 = vsub.f32 %v8898_v28, %v4363_v38  ;;  %v4458_v13 = vsub.f32 %v8900_v48, %v4363_v38  ;;  %v10528_v28 = vunpack.c.h.bf16 %v10526_v37 }
 0xcb1   :  { %v4521_v51 = vmul.f32 1.442695, %v4457_v61  ;;  %v4523_v30 = vmul.f32 1.442695, %v4458_v13 }
 0xcb3   :  { %6116 = vpow2.f32 %v4521_v51 }
 0xcb4   :  { %6118 = vpow2.f32 %v4523_v30 }
 0xcb6   :  { %v4366_v1 = vpop.xlane.xlu1 %4365 }
 0xcb7   :  { %v4459_v27 = vsub.f32 %v8910_v6, %v4366_v1  ;;  %v4460_v40 = vsub.f32 %v8906_v62, %v4366_v1 }
 0xcb9   :  { %v6117_v17 = vpop.eup %6116  ;;  %v4525_v53 = vmul.f32 1.442695, %v4459_v27  ;;  %v4527_v33 = vmul.f32 1.442695, %v4460_v40  ;;  %v10529_v27 = vld [vmem:[#allocation71_spill] sm:$0xff] }
 0xcba   :  { %v6119_v41 = vpop.eup %6118  ;;  %v9116_v9 = vmul.f32 %v6117_v17, %v10527_v22  ;;  %v10530_v40 = vunpack.c.l.bf16 %v10529_v27 }
 0xcbb   :  { %6120 = vpow2.f32 %v4525_v53  ;;  %v9120_v48 = vmul.f32 %v6119_v41, %v10528_v28  ;;  %v10531_v41 = vunpack.c.h.bf16 %v10529_v27  ;;  %v4214_v28 = vadd.f32 %v8888_v36, %v8878_v39 }
 0xcbc   :  { %6122 = vpow2.f32 %v4527_v33 }
 0xcbd   :  { %v4713_v38 = vadd.f32 %v9120_v48, %v9116_v9 }
 0xcbe   :  { %v4369_v6 = vpop.xlane.xlu1 %4368 }
 0xcbf   :  { %4714 = vadd.xlane.f32.xlu1 %v4713_v38  ;;  %v4461_v62 = vsub.f32 %v8920_v32, %v4369_v6  ;;  %v4462_v61 = vsub.f32 %v8916_v7, %v4369_v6 }
 0xcc1   :  { %v6121_v13 = vpop.eup %6120  ;;  %v4529_v51 = vmul.f32 1.442695, %v4461_v62  ;;  %v4531_v30 = vmul.f32 1.442695, %v4462_v61  ;;  %v10532_v61 = vld [vmem:[#allocation72_spill] sm:$0xff] }
 0xcc2   :  { %v6123_v1 = vpop.eup %6122  ;;  %v9128_v17 = vmul.f32 %v6121_v13, %v10530_v40  ;;  %v10533_v13 = vunpack.c.l.bf16 %v10532_v61 }
 0xcc3   :  { %6124 = vpow2.f32 %v4529_v51  ;;  %v9132_v37 = vmul.f32 %v6123_v1, %v10531_v41  ;;  %v10534_v1 = vunpack.c.h.bf16 %v10532_v61 }
 0xcc4   :  { %6126 = vpow2.f32 %v4531_v30  ;;  %v4213_v30 = vadd.f32 %v8886_v23, %v8878_v39 }
 0xcc5   :  { %v4716_v53 = vadd.f32 %v9132_v37, %v9128_v17 }
 0xcc6   :  { %v4372_v32 = vpop.xlane.xlu1 %4371  ;;  %v4277_v41 = vmul.f32 0.2, %v4213_v30 }
 0xcc7   :  { %4717 = vadd.xlane.f32.xlu0 %v4716_v53  ;;  %v4463_v7 = vsub.f32 %v8930_v60, %v4372_v32  ;;  %v4464_v33 = vsub.f32 %v8926_v3, %v4372_v32  ;;  %v4278_v3 = vmul.f32 0.2, %v4214_v28 }
 0xcc9   :  { %v6125_v22 = vpop.eup %6124  ;;  %v4533_v38 = vmul.f32 1.442695, %v4463_v7  ;;  %v4535_v6 = vmul.f32 1.442695, %v4464_v33  ;;  %v9154_v33 = vmax.f32 %v4214_v28, %v4278_v3 }
 0xcca   :  { %v6127_v62 = vpop.eup %6126  ;;  %v9142_v51 = vmul.f32 %v6125_v22, %v10533_v13  ;;  %v9160_v13 = vmax.f32 %v4213_v30, %v4277_v41 }
 0xccb   :  { %6128 = vpow2.f32 %v4533_v38  ;;  %v9148_v60 = vmul.f32 %v6127_v62, %v10534_v1  ;;  %v10535_v62 = vld [vmem:[#allocation73_spill] sm:$0xff] }
 0xccc   :  { %6130 = vpow2.f32 %v4535_v6  ;;  %v10536_v61 = vunpack.c.l.bf16 %v10535_v62  ;;  %v10537_v1 = vunpack.c.h.bf16 %v10535_v62 }
 0xccd   :  { %v4719_v27 = vadd.f32 %v9148_v60, %v9142_v51 }
 0xcce   :  { %v4378_v40 = vpop.xlane.xlu1 %4377 }
 0xccf   :  { %4720 = vadd.xlane.f32.xlu2 %v4719_v27  ;;  %v4467_v53 = vsub.f32 %v8942_v20, %v4378_v40  ;;  %v4468_v32 = vsub.f32 %v8936_v2, %v4378_v40  ;;  %v4427_v2 = vmax.f32 %v9160_v13, %v9154_v33 }
 0xcd1   :  { %v6129_v7 = vpop.eup %6128  ;;  %v4541_v39 = vmul.f32 1.442695, %v4467_v53  ;;  %v4543_v22 = vmul.f32 1.442695, %v4468_v32 }
 0xcd2   :  { %v6131_v38 = vpop.eup %6130  ;;  %v9158_v6 = vmul.f32 %v6129_v7, %v10536_v61  ;;  %v10538_v7 = vld [vmem:[#allocation74_spill] sm:$0xff] }
 0xcd3   :  { %6132 = vpow2.f32 %v4541_v39  ;;  %v9164_v27 = vmul.f32 %v6131_v38, %v10537_v1  ;;  %v10539_v39 = vunpack.c.l.bf16 %v10538_v7  ;;  %v10540_v38 = vunpack.c.h.bf16 %v10538_v7  ;;  %v10541_v1 = vld [vmem:[#allocation84_spill] sm:$0xff] }
 0xcd4   :  { %6134 = vpow2.f32 %v4543_v22 }
 0xcd5   :  { %v4722_v20 = vadd.f32 %v9164_v27, %v9158_v6 }
 0xcd6   :  { %v4381_v28 = vpop.xlane.xlu1 %4380 }
 0xcd7   :  { %4428 = vmax.xlane.f32.xlu2 %v4427_v2  ;;  %4723 = vadd.xlane.f32.xlu1 %v4722_v20  ;;  %v4469_v3 = vsub.f32 %v8956_v4, %v4381_v28  ;;  %v4470_v30 = vsub.f32 %v8950_v8, %v4381_v28  ;;  %v10542_v2 = vunpack.c.l.bf16 %v10541_v1  ;;  %v10543_v28 = vunpack.c.h.bf16 %v10541_v1 }
 0xcd9   :  { %v6133_v40 = vpop.eup %6132  ;;  %v4545_v41 = vmul.f32 1.442695, %v4469_v3  ;;  %v4547_v53 = vmul.f32 1.442695, %v4470_v30 }
 0xcda   :  { %v6135_v32 = vpop.eup %6134  ;;  %v9174_v22 = vmul.f32 %v6133_v40, %v10539_v39 }
 0xcdb   :  { %6136 = vpow2.f32 %v4545_v41  ;;  %v9178_v62 = vmul.f32 %v6135_v32, %v10540_v38 }
 0xcdc   :  { %6138 = vpow2.f32 %v4547_v53 }
 0xcdd   :  { %v4728_v61 = vadd.f32 %v9178_v62, %v9174_v22 }
 0xcdf   :  { %4729 = vadd.xlane.f32.xlu1 %v4728_v61  ;;  %v10544_v61 = vld [vmem:[#allocation76_spill] sm:$0xff] }
 0xce1   :  { %v6137_v4 = vpop.eup %6136 }
 0xce2   :  { %v6139_v8 = vpop.eup %6138  ;;  %v9184_v20 = vmul.f32 %v6137_v4, %v10542_v2  ;;  %v10545_v4 = vunpack.c.l.bf16 %v10544_v61 }
 0xce3   :  { %v9188_v3 = vmul.f32 %v6139_v8, %v10543_v28  ;;  %v10546_v8 = vunpack.c.h.bf16 %v10544_v61 }
 0xce5   :  { %v4731_v40 = vadd.f32 %v9188_v3, %v9184_v20 }
 0xce7   :  { %4732 = vadd.xlane.f32.xlu2 %v4731_v40 }
 0xce8   :  { %v4375_v30 = vpop.xlane.xlu0 %4374 }
 0xce9   :  { %v4465_v41 = vsub.f32 %v9000_v54, %v4375_v30  ;;  %v4466_v53 = vsub.f32 %v8992_v43, %v4375_v30  ;;  %v4390_v43 = vpop.xlane.xlu1 %4389 }
 0xcea   :  { %v4475_v40 = vsub.f32 %v8980_v15, %v4390_v43 }
 0xceb   :  { %v4537_v32 = vmul.f32 1.442695, %v4465_v41  ;;  %v4539_v7 = vmul.f32 1.442695, %v4466_v53  ;;  %v4476_v53 = vsub.f32 %v8974_v46, %v4390_v43 }
 0xced   :  { %6140 = vpow2.f32 %v4537_v32  ;;  %v4557_v32 = vmul.f32 1.442695, %v4475_v40 }
 0xcee   :  { %6142 = vpow2.f32 %v4539_v7  ;;  %v4559_v7 = vmul.f32 1.442695, %v4476_v53  ;;  %v10547_v53 = vld [vmem:[#allocation75_spill] sm:$0xff] }
 0xcef   :  { %6144 = vpow2.f32 %v4557_v32  ;;  %v10548_v32 = vunpack.c.l.bf16 %v10547_v53 }
 0xcf0   :  { %v4393_v28 = vpop.xlane.xlu0 %4392  ;;  %6146 = vpow2.f32 %v4559_v7 }
 0xcf1   :  { %v4399_v30 = vpop.xlane.xlu1 %4398  ;;  %v4478_v15 = vsub.f32 %v9022_v34, %v4393_v28 }
 0xcf3   :  { %v6141_v39 = vpop.eup %6140 }
 0xcf4   :  { %v6143_v38 = vpop.eup %6142  ;;  %v9196_v1 = vmul.f32 %v6141_v39, %v10545_v4 }
 0xcf5   :  { %v9200_v2 = vmul.f32 %v6143_v38, %v10546_v8  ;;  %v9210_v38 = vpop.xlane.xlu2 %4383  ;;  %v6145_v43 = vpop.eup %6144 }
 0xcf6   :  { %v6147_v40 = vpop.eup %6146  ;;  %v9225_v7 = vmul.f32 %v6145_v43, %v10548_v32  ;;  %v10550_v43 = vld [vmem:[#allocation87_spill] sm:$0xff] }
 0xcf7   :  { %v4725_v54 = vadd.f32 %v9200_v2, %v9196_v1 }
 0xcf8   :  { %4144 = vperm.xlu1 %5917, %v8819_v0   ;;  %v4396_v41 = vpop.xlane.xlu0 %4395 }
 0xcf9   :  { %4726 = vadd.xlane.f32.xlu0 %v4725_v54  ;;  %v4479_v39 = vsub.f32 %v9056_v12, %v4396_v41  ;;  %v4480_v0 = vsub.f32 %v9048_v56, %v4396_v41  ;;  %v9214_v61 = vpop.xlane.xlu1 %4401  ;;  %v4563_v54 = vmul.f32 1.442695, %v4478_v15  ;;  %v4481_v12 = vsub.f32 %v9006_v5, %v4399_v30 }
 0xcfa   :  { %v4482_v56 = vsub.f32 %v9002_v58, %v4399_v30  ;;  %v10549_v5 = vunpack.c.h.bf16 %v10547_v53 }
 0xcfb   :  { %v4565_v4 = vmul.f32 1.442695, %v4479_v39  ;;  %v4567_v8 = vmul.f32 1.442695, %v4480_v0 }
 0xcfc   :  { %v9229_v39 = vmul.f32 %v6147_v40, %v10549_v5  ;;  %v4571_v0 = vmul.f32 1.442695, %v4482_v56  ;;  %v10552_v56 = vunpack.c.h.bf16 %v10550_v43 }
 0xcfd   :  { %6148 = vpow2.f32 %v4565_v4  ;;  %v9220_v41 = vpop.xlane.xlu2 %4386 }
 0xcfe   :  { %6150 = vpow2.f32 %v4567_v8 }
 0xcff   :  { %4152 = vperm.xlu2 %5918, %v8833_v14   ;;  %v4477_v14 = vsub.f32 %v9030_v16, %v4393_v28  ;;  %v4569_v28 = vmul.f32 1.442695, %v4481_v12  ;;  %v10551_v12 = vunpack.c.l.bf16 %v10550_v43 }
 0xd01   :  { %v4561_v46 = vmul.f32 1.442695, %v4477_v14  ;;  %v4408_v58 = vpop.xlane.xlu1 %4407 }
 0xd03   :  { %6152 = vpow2.f32 %v4561_v46  ;;  %v6149_v30 = vpop.eup %6148 }
 0xd04   :  { %6154 = vpow2.f32 %v4563_v54  ;;  %v4488_v54 = vsub.f32 %v9058_v29, %v4408_v58  ;;  %v9239_v40 = vmul.f32 %v6149_v30, %v10551_v12 }
 0xd05   :  { %6156 = vpow2.f32 %v4569_v28  ;;  %v10553_v28 = vld [vmem:[#allocation78_spill] sm:$0xff] }
 0xd06   :  { %6158 = vpow2.f32 %v4571_v0  ;;  %v10554_v53 = vunpack.c.l.bf16 %v10553_v28  ;;  %v10555_v29 = vunpack.c.h.bf16 %v10553_v28  ;;  %v4472_v0 = vsub.f32 %v8958_v11, %v9210_v38  ;;  %v10556_v28 = vld [vmem:[#allocation79_spill] sm:$0xff] }
 0xd07   :  { %v4583_v30 = vmul.f32 1.442695, %v4488_v54 }
 0xd08   :  { %v4551_v54 = vmul.f32 1.442695, %v4472_v0  ;;  %v4474_v0 = vsub.f32 %v8982_v19, %v9220_v41 }
 0xd0d   :  { %4148 = vperm.xlu0 %5916, %v8825_v31   ;;  %v4405_v31 = vpop.xlane.xlu0 %4404 }
 0xd0e   :  { %v4485_v16 = vsub.f32 %v9074_v10, %v4405_v31  ;;  %v4486_v34 = vsub.f32 %v9070_v35, %v4405_v31  ;;  %v6151_v10 = vpop.eup %6150  ;;  %v4487_v35 = vsub.f32 %v9062_v57, %v4408_v58  ;;  %v4740_v31 = vadd.f32 %v9229_v39, %v9225_v7  ;;  %v4411_v58 = vpop.xlane.xlu2 %4410 }
 0xd0f   :  { %v6153_v8 = vpop.eup %6152  ;;  %v4471_v57 = vsub.f32 %v8962_v25, %v9210_v38  ;;  %v4490_v12 = vsub.f32 %v9010_v42, %v4411_v58 }
 0xd10   :  { %v4577_v14 = vmul.f32 1.442695, %v4485_v16  ;;  %v4579_v4 = vmul.f32 1.442695, %v4486_v34  ;;  %v6155_v46 = vpop.eup %6154  ;;  %v9243_v16 = vmul.f32 %v6151_v10, %v10552_v56  ;;  %v4581_v34 = vmul.f32 1.442695, %v4487_v35 }
 0xd11   :  { %v9249_v32 = vmul.f32 %v6153_v8, %v10554_v53  ;;  %v9253_v5 = vmul.f32 %v6155_v46, %v10555_v29  ;;  %v4216_v10 = vadd.f32 %v8888_v36, %v8880_v45  ;;  %v4215_v8 = vadd.f32 %v8886_v23, %v8880_v45 }
 0xd12   :  { %6160 = vpow2.f32 %v4577_v14  ;;  %v6157_v14 = vpop.eup %6156  ;;  %v4746_v25 = vadd.f32 %v9243_v16, %v9239_v40  ;;  %v4549_v35 = vmul.f32 1.442695, %v4471_v57  ;;  %v4489_v46 = vsub.f32 %v9016_v59, %v4411_v58  ;;  %v10559_v58 = vld [vmem:[#allocation90_spill] sm:$0xff] }
 0xd13   :  { %6162 = vpow2.f32 %v4579_v4  ;;  %v6159_v4 = vpop.eup %6158  ;;  %v4743_v11 = vadd.f32 %v9253_v5, %v9249_v32  ;;  %v4280_v56 = vmul.f32 0.2, %v4216_v10  ;;  %v10557_v45 = vunpack.c.l.bf16 %v10556_v28 }
 0xd14   :  { %6164 = vpow2.f32 %v4581_v34  ;;  %v10558_v59 = vunpack.c.h.bf16 %v10556_v28  ;;  %v4279_v53 = vmul.f32 0.2, %v4215_v8  ;;  %v4473_v29 = vsub.f32 %v8986_v63, %v9220_v41 }
 0xd15   :  { %v9231_v15 = vpop.xlane.xlu0 %4416  ;;  %6166 = vpow2.f32 %v4583_v30  ;;  %v9271_v57 = vmul.f32 %v6157_v14, %v10557_v45  ;;  %v4585_v42 = vmul.f32 1.442695, %v4489_v46  ;;  %v10560_v30 = vunpack.c.l.bf16 %v10559_v58 }
 0xd16   :  { %v9275_v34 = vmul.f32 %v6159_v4, %v10558_v59  ;;  %6168 = vpow2.f32 %v4549_v35  ;;  %v10561_v14 = vunpack.c.h.bf16 %v10559_v58  ;;  %v4587_v4 = vmul.f32 1.442695, %v4490_v12  ;;  %v9291_v35 = vpop.xlane.xlu1 %4413 }
 0xd17   :  { %6170 = vpow2.f32 %v4551_v54  ;;  %v9289_v45 = vmax.f32 %v4216_v10, %v4280_v56  ;;  %v4553_v41 = vmul.f32 1.442695, %v4473_v29  ;;  %v9295_v46 = vmax.f32 %v4215_v8, %v4279_v53  ;;  %v10563_v56 = vld [vmem:[#allocation80_spill] sm:$0xff] }
 0xd18   :  { %v4749_v63 = vadd.f32 %v9275_v34, %v9271_v57  ;;  %6172 = vpow2.f32 %v4585_v42  ;;  %v10564_v59 = vunpack.c.l.bf16 %v10563_v56  ;;  %v10565_v8 = vunpack.c.h.bf16 %v10563_v56 }
 0xd19   :  { %6174 = vpow2.f32 %v4587_v4  ;;  %v4430_v10 = vmax.f32 %v9295_v46, %v9289_v45  ;;  %v4484_v42 = vsub.f32 %v9032_v47, %v9214_v61 }
 0xd1a   :  { %6176 = vpow2.f32 %v4553_v41 }
 0xd1d   :  { %v9264_v43 = vpop.xlane.xlu0 %4422 }
 0xd22   :  { %4741 = vadd.xlane.f32.xlu1 %v4740_v31  ;;  %v6161_v31 = vpop.eup %6160 }
 0xd23   :  { %v6163_v38 = vpop.eup %6162 }
 0xd24   :  { %v6165_v28 = vpop.eup %6164 }
 0xd25   :  { %v6167_v19 = vpop.eup %6166  ;;  %v9299_v12 = vpop.xlane.xlu0 %4425  ;;  %v9305_v58 = vmul.f32 %v6165_v28, %v10564_v59  ;;  %v10567_v28 = vld [vmem:[#allocation77_spill] sm:$0xff] }
 0xd26   :  { %v6169_v54 = vpop.eup %6168  ;;  %v9309_v53 = vmul.f32 %v6167_v19, %v10565_v8  ;;  %v10569_v19 = vunpack.c.h.bf16 %v10567_v28  ;;  %v10570_v8 = vld [vmem:[#allocation83_spill] sm:$0xff] }
 0xd27   :  { %v6171_v29 = vpop.eup %6170 }
 0xd28   :  { %4747 = vadd.xlane.f32.xlu2 %v4746_v25  ;;  %v9283_v25 = vmul.f32 %v6161_v31, %v10560_v30  ;;  %v4555_v31 = vmul.f32 1.442695, %v4474_v0  ;;  %10566 = vst [vmem:[#allocation41_spill] sm:$0xff] %v9309_v53  ;;  %v4483_v0 = vsub.f32 %v9036_v44, %v9214_v61  ;;  %v6173_v30 = vpop.eup %6172  ;;  %v4758_v4 = vadd.f32 %v9309_v53, %v9305_v58 }
 0xd29   :  { %v9323_v41 = vmul.f32 %v6171_v29, %v10569_v19  ;;  %v10573_v29 = vld [vmem:[#allocation88_spill] sm:$0xff] }
 0xd2a   :  { %4744 = vadd.xlane.f32.xlu1 %v4743_v11  ;;  %v9287_v11 = vmul.f32 %v6163_v38, %v10561_v14  ;;  %6178 = vpow2.f32 %v4555_v31  ;;  %v6175_v31 = vpop.eup %6174  ;;  %v4573_v56 = vmul.f32 1.442695, %v4483_v0  ;;  %v10574_v0 = vunpack.c.l.bf16 %v10573_v29 }
 0xd2b   :  { %v6177_v44 = vpop.eup %6176 }
 0xd2c   :  { %10562 = vst [vmem:[#allocation42_spill] sm:$0xff] %v9287_v11  ;;  %v4755_v38 = vadd.f32 %v9287_v11, %v9283_v25  ;;  %v10571_v11 = vunpack.c.l.bf16 %v10570_v8 }
 0xd2e   :  { %v9329_v53 = vmul.f32 %v6173_v30, %v10571_v11 }
 0xd30   :  { %4750 = vadd.xlane.f32.xlu2 %v4749_v63  ;;  %v10568_v63 = vunpack.c.l.bf16 %v10567_v28  ;;  %v6179_v47 = vpop.eup %6178 }
 0xd32   :  { %4756 = vadd.xlane.f32.xlu1 %v4755_v38  ;;  %v4715_v14 = vpop.xlane.xlu1 %4714  ;;  %v9319_v38 = vmul.f32 %v6169_v54, %v10568_v63  ;;  %v10572_v54 = vunpack.c.h.bf16 %v10570_v8  ;;  %v9343_v63 = vpop.xlane.xlu2 %4419  ;;  %v4491_v8 = vsub.f32 %v9078_v18, %v9291_v35  ;;  %v4219_v18 = vadd.f32 %v8886_v23, %v8884_v26 }
 0xd33   :  { %6180 = vrcp.f32 %v4715_v14  ;;  %v10575_v14 = vunpack.c.h.bf16 %v10573_v29 }
 0xd34   :  { %v4734_v59 = vadd.f32 %v9323_v41, %v9319_v38  ;;  %v9333_v28 = vmul.f32 %v6175_v31, %v10572_v54 }
 0xd36   :  { %v4761_v11 = vadd.f32 %v9333_v28, %v9329_v53 }
 0xd37   :  { %4431 = vmax.xlane.f32.xlu0 %v4430_v10  ;;  %v4575_v10 = vmul.f32 1.442695, %v4484_v42  ;;  %v9337_v42 = vmul.f32 %v6177_v44, %v10574_v0  ;;  %v4220_v0 = vadd.f32 %v8888_v36, %v8884_v26 }
 0xd38   :  { %4759 = vadd.xlane.f32.xlu2 %v4758_v4  ;;  %v9341_v4 = vmul.f32 %v6179_v47, %v10575_v14  ;;  %v4492_v14 = vsub.f32 %v9076_v52, %v9291_v35  ;;  %v4283_v35 = vmul.f32 0.2, %v4219_v18 }
 0xd39   :  { %v6181_v30 = vpop.eup %6180 }
 0xd3a   :  { %v4718_v61 = vpop.xlane.xlu0 %4717  ;;  %v4737_v31 = vadd.f32 %v9341_v4, %v9337_v42  ;;  %v4842_v44 = vmul.f32 %v6181_v30, %v9120_v48  ;;  %v10576_v48 = vld [vmem:[#allocation89_spill] sm:$0xff] }
 0xd3b   :  { %6182 = vrcp.f32 %v4718_v61 }
 0xd3c   :  { %6184 = vpow2.f32 %v4573_v56 }
 0xd3d   :  { %6186 = vpow2.f32 %v4575_v10  ;;  %v4841_v10 = vmul.f32 %v6181_v30, %v9116_v9 }
 0xd3f   :  { %4735 = vadd.xlane.f32.xlu0 %v4734_v59 }
 0xd40   :  { %4762 = vadd.xlane.f32.xlu2 %v4761_v11 }
 0xd41   :  { %v6183_v19 = vpop.eup %6182 }
 0xd42   :  { %v6185_v56 = vpop.eup %6184  ;;  %v4843_v61 = vmul.f32 %v6183_v19, %v9128_v17  ;;  %v4844_v47 = vmul.f32 %v6183_v19, %v9132_v37  ;;  %v4721_v9 = vpop.xlane.xlu2 %4720  ;;  %v10577_v17 = vunpack.c.l.bf16 %v10576_v48  ;;  %v10578_v37 = vunpack.c.h.bf16 %v10576_v48 }
 0xd43   :  { %v6187_v59 = vpop.eup %6186  ;;  %v4589_v19 = vmul.f32 1.442695, %v4491_v8  ;;  %6188 = vrcp.f32 %v4721_v9 }
 0xd44   :  { %v4905_v54 = vpack.c.bf16 %v4843_v61, %v4841_v10  ;;  %v4906_v29 = vpack.c.bf16 %v4844_v47, %v4842_v44  ;;  %v9361_v11 = vmul.f32 %v6185_v56, %v10577_v17  ;;  %v9365_v30 = vmul.f32 %v6187_v59, %v10578_v37  ;;  %v10579_v17 = vld [vmem:[#allocation67_spill] sm:$0xff] }
 0xd45   :  { %v4591_v10 = vmul.f32 1.442695, %v4492_v14  ;;  %v9374_v47 = vmax.f32 %v4219_v18, %v4283_v35  ;;  %v10580_v37 = vunpack.c.l.bf16 %v10579_v17 }
 0xd46   :  { %4948 = vmatmul.bf16.vlgmr.msrb.gmra.mxu2 %v4905_v54  ;;  %5037 = vmatmul.bf16.vlgmr.msrb.gmra.mxu3 %v4906_v29  ;;  %v4752_v52 = vadd.f32 %v9365_v30, %v9361_v11 }
 0xd47   :  { %4738 = vadd.xlane.f32.xlu0 %v4737_v31  ;;  %v4284_v31 = vmul.f32 0.2, %v4220_v0 }
 0xd49   :  { %v9372_v56 = vmax.f32 %v4220_v0, %v4284_v31  ;;  %v6189_v61 = vpop.eup %6188 }
 0xd4a   :  { %v4724_v44 = vpop.xlane.xlu1 %4723  ;;  %v4845_v54 = vmul.f32 %v6189_v61, %v9142_v51  ;;  %v4846_v14 = vmul.f32 %v6189_v61, %v9148_v60  ;;  %v10582_v51 = vld [vmem:[#allocation49_spill] sm:$0xff] }
 0xd4b   :  { %6190 = vrcp.f32 %v4724_v44  ;;  %4156 = vperm.xlu1 %5917, %v8839_v50   ;;  %v4436_v59 = vmax.f32 %v9374_v47, %v9372_v56 }
 0xd4c   :  { %6192 = vpow2.f32 %v4589_v19  ;;  %v10581_v19 = vunpack.c.h.bf16 %v10579_v17 }
 0xd4d   :  { %6194 = vpow2.f32 %v4591_v10 }
 0xd4f   :  { %4753 = vadd.xlane.f32.xlu0 %v4752_v52 }
 0xd51   :  { %v6191_v26 = vpop.eup %6190 }
 0xd52   :  { %v6193_v8 = vpop.eup %6192  ;;  %v4847_v29 = vmul.f32 %v6191_v26, %v9158_v6  ;;  %v4848_v50 = vmul.f32 %v6191_v26, %v9164_v27  ;;  %v4730_v6 = vpop.xlane.xlu1 %4729  ;;  %v10583_v27 = vld [vmem:[#allocation47_spill] sm:$0xff] }
 0xd53   :  { %v6195_v9 = vpop.eup %6194  ;;  %v9384_v18 = vmul.f32 %v6193_v8, %v10580_v37  ;;  %v4218_v10 = vadd.f32 %v8888_v36, %v10583_v27  ;;  %v4217_v44 = vadd.f32 %v8886_v23, %v10583_v27  ;;  %6196 = vrcp.f32 %v4730_v6 }
 0xd54   :  { %v4907_v0 = vpack.c.bf16 %v4847_v29, %v4845_v54  ;;  %v4908_v48 = vpack.c.bf16 %v4848_v50, %v4846_v14  ;;  %v9388_v31 = vmul.f32 %v6195_v9, %v10581_v19  ;;  %v10584_v14 = vld [vmem:[#allocation48_spill] sm:$0xff]  ;;  %v4495_v6 = vsub.f32 %v9042_v49, %v9343_v63 }
 0xd55   :  { %v4282_v35 = vmul.f32 0.2, %v4218_v10  ;;  %v4281_v61 = vmul.f32 0.2, %v4217_v44 }
 0xd56   :  { %4953 = vmatmul.bf16.gmra.mxu2 %v4907_v0  ;;  %5042 = vmatmul.bf16.gmra.mxu3 %v4908_v48  ;;  %v4764_v60 = vadd.f32 %v9388_v31, %v9384_v18  ;;  %v4597_v27 = vmul.f32 1.442695, %v4495_v6 }
 0xd57   :  { %4437 = vmax.xlane.f32.xlu0 %v4436_v59  ;;  %v9397_v59 = vmax.f32 %v4218_v10, %v4282_v35  ;;  %v9399_v54 = vmax.f32 %v4217_v44, %v4281_v61  ;;  %v4497_v61 = vsub.f32 %v9100_v24, %v9264_v43  ;;  %v4493_v24 = vsub.f32 %v9090_v55, %v9231_v15 }
 0xd58   :  { %4164 = vperm.xlu2 %5918, %v10582_v51  }
 0xd59   :  { %v6197_v26 = vpop.eup %6196  ;;  %v4433_v17 = vmax.f32 %v9399_v54, %v9397_v59 }
 0xd5a   :  { %v4851_v9 = vmul.f32 %v6197_v26, %v9174_v22  ;;  %v4852_v48 = vmul.f32 %v6197_v26, %v9178_v62  ;;  %v10585_v22 = vld [vmem:[#allocation46_spill] sm:$0xff] }
 0xd5f   :  { %4765 = vadd.xlane.f32.xlu0 %v4764_v60 }
 0xd6a   :  { %v4145_v29 = vpop.permute.xlu1 %4144 }
 0xd6b   :  { %v4221_v37 = vadd.f32 %v8886_v23, %v4145_v29  ;;  %v4222_v19 = vadd.f32 %v8888_v36, %v4145_v29 }
 0xd6c   :  { %v4727_v52 = vpop.xlane.xlu0 %4726 }
 0xd6d   :  { %6198 = vrcp.f32 %v4727_v52  ;;  %v4286_v62 = vmul.f32 0.2, %v4222_v19 }
 0xd6e   :  { %6200 = vpow2.f32 %v4597_v27  ;;  %v10589_v27 = vld [vmem:[#allocation68_spill] sm:$0xff] }
 0xd6f   :  { %v9416_v52 = vmax.f32 %v4222_v19, %v4286_v62  ;;  %v10586_v19 = vld [vmem:[#allocation45_spill] sm:$0xff] }
 0xd73   :  { %v6199_v8 = vpop.eup %6198  ;;  %4160 = vperm.xlu0 %5916, %v10584_v14  }
 0xd74   :  { %v4849_v50 = vmul.f32 %v6199_v8, %v9196_v1  ;;  %v4850_v0 = vmul.f32 %v6199_v8, %v9200_v2  ;;  %v4496_v1 = vsub.f32 %v10585_v22, %v9343_v63  ;;  %v4285_v2 = vmul.f32 0.2, %v4221_v37  ;;  %v4429_v8 = vpop.xlane.xlu2 %4428 }
 0xd75   :  { %4434 = vmax.xlane.f32.xlu1 %v4433_v17  ;;  %v4498_v63 = vsub.f32 %v9096_v21, %v9264_v43  ;;  %v4494_v21 = vsub.f32 %v10586_v19, %v9231_v15  ;;  %v4593_v22 = vmul.f32 1.442695, %v4493_v24  ;;  %v10591_v15 = vunpack.c.h.bf16 %v10589_v27 }
 0xd76   :  { %v4909_v51 = vpack.c.bf16 %v4851_v9, %v4849_v50  ;;  %v4910_v60 = vpack.c.bf16 %v4852_v48, %v4850_v0  ;;  %v4599_v10 = vmul.f32 1.442695, %v4496_v1  ;;  %v9414_v44 = vmax.f32 %v4221_v37, %v4285_v2  ;;  %v6201_v37 = vpop.eup %6200  ;;  %v10588_v1 = vld [vmem:[#allocation44_spill] sm:$0xff] }
 0xd77   :  { %v4601_v9 = vmul.f32 1.442695, %v4497_v61  ;;  %v4603_v17 = vmul.f32 1.442695, %v4498_v63  ;;  %v4500_v2 = vsub.f32 %v10588_v1, %v9299_v12  ;;  %v4595_v55 = vmul.f32 1.442695, %v4494_v21 }
 0xd78   :  { %4958 = vmatmul.bf16.gmra.mxu2 %v4909_v51  ;;  %5047 = vmatmul.bf16.gmra.mxu3 %v4910_v60  ;;  %6202 = vpow2.f32 %v4599_v10  ;;  %v4439_v50 = vmax.f32 %v9414_v44, %v9416_v52  ;;  %v10587_v60 = vld [vmem:[#allocation43_spill] sm:$0xff]  ;;  %v10590_v10 = vunpack.c.l.bf16 %v10589_v27 }
 0xd79   :  { %6204 = vpow2.f32 %v4601_v9  ;;  %v4499_v6 = vsub.f32 %v10587_v60, %v9299_v12  ;;  %v10592_v12 = vld [vmem:[#allocation69_spill] sm:$0xff]  ;;  %v4502_v60 = vsub.f32 %v9154_v33, %v4429_v8  ;;  %v10600_v33 = vld [vmem:[#allocation92_spill] sm:$0xff] }
 0xd7a   :  { %6206 = vpow2.f32 %v4603_v17  ;;  %v10595_v24 = vunpack.c.h.bf16 %v10592_v12 }
 0xd7b   :  { %6208 = vpow2.f32 %v4593_v22 }
 0xd7c   :  { %v4733_v62 = vpop.xlane.xlu2 %4732  ;;  %6210 = vpow2.f32 %v4595_v55  ;;  %v10597_v55 = vld [vmem:[#allocation66_spill] sm:$0xff] }
 0xd7d   :  { %v10598_v27 = vunpack.c.l.bf16 %v10597_v55 }
 0xd7e   :  { %v6203_v51 = vpop.eup %6202 }
 0xd7f   :  { %v4149_v35 = vpop.permute.xlu0 %4148  ;;  %v9446_v61 = vmul.f32 %v6203_v51, %v10591_v15  ;;  %v6205_v63 = vpop.eup %6204  ;;  %v10599_v15 = vunpack.c.h.bf16 %v10597_v55 }
 0xd80   :  { %v4223_v49 = vadd.f32 %v8886_v23, %v4149_v35  ;;  %v4224_v26 = vadd.f32 %v8888_v36, %v4149_v35  ;;  %v9442_v35 = vmul.f32 %v6201_v37, %v10590_v10 }
 0xd81   :  { %4440 = vmax.xlane.f32.xlu2 %v4439_v50  ;;  %v10593_v50 = vunpack.c.l.bf16 %v10592_v12 }
 0xd82   :  { %v4287_v29 = vmul.f32 0.2, %v4223_v49  ;;  %v4288_v14 = vmul.f32 0.2, %v4224_v26 }
 0xd83   :  { %v9452_v9 = vmul.f32 %v6205_v63, %v10593_v50 }
 0xd84   :  { %v9426_v0 = vmax.f32 %v4223_v49, %v4287_v29  ;;  %v9428_v48 = vmax.f32 %v4224_v26, %v4288_v14  ;;  %v4605_v49 = vmul.f32 1.442695, %v4499_v6  ;;  %v4607_v26 = vmul.f32 1.442695, %v4500_v2  ;;  %v6207_v14 = vpop.eup %6206  ;;  %v4153_v21 = vpop.permute.xlu2 %4152 }
 0xd85   :  { %v4770_v29 = vadd.f32 %v9446_v61, %v9442_v35  ;;  %10594 = vst [vmem:[#allocation39_spill] sm:$0xff] %v9452_v9  ;;  %v9456_v17 = vmul.f32 %v6207_v14, %v10595_v24  ;;  %v6209_v37 = vpop.eup %6208  ;;  %v4225_v1 = vadd.f32 %v8886_v23, %v4153_v21  ;;  %v4226_v2 = vadd.f32 %v8888_v36, %v4153_v21 }
 0xd86   :  { %v4442_v43 = vmax.f32 %v9426_v0, %v9428_v48  ;;  %6212 = vpow2.f32 %v4605_v49  ;;  %v6211_v19 = vpop.eup %6210  ;;  %v9466_v10 = vmul.f32 %v6209_v37, %v10598_v27  ;;  %v10604_v27 = vld [vmem:[#allocation93_spill] sm:$0xff] }
 0xd87   :  { %6214 = vpow2.f32 %v4607_v26  ;;  %10596 = vst [vmem:[#allocation40_spill] sm:$0xff] %v9456_v17  ;;  %v4773_v6 = vadd.f32 %v9456_v17, %v9452_v9  ;;  %v9470_v49 = vmul.f32 %v6211_v19, %v10599_v15  ;;  %v4611_v26 = vmul.f32 1.442695, %v4502_v60 }
 0xd88   :  { %4443 = vmax.xlane.f32.xlu1 %v4442_v43  ;;  %v4501_v43 = vsub.f32 %v9160_v13, %v4429_v8  ;;  %v10601_v8 = vunpack.c.l.bf16 %v10600_v33  ;;  %v4289_v12 = vmul.f32 0.2, %v4225_v1  ;;  %v4290_v50 = vmul.f32 0.2, %v4226_v2 }
 0xd89   :  { %v4767_v24 = vadd.f32 %v9470_v49, %v9466_v10  ;;  %v10605_v15 = vunpack.c.l.bf16 %v10604_v27 }
 0xd8a   :  { %v4609_v13 = vmul.f32 1.442695, %v4501_v43  ;;  %v9486_v21 = vmax.f32 %v4225_v1, %v4289_v12  ;;  %v9488_v43 = vmax.f32 %v4226_v2, %v4290_v50  ;;  %v5185_v50 = vld [vmem:[%s10090_s13 + $0x18] sm:$0xff] }
 0xd8b   :  { %5298 = vmatpush.msrb.mxu0 %v5185_v50 }
 0xd8c   :  { %v6213_v51 = vpop.eup %6212  ;;  %6216 = vpow2.f32 %v4609_v13  ;;  %v4445_v60 = vmax.f32 %v9486_v21, %v9488_v43 }
 0xd8d   :  { %v6215_v22 = vpop.eup %6214  ;;  %v9474_v63 = vmul.f32 %v6213_v51, %v10601_v8  ;;  %6218 = vpow2.f32 %v4611_v26  ;;  %v10607_v26 = vunpack.c.h.bf16 %v10604_v27 }
 0xd8e   :  { %6220 = vrcp.f32 %v4733_v62  ;;  %v5182_v62 = vld [vmem:[%s10090_s13] sm:$0xff] }
 0xd90   :  { %4771 = vadd.xlane.f32.xlu1 %v4770_v29  ;;  %v10602_v29 = vunpack.c.h.bf16 %v10600_v33 }
 0xd92   :  { %v9478_v14 = vmul.f32 %v6215_v22, %v10602_v29  ;;  %v6217_v51 = vpop.eup %6216 }
 0xd93   :  { %v9496_v13 = vmul.f32 %v6217_v51, %v10605_v15 }
 0xd94   :  { %10603 = vst [vmem:[#allocation37_spill] sm:$0xff] %v9478_v14  ;;  %v4776_v19 = vadd.f32 %v9478_v14, %v9474_v63 }
 0xd95   :  { %v4742_v22 = vpop.xlane.xlu1 %4741  ;;  %10606 = vst [vmem:[#allocation38_spill] sm:$0xff] %v9496_v13 }
 0xd98   :  { %4774 = vadd.xlane.f32.xlu1 %v4773_v6  ;;  %v6219_v6 = vpop.eup %6218 }
 0xd99   :  { %v9500_v1 = vmul.f32 %v6219_v6, %v10607_v26  ;;  %v6221_v51 = vpop.eup %6220 }
 0xd9a   :  { %v4853_v26 = vmul.f32 %v6221_v51, %v9184_v20  ;;  %v4854_v50 = vmul.f32 %v6221_v51, %v9188_v3 }
 0xd9b   :  { %v9482_v37 = vpop.xlane.xlu2 %4747  ;;  %10608 = vst [vmem:[#allocation35_spill] sm:$0xff] %v9500_v1  ;;  %v4779_v33 = vadd.f32 %v9500_v1, %v9496_v13 }
 0xd9d   :  { %4768 = vadd.xlane.f32.xlu0 %v4767_v24  ;;  %v9504_v8 = vpop.xlane.xlu1 %4744  ;;  %v5184_v24 = vld [vmem:[%s10090_s13 + $0x10] sm:$0xff] }
 0xd9e   :  { %5299 = vmatpush.msrb.mxu0 %v5184_v24 }
 0xda0   :  { %4777 = vadd.xlane.f32.xlu1 %v4776_v19  ;;  %v5183_v19 = vld [vmem:[%s10090_s13 + $0x8] sm:$0xff] }
 0xda1   :  { %5300 = vmatpush.msrb.mxu0 %v5183_v19 }
 0xda3   :  { %v9492_v55 = vpop.xlane.xlu2 %4750  ;;  %5301 = vmatpush.msrb.mxu0 %v5182_v62 }
 0xda5   :  { %4446 = vmax.xlane.f32.xlu0 %v4445_v60  ;;  %v9522_v6 = vpop.xlane.xlu1 %4756 }
 0xdaa   :  { %v4432_v2 = vpop.xlane.xlu0 %4431 }
 0xdab   :  { %v9506_v29 = vpop.xlane.xlu2 %4759  ;;  %v4503_v27 = vsub.f32 %v9295_v46, %v4432_v2 }
 0xdad   :  { %4780 = vadd.xlane.f32.xlu0 %v4779_v33  ;;  %v4504_v33 = vsub.f32 %v9289_v45, %v4432_v2  ;;  %v4613_v1 = vmul.f32 1.442695, %v4503_v27 }
 0xdaf   :  { %v4615_v14 = vmul.f32 1.442695, %v4504_v33 }
 0xdb2   :  { %v4736_v12 = vpop.xlane.xlu0 %4735 }
 0xdb3   :  { %6222 = vrcp.f32 %v4736_v12  ;;  %v9517_v60 = vpop.xlane.xlu2 %4762 }
 0xdb4   :  { %6224 = vrcp.f32 %v4742_v22 }
 0xdb9   :  { %v6223_v15 = vpop.eup %6222 }
 0xdba   :  { %v4855_v12 = vmul.f32 %v6223_v15, %v9319_v38  ;;  %v4856_v24 = vmul.f32 %v6223_v15, %v9323_v41  ;;  %v4739_v13 = vpop.xlane.xlu0 %4738 }
 0xdbb   :  { %v4165_v46 = vpop.permute.xlu2 %4164  ;;  %6226 = vrcp.f32 %v4739_v13  ;;  %v6225_v13 = vpop.eup %6224 }
 0xdbc   :  { %v4911_v17 = vpack.c.bf16 %v4855_v12, %v4853_v26  ;;  %v4912_v9 = vpack.c.bf16 %v4856_v24, %v4854_v50  ;;  %v4231_v20 = vadd.f32 %v8886_v23, %v4165_v46  ;;  %v4232_v45 = vadd.f32 %v8888_v36, %v4165_v46  ;;  %v9551_v46 = vld [vmem:[%s10089_s12] ss:$0 sm:$0xff] }
 0xdbd   :  { %6228 = vpow2.f32 %v4613_v1  ;;  %v4157_v38 = vpop.permute.xlu1 %4156 }
 0xdbe   :  { %4963 = vmatmul.bf16.gmra.mxu2 %v4911_v17  ;;  %5052 = vmatmul.bf16.gmra.mxu3 %v4912_v9  ;;  %v4295_v3 = vmul.f32 0.2, %v4231_v20  ;;  %v4296_v2 = vmul.f32 0.2, %v4232_v45  ;;  %v4227_v41 = vadd.f32 %v8886_v23, %v4157_v38  ;;  %v4228_v19 = vadd.f32 %v8888_v36, %v4157_v38  ;;  %v10609_v38 = vld [vmem:[#allocation94_spill] sm:$0xff] }
 0xdbf   :  { %6230 = vpow2.f32 %v4615_v14 }
 0xdc0   :  { %v9534_v51 = vmax.f32 %v4231_v20, %v4295_v3  ;;  %v9536_v22 = vmax.f32 %v4232_v45, %v4296_v2  ;;  %v4291_v17 = vmul.f32 0.2, %v4227_v41  ;;  %v4292_v9 = vmul.f32 0.2, %v4228_v19 }
 0xdc1   :  { %v6227_v62 = vpop.eup %6226  ;;  %v4859_v20 = vmul.f32 %v6225_v13, %v9225_v7  ;;  %v4860_v45 = vmul.f32 %v6225_v13, %v9229_v39  ;;  %v10610_v3 = vunpack.c.l.bf16 %v10609_v38  ;;  %6232 = vrcp.f32 %v9504_v8 }
 0xdc2   :  { %v9538_v27 = vmax.f32 %v4227_v41, %v4291_v17  ;;  %v9540_v15 = vmax.f32 %v4228_v19, %v4292_v9  ;;  %v4454_v1 = vmax.f32 %v9534_v51, %v9536_v22  ;;  %v4857_v12 = vmul.f32 %v6227_v62, %v9337_v42  ;;  %v4754_v24 = vpop.xlane.xlu0 %4753 }
 0xdc3   :  { %v6229_v26 = vpop.eup %6228  ;;  %v4858_v50 = vmul.f32 %v6227_v62, %v9341_v4  ;;  %v10611_v41 = vunpack.c.h.bf16 %v10609_v38  ;;  %6234 = vrcp.f32 %v9482_v37 }
 0xdc4   :  { %4455 = vmax.xlane.f32.xlu2 %v4454_v1  ;;  %v4448_v14 = vmax.f32 %v9538_v27, %v9540_v15  ;;  %v9557_v2 = vmul.f32 %v6229_v26, %v10610_v3  ;;  %v4913_v17 = vpack.c.bf16 %v4859_v20, %v4857_v12  ;;  %6236 = vrcp.f32 %v4754_v24 }
 0xdc5   :  { %v6231_v33 = vpop.eup %6230  ;;  %v4914_v9 = vpack.c.bf16 %v4860_v45, %v4858_v50  ;;  %6238 = vrcp.f32 %v9492_v55 }
 0xdc6   :  { %4449 = vmax.xlane.f32.xlu1 %v4448_v14  ;;  %v9561_v42 = vmul.f32 %v6231_v33, %v10611_v41 }
 0xdc7   :  { %v6233_v33 = vpop.eup %6232 }
 0xdc8   :  { %v4782_v39 = vadd.f32 %v9561_v42, %v9557_v2  ;;  %v4861_v20 = vmul.f32 %v6233_v33, %v9249_v32  ;;  %v4862_v37 = vmul.f32 %v6233_v33, %v9253_v5 }
 0xdc9   :  { %v4949_v4 = vpop.f32.mrf.mxu2  ;;  %v5038_v19 = vpop.f32.mrf.mxu3 }
 0xdca   :  { %v4950_v62 = vadd.f32 %v9551_v46, %v4949_v4  ;;  %v4438_v1 = vpop.xlane.xlu0 %4437  ;;  %v6235_v12 = vpop.eup %6234 }
 0xdcb   :  { %v4863_v38 = vmul.f32 %v6235_v12, %v9239_v40  ;;  %v4864_v3 = vmul.f32 %v6235_v12, %v9243_v16  ;;  %v4507_v5 = vsub.f32 %v9374_v47, %v4438_v1  ;;  %v4508_v40 = vsub.f32 %v9372_v56, %v4438_v1  ;;  %v6237_v47 = vpop.eup %6236 }
 0xdcc   :  { %v5039_v7 = vadd.f32 %v5038_v19, %v4950_v62 }
 0xdcd   :  { %v4915_v19 = vpack.c.bf16 %v4863_v38, %v4861_v20 }
 0xdce   :  { %4968 = vmatmul.bf16.gmra.mxu2 %v4913_v17  ;;  %5057 = vmatmul.bf16.gmra.mxu3 %v4914_v9  ;;  %v5118_v13 = vmax.f32 %v5039_v7, 0.0  ;;  %v4916_v17 = vpack.c.bf16 %v4864_v3, %v4862_v37  ;;  %v4621_v7 = vmul.f32 1.442695, %v4507_v5  ;;  %v4868_v37 = vmul.f32 %v6237_v47, %v9365_v30 }
 0xdcf   :  { %4783 = vadd.xlane.f32.xlu1 %v4782_v39  ;;  %v4623_v39 = vmul.f32 1.442695, %v4508_v40 }
 0xdd0   :  { %5150 = vst.msk [vmem:[%s10091_s15] sm:$0xff] %vm1058_vm1, %v5118_v13  ;;  %5824 = vmatmul.msk.f32.vlgmr.msrb.gmra.mxu0 %vm1058_vm1, %v5118_v13  ;;  %6240 = vpow2.f32 %v4621_v7 }
 0xdd1   :  { %v4951_v26 = vpop.f32.mrf.mxu2  ;;  %v5040_v14 = vpop.f32.mrf.mxu3  ;;  %6242 = vpow2.f32 %v4623_v39 }
 0xdd2   :  { %v4952_v8 = vadd.f32 %v9551_v46, %v4951_v26  ;;  %v9583_v9 = vpop.xlane.xlu0 %4765  ;;  %6244 = vrcp.f32 %v9506_v29 }
 0xdd3   :  { %6246 = vrcp.f32 %v9522_v6 }
 0xdd4   :  { %v5041_v50 = vadd.f32 %v5040_v14, %v4952_v8  ;;  %v6239_v14 = vpop.eup %6238 }
 0xdd5   :  { %v4865_v3 = vmul.f32 %v6239_v14, %v9271_v57 }
 0xdd6   :  { %v5119_v45 = vmax.f32 %v5041_v50, 0.0  ;;  %v4867_v50 = vmul.f32 %v6237_v47, %v9361_v11  ;;  %v6241_v11 = vpop.eup %6240  ;;  %v10615_v47 = vld [vmem:[#allocation91_spill] sm:$0xff] }
 0xdd7   :  { %v6243_v57 = vpop.eup %6242 }
 0xdd8   :  { %5151 = vst.msk [vmem:[%s10091_s15 + $0x8] sm:$0xff] %vm1058_vm1, %v5119_v45  ;;  %5825 = vmatmul.msk.f32.gmra.mxu0 %vm1058_vm1, %v5119_v45 }
 0xdd9   :  { %v4954_v41 = vpop.f32.mrf.mxu2  ;;  %v5043_v4 = vpop.f32.mrf.mxu3 }
 0xdda   :  { %v4955_v32 = vadd.f32 %v9551_v46, %v4954_v41 }
 0xddc   :  { %v5044_v16 = vadd.f32 %v5043_v4, %v4955_v32 }
 0xdde   :  { %4973 = vmatmul.bf16.gmra.mxu2 %v4915_v19  ;;  %5062 = vmatmul.bf16.gmra.mxu3 %v4916_v17  ;;  %v5120_v62 = vmax.f32 %v5044_v16, 0.0  ;;  %v4917_v19 = vpack.c.bf16 %v4867_v50, %v4865_v3 }
 0xde0   :  { %5152 = vst.msk [vmem:[%s10091_s15 + $0x10] sm:$0xff] %vm1058_vm1, %v5120_v62  ;;  %5826 = vmatmul.msk.f32.gmra.mxu0 %vm1058_vm1, %v5120_v62  ;;  %v6245_v62 = vpop.eup %6244 }
 0xde1   :  { %v4956_v13 = vpop.f32.mrf.mxu2  ;;  %v5045_v56 = vpop.f32.mrf.mxu3 }
 0xde2   :  { %v4957_v26 = vadd.f32 %v9551_v46, %v4956_v13  ;;  %v6247_v7 = vpop.eup %6246 }
 0xde4   :  { %v5046_v33 = vadd.f32 %v5045_v56, %v4957_v26  ;;  %v10616_v26 = vunpack.c.l.bf16 %v10615_v47  ;;  %v4871_v56 = vmul.f32 %v6245_v62, %v9305_v58 }
 0xde5   :  { %v4161_v24 = vpop.permute.xlu0 %4160 }
 0xde6   :  { %v4229_v1 = vadd.f32 %v8886_v23, %v4161_v24  ;;  %v4230_v55 = vadd.f32 %v8888_v36, %v4161_v24  ;;  %v5121_v20 = vmax.f32 %v5046_v33, 0.0  ;;  %v4866_v36 = vmul.f32 %v6239_v14, %v9275_v34  ;;  %v10612_v34 = vld [vmem:[#allocation81_spill] sm:$0xff] }
 0xde7   :  { %v10617_v14 = vunpack.c.h.bf16 %v10615_v47 }
 0xde8   :  { %v4293_v8 = vmul.f32 0.2, %v4229_v1  ;;  %v4294_v12 = vmul.f32 0.2, %v4230_v55  ;;  %5153 = vst.msk [vmem:[%s10091_s15 + $0x18] sm:$0xff] %vm1058_vm1, %v5121_v20  ;;  %5827 = vmatmul.msk.f32.gmra.mxu0 %vm1058_vm1, %v5121_v20  ;;  %v4435_v23 = vpop.xlane.xlu1 %4434  ;;  %v4918_v17 = vpack.c.bf16 %v4868_v37, %v4866_v36 }
 0xde9   :  { %v4505_v41 = vsub.f32 %v9399_v54, %v4435_v23  ;;  %v4506_v30 = vsub.f32 %v9397_v59, %v4435_v23  ;;  %v10613_v54 = vunpack.c.l.bf16 %v10612_v34  ;;  %v10614_v59 = vunpack.c.h.bf16 %v10612_v34 }
 0xdea   :  { %v9599_v45 = vmax.f32 %v4229_v1, %v4293_v8  ;;  %v9601_v38 = vmax.f32 %v4230_v55, %v4294_v12  ;;  %v4869_v8 = vmul.f32 %v6247_v7, %v9283_v25  ;;  %v10618_v12 = vld [vmem:[#allocation41_spill] sm:$0xff] }
 0xdeb   :  { %v4617_v32 = vmul.f32 1.442695, %v4505_v41  ;;  %v4619_v5 = vmul.f32 1.442695, %v4506_v30  ;;  %v9618_v40 = vmul.f32 %v6241_v11, %v10613_v54  ;;  %v9622_v16 = vmul.f32 %v6243_v57, %v10614_v59  ;;  %v10619_v11 = vld [vmem:[#allocation42_spill] sm:$0xff] }
 0xdec   :  { %v4451_v4 = vmax.f32 %v9599_v45, %v9601_v38  ;;  %v4872_v50 = vmul.f32 %v6245_v62, %v10618_v12  ;;  %v4919_v58 = vpack.c.bf16 %v4871_v56, %v4869_v8  ;;  %v10623_v56 = vld [vmem:[#allocation85_spill] sm:$0xff] }
 0xded   :  { %6248 = vpow2.f32 %v4617_v32  ;;  %v4788_v29 = vadd.f32 %v9622_v16, %v9618_v40  ;;  %v10625_v12 = vunpack.c.h.bf16 %v10623_v56 }
 0xdee   :  { %4452 = vmax.xlane.f32.xlu0 %v4451_v4  ;;  %4978 = vmatmul.bf16.gmra.mxu2 %v4917_v19  ;;  %6250 = vpow2.f32 %v4619_v5 }
 0xdef   :  { %5067 = vmatmul.bf16.gmra.mxu3 %v4918_v17 }
 0xdf3   :  { %v6249_v39 = vpop.eup %6248 }
 0xdf4   :  { %v6251_v13 = vpop.eup %6250  ;;  %v4441_v6 = vpop.xlane.xlu2 %4440  ;;  %v9628_v24 = vmul.f32 %v6249_v39, %v10616_v26 }
 0xdf5   :  { %v4509_v1 = vsub.f32 %v9414_v44, %v4441_v6  ;;  %v4510_v55 = vsub.f32 %v9416_v52, %v4441_v6  ;;  %v9635_v33 = vmul.f32 %v6251_v13, %v10617_v14  ;;  %v4870_v44 = vmul.f32 %v6247_v7, %v10619_v11 }
 0xdf6   :  { %4789 = vadd.xlane.f32.xlu0 %v4788_v29 }
 0xdf7   :  { %v4625_v20 = vmul.f32 1.442695, %v4509_v1  ;;  %v4627_v37 = vmul.f32 1.442695, %v4510_v55  ;;  %v4785_v3 = vadd.f32 %v9635_v33, %v9628_v24  ;;  %v4920_v4 = vpack.c.bf16 %v4872_v50, %v4870_v44 }
 0xdf8   :  { %v10624_v1 = vunpack.c.l.bf16 %v10623_v56 }
 0xdf9   :  { %6252 = vpow2.f32 %v4625_v20  ;;  %4786 = vadd.xlane.f32.xlu1 %v4785_v3 }
 0xdfa   :  { %6254 = vpow2.f32 %v4627_v37 }
 0xdfb   :  { %v4959_v23 = vpop.f32.mrf.mxu2  ;;  %v4444_v36 = vpop.xlane.xlu1 %4443  ;;  %6256 = vrcp.f32 %v9517_v60  ;;  %v10620_v60 = vld [vmem:[#allocation82_spill] sm:$0xff] }
 0xdfc   :  { %v4960_v52 = vadd.f32 %v9551_v46, %v4959_v23  ;;  %v5048_v41 = vpop.f32.mrf.mxu3  ;;  %v4511_v30 = vsub.f32 %v9426_v0, %v4444_v36  ;;  %v4512_v25 = vsub.f32 %v9428_v48, %v4444_v36  ;;  %6258 = vrcp.f32 %v9583_v9 }
 0xdfd   :  { %v10621_v34 = vunpack.c.l.bf16 %v10620_v60  ;;  %v10622_v62 = vunpack.c.h.bf16 %v10620_v60 }
 0xdfe   :  { %v5049_v19 = vadd.f32 %v5048_v41, %v4960_v52  ;;  %v4629_v57 = vmul.f32 1.442695, %v4511_v30  ;;  %v4631_v17 = vmul.f32 1.442695, %v4512_v25  ;;  %4983 = vmatmul.bf16.gmra.mxu2 %v4919_v58 }
 0xdff   :  { %5072 = vmatmul.bf16.gmra.mxu3 %v4920_v4  ;;  %v6253_v5 = vpop.eup %6252 }
 0xe00   :  { %v5122_v32 = vmax.f32 %v5049_v19, 0.0  ;;  %6260 = vpow2.f32 %v4629_v57  ;;  %v6255_v0 = vpop.eup %6254  ;;  %v9654_v54 = vmul.f32 %v6253_v5, %v10621_v34 }
 0xe01   :  { %6262 = vpow2.f32 %v4631_v17  ;;  %v6257_v59 = vpop.eup %6256  ;;  %v9659_v29 = vmul.f32 %v6255_v0, %v10622_v62  ;;  %v10629_v62 = vld [vmem:[#allocation37_spill] sm:$0xff] }
 0xe02   :  { %5154 = vst.msk [vmem:[%s10091_s15 + $0x20] sm:$0xff] %vm1058_vm1, %v5122_v32  ;;  %5828 = vmatmul.msk.f32.gmra.mxu0 %vm1058_vm1, %v5122_v32  ;;  %v6259_v7 = vpop.eup %6258  ;;  %v4873_v23 = vmul.f32 %v6257_v59, %v9329_v53  ;;  %v4874_v36 = vmul.f32 %v6257_v59, %v9333_v28 }
 0xe03   :  { %v4961_v48 = vpop.f32.mrf.mxu2  ;;  %v4791_v47 = vadd.f32 %v9659_v29, %v9654_v54  ;;  %v4772_v8 = vpop.xlane.xlu1 %4771  ;;  %v4875_v20 = vmul.f32 %v6259_v7, %v9384_v18  ;;  %v4876_v37 = vmul.f32 %v6259_v7, %v9388_v31 }
 0xe04   :  { %v4962_v9 = vadd.f32 %v9551_v46, %v4961_v48  ;;  %v5050_v39 = vpop.f32.mrf.mxu3  ;;  %6264 = vrcp.f32 %v4772_v8 }
 0xe05   :  { %4792 = vadd.xlane.f32.xlu2 %v4791_v47  ;;  %v4921_v58 = vpack.c.bf16 %v4875_v20, %v4873_v23  ;;  %v4922_v11 = vpack.c.bf16 %v4876_v37, %v4874_v36 }
 0xe06   :  { %v6261_v13 = vpop.eup %6260  ;;  %v5051_v6 = vadd.f32 %v5050_v39, %v4962_v9  ;;  %v10630_v39 = vld [vmem:[#allocation39_spill] sm:$0xff] }
 0xe07   :  { %v6263_v26 = vpop.eup %6262  ;;  %v9665_v55 = vmul.f32 %v6261_v13, %v10624_v1 }
 0xe08   :  { %v5123_v14 = vmax.f32 %v5051_v6, 0.0  ;;  %v9669_v50 = vmul.f32 %v6263_v26, %v10625_v12  ;;  %v10631_v6 = vld [vmem:[#allocation40_spill] sm:$0xff] }
 0xe0a   :  { %5155 = vst.msk [vmem:[%s10091_s15 + $0x28] sm:$0xff] %vm1058_vm1, %v5123_v14  ;;  %5829 = vmatmul.msk.f32.gmra.mxu0 %vm1058_vm1, %v5123_v14  ;;  %v4794_v3 = vadd.f32 %v9669_v50, %v9665_v55  ;;  %v6265_v44 = vpop.eup %6264 }
 0xe0b   :  { %v4775_v31 = vpop.xlane.xlu1 %4774  ;;  %v4879_v4 = vmul.f32 %v6265_v44, %v9442_v35  ;;  %v4880_v17 = vmul.f32 %v6265_v44, %v9446_v61 }
 0xe0c   :  { %4795 = vadd.xlane.f32.xlu1 %v4794_v3 }
 0xe0e   :  { %4988 = vmatmul.bf16.gmra.mxu2 %v4921_v58 }
 0xe0f   :  { %5077 = vmatmul.bf16.gmra.mxu3 %v4922_v11 }
 0xe10   :  { %v4769_v18 = vpop.xlane.xlu0 %4768 }
 0xe11   :  { %6266 = vrcp.f32 %v4769_v18 }
 0xe13   :  { %v4778_v32 = vpop.xlane.xlu1 %4777 }
 0xe17   :  { %v6267_v52 = vpop.eup %6266 }
 0xe18   :  { %v4447_v41 = vpop.xlane.xlu0 %4446  ;;  %v4877_v30 = vmul.f32 %v6267_v52, %v9466_v10  ;;  %v4878_v28 = vmul.f32 %v6267_v52, %v9470_v49 }
 0xe19   :  { %v4513_v25 = vsub.f32 %v9486_v21, %v4447_v41  ;;  %v4514_v53 = vsub.f32 %v9488_v43, %v4447_v41  ;;  %v10626_v43 = vld [vmem:[#allocation86_spill] sm:$0xff] }
 0xe1a   :  { %v4923_v5 = vpack.c.bf16 %v4879_v4, %v4877_v30  ;;  %v4924_v0 = vpack.c.bf16 %v4880_v17, %v4878_v28  ;;  %v10627_v48 = vunpack.c.l.bf16 %v10626_v43  ;;  %v10628_v60 = vunpack.c.h.bf16 %v10626_v43  ;;  %v10632_v30 = vld [vmem:[#allocation97_spill] sm:$0xff] }
 0xe1b   :  { %v4633_v19 = vmul.f32 1.442695, %v4513_v25  ;;  %v4635_v57 = vmul.f32 1.442695, %v4514_v53  ;;  %v10634_v28 = vunpack.c.h.bf16 %v10632_v30 }
 0xe1d   :  { %6268 = vpow2.f32 %v4633_v19 }
 0xe1e   :  { %6270 = vpow2.f32 %v4635_v57  ;;  %4993 = vmatmul.bf16.gmra.mxu2 %v4923_v5  ;;  %v10635_v57 = vld [vmem:[#allocation96_spill] sm:$0xff] }
 0xe1f   :  { %6272 = vrcp.f32 %v4778_v32  ;;  %5082 = vmatmul.bf16.gmra.mxu3 %v4924_v0  ;;  %v10636_v17 = vunpack.c.l.bf16 %v10635_v57 }
 0xe20   :  { %6274 = vrcp.f32 %v4775_v31  ;;  %v4781_v14 = vpop.xlane.xlu0 %4780 }
 0xe21   :  { %6276 = vrcp.f32 %v4781_v14 }
 0xe23   :  { %v6269_v10 = vpop.eup %6268 }
 0xe24   :  { %v6271_v21 = vpop.eup %6270  ;;  %v9690_v49 = vmul.f32 %v6269_v10, %v10627_v48 }
 0xe25   :  { %v6273_v35 = vpop.eup %6272  ;;  %v9694_v34 = vmul.f32 %v6271_v21, %v10628_v60  ;;  %v10637_v21 = vunpack.c.h.bf16 %v10635_v57 }
 0xe26   :  { %v6275_v61 = vpop.eup %6274  ;;  %v4883_v9 = vmul.f32 %v6273_v35, %v9474_v63  ;;  %v4884_v7 = vmul.f32 %v6273_v35, %v10629_v62 }
 0xe27   :  { %v4797_v59 = vadd.f32 %v9694_v34, %v9690_v49  ;;  %v4881_v13 = vmul.f32 %v6275_v61, %v10630_v39  ;;  %v4882_v47 = vmul.f32 %v6275_v61, %v10631_v6  ;;  %v6277_v31 = vpop.eup %6276  ;;  %v10638_v61 = vld [vmem:[#allocation38_spill] sm:$0xff] }
 0xe28   :  { %v9740_v6 = vld [vmem:[%s10092_s14] ss:$0 sm:$0xff] }
 0xe29   :  { %4798 = vadd.xlane.f32.xlu0 %v4797_v59  ;;  %v4925_v26 = vpack.c.bf16 %v4883_v9, %v4881_v13  ;;  %v4926_v56 = vpack.c.bf16 %v4884_v7, %v4882_v47  ;;  %v4885_v59 = vmul.f32 %v6277_v31, %v10638_v61  ;;  %v10639_v7 = vld [vmem:[#allocation35_spill] sm:$0xff] }
 0xe2a   :  { %v4886_v39 = vmul.f32 %v6277_v31, %v10639_v7 }
 0xe2e   :  { %4998 = vmatmul.bf16.gmra.mxu2 %v4925_v26 }
 0xe2f   :  { %5087 = vmatmul.bf16.gmra.mxu3 %v4926_v56 }
 0xe37   :  { %v4456_v1 = vpop.xlane.xlu2 %4455 }
 0xe38   :  { %v4519_v8 = vsub.f32 %v9534_v51, %v4456_v1  ;;  %v4520_v12 = vsub.f32 %v9536_v22, %v4456_v1 }
 0xe39   :  { %v4450_v20 = vpop.xlane.xlu1 %4449 }
 0xe3a   :  { %v4645_v37 = vmul.f32 1.442695, %v4519_v8  ;;  %v4647_v63 = vmul.f32 1.442695, %v4520_v12  ;;  %v4515_v3 = vsub.f32 %v9538_v27, %v4450_v20  ;;  %v4516_v23 = vsub.f32 %v9540_v15, %v4450_v20 }
 0xe3b   :  { %v10633_v15 = vunpack.c.l.bf16 %v10632_v30 }
 0xe3c   :  { %6278 = vpow2.f32 %v4645_v37  ;;  %v4637_v36 = vmul.f32 1.442695, %v4515_v3  ;;  %v4639_v58 = vmul.f32 1.442695, %v4516_v23 }
 0xe3d   :  { %6280 = vpow2.f32 %v4647_v63 }
 0xe3e   :  { %6282 = vpow2.f32 %v4637_v36 }
 0xe3f   :  { %6284 = vpow2.f32 %v4639_v58 }
 0xe41   :  { %v4964_v11 = vpop.f32.mrf.mxu2  ;;  %v5053_v18 = vpop.f32.mrf.mxu3 }
 0xe42   :  { %v4965_v51 = vadd.f32 %v9551_v46, %v4964_v11  ;;  %v4784_v44 = vpop.xlane.xlu1 %4783  ;;  %v6279_v52 = vpop.eup %6278 }
 0xe43   :  { %6286 = vrcp.f32 %v4784_v44  ;;  %v6281_v41 = vpop.eup %6280  ;;  %v9709_v25 = vmul.f32 %v6279_v52, %v10633_v15 }
 0xe44   :  { %v5054_v22 = vadd.f32 %v5053_v18, %v4965_v51  ;;  %v6283_v53 = vpop.eup %6282  ;;  %v9713_v4 = vmul.f32 %v6281_v41, %v10634_v28 }
 0xe45   :  { %v6285_v19 = vpop.eup %6284  ;;  %v9722_v32 = vmul.f32 %v6283_v53, %v10636_v17 }
 0xe46   :  { %v5124_v27 = vmax.f32 %v5054_v22, 0.0  ;;  %v4806_v5 = vadd.f32 %v9713_v4, %v9709_v25  ;;  %v9728_v43 = vmul.f32 %v6285_v19, %v10637_v21 }
 0xe48   :  { %5156 = vst.msk [vmem:[%s10091_s15 + $0x30] sm:$0xff] %vm1058_vm1, %v5124_v27  ;;  %5830 = vmatmul.msk.f32.gmra.mxu0 %vm1058_vm1, %v5124_v27  ;;  %4807 = vadd.xlane.f32.xlu0 %v4806_v5  ;;  %v4800_v60 = vadd.f32 %v9728_v43, %v9722_v32 }
 0xe49   :  { %v4966_v0 = vpop.f32.mrf.mxu2  ;;  %v5055_v10 = vpop.f32.mrf.mxu3 }
 0xe4a   :  { %v4967_v48 = vadd.f32 %v9551_v46, %v4966_v0  ;;  %v6287_v35 = vpop.eup %6286  ;;  %4801 = vadd.xlane.f32.xlu2 %v4800_v60 }
 0xe4b   :  { %v4887_v62 = vmul.f32 %v6287_v35, %v9557_v2  ;;  %v4888_v13 = vmul.f32 %v6287_v35, %v9561_v42 }
 0xe4c   :  { %v5056_v9 = vadd.f32 %v5055_v10, %v4967_v48  ;;  %v10640_v48 = vld [vmem:[#allocation95_spill] sm:$0xff] }
 0xe4d   :  { %v4927_v26 = vpack.c.bf16 %v4887_v62, %v4885_v59  ;;  %v4928_v56 = vpack.c.bf16 %v4888_v13, %v4886_v39  ;;  %v5303_v2 = vpop.f32.mrf.mxu0  ;;  %v10641_v35 = vunpack.c.l.bf16 %v10640_v48  ;;  %v10642_v59 = vunpack.c.h.bf16 %v10640_v48 }
 0xe4e   :  { %v5125_v47 = vmax.f32 %v5056_v9, 0.0  ;;  %v5304_v42 = vadd.f32 %v9740_v6, %v5303_v2 }
 0xe4f   :  { %5003 = vmatmul.bf16.gmra.mxu2 %v4927_v26  ;;  %5092 = vmatmul.bf16.gmra.mxu3 %v4928_v56 }
 0xe50   :  { %5157 = vst.msk [vmem:[%s10091_s15 + $0x38] sm:$0xff] %vm1058_vm1, %v5125_v47  ;;  %5831 = vmatmul.msk.f32.gmra.mxu0 %vm1058_vm1, %v5125_v47 }
 0xe51   :  { %v4969_v1 = vpop.f32.mrf.mxu2  ;;  %v5058_v14 = vpop.f32.mrf.mxu3  ;;  %5400 = vst.msk [vmem:[%s10093_s16] sm:$0xff] %vm5399_vm2, %v5304_v42 }
 0xe52   :  { %v4970_v8 = vadd.f32 %v9551_v46, %v4969_v1 }
 0xe54   :  { %v5059_v12 = vadd.f32 %v5058_v14, %v4970_v8 }
 0xe55   :  { %v5306_v37 = vpop.f32.mrf.mxu0 }
 0xe56   :  { %v5126_v20 = vmax.f32 %v5059_v12, 0.0  ;;  %v5307_v63 = vadd.f32 %v9740_v6, %v5306_v37 }
 0xe58   :  { %5158 = vst.msk [vmem:[%s10091_s15 + $0x40] sm:$0xff] %vm1058_vm1, %v5126_v20  ;;  %5832 = vmatmul.msk.f32.gmra.mxu0 %vm1058_vm1, %v5126_v20 }
 0xe59   :  { %v4971_v3 = vpop.f32.mrf.mxu2  ;;  %v5060_v23 = vpop.f32.mrf.mxu3  ;;  %5401 = vst.msk [vmem:[%s10093_s16 + $0x8] sm:$0xff] %vm5399_vm2, %v5307_v63 }
 0xe5a   :  { %v4972_v36 = vadd.f32 %v9551_v46, %v4971_v3 }
 0xe5c   :  { %v5061_v58 = vadd.f32 %v5060_v23, %v4972_v36 }
 0xe5d   :  { %v5309_v18 = vpop.f32.mrf.mxu0 }
 0xe5e   :  { %v5127_v11 = vmax.f32 %v5061_v58, 0.0  ;;  %v5310_v51 = vadd.f32 %v9740_v6, %v5309_v18 }
 0xe60   :  { %5159 = vst.msk [vmem:[%s10091_s15 + $0x48] sm:$0xff] %vm1058_vm1, %v5127_v11  ;;  %5833 = vmatmul.msk.f32.gmra.mxu0 %vm1058_vm1, %v5127_v11 }
 0xe61   :  { %v4453_v31 = vpop.xlane.xlu0 %4452  ;;  %v4974_v22 = vpop.f32.mrf.mxu2  ;;  %5402 = vst.msk [vmem:[%s10093_s16 + $0x10] sm:$0xff] %vm5399_vm2, %v5310_v51 }
 0xe62   :  { %v4517_v44 = vsub.f32 %v9599_v45, %v4453_v31  ;;  %v4518_v52 = vsub.f32 %v9601_v38, %v4453_v31  ;;  %v4975_v41 = vadd.f32 %v9551_v46, %v4974_v22  ;;  %v5063_v27 = vpop.f32.mrf.mxu3 }
 0xe64   :  { %v4641_v30 = vmul.f32 1.442695, %v4517_v44  ;;  %v4643_v15 = vmul.f32 1.442695, %v4518_v52  ;;  %v5064_v53 = vadd.f32 %v5063_v27, %v4975_v41 }
 0xe65   :  { %v5312_v45 = vpop.f32.mrf.mxu0 }
 0xe66   :  { %6288 = vpow2.f32 %v4641_v30  ;;  %v5128_v28 = vmax.f32 %v5064_v53, 0.0  ;;  %v5313_v38 = vadd.f32 %v9740_v6, %v5312_v45 }
 0xe67   :  { %6290 = vpow2.f32 %v4643_v15 }
 0xe68   :  { %5160 = vst.msk [vmem:[%s10091_s15 + $0x50] sm:$0xff] %vm1058_vm1, %v5128_v28  ;;  %5834 = vmatmul.msk.f32.gmra.mxu0 %vm1058_vm1, %v5128_v28 }
 0xe69   :  { %v4976_v19 = vpop.f32.mrf.mxu2  ;;  %5403 = vst.msk [vmem:[%s10093_s16 + $0x18] sm:$0xff] %vm5399_vm2, %v5313_v38  ;;  %v4790_v5 = vpop.xlane.xlu0 %4789 }
 0xe6a   :  { %v4977_v57 = vadd.f32 %v9551_v46, %v4976_v19  ;;  %v5065_v17 = vpop.f32.mrf.mxu3  ;;  %6292 = vrcp.f32 %v4790_v5 }
 0xe6c   :  { %v6289_v0 = vpop.eup %6288  ;;  %v5066_v10 = vadd.f32 %v5065_v17, %v4977_v57  ;;  %v4787_v62 = vpop.xlane.xlu1 %4786 }
 0xe6d   :  { %v6291_v21 = vpop.eup %6290  ;;  %v9790_v60 = vmul.f32 %v6289_v0, %v10641_v35  ;;  %6294 = vrcp.f32 %v4787_v62 }
 0xe6e   :  { %v5129_v61 = vmax.f32 %v5066_v10, 0.0  ;;  %v9794_v9 = vmul.f32 %v6291_v21, %v10642_v59 }
 0xe70   :  { %5161 = vst.msk [vmem:[%s10091_s15 + $0x58] sm:$0xff] %vm1058_vm1, %v5129_v61  ;;  %v4803_v7 = vadd.f32 %v9794_v9, %v9790_v60  ;;  %5835 = vmatmul.msk.f32.gmra.mxu0 %vm1058_vm1, %v5129_v61  ;;  %v6293_v26 = vpop.eup %6292 }
 0xe71   :  { %v4979_v39 = vpop.f32.mrf.mxu2  ;;  %v4891_v14 = vmul.f32 %v6293_v26, %v9618_v40  ;;  %v4892_v12 = vmul.f32 %v6293_v26, %v9622_v16 }
 0xe72   :  { %v4980_v13 = vadd.f32 %v9551_v46, %v4979_v39  ;;  %v5068_v47 = vpop.f32.mrf.mxu3  ;;  %4804 = vadd.xlane.f32.xlu1 %v4803_v7 }
 0xe73   :  { %v6295_v2 = vpop.eup %6294 }
 0xe74   :  { %v5069_v56 = vadd.f32 %v5068_v47, %v4980_v13  ;;  %v4889_v1 = vmul.f32 %v6295_v2, %v9628_v24  ;;  %v4890_v8 = vmul.f32 %v6295_v2, %v9635_v33 }
 0xe76   :  { %v5130_v42 = vmax.f32 %v5069_v56, 0.0  ;;  %v4929_v20 = vpack.c.bf16 %v4891_v14, %v4889_v1  ;;  %v4930_v37 = vpack.c.bf16 %v4892_v12, %v4890_v8 }
 0xe78   :  { %5162 = vst.msk [vmem:[%s10091_s15 + $0x60] sm:$0xff] %vm1058_vm1, %v5130_v42  ;;  %5836 = vmatmul.msk.f32.gmra.mxu0 %vm1058_vm1, %v5130_v42  ;;  %v4793_v24 = vpop.xlane.xlu2 %4792  ;;  %5008 = vmatmul.bf16.gmra.mxu2 %v4929_v20 }
 0xe79   :  { %v4981_v63 = vpop.f32.mrf.mxu2  ;;  %5097 = vmatmul.bf16.gmra.mxu3 %v4930_v37  ;;  %6296 = vrcp.f32 %v4793_v24 }
 0xe7a   :  { %v4982_v3 = vadd.f32 %v9551_v46, %v4981_v63  ;;  %v5070_v23 = vpop.f32.mrf.mxu3 }
 0xe7c   :  { %v5071_v40 = vadd.f32 %v5070_v23, %v4982_v3 }
 0xe7e   :  { %v5131_v33 = vmax.f32 %v5071_v40, 0.0 }
 0xe7f   :  { %v4796_v16 = vpop.xlane.xlu1 %4795  ;;  %v5315_v36 = vpop.f32.mrf.mxu0 }
 0xe80   :  { %5163 = vst.msk [vmem:[%s10091_s15 + $0x68] sm:$0xff] %vm1058_vm1, %v5131_v33  ;;  %6298 = vrcp.f32 %v4796_v16  ;;  %v5316_v58 = vadd.f32 %v9740_v6, %v5315_v36  ;;  %5837 = vmatmul.msk.f32.gmra.mxu0 %vm1058_vm1, %v5131_v33  ;;  %v6297_v31 = vpop.eup %6296 }
 0xe81   :  { %v4984_v11 = vpop.f32.mrf.mxu2  ;;  %v4893_v27 = vmul.f32 %v6297_v31, %v9654_v54  ;;  %v4894_v15 = vmul.f32 %v6297_v31, %v9659_v29 }
 0xe82   :  { %5404 = vst.msk [vmem:[%s10093_s16 + $0x20] sm:$0xff] %vm5399_vm2, %v5316_v58  ;;  %v4985_v18 = vadd.f32 %v9551_v46, %v4984_v11  ;;  %v5073_v51 = vpop.f32.mrf.mxu3 }
 0xe84   :  { %v5074_v22 = vadd.f32 %v5073_v51, %v4985_v18 }
 0xe86   :  { %v6299_v44 = vpop.eup %6298  ;;  %v5132_v52 = vmax.f32 %v5074_v22, 0.0 }
 0xe87   :  { %v5318_v41 = vpop.f32.mrf.mxu0  ;;  %v4895_v30 = vmul.f32 %v6299_v44, %v9665_v55  ;;  %v4896_v53 = vmul.f32 %v6299_v44, %v9669_v50 }
 0xe88   :  { %5164 = vst.msk [vmem:[%s10091_s15 + $0x70] sm:$0xff] %vm1058_vm1, %v5132_v52  ;;  %v5319_v28 = vadd.f32 %v9740_v6, %v5318_v41  ;;  %5838 = vmatmul.msk.f32.gmra.mxu0 %vm1058_vm1, %v5132_v52 }
 0xe89   :  { %v4986_v45 = vpop.f32.mrf.mxu2  ;;  %v4931_v38 = vpack.c.bf16 %v4895_v30, %v4893_v27  ;;  %v4932_v19 = vpack.c.bf16 %v4896_v53, %v4894_v15 }
 0xe8a   :  { %5405 = vst.msk [vmem:[%s10093_s16 + $0x28] sm:$0xff] %vm5399_vm2, %v5319_v28  ;;  %v4987_v54 = vadd.f32 %v9551_v46, %v4986_v45  ;;  %v5075_v29 = vpop.f32.mrf.mxu3 }
 0xe8b   :  { %5013 = vmatmul.bf16.gmra.mxu2 %v4931_v38  ;;  %5102 = vmatmul.bf16.gmra.mxu3 %v4932_v19 }
 0xe8c   :  { %v5076_v55 = vadd.f32 %v5075_v29, %v4987_v54 }
 0xe8e   :  { %v5133_v50 = vmax.f32 %v5076_v55, 0.0 }
 0xe90   :  { %5165 = vst.msk [vmem:[%s10091_s15 + $0x78] sm:$0xff] %vm1058_vm1, %v5133_v50  ;;  %5839 = vmatmul.msk.f32.gmra.mxu0 %vm1058_vm1, %v5133_v50 }
 0xe91   :  { %v4989_v57 = vpop.f32.mrf.mxu2 }
 0xe92   :  { %v4990_v17 = vadd.f32 %v9551_v46, %v4989_v57  ;;  %v5078_v5 = vpop.f32.mrf.mxu3 }
 0xe94   :  { %v5079_v0 = vadd.f32 %v5078_v5, %v4990_v17 }
 0xe96   :  { %v5134_v10 = vmax.f32 %v5079_v0, 0.0 }
 0xe98   :  { %5166 = vst.msk [vmem:[%s10091_s15 + $0x80] sm:$0xff] %vm1058_vm1, %v5134_v10  ;;  %5840 = vmatmul.msk.f32.gmra.mxu0 %vm1058_vm1, %v5134_v10 }
 0xe99   :  { %v4991_v21 = vpop.f32.mrf.mxu2 }
 0xe9a   :  { %v4992_v48 = vadd.f32 %v9551_v46, %v4991_v21  ;;  %v5080_v35 = vpop.f32.mrf.mxu3 }
 0xe9c   :  { %v5081_v61 = vadd.f32 %v5080_v35, %v4992_v48  ;;  %v4799_v24 = vpop.xlane.xlu0 %4798 }
 0xe9d   :  { %6300 = vrcp.f32 %v4799_v24 }
 0xe9e   :  { %v5135_v59 = vmax.f32 %v5081_v61, 0.0 }
 0xea0   :  { %5167 = vst.msk [vmem:[%s10091_s15 + $0x88] sm:$0xff] %vm1058_vm1, %v5135_v59  ;;  %5841 = vmatmul.msk.f32.gmra.mxu0 %vm1058_vm1, %v5135_v59 }
 0xea1   :  { %v4994_v62 = vpop.f32.mrf.mxu2 }
 0xea2   :  { %v4995_v7 = vadd.f32 %v9551_v46, %v4994_v62  ;;  %v5083_v39 = vpop.f32.mrf.mxu3 }
 0xea3   :  { %v6301_v36 = vpop.eup %6300 }
 0xea4   :  { %v5084_v13 = vadd.f32 %v5083_v39, %v4995_v7  ;;  %v4897_v51 = vmul.f32 %v6301_v36, %v9690_v49  ;;  %v4898_v22 = vmul.f32 %v6301_v36, %v9694_v34 }
 0xea6   :  { %v5136_v47 = vmax.f32 %v5084_v13, 0.0 }
 0xea8   :  { %5168 = vst.msk [vmem:[%s10091_s15 + $0x90] sm:$0xff] %vm1058_vm1, %v5136_v47  ;;  %5842 = vmatmul.msk.f32.gmra.mxu0 %vm1058_vm1, %v5136_v47 }
 0xea9   :  { %v4996_v26 = vpop.f32.mrf.mxu2 }
 0xeaa   :  { %v4997_v56 = vadd.f32 %v9551_v46, %v4996_v26  ;;  %v5085_v2 = vpop.f32.mrf.mxu3 }
 0xeac   :  { %v5086_v42 = vadd.f32 %v5085_v2, %v4997_v56 }
 0xeae   :  { %v5137_v1 = vmax.f32 %v5086_v42, 0.0 }
 0xeb0   :  { %5169 = vst.msk [vmem:[%s10091_s15 + $0x98] sm:$0xff] %vm1058_vm1, %v5137_v1  ;;  %5843 = vmatmul.msk.f32.gmra.mxu0 %vm1058_vm1, %v5137_v1 }
 0xeb1   :  { %v4999_v14 = vpop.f32.mrf.mxu2 }
 0xeb2   :  { %v5000_v8 = vadd.f32 %v9551_v46, %v4999_v14  ;;  %v5088_v12 = vpop.f32.mrf.mxu3 }
 0xeb4   :  { %v5089_v20 = vadd.f32 %v5088_v12, %v5000_v8 }
 0xeb6   :  { %v5138_v37 = vmax.f32 %v5089_v20, 0.0 }
 0xeb8   :  { %5170 = vst.msk [vmem:[%s10091_s15 + $0xa0] sm:$0xff] %vm1058_vm1, %v5138_v37  ;;  %5844 = vmatmul.msk.f32.gmra.mxu0 %vm1058_vm1, %v5138_v37 }
 0xeb9   :  { %v5001_v63 = vpop.f32.mrf.mxu2 }
 0xeba   :  { %v5002_v3 = vadd.f32 %v9551_v46, %v5001_v63  ;;  %v5090_v23 = vpop.f32.mrf.mxu3 }
 0xebb   :  { %v4808_v57 = vpop.xlane.xlu0 %4807 }
 0xebc   :  { %v5091_v40 = vadd.f32 %v5090_v23, %v5002_v3 }
 0xebd   :  { %v4802_v16 = vpop.xlane.xlu2 %4801 }
 0xebe   :  { %v5139_v33 = vmax.f32 %v5091_v40, 0.0  ;;  %6302 = vrcp.f32 %v4802_v16 }
 0xebf   :  { %6304 = vrcp.f32 %v4808_v57 }
 0xec0   :  { %5171 = vst.msk [vmem:[%s10091_s15 + $0xa8] sm:$0xff] %vm1058_vm1, %v5139_v33  ;;  %5845 = vmatmul.msk.f32.gmra.mxu0 %vm1058_vm1, %v5139_v33 }
 0xec4   :  { %v6303_v18 = vpop.eup %6302 }
 0xec5   :  { %v5321_v58 = vpop.f32.mrf.mxu0  ;;  %v4899_v31 = vmul.f32 %v6303_v18, %v9722_v32  ;;  %v4900_v44 = vmul.f32 %v6303_v18, %v9728_v43  ;;  %v6305_v10 = vpop.eup %6304 }
 0xec6   :  { %v5322_v11 = vadd.f32 %v9740_v6, %v5321_v58  ;;  %v4903_v35 = vmul.f32 %v6305_v10, %v9709_v25  ;;  %v4904_v59 = vmul.f32 %v6305_v10, %v9713_v4 }
 0xec7   :  { %v4933_v52 = vpack.c.bf16 %v4899_v31, %v4897_v51  ;;  %v4934_v41 = vpack.c.bf16 %v4900_v44, %v4898_v22 }
 0xec8   :  { %5406 = vst.msk [vmem:[%s10093_s16 + $0x30] sm:$0xff] %vm5399_vm2, %v5322_v11 }
 0xec9   :  { %5018 = vmatmul.bf16.gmra.mxu2 %v4933_v52  ;;  %5107 = vmatmul.bf16.gmra.mxu3 %v4934_v41 }
 0xecd   :  { %v5324_v27 = vpop.f32.mrf.mxu0 }
 0xece   :  { %v5325_v30 = vadd.f32 %v9740_v6, %v5324_v27 }
 0xed0   :  { %5407 = vst.msk [vmem:[%s10093_s16 + $0x38] sm:$0xff] %vm5399_vm2, %v5325_v30 }
 0xed2   :  { %v5004_v15 = vpop.f32.mrf.mxu2  ;;  %v5093_v49 = vpop.f32.mrf.mxu3 }
 0xed3   :  { %v5005_v32 = vadd.f32 %v9551_v46, %v5004_v15 }
 0xed5   :  { %v5094_v53 = vadd.f32 %v5093_v49, %v5005_v32  ;;  %v5327_v34 = vpop.f32.mrf.mxu0 }
 0xed6   :  { %v5328_v43 = vadd.f32 %v9740_v6, %v5327_v34 }
 0xed7   :  { %v5140_v28 = vmax.f32 %v5094_v53, 0.0 }
 0xed8   :  { %5408 = vst.msk [vmem:[%s10093_s16 + $0x40] sm:$0xff] %vm5399_vm2, %v5328_v43 }
 0xed9   :  { %5172 = vst.msk [vmem:[%s10091_s15 + $0xb0] sm:$0xff] %vm1058_vm1, %v5140_v28  ;;  %5846 = vmatmul.msk.f32.gmra.mxu0 %vm1058_vm1, %v5140_v28 }
 0xeda   :  { %v5006_v45 = vpop.f32.mrf.mxu2  ;;  %v5095_v19 = vpop.f32.mrf.mxu3 }
 0xedb   :  { %v5007_v38 = vadd.f32 %v9551_v46, %v5006_v45 }
 0xedd   :  { %v5096_v54 = vadd.f32 %v5095_v19, %v5007_v38  ;;  %v5330_v29 = vpop.f32.mrf.mxu0 }
 0xede   :  { %v5331_v55 = vadd.f32 %v9740_v6, %v5330_v29 }
 0xedf   :  { %v5141_v50 = vmax.f32 %v5096_v54, 0.0 }
 0xee0   :  { %5409 = vst.msk [vmem:[%s10093_s16 + $0x48] sm:$0xff] %vm5399_vm2, %v5331_v55 }
 0xee1   :  { %5173 = vst.msk [vmem:[%s10091_s15 + $0xb8] sm:$0xff] %vm1058_vm1, %v5141_v50  ;;  %5847 = vmatmul.msk.f32.gmra.mxu0 %vm1058_vm1, %v5141_v50 }
 0xee5   :  { %v4805_v17 = vpop.xlane.xlu1 %4804  ;;  %v5333_v5 = vpop.f32.mrf.mxu0 }
 0xee6   :  { %6306 = vrcp.f32 %v4805_v17  ;;  %v5334_v0 = vadd.f32 %v9740_v6, %v5333_v5 }
 0xee8   :  { %5410 = vst.msk [vmem:[%s10093_s16 + $0x50] sm:$0xff] %vm5399_vm2, %v5334_v0 }
 0xeec   :  { %v6307_v21 = vpop.eup %6306 }
 0xeed   :  { %v4901_v48 = vmul.f32 %v6307_v21, %v9790_v60  ;;  %v4902_v61 = vmul.f32 %v6307_v21, %v9794_v9  ;;  %v5336_v62 = vpop.f32.mrf.mxu0 }
 0xeee   :  { %v5337_v7 = vadd.f32 %v9740_v6, %v5336_v62 }
 0xeef   :  { %v4935_v39 = vpack.c.bf16 %v4903_v35, %v4901_v48  ;;  %v4936_v13 = vpack.c.bf16 %v4904_v59, %v4902_v61 }
 0xef0   :  { %5411 = vst.msk [vmem:[%s10093_s16 + $0x58] sm:$0xff] %vm5399_vm2, %v5337_v7 }
 0xef1   :  { %5023 = vmatmul.bf16.gmra.mxu2 %v4935_v39  ;;  %5112 = vmatmul.bf16.gmra.mxu3 %v4936_v13 }
 0xef5   :  { %v5339_v47 = vpop.f32.mrf.mxu0 }
 0xef6   :  { %v5340_v60 = vadd.f32 %v9740_v6, %v5339_v47 }
 0xef8   :  { %5412 = vst.msk [vmem:[%s10093_s16 + $0x60] sm:$0xff] %vm5399_vm2, %v5340_v60 }
 0xefb   :  { %v5009_v25 = vpop.f32.mrf.mxu2 }
 0xefc   :  { %v5098_v4 = vpop.f32.mrf.mxu3  ;;  %v5010_v9 = vadd.f32 %v9551_v46, %v5009_v25 }
 0xefd   :  { %v5342_v26 = vpop.f32.mrf.mxu0 }
 0xefe   :  { %v5343_v56 = vadd.f32 %v9740_v6, %v5342_v26  ;;  %v5099_v2 = vadd.f32 %v5098_v4, %v5010_v9 }
 0xf00   :  { %5413 = vst.msk [vmem:[%s10093_s16 + $0x68] sm:$0xff] %vm5399_vm2, %v5343_v56  ;;  %v5142_v42 = vmax.f32 %v5099_v2, 0.0 }
 0xf02   :  { %5174 = vst.msk [vmem:[%s10091_s15 + $0xc0] sm:$0xff] %vm1058_vm1, %v5142_v42  ;;  %5848 = vmatmul.msk.f32.gmra.mxu0 %vm1058_vm1, %v5142_v42 }
 0xf03   :  { %v5011_v1 = vpop.f32.mrf.mxu2 }
 0xf04   :  { %v5100_v14 = vpop.f32.mrf.mxu3  ;;  %v5012_v8 = vadd.f32 %v9551_v46, %v5011_v1 }
 0xf05   :  { %v5345_v12 = vpop.f32.mrf.mxu0 }
 0xf06   :  { %v5346_v20 = vadd.f32 %v9740_v6, %v5345_v12  ;;  %v5101_v37 = vadd.f32 %v5100_v14, %v5012_v8 }
 0xf08   :  { %5414 = vst.msk [vmem:[%s10093_s16 + $0x70] sm:$0xff] %vm5399_vm2, %v5346_v20  ;;  %v5143_v63 = vmax.f32 %v5101_v37, 0.0 }
 0xf0a   :  { %5175 = vst.msk [vmem:[%s10091_s15 + $0xc8] sm:$0xff] %vm1058_vm1, %v5143_v63  ;;  %5849 = vmatmul.msk.f32.gmra.mxu0 %vm1058_vm1, %v5143_v63 }
 0xf0d   :  { %v5348_v40 = vpop.f32.mrf.mxu0 }
 0xf0e   :  { %v5014_v3 = vpop.f32.mrf.mxu2  ;;  %v5103_v23 = vpop.f32.mrf.mxu3  ;;  %v5349_v33 = vadd.f32 %v9740_v6, %v5348_v40 }
 0xf0f   :  { %v5015_v24 = vadd.f32 %v9551_v46, %v5014_v3  ;;  %v6308_v46 = vld [vmem:[%s10089_s12] ss:$0 sm:$0xff] }
 0xf10   :  { %5415 = vst.msk [vmem:[%s10093_s16 + $0x78] sm:$0xff] %vm5399_vm2, %v5349_v33 }
 0xf11   :  { %v5104_v16 = vadd.f32 %v5103_v23, %v5015_v24 }
 0xf13   :  { %v5144_v36 = vmax.f32 %v5104_v16, 0.0 }
 0xf15   :  { %5176 = vst.msk [vmem:[%s10091_s15 + $0xd0] sm:$0xff] %vm1058_vm1, %v5144_v36  ;;  %5850 = vmatmul.msk.f32.gmra.mxu0 %vm1058_vm1, %v5144_v36  ;;  %v5351_v18 = vpop.f32.mrf.mxu0 }
 0xf16   :  { %v5016_v58 = vpop.f32.mrf.mxu2  ;;  %v5105_v51 = vpop.f32.mrf.mxu3  ;;  %v5352_v31 = vadd.f32 %v9740_v6, %v5351_v18 }
 0xf17   :  { %v5017_v11 = vadd.f32 %v6308_v46, %v5016_v58 }
 0xf18   :  { %5416 = vst.msk [vmem:[%s10093_s16 + $0x80] sm:$0xff] %vm5399_vm2, %v5352_v31 }
 0xf19   :  { %v5106_v22 = vadd.f32 %v5105_v51, %v5017_v11 }
 0xf1b   :  { %v5145_v44 = vmax.f32 %v5106_v22, 0.0 }
 0xf1d   :  { %5177 = vst.msk [vmem:[%s10091_s15 + $0xd8] sm:$0xff] %vm1058_vm1, %v5145_v44  ;;  %5851 = vmatmul.msk.f32.gmra.mxu0 %vm1058_vm1, %v5145_v44  ;;  %v5354_v52 = vpop.f32.mrf.mxu0 }
 0xf1e   :  { %v5355_v41 = vadd.f32 %v9740_v6, %v5354_v52 }
 0xf20   :  { %5417 = vst.msk [vmem:[%s10093_s16 + $0x88] sm:$0xff] %vm5399_vm2, %v5355_v41 }
 0xf25   :  { %v5357_v27 = vpop.f32.mrf.mxu0 }
 0xf26   :  { %v5358_v30 = vadd.f32 %v9740_v6, %v5357_v27 }
 0xf28   :  { %5418 = vst.msk [vmem:[%s10093_s16 + $0x90] sm:$0xff] %vm5399_vm2, %v5358_v30 }
 0xf2d   :  { %v5360_v15 = vpop.f32.mrf.mxu0 }
 0xf2e   :  { %v5361_v49 = vadd.f32 %v9740_v6, %v5360_v15 }
 0xf30   :  { %5419 = vst.msk [vmem:[%s10093_s16 + $0x98] sm:$0xff] %vm5399_vm2, %v5361_v49 }
 0xf35   :  { %v5363_v32 = vpop.f32.mrf.mxu0 }
 0xf36   :  { %v5364_v53 = vadd.f32 %v9740_v6, %v5363_v32 }
 0xf38   :  { %5420 = vst.msk [vmem:[%s10093_s16 + $0xa0] sm:$0xff] %vm5399_vm2, %v5364_v53 }
 0xf3d   :  { %v5366_v34 = vpop.f32.mrf.mxu0 }
 0xf3e   :  { %v5367_v43 = vadd.f32 %v9740_v6, %v5366_v34 }
 0xf40   :  { %5421 = vst.msk [vmem:[%s10093_s16 + $0xa8] sm:$0xff] %vm5399_vm2, %v5367_v43 }
 0xf4c   :  { %v5019_v28 = vpop.f32.mrf.mxu2  ;;  %v5108_v45 = vpop.f32.mrf.mxu3 }
 0xf4d   :  { %v5020_v38 = vadd.f32 %v6308_v46, %v5019_v28 }
 0xf4f   :  { %v5109_v19 = vadd.f32 %v5108_v45, %v5020_v38 }
 0xf51   :  { %v5146_v54 = vmax.f32 %v5109_v19, 0.0 }
 0xf53   :  { %5178 = vst.msk [vmem:[%s10091_s15 + $0xe0] sm:$0xff] %vm1058_vm1, %v5146_v54  ;;  %5852 = vmatmul.msk.f32.gmra.mxu0 %vm1058_vm1, %v5146_v54 }
 0xf54   :  { %v5021_v29 = vpop.f32.mrf.mxu2  ;;  %v5110_v57 = vpop.f32.mrf.mxu3 }
 0xf55   :  { %v5022_v55 = vadd.f32 %v6308_v46, %v5021_v29 }
 0xf56   :  { %v5369_v50 = vpop.f32.mrf.mxu0 }
 0xf57   :  { %v5370_v17 = vadd.f32 %v9740_v6, %v5369_v50  ;;  %v5111_v5 = vadd.f32 %v5110_v57, %v5022_v55 }
 0xf59   :  { %5422 = vst.msk [vmem:[%s10093_s16 + $0xb0] sm:$0xff] %vm5399_vm2, %v5370_v17  ;;  %v5147_v0 = vmax.f32 %v5111_v5, 0.0 }
 0xf5b   :  { %5179 = vst.msk [vmem:[%s10091_s15 + $0xe8] sm:$0xff] %vm1058_vm1, %v5147_v0  ;;  %5853 = vmatmul.msk.f32.gmra.mxu0 %vm1058_vm1, %v5147_v0 }
 0xf5e   :  { %v5372_v10 = vpop.f32.mrf.mxu0 }
 0xf5f   :  { %v5373_v21 = vadd.f32 %v9740_v6, %v5372_v10 }
 0xf61   :  { %5423 = vst.msk [vmem:[%s10093_s16 + $0xb8] sm:$0xff] %vm5399_vm2, %v5373_v21 }
 0xf74   :  { %v5024_v48 = vpop.f32.mrf.mxu2  ;;  %v5113_v35 = vpop.f32.mrf.mxu3 }
 0xf75   :  { %v5025_v61 = vadd.f32 %v6308_v46, %v5024_v48 }
 0xf77   :  { %v5114_v59 = vadd.f32 %v5113_v35, %v5025_v61 }
 0xf79   :  { %v5148_v62 = vmax.f32 %v5114_v59, 0.0 }
 0xf7b   :  { %5180 = vst.msk [vmem:[%s10091_s15 + $0xf0] sm:$0xff] %vm1058_vm1, %v5148_v62  ;;  %5854 = vmatmul.msk.f32.gmra.mxu0 %vm1058_vm1, %v5148_v62 }
 0xf7c   :  { %v5026_v7 = vpop.f32.mrf.mxu2  ;;  %v5115_v13 = vpop.f32.mrf.mxu3 }
 0xf7d   :  { %v5027_v39 = vadd.f32 %v6308_v46, %v5026_v7 }
 0xf7f   :  { %v5116_v47 = vadd.f32 %v5115_v13, %v5027_v39  ;;  %v5375_v25 = vpop.f32.mrf.mxu0 }
 0xf80   :  { %v5376_v4 = vadd.f32 %v9740_v6, %v5375_v25 }
 0xf81   :  { %v5149_v60 = vmax.f32 %v5116_v47, 0.0 }
 0xf82   :  { %5424 = vst.msk [vmem:[%s10093_s16 + $0xc0] sm:$0xff] %vm5399_vm2, %v5376_v4 }
 0xf83   :  { %5181 = vst.msk [vmem:[%s10091_s15 + $0xf8] sm:$0xff] %vm1058_vm1, %v5149_v60  ;;  %5855 = vmatmul.msk.f32.gmra.mxu0 %vm1058_vm1, %v5149_v60 }
 0xf87   :  { %v5378_v9 = vpop.f32.mrf.mxu0 }
 0xf88   :  { %v5379_v26 = vadd.f32 %v9740_v6, %v5378_v9 }
 0xf8a   :  { %5425 = vst.msk [vmem:[%s10093_s16 + $0xc8] sm:$0xff] %vm5399_vm2, %v5379_v26 }
 0xf92   :  { %v5381_v56 = vpop.f32.mrf.mxu0 }
 0xf93   :  { %v5382_v2 = vadd.f32 %v9740_v6, %v5381_v56 }
 0xf95   :  { %5426 = vst.msk [vmem:[%s10093_s16 + $0xd0] sm:$0xff] %vm5399_vm2, %v5382_v2 }
 0xf9a   :  { %v5384_v42 = vpop.f32.mrf.mxu0 }
 0xf9b   :  { %v5385_v1 = vadd.f32 %v9740_v6, %v5384_v42 }
 0xf9d   :  { %5427 = vst.msk [vmem:[%s10093_s16 + $0xd8] sm:$0xff] %vm5399_vm2, %v5385_v1 }
 0xfd0   :  { %v5387_v14 = vpop.f32.mrf.mxu0 }
 0xfd1   :  { %v5388_v8 = vadd.f32 %v9740_v6, %v5387_v14 }
 0xfd3   :  { %5428 = vst.msk [vmem:[%s10093_s16 + $0xe0] sm:$0xff] %vm5399_vm2, %v5388_v8 }
 0xfd8   :  { %v5390_v12 = vpop.f32.mrf.mxu0 }
 0xfd9   :  { %v5391_v20 = vadd.f32 %v9740_v6, %v5390_v12 }
 0xfdb   :  { %5429 = vst.msk [vmem:[%s10093_s16 + $0xe8] sm:$0xff] %vm5399_vm2, %v5391_v20 }
 0xff8   :  { %v5393_v37 = vpop.f32.mrf.mxu0 }
 0xff9   :  { %v5394_v63 = vadd.f32 %v9740_v6, %v5393_v37 }
 0xffb   :  { %5430 = vst.msk [vmem:[%s10093_s16 + $0xf0] sm:$0xff] %vm5399_vm2, %v5394_v63 }
0x1000   :  { %v5396_v3 = vpop.f32.mrf.mxu0 }
0x1001   :  { %v5397_v23 = vadd.f32 %v9740_v6, %v5396_v3 }
0x1003   :  { %5431 = vst.msk [vmem:[%s10093_s16 + $0xf8] sm:$0xff] %vm5399_vm2, %v5397_v23 }

</bundles_post_ra>
